<compile_context>
chip_gen: v7x
topology: tpu7x:2x2x1
jax: 0.10.0
libtpu: 0.0.40
codegen_flags: <defaults>
</compile_context>

<pallas_src>
import functools

import jax
import jax.numpy as jnp
from jax.experimental import pallas as pl
from jax.experimental.pallas import tpu as pltpu

KSIZE = 5
STRIDE = 2
BN_EPS = 1e-5


# ----------------------------- Pallas kernel --------------------------------
def _mm_bias_kernel(x_ref, w_ref, b_ref, o_ref, *, relu):
    # (TM, K) @ (K, N) on the MXU with f32 accumulation, + bias (+ReLU) on the VPU.
    y = jnp.dot(x_ref[...], w_ref[...], preferred_element_type=jnp.float32)
    y = y + b_ref[...]
    if relu:
        y = jnp.maximum(y, 0.0)
    o_ref[...] = y.astype(o_ref.dtype)


def _round_up(a, b):
    return ((a + b - 1) // b) * b


def matmul_bias(x, w, b, *, relu, out_dtype):
    """relu((x @ w) + b) with a single fused Pallas kernel, tiled over rows.

    x: (M, K), w: (K, N), b: (1, N).  K and N stay resident per grid step; the
    ragged last row block (if any) is masked by Pallas.
    """
    M, K = x.shape
    K2, N = w.shape
    assert K == K2 and b.shape == (1, N)

    if M <= 256:
        tm = M                                     # single block (== full array dim)
    else:
        nsteps = max(2, pl.cdiv(M, 512))           # >=2 row tiles -> both v7x TCs busy
        tm = _round_up(pl.cdiv(M, nsteps), 8)
    grid = (pl.cdiv(M, tm),)

    return pl.pallas_call(
        functools.partial(_mm_bias_kernel, relu=relu),
        out_shape=jax.ShapeDtypeStruct((M, N), out_dtype),
        grid=grid,
        in_specs=[
            pl.BlockSpec((tm, K), lambda i: (i, 0)),   # activations: tile rows
            pl.BlockSpec((K, N), lambda i: (0, 0)),    # weights: resident
            pl.BlockSpec((1, N), lambda i: (0, 0)),    # folded bias: resident
        ],
        out_specs=pl.BlockSpec((tm, N), lambda i: (i, 0)),
        compiler_params=pltpu.CompilerParams(dimension_semantics=("parallel",)),
    )(x, w, b)


# ------------------------------ plain-JAX glue -------------------------------
def im2col(x):
    """x: (N, H, W, C) NHWC -> (N*OH*OW, K*K*C); patch feature order (kh, kw, c)."""
    N, H, W, C = x.shape
    OH = (H - KSIZE) // STRIDE + 1
    OW = (W - KSIZE) // STRIDE + 1
    patches = []
    for kh in range(KSIZE):
        for kw in range(KSIZE):
            patches.append(
                x[:, kh:kh + STRIDE * OH:STRIDE, kw:kw + STRIDE * OW:STRIDE, :])
    p = jnp.stack(patches, axis=3)  # (N, OH, OW, K*K, C)
    return p.reshape(N * OH * OW, KSIZE * KSIZE * C), OH, OW


def _group_factor(M, N):
    """Largest r with r*N <= 128 and r | M (pack r rows -> one lane-dense row)."""
    r = max(1, 128 // N)
    while r > 1 and M % r != 0:
        r //= 2
    return r


def init_params(key, n_actions, n_junctions):
    """Deterministic synthetic parameters matching DQN_joint.__init__ shapes.

    BN scale is folded into the (bf16) weight matrix; BN shift + conv bias are
    folded into a per-output-channel f32 bias.
    """
    conv_dims = [(3, 16), (16, 32), (32, 32), (32, 64)]
    params = {}
    for li, (ic, oc) in enumerate(conv_dims, start=1):
        key, k1, k2, k3, k4, k5, k6 = jax.random.split(key, 7)
        w_pt = 0.05 * jax.random.normal(k1, (oc, ic, KSIZE, KSIZE), jnp.float32)
        b_conv = 0.05 * jax.random.normal(k2, (oc,), jnp.float32)
        gamma = 1.0 + 0.1 * jax.random.normal(k3, (oc,), jnp.float32)
        beta = 0.05 * jax.random.normal(k4, (oc,), jnp.float32)
        run_mean = 0.05 * jax.random.normal(k5, (oc,), jnp.float32)
        run_var = 1.0 + 0.1 * jax.random.uniform(k6, (oc,), jnp.float32)
        s = gamma / jnp.sqrt(run_var + BN_EPS)
        bias = b_conv * s + (beta - run_mean * s)
        # (OC, IC, KH, KW) -> (KH, KW, IC, OC) -> (KH*KW*IC, OC); matches im2col order.
        w_mat = jnp.transpose(w_pt, (2, 3, 1, 0)).reshape(KSIZE * KSIZE * ic, oc)
        w_mat = (w_mat * s[None, :]).astype(jnp.bfloat16)   # fold BN scale into W
        params[f"conv{li}"] = (w_mat, bias)

    in_f = 576 * n_junctions
    out_f = n_actions ** n_junctions
    key, kw, kb = jax.random.split(key, 3)
    w_head_pt = 0.02 * jax.random.normal(kw, (out_f, in_f), jnp.float32)  # torch (out,in)
    b_head = 0.02 * jax.random.normal(kb, (out_f,), jnp.float32)
    params["head"] = (w_head_pt.T.astype(jnp.bfloat16), b_head)  # stored (in, out)
    return params


def dqn_joint_forward(params, imgs):
    """imgs: (B, n_junctions, 3, H, W) float32 (PyTorch NCHW per junction)."""
    B, J = imgs.shape[0], imgs.shape[1]
    # Fold junctions into the batch (shared conv weights) and go NHWC bf16.
    x = jnp.transpose(imgs.reshape((B * J,) + imgs.shape[2:]), (0, 2, 3, 1))
    x = x.astype(jnp.bfloat16)

    for li in range(1, 5):
        w_mat, bias = params[f"conv{li}"]          # (K, N) bf16, (N,) f32
        cols, OH, OW = im2col(x)                   # (B*J*OH*OW, K) bf16
        M, K = cols.shape
        N = w_mat.shape[1]
        r = _group_factor(M, N)
        # Block-diagonal weight: r im2col rows packed per matmul row -> lane-dense
        # (r*N wide) stores; row-major data order is unchanged.  Constant-folded
        # under jit (params are closure constants).
        wg = jnp.kron(jnp.eye(r, dtype=w_mat.dtype), w_mat)   # (r*K, r*N)
        bg = jnp.tile(bias, r).reshape(1, r * N)
        y = matmul_bias(cols.reshape(M // r, r * K), wg, bg,
                        relu=True, out_dtype=jnp.bfloat16)
        x = y.reshape(B * J, OH, OW, N)

    # PyTorch x.view(B, -1) flattens NCHW (channel-major) per junction, then
    # concatenates junctions along dim 1: (j, c, h, w) ordering.
    feats = jnp.transpose(x, (0, 3, 1, 2)).reshape(B, -1)      # (B, 576 * J) bf16
    w_head, b_head = params["head"]
    return matmul_bias(feats, w_head, b_head.reshape(1, -1),
                       relu=False, out_dtype=jnp.float32)


if __name__ == "__main__":
    # The head is hardcoded to 576*n_junctions = 64*3*3 per junction, which forces
    # the input spatial size: 93 -> 45 -> 21 -> 9 -> 3 under k=5, s=2.
    n_actions, n_junctions = 3, 2
    B, H, W = 2, 93, 93

    key = jax.random.PRNGKey(0)
    kp, kx = jax.random.split(key)
    params = init_params(kp, n_actions, n_junctions)
    imgs = jax.random.uniform(kx, (B, n_junctions, 3, H, W), jnp.float32)

    out = jax.jit(lambda im: dqn_joint_forward(params, im))(imgs)
    jax.block_until_ready(out)
    assert out.shape == (B, n_actions ** n_junctions), out.shape
    print("KERNEL_OK")
</pallas_src>

<mosaic_0001>
module attributes {stable_mosaic.version = 11 : i64} {
  func.func @_mm_bias_kernel(%arg0: i32, %arg1: memref<512x300xbf16, #tpu.memory_space<vmem>>, %arg2: memref<300x64xbf16, #tpu.memory_space<vmem>>, %arg3: memref<1x64xf32, #tpu.memory_space<vmem>>, %arg4: memref<512x64xbf16, #tpu.memory_space<vmem>>) attributes {dimension_semantics = [#tpu.dimension_semantics<parallel>], iteration_bounds = array<i64: 4>, scalar_prefetch = 0 : i64, scratch_operands = 0 : i64, tpu.core_type = #tpu.core_type<tc>, window_params = [{transform_indices = @transform_0, window_bounds = array<i64: 512, 300>}, {pipeline_mode = #tpu.pipeline_mode<synchronous>, transform_indices = @transform_1, window_bounds = array<i64: 300, 64>}, {pipeline_mode = #tpu.pipeline_mode<synchronous>, transform_indices = @transform_2, window_bounds = array<i64: 1, 64>}, {transform_indices = @transform_3, window_bounds = array<i64: 512, 64>}]} {
    %c0 = arith.constant 0 : index
    %c0_0 = arith.constant 0 : index
    %0 = vector.load %arg1[%c0, %c0_0] : memref<512x300xbf16, #tpu.memory_space<vmem>>, vector<512x300xbf16>
    %c0_1 = arith.constant 0 : index
    %c0_2 = arith.constant 0 : index
    %1 = vector.load %arg2[%c0_1, %c0_2] : memref<300x64xbf16, #tpu.memory_space<vmem>>, vector<300x64xbf16>
    %cst = arith.constant dense<0.000000e+00> : vector<512x64xf32>
    %2 = tpu.matmul %0, %1, %cst {dimension_numbers = #tpu.dot_dimension_numbers<[1], [0], [0], [1], [0, 0, 1, 1], [], []>} : vector<512x300xbf16>, vector<300x64xbf16>, vector<512x64xf32> -> vector<512x64xf32>
    %c0_3 = arith.constant 0 : index
    %c0_4 = arith.constant 0 : index
    %3 = vector.load %arg3[%c0_3, %c0_4] : memref<1x64xf32, #tpu.memory_space<vmem>>, vector<1x64xf32>
    %4 = vector.broadcast %3 : vector<1x64xf32> to vector<512x64xf32>
    %5 = arith.addf %2, %4 : vector<512x64xf32>
    %cst_5 = arith.constant 0.000000e+00 : f32
    %6 = vector.broadcast %cst_5 : f32 to vector<512x64xf32>
    %7 = arith.maximumf %5, %6 : vector<512x64xf32>
    %8 = arith.truncf %7 : vector<512x64xf32> to vector<512x64xbf16>
    %c0_6 = arith.constant 0 : index
    %c0_7 = arith.constant 0 : index
    %9 = vector.load %arg4[%c0_6, %c0_7] : memref<512x64xbf16, #tpu.memory_space<vmem>>, vector<512x64xbf16>
    tpu.vector_store %arg4[%c0_6, %c0_7], %8 {strides = array<i32>} : memref<512x64xbf16, #tpu.memory_space<vmem>>, vector<512x64xbf16>,
    return
  }
  func.func @transform_0(%arg0: i32) -> (i32, i32) {
    %c0_i32 = arith.constant 0 : i32
    %c0_i32_0 = arith.constant 0 : i32
    return %arg0, %c0_i32 : i32, i32
  }
  func.func @transform_1(%arg0: i32) -> (i32, i32) {
    %c0_i32 = arith.constant 0 : i32
    %c0_i32_0 = arith.constant 0 : i32
    %c0_i32_1 = arith.constant 0 : i32
    return %c0_i32, %c0_i32_0 : i32, i32
  }
  func.func @transform_2(%arg0: i32) -> (i32, i32) {
    %c0_i32 = arith.constant 0 : i32
    %c0_i32_0 = arith.constant 0 : i32
    %c0_i32_1 = arith.constant 0 : i32
    return %c0_i32, %c0_i32_0 : i32, i32
  }
  func.func @transform_3(%arg0: i32) -> (i32, i32) {
    %c0_i32 = arith.constant 0 : i32
    %c0_i32_0 = arith.constant 0 : i32
    return %arg0, %c0_i32 : i32, i32
  }
}

module attributes {stable_mosaic.version = 11 : i64} {
  func.func @_mm_bias_kernel(%arg0: i32, %arg1: memref<224x1600xbf16, #tpu.memory_space<vmem>>, %arg2: memref<1600x128xbf16, #tpu.memory_space<vmem>>, %arg3: memref<1x128xf32, #tpu.memory_space<vmem>>, %arg4: memref<224x128xbf16, #tpu.memory_space<vmem>>) attributes {dimension_semantics = [#tpu.dimension_semantics<parallel>], iteration_bounds = array<i64: 2>, scalar_prefetch = 0 : i64, scratch_operands = 0 : i64, tpu.core_type = #tpu.core_type<tc>, window_params = [{transform_indices = @transform_0, window_bounds = array<i64: 224, 1600>}, {pipeline_mode = #tpu.pipeline_mode<synchronous>, transform_indices = @transform_1, window_bounds = array<i64: 1600, 128>}, {pipeline_mode = #tpu.pipeline_mode<synchronous>, transform_indices = @transform_2, window_bounds = array<i64: 1, 128>}, {transform_indices = @transform_3, window_bounds = array<i64: 224, 128>}]} {
    %c0 = arith.constant 0 : index
    %c0_0 = arith.constant 0 : index
    %0 = vector.load %arg1[%c0, %c0_0] : memref<224x1600xbf16, #tpu.memory_space<vmem>>, vector<224x1600xbf16>
    %c0_1 = arith.constant 0 : index
    %c0_2 = arith.constant 0 : index
    %1 = vector.load %arg2[%c0_1, %c0_2] : memref<1600x128xbf16, #tpu.memory_space<vmem>>, vector<1600x128xbf16>
    %cst = arith.constant dense<0.000000e+00> : vector<224x128xf32>
    %2 = tpu.matmul %0, %1, %cst {dimension_numbers = #tpu.dot_dimension_numbers<[1], [0], [0], [1], [0, 0, 1, 1], [], []>} : vector<224x1600xbf16>, vector<1600x128xbf16>, vector<224x128xf32> -> vector<224x128xf32>
    %c0_3 = arith.constant 0 : index
    %c0_4 = arith.constant 0 : index
    %3 = vector.load %arg3[%c0_3, %c0_4] : memref<1x128xf32, #tpu.memory_space<vmem>>, vector<1x128xf32>
    %4 = vector.broadcast %3 : vector<1x128xf32> to vector<224x128xf32>
    %5 = arith.addf %2, %4 : vector<224x128xf32>
    %cst_5 = arith.constant 0.000000e+00 : f32
    %6 = vector.broadcast %cst_5 : f32 to vector<224x128xf32>
    %7 = arith.maximumf %5, %6 : vector<224x128xf32>
    %8 = arith.truncf %7 : vector<224x128xf32> to vector<224x128xbf16>
    %c0_6 = arith.constant 0 : index
    %c0_7 = arith.constant 0 : index
    %9 = vector.load %arg4[%c0_6, %c0_7] : memref<224x128xbf16, #tpu.memory_space<vmem>>, vector<224x128xbf16>
    tpu.vector_store %arg4[%c0_6, %c0_7], %8 {strides = array<i32>} : memref<224x128xbf16, #tpu.memory_space<vmem>>, vector<224x128xbf16>,
    return
  }
  func.func @transform_0(%arg0: i32) -> (i32, i32) {
    %c0_i32 = arith.constant 0 : i32
    %c0_i32_0 = arith.constant 0 : i32
    return %arg0, %c0_i32 : i32, i32
  }
  func.func @transform_1(%arg0: i32) -> (i32, i32) {
    %c0_i32 = arith.constant 0 : i32
    %c0_i32_0 = arith.constant 0 : i32
    %c0_i32_1 = arith.constant 0 : i32
    return %c0_i32, %c0_i32_0 : i32, i32
  }
  func.func @transform_2(%arg0: i32) -> (i32, i32) {
    %c0_i32 = arith.constant 0 : i32
    %c0_i32_0 = arith.constant 0 : i32
    %c0_i32_1 = arith.constant 0 : i32
    return %c0_i32, %c0_i32_0 : i32, i32
  }
  func.func @transform_3(%arg0: i32) -> (i32, i32) {
    %c0_i32 = arith.constant 0 : i32
    %c0_i32_0 = arith.constant 0 : i32
    return %arg0, %c0_i32 : i32, i32
  }
}

module attributes {stable_mosaic.version = 11 : i64} {
  func.func @_mm_bias_kernel(%arg0: i32, %arg1: memref<81x3200xbf16, #tpu.memory_space<vmem>>, %arg2: memref<3200x128xbf16, #tpu.memory_space<vmem>>, %arg3: memref<1x128xf32, #tpu.memory_space<vmem>>, %arg4: memref<81x128xbf16, #tpu.memory_space<vmem>>) attributes {dimension_semantics = [#tpu.dimension_semantics<parallel>], iteration_bounds = array<i64: 1>, scalar_prefetch = 0 : i64, scratch_operands = 0 : i64, tpu.core_type = #tpu.core_type<tc>, window_params = [{transform_indices = @transform_0, window_bounds = array<i64: 81, 3200>}, {pipeline_mode = #tpu.pipeline_mode<synchronous>, transform_indices = @transform_1, window_bounds = array<i64: 3200, 128>}, {pipeline_mode = #tpu.pipeline_mode<synchronous>, transform_indices = @transform_2, window_bounds = array<i64: 1, 128>}, {transform_indices = @transform_3, window_bounds = array<i64: 81, 128>}]} {
    %c0 = arith.constant 0 : index
    %c0_0 = arith.constant 0 : index
    %0 = vector.load %arg1[%c0, %c0_0] : memref<81x3200xbf16, #tpu.memory_space<vmem>>, vector<81x3200xbf16>
    %c0_1 = arith.constant 0 : index
    %c0_2 = arith.constant 0 : index
    %1 = vector.load %arg2[%c0_1, %c0_2] : memref<3200x128xbf16, #tpu.memory_space<vmem>>, vector<3200x128xbf16>
    %cst = arith.constant dense<0.000000e+00> : vector<81x128xf32>
    %2 = tpu.matmul %0, %1, %cst {dimension_numbers = #tpu.dot_dimension_numbers<[1], [0], [0], [1], [0, 0, 1, 1], [], []>} : vector<81x3200xbf16>, vector<3200x128xbf16>, vector<81x128xf32> -> vector<81x128xf32>
    %c0_3 = arith.constant 0 : index
    %c0_4 = arith.constant 0 : index
    %3 = vector.load %arg3[%c0_3, %c0_4] : memref<1x128xf32, #tpu.memory_space<vmem>>, vector<1x128xf32>
    %4 = vector.broadcast %3 : vector<1x128xf32> to vector<81x128xf32>
    %5 = arith.addf %2, %4 : vector<81x128xf32>
    %cst_5 = arith.constant 0.000000e+00 : f32
    %6 = vector.broadcast %cst_5 : f32 to vector<81x128xf32>
    %7 = arith.maximumf %5, %6 : vector<81x128xf32>
    %8 = arith.truncf %7 : vector<81x128xf32> to vector<81x128xbf16>
    %c0_6 = arith.constant 0 : index
    %c0_7 = arith.constant 0 : index
    %9 = vector.load %arg4[%c0_6, %c0_7] : memref<81x128xbf16, #tpu.memory_space<vmem>>, vector<81x128xbf16>
    tpu.vector_store %arg4[%c0_6, %c0_7], %8 {strides = array<i32>} : memref<81x128xbf16, #tpu.memory_space<vmem>>, vector<81x128xbf16>,
    return
  }
  func.func @transform_0(%arg0: i32) -> (i32, i32) {
    %c0_i32 = arith.constant 0 : i32
    %c0_i32_0 = arith.constant 0 : i32
    return %arg0, %c0_i32 : i32, i32
  }
  func.func @transform_1(%arg0: i32) -> (i32, i32) {
    %c0_i32 = arith.constant 0 : i32
    %c0_i32_0 = arith.constant 0 : i32
    %c0_i32_1 = arith.constant 0 : i32
    return %c0_i32, %c0_i32_0 : i32, i32
  }
  func.func @transform_2(%arg0: i32) -> (i32, i32) {
    %c0_i32 = arith.constant 0 : i32
    %c0_i32_0 = arith.constant 0 : i32
    %c0_i32_1 = arith.constant 0 : i32
    return %c0_i32, %c0_i32_0 : i32, i32
  }
  func.func @transform_3(%arg0: i32) -> (i32, i32) {
    %c0_i32 = arith.constant 0 : i32
    %c0_i32_0 = arith.constant 0 : i32
    return %arg0, %c0_i32 : i32, i32
  }
}

module attributes {stable_mosaic.version = 11 : i64} {
  func.func @_mm_bias_kernel(%arg0: i32, %arg1: memref<18x1600xbf16, #tpu.memory_space<vmem>>, %arg2: memref<1600x128xbf16, #tpu.memory_space<vmem>>, %arg3: memref<1x128xf32, #tpu.memory_space<vmem>>, %arg4: memref<18x128xbf16, #tpu.memory_space<vmem>>) attributes {dimension_semantics = [#tpu.dimension_semantics<parallel>], iteration_bounds = array<i64: 1>, scalar_prefetch = 0 : i64, scratch_operands = 0 : i64, tpu.core_type = #tpu.core_type<tc>, window_params = [{transform_indices = @transform_0, window_bounds = array<i64: 18, 1600>}, {pipeline_mode = #tpu.pipeline_mode<synchronous>, transform_indices = @transform_1, window_bounds = array<i64: 1600, 128>}, {pipeline_mode = #tpu.pipeline_mode<synchronous>, transform_indices = @transform_2, window_bounds = array<i64: 1, 128>}, {transform_indices = @transform_3, window_bounds = array<i64: 18, 128>}]} {
    %c0 = arith.constant 0 : index
    %c0_0 = arith.constant 0 : index
    %0 = vector.load %arg1[%c0, %c0_0] : memref<18x1600xbf16, #tpu.memory_space<vmem>>, vector<18x1600xbf16>
    %c0_1 = arith.constant 0 : index
    %c0_2 = arith.constant 0 : index
    %1 = vector.load %arg2[%c0_1, %c0_2] : memref<1600x128xbf16, #tpu.memory_space<vmem>>, vector<1600x128xbf16>
    %cst = arith.constant dense<0.000000e+00> : vector<18x128xf32>
    %2 = tpu.matmul %0, %1, %cst {dimension_numbers = #tpu.dot_dimension_numbers<[1], [0], [0], [1], [0, 0, 1, 1], [], []>} : vector<18x1600xbf16>, vector<1600x128xbf16>, vector<18x128xf32> -> vector<18x128xf32>
    %c0_3 = arith.constant 0 : index
    %c0_4 = arith.constant 0 : index
    %3 = vector.load %arg3[%c0_3, %c0_4] : memref<1x128xf32, #tpu.memory_space<vmem>>, vector<1x128xf32>
    %4 = vector.broadcast %3 : vector<1x128xf32> to vector<18x128xf32>
    %5 = arith.addf %2, %4 : vector<18x128xf32>
    %cst_5 = arith.constant 0.000000e+00 : f32
    %6 = vector.broadcast %cst_5 : f32 to vector<18x128xf32>
    %7 = arith.maximumf %5, %6 : vector<18x128xf32>
    %8 = arith.truncf %7 : vector<18x128xf32> to vector<18x128xbf16>
    %c0_6 = arith.constant 0 : index
    %c0_7 = arith.constant 0 : index
    %9 = vector.load %arg4[%c0_6, %c0_7] : memref<18x128xbf16, #tpu.memory_space<vmem>>, vector<18x128xbf16>
    tpu.vector_store %arg4[%c0_6, %c0_7], %8 {strides = array<i32>} : memref<18x128xbf16, #tpu.memory_space<vmem>>, vector<18x128xbf16>,
    return
  }
  func.func @transform_0(%arg0: i32) -> (i32, i32) {
    %c0_i32 = arith.constant 0 : i32
    %c0_i32_0 = arith.constant 0 : i32
    return %arg0, %c0_i32 : i32, i32
  }
  func.func @transform_1(%arg0: i32) -> (i32, i32) {
    %c0_i32 = arith.constant 0 : i32
    %c0_i32_0 = arith.constant 0 : i32
    %c0_i32_1 = arith.constant 0 : i32
    return %c0_i32, %c0_i32_0 : i32, i32
  }
  func.func @transform_2(%arg0: i32) -> (i32, i32) {
    %c0_i32 = arith.constant 0 : i32
    %c0_i32_0 = arith.constant 0 : i32
    %c0_i32_1 = arith.constant 0 : i32
    return %c0_i32, %c0_i32_0 : i32, i32
  }
  func.func @transform_3(%arg0: i32) -> (i32, i32) {
    %c0_i32 = arith.constant 0 : i32
    %c0_i32_0 = arith.constant 0 : i32
    return %arg0, %c0_i32 : i32, i32
  }
}

module attributes {stable_mosaic.version = 11 : i64} {
  func.func @_mm_bias_kernel(%arg0: i32, %arg1: memref<2x1152xbf16, #tpu.memory_space<vmem>>, %arg2: memref<1152x9xbf16, #tpu.memory_space<vmem>>, %arg3: memref<1x9xf32, #tpu.memory_space<vmem>>, %arg4: memref<2x9xf32, #tpu.memory_space<vmem>>) attributes {dimension_semantics = [#tpu.dimension_semantics<parallel>], iteration_bounds = array<i64: 1>, scalar_prefetch = 0 : i64, scratch_operands = 0 : i64, tpu.core_type = #tpu.core_type<tc>, window_params = [{transform_indices = @transform_0, window_bounds = array<i64: 2, 1152>}, {pipeline_mode = #tpu.pipeline_mode<synchronous>, transform_indices = @transform_1, window_bounds = array<i64: 1152, 9>}, {pipeline_mode = #tpu.pipeline_mode<synchronous>, transform_indices = @transform_2, window_bounds = array<i64: 1, 9>}, {transform_indices = @transform_3, window_bounds = array<i64: 2, 9>}]} {
    %c0 = arith.constant 0 : index
    %c0_0 = arith.constant 0 : index
    %0 = vector.load %arg1[%c0, %c0_0] : memref<2x1152xbf16, #tpu.memory_space<vmem>>, vector<2x1152xbf16>
    %c0_1 = arith.constant 0 : index
    %c0_2 = arith.constant 0 : index
    %1 = vector.load %arg2[%c0_1, %c0_2] : memref<1152x9xbf16, #tpu.memory_space<vmem>>, vector<1152x9xbf16>
    %cst = arith.constant dense<0.000000e+00> : vector<2x9xf32>
    %2 = tpu.matmul %0, %1, %cst {dimension_numbers = #tpu.dot_dimension_numbers<[1], [0], [0], [1], [0, 0, 1, 1], [], []>} : vector<2x1152xbf16>, vector<1152x9xbf16>, vector<2x9xf32> -> vector<2x9xf32>
    %c0_3 = arith.constant 0 : index
    %c0_4 = arith.constant 0 : index
    %3 = vector.load %arg3[%c0_3, %c0_4] : memref<1x9xf32, #tpu.memory_space<vmem>>, vector<1x9xf32>
    %4 = vector.broadcast %3 : vector<1x9xf32> to vector<2x9xf32>
    %5 = arith.addf %2, %4 : vector<2x9xf32>
    %c0_5 = arith.constant 0 : index
    %c0_6 = arith.constant 0 : index
    %6 = vector.load %arg4[%c0_5, %c0_6] : memref<2x9xf32, #tpu.memory_space<vmem>>, vector<2x9xf32>
    tpu.vector_store %arg4[%c0_5, %c0_6], %5 {strides = array<i32>} : memref<2x9xf32, #tpu.memory_space<vmem>>, vector<2x9xf32>,
    return
  }
  func.func @transform_0(%arg0: i32) -> (i32, i32) {
    %c0_i32 = arith.constant 0 : i32
    %c0_i32_0 = arith.constant 0 : i32
    return %arg0, %c0_i32 : i32, i32
  }
  func.func @transform_1(%arg0: i32) -> (i32, i32) {
    %c0_i32 = arith.constant 0 : i32
    %c0_i32_0 = arith.constant 0 : i32
    %c0_i32_1 = arith.constant 0 : i32
    return %c0_i32, %c0_i32_0 : i32, i32
  }
  func.func @transform_2(%arg0: i32) -> (i32, i32) {
    %c0_i32 = arith.constant 0 : i32
    %c0_i32_0 = arith.constant 0 : i32
    %c0_i32_1 = arith.constant 0 : i32
    return %c0_i32, %c0_i32_0 : i32, i32
  }
  func.func @transform_3(%arg0: i32) -> (i32, i32) {
    %c0_i32 = arith.constant 0 : i32
    %c0_i32_0 = arith.constant 0 : i32
    return %arg0, %c0_i32 : i32, i32
  }
}

</mosaic_0001>

<bundles_post_ra>
// kernel: tile.18
= control target key start
LH: loop header
LB: loop body
LE: loop exit
PB: predicated region body
PF: predicated region fallthrough
CT: control target
= control target key end

     0   :  { %s22_s0 = inlined_call_operand.vmem [shape: f32[16], index: 0, kind: input, shape index: {}]   ;;  %s23_s1 = inlined_call_operand.vmem [shape: f32[4,16], index: 1, kind: output, shape index: {}]  }
   0x1   :  { %v4_v0 = vld [vmem:[%s22_s0] ss:$0 sm:$0xff] }
   0x2   :  { %5 = vst [vmem:[%s23_s1] sm:$0xf] %v4_v0 }

// kernel: tile.19
= control target key start
LH: loop header
LB: loop body
LE: loop exit
PB: predicated region body
PF: predicated region fallthrough
CT: control target
= control target key end

     0   :  { %vm7_vm0 = vcmask 130048   ;;  %s37_s8 = smov 16   ;;  %s38_s9 = smov 32   ;;  %vm13_vm1 = vcmask 523648   ;;  %vm19_vm2 = vcmask 392448   ;;  %vm25_vm3 = vcmask 261248   ;;  %s55_s0 = inlined_call_operand.vmem [shape: f32[4,16], index: 0, kind: input, shape index: {}]   ;;  %s56_s1 = inlined_call_operand.vmem [shape: f32[1,64], index: 1, kind: output, shape index: {}]  }
   0x1   :  { %v4_v0 = vld [vmem:[%s55_s0] sm:$0xf]  ;;  %s36_s0 = smov 48  }
   0x2   :  { %5 = vst [vmem:[#allocation1] sm:$0xf] %v4_v0 }
   0x9   :  { %v10_v1 = vld [vmem:[#allocation1 + $0x3] sm:$0x1]   ;;  %v22_v2 = vld [vmem:[#allocation1 + $0x1] sm:$0x1]   ;;  %v6_v3 = vld [vmem:[#allocation1] sm:$0x1]  }
   0xa   :  { %11 = vrot.lane.b32.xlu0 %v10_v1, %s36_s0  ;;  %23 = vrot.lane.b32.xlu1 %v22_v2, %s37_s8  ;;  %v16_v4 = vld [vmem:[#allocation1 + $0x2] sm:$0x1]   ;;  %8 = vst.msk [vmem:[#allocation0] sm:$0x1] %vm7_vm0, %v6_v3  }
   0xe   :  { %17 = vrot.lane.b32.xlu0 %v16_v4, %s38_s9 }
  0x7c   :  { %v12_v5 = vpop.permute.xlu0 %11   ;;  %v24_v6 = vpop.permute.xlu1 %23  }
  0x7d   :  { %14 = vst.msk [vmem:[#allocation0] sm:$0x1] %vm13_vm1, %v12_v5  }
  0x80   :  { %v18_v7 = vpop.permute.xlu0 %17  }
  0x81   :  { %20 = vst.msk [vmem:[#allocation0] sm:$0x1] %vm19_vm2, %v18_v7  }
  0x82   :  { %26 = vst.msk [vmem:[#allocation0] sm:$0x1] %vm25_vm3, %v24_v6  }
  0x89   :  { %v30_v8 = vld [vmem:[#allocation0] sm:$0x1] }
  0x8a   :  { %32 = vst [vmem:[%s56_s1] sm:$0x1] %v30_v8 }

// kernel: _lambda_.5
= control target key start
LH: loop header
LB: loop body
LE: loop exit
PB: predicated region body
PF: predicated region fallthrough
CT: control target
= control target key end

     0   :  { %s3284_s12 = smov 0   ;;  %s3286_s13 = smov 0   ;;  %s4065_s0 = inlined_call_operand.vmem [shape: bf16[2025,300], index: 0, kind: input, shape index: {}]   ;;  %s4066_s1 = inlined_call_operand.vmem [shape: bf16[300,64], index: 1, kind: input, shape index: {}]   ;;  %s4067_s2 = inlined_call_operand.vmem [shape: f32[1,64], index: 2, kind: input, shape index: {}]   ;;  %s4068_s3 = inlined_call_operand.vmem [shape: bf16[2025,64], index: 3, kind: output, shape index: {}]  }
   0x1   :  { %s3288_s14 = smov 0  }
   0x2 LB: > { %s3297_s15 = sadd.s32 4294967295, %s3229_s14   ;;  %s3299_s16 = sadd.s32 1, %s3229_s14   ;;  %s3229_s14 = sphi %s3288_s14, %s4075_s14   ;;  %s3225_s13 = sphi %s3286_s13, %s4074_s13   ;;  %s3221_s12 = sphi %s3284_s12, %s4073_s12  }
   0x3   : > { %s85_s17 = ssub.s32 %s3229_s14, %s3299_s16  ;;  %s88_s18 = sadd.s32 1, %s3225_s13 }
   0x4   : > { %p86_p0 = scmp.eq.s32.totalorder %s85_s17, 0  ;;  %p98_p1 = scmp.ne.s32.totalorder %s3225_s13, %s3221_s12 }
   0x5   : > { %p99_p2 = scmp.eq.s32.totalorder %s3297_s15, 3  ;;  %p2500_p3 = scmp.ge.s32.totalorder %s3229_s14, 1 }
   0x6   : > { %s3307_s19 = scalar_select %p86_p0, %s3225_s13, %s88_s18  }
   0x7   : > { %p3309_p4 = por %p99_p2, %p98_p1  ;;  %p149_p5 = scmp.lt.s32.totalorder %s3229_s14, 5 }
   0x9   : > { %p150_p6 = pnand %p2500_p3, %p149_p5 }
   0xa   : > { %v3028_v0 = vld [vmem:[%s4066_s1] sm:$0xff] (!%p150_p6)   ;;  %v3263_v1 = vmov (!%p150_p6), 0   ;;  %s3319_s23 = sshll.u32 (!%p150_p6), %s3297_s15, 6  ;;  %v3029_v2 = vld [vmem:[%s4066_s1 + $0x8] sm:$0xff] (!%p150_p6)   ;;  %v3030_v3 = vld [vmem:[%s4066_s1 + $0x10] sm:$0xff] (!%p150_p6)   ;;  %vm1064_vm0 = vcmask (!%p150_p6), 1045504  }
   0xb   : > { %153 = sbr.rel (%p150_p6) target bundleno = 573 (0x23d), region = 32  ;;  %1068 = vmatprep.subr.bf16.mxu0 (!%p150_p6), %v3263_v1  ;;  %2905 = vmatprep.subr.bf16.mxu1 (!%p150_p6), %v3263_v1  ;;  %p184_p7 = scmp.lt.s32.totalorder (!%p150_p6), %s3319_s23, 253  ;;  %v3031_v4 = vld [vmem:[%s4066_s1 + $0x18] sm:$0xff] (!%p150_p6)   ;;  %v3032_v5 = vld [vmem:[%s4066_s1 + $0x20] sm:$0xff] (!%p150_p6)   ;;  %v3033_v7 = vld [vmem:[%s4066_s1 + $0x28] sm:$0xff] (!%p150_p6)   ;;  %vm967_vm1 = vcmask (!%p150_p6), 359424  }
   0xc   : > { %1069 = vmatpush1.bf16.msra.mxu0 (!%p150_p6), %v3028_v0  ;;  %2921 = vmatpush1.bf16.msra.mxu1 (!%p150_p6), %v3028_v0  ;;  %v3034_v9 = vld [vmem:[%s4066_s1 + $0x30] sm:$0xff] (!%p150_p6)   ;;  %v3035_v10 = vld [vmem:[%s4066_s1 + $0x38] sm:$0xff] (!%p150_p6)   ;;  %v3036_v11 = vld [vmem:[%s4066_s1 + $0x40] sm:$0xff] (!%p150_p6)   ;;  %s175_s27 = sand.u32 (!%p150_p6), 1, %s3221_s12   ;;  %vm1966_vm2 = vcmask (!%p150_p6), 519168  }
   0xd   : > { %1070 = vmatprep.subr.bf16.mxu0 (!%p150_p6), %v3263_v1  ;;  %2906 = vmatprep.subr.bf16.mxu1 (!%p150_p6), %v3263_v1  ;;  %v3037_v12 = vld [vmem:[%s4066_s1 + $0x48] sm:$0xff] (!%p150_p6)   ;;  %v3038_v13 = vld [vmem:[%s4066_s1 + $0x50] sm:$0xff] (!%p150_p6)   ;;  %v3039_v14 = vld [vmem:[%s4066_s1 + $0x58] sm:$0xff] (!%p150_p6)  }
   0xe   : > { %v3040_v15 = vld [vmem:[%s4066_s1 + $0x60] sm:$0xff] (!%p150_p6)   ;;  %v3041_v16 = vld [vmem:[%s4066_s1 + $0x68] sm:$0xff] (!%p150_p6)   ;;  %v3042_v17 = vld [vmem:[%s4066_s1 + $0x70] sm:$0xff] (!%p150_p6)  }
   0xf   : > { %v3043_v18 = vld [vmem:[%s4066_s1 + $0x78] sm:$0xff] (!%p150_p6)   ;;  %v3050_v19 = vld [vmem:[%s4066_s1 + $0x80] sm:$0xff] (!%p150_p6)   ;;  %v3063_v24 = vld [vmem:[%s4066_s1 + $0x88] sm:$0xff] (!%p150_p6)  }
  0x10   : > { %1071 = vmatpush1.bf16.msra.mxu0 (!%p150_p6), %v3029_v2  ;;  %2922 = vmatpush1.bf16.msra.mxu1 (!%p150_p6), %v3029_v2  ;;  %v3082_v26 = vld [vmem:[%s4066_s1 + $0x90] sm:$0x3f] (!%p150_p6)  }
  0x11   : > { %1072 = vmatprep.subr.bf16.mxu0 (!%p150_p6), %v3263_v1  ;;  %2907 = vmatprep.subr.bf16.mxu1 (!%p150_p6), %v3263_v1  ;;  %v1066_v30 = vsel (!%p150_p6), %vm1064_vm0, %v3082_v26, 0 }
  0x12   : > { %s185_s28 = scalar_select %p184_p7, %s3319_s23, 253 }
  0x13   : > { %s2039_s29 = ssub.s32 (%p3309_p4), 254, %s3319_s23  ;;  %s2797_s30 = sshll.u32 (%p3309_p4), %s3297_s15, 8 }
  0x14   : > { %1073 = vmatpush1.bf16.msra.mxu0 %v3030_v3  ;;  %2923 = vmatpush1.bf16.msra.mxu1 %v3030_v3  ;;  %s2938_s4 = smul.u32 12, %s185_s28  ;;  %s2501_s28 = sshll.u32 %s175_s27, 8 }
  0x15   : > { %1074 = vmatprep.subr.bf16.mxu0 %v3263_v1  ;;  %2908 = vmatprep.subr.bf16.mxu1 %v3263_v1  ;;  %s3618_s12 = scalar_lea.vmem [#allocation2], %s2501_s28   ;;  %p2040_p8 = scmp.lt.s32.totalorder (%p3309_p4), %s2039_s29, 64 }
  0x16   : > { %s3344_s9 = scalar_lea.vmem %s4065_s0, %s2938_s4  ;;  %s3873_s6 = scalar_lea.vmem (%p3309_p4), %s4068_s3, %s2797_s30  }
  0x17   : > { %v3046_v6 = vld [vmem:[%s3344_s9 + $0x4] ss:$12 sps:$4 sm:$0xff]   ;;  %v3044_v20 = vld [vmem:[%s3344_s9] ss:$12 sps:$4 sm:$0xff]   ;;  %v3051_v22 = vld [vmem:[%s3344_s9 + $0x1c] ss:$12 sps:$4 sm:$0xff]  }
  0x18   : > { %1075 = vmatpush1.bf16.msra.mxu0 %v3031_v4  ;;  %2924 = vmatpush1.bf16.msra.mxu1 %v3031_v4  ;;  %v3049_v8 = vld [vmem:[%s3344_s9 + $0x244] ss:$12 sps:$4 sm:$0xff]   ;;  %v3047_v21 = vld [vmem:[%s3344_s9 + $0x240] ss:$12 sps:$4 sm:$0xff]   ;;  %v3053_v23 = vld [vmem:[%s3344_s9 + $0x25c] ss:$12 sps:$4 sm:$0xff]  }
  0x19   : > { %1076 = vmatprep.subr.bf16.mxu0 %v3263_v1  ;;  %2909 = vmatprep.subr.bf16.mxu1 %v3263_v1  ;;  %v3055_v25 = vld [vmem:[%s3344_s9 + $0x18] ss:$12 sps:$4 sm:$0xff]   ;;  %v3057_v28 = vld [vmem:[%s3344_s9 + $0x34] ss:$12 sps:$4 sm:$0xff]   ;;  %v3061_v31 = vld [vmem:[%s3344_s9 + $0x30] ss:$12 sps:$4 sm:$0xff]  }
  0x1a   : > { %1100 = vmatprep.mubr.bf16.mxu0 %v3046_v6  ;;  %1292 = vmatprep.mubr.bf16.mxu1 %v3049_v8  ;;  %v3056_v27 = vld [vmem:[%s3344_s9 + $0x258] ss:$12 sps:$4 sm:$0xff]   ;;  %v3059_v29 = vld [vmem:[%s3344_s9 + $0x274] ss:$12 sps:$4 sm:$0xff]   ;;  %v3062_v32 = vld [vmem:[%s3344_s9 + $0x270] ss:$12 sps:$4 sm:$0xff]  }
  0x1b   : > { %v3064_v33 = vld [vmem:[%s3344_s9 + $0x4c] ss:$12 sps:$4 sm:$0xff]   ;;  %v3068_v35 = vld [vmem:[%s3344_s9 + $0x48] ss:$12 sps:$4 sm:$0xff]   ;;  %v3070_v37 = vld [vmem:[%s3344_s9 + $0x64] ss:$12 sps:$4 sm:$0xff]  }
  0x1c   : > { %1077 = vmatpush1.bf16.msra.mxu0 %v3032_v5  ;;  %2925 = vmatpush1.bf16.msra.mxu1 %v3032_v5  ;;  %v3066_v34 = vld [vmem:[%s3344_s9 + $0x28c] ss:$12 sps:$4 sm:$0xff]   ;;  %v3069_v36 = vld [vmem:[%s3344_s9 + $0x288] ss:$12 sps:$4 sm:$0xff]   ;;  %v3072_v38 = vld [vmem:[%s3344_s9 + $0x2a4] ss:$12 sps:$4 sm:$0xff]  }
  0x1d   : > { %1078 = vmatprep.subr.bf16.mxu0 %v3263_v1  ;;  %2910 = vmatprep.subr.bf16.mxu1 %v3263_v1  ;;  %v3074_v39 = vld [vmem:[%s3344_s9 + $0x60] ss:$12 sps:$4 sm:$0xff]   ;;  %v3076_v41 = vld [vmem:[%s3344_s9 + $0x7c] ss:$12 sps:$4 sm:$0xff]   ;;  %v3080_v43 = vld [vmem:[%s3344_s9 + $0x78] ss:$12 sps:$4 sm:$0xff]  }
  0x1e   : > { %v3075_v40 = vld [vmem:[%s3344_s9 + $0x2a0] ss:$12 sps:$4 sm:$0xff]   ;;  %v3078_v42 = vld [vmem:[%s3344_s9 + $0x2bc] ss:$12 sps:$4 sm:$0xff]   ;;  %v3081_v44 = vld [vmem:[%s3344_s9 + $0x2b8] ss:$12 sps:$4 sm:$0xff]  }
  0x1f   : > { %v3083_v45 = vld [vmem:[%s3344_s9 + $0x94] ss:$12 sps:$4 sm:$0xff]   ;;  %v3087_v47 = vld [vmem:[%s3344_s9 + $0x90] ss:$12 sps:$4 sm:$0xff]   ;;  %v3089_v49 = vld [vmem:[%s3344_s9 + $0xac] ss:$12 sps:$4 sm:$0xff]  }
  0x20   : > { %1079 = vmatpush1.bf16.msra.mxu0 %v3033_v7  ;;  %2926 = vmatpush1.bf16.msra.mxu1 %v3033_v7  ;;  %v3085_v46 = vld [vmem:[%s3344_s9 + $0x2d4] ss:$12 sps:$4 sm:$0xff]   ;;  %v3088_v48 = vld [vmem:[%s3344_s9 + $0x2d0] ss:$12 sps:$4 sm:$0xff]   ;;  %v3091_v50 = vld [vmem:[%s3344_s9 + $0x2ec] ss:$12 sps:$4 sm:$0xff]  }
  0x21   : > { %1080 = vmatprep.subr.bf16.mxu0 %v3263_v1  ;;  %2911 = vmatprep.subr.bf16.mxu1 %v3263_v1  ;;  %v3093_v51 = vld [vmem:[%s3344_s9 + $0xa8] ss:$12 sps:$4 sm:$0xff]   ;;  %v3095_v53 = vld [vmem:[%s3344_s9 + $0xc4] ss:$12 sps:$4 sm:$0xff]   ;;  %v3098_v55 = vld [vmem:[%s3344_s9 + $0xc0] ss:$12 sps:$4 sm:$0xff]  }
  0x22   : > { %v3094_v52 = vld [vmem:[%s3344_s9 + $0x2e8] ss:$12 sps:$4 sm:$0xff]   ;;  %v3099_v56 = vld [vmem:[%s3344_s9 + $0x20] ss:$12 sps:$4 sm:$0xff]   ;;  %v3102_v58 = vld [vmem:[%s3344_s9 + $0x38] ss:$12 sps:$4 sm:$0xff]  }
  0x23   : > { %v3097_v54 = vld [vmem:[%s3344_s9 + $0x8] ss:$12 sps:$4 sm:$0xff]   ;;  %v3103_v59 = vld [vmem:[%s3344_s9 + $0xd8] ss:$12 sps:$4 sm:$0xff]   ;;  %v3104_v60 = vld [vmem:[%s3344_s9 + $0x50] ss:$12 sps:$4 sm:$0xff]  }
  0x24   : > { %1081 = vmatpush1.bf16.msra.mxu0 %v3034_v9  ;;  %2927 = vmatpush1.bf16.msra.mxu1 %v3034_v9  ;;  %v3100_v57 = vld [vmem:[%s3344_s9 + $0xdc] ss:$12 sps:$4 sm:$0xff]   ;;  %v3105_v61 = vld [vmem:[%s3344_s9 + $0xf4] ss:$12 sps:$4 sm:$0xff]   ;;  %v3112_v2 = vld [vmem:[%s3344_s9 + $0x98] ss:$12 sps:$4 sm:$0xff]  }
  0x25   : > { %1082 = vmatprep.subr.bf16.mxu0 %v3263_v1  ;;  %2912 = vmatprep.subr.bf16.mxu1 %v3263_v1  ;;  %v3107_v62 = vld [vmem:[%s3344_s9 + $0x68] ss:$12 sps:$4 sm:$0xff]   ;;  %v3108_v63 = vld [vmem:[%s3344_s9 + $0xf0] ss:$12 sps:$4 sm:$0xff]   ;;  %v3109_v0 = vld [vmem:[%s3344_s9 + $0x80] ss:$12 sps:$4 sm:$0xff]  }
  0x26   : > { %v3113_v3 = vld [vmem:[%s3344_s9 + $0x108] ss:$12 sps:$4 sm:$0xff]   ;;  %v3114_v4 = vld [vmem:[%s3344_s9 + $0xb0] ss:$12 sps:$4 sm:$0xff]   ;;  %v3118_v7 = vld [vmem:[%s3344_s9 + $0x120] ss:$12 sps:$4 sm:$0xff]  }
  0x27   : > { %v3115_v5 = vld [vmem:[%s3344_s9 + $0x124] ss:$12 sps:$4 sm:$0xff]   ;;  %v3117_v6 = vld [vmem:[%s3344_s9 + $0xc8] ss:$12 sps:$4 sm:$0xff]   ;;  %v3119_v8 = vld [vmem:[%s3344_s9 + $0xe0] ss:$12 sps:$4 sm:$0xff]  }
  0x28   : > { %1083 = vmatpush1.bf16.msra.mxu0 %v3035_v10  ;;  %2928 = vmatpush1.bf16.msra.mxu1 %v3035_v10  ;;  %v3120_v9 = vld [vmem:[%s3344_s9 + $0x13c] ss:$12 sps:$4 sm:$0xff]   ;;  %v3122_v10 = vld [vmem:[%s3344_s9 + $0xf8] ss:$12 sps:$4 sm:$0xff]  }
  0x29   : > { %1084 = vmatprep.subr.bf16.mxu0 %v3263_v1  ;;  %2913 = vmatprep.subr.bf16.mxu1 %v3263_v1 }
  0x2c   : > { %1085 = vmatpush1.bf16.msra.mxu0 %v3036_v11  ;;  %2929 = vmatpush1.bf16.msra.mxu1 %v3036_v11  ;;  %v3123_v11 = vld [vmem:[%s3344_s9 + $0x138] ss:$12 sps:$4 sm:$0xff]  }
  0x2d   : > { %1086 = vmatprep.subr.bf16.mxu0 %v3263_v1  ;;  %2914 = vmatprep.subr.bf16.mxu1 %v3263_v1 }
  0x30   : > { %1087 = vmatpush1.bf16.msra.mxu0 %v3037_v12  ;;  %2930 = vmatpush1.bf16.msra.mxu1 %v3037_v12  ;;  %v3124_v12 = vld [vmem:[%s3344_s9 + $0x110] ss:$12 sps:$4 sm:$0xff]  }
  0x31   : > { %1088 = vmatprep.subr.bf16.mxu0 %v3263_v1  ;;  %2915 = vmatprep.subr.bf16.mxu1 %v3263_v1 }
  0x34   : > { %1089 = vmatpush1.bf16.msra.mxu0 %v3038_v13  ;;  %2931 = vmatpush1.bf16.msra.mxu1 %v3038_v13  ;;  %v3125_v13 = vld [vmem:[%s3344_s9 + $0x154] ss:$12 sps:$4 sm:$0xff]  }
  0x35   : > { %1090 = vmatprep.subr.bf16.mxu0 %v3263_v1  ;;  %2916 = vmatprep.subr.bf16.mxu1 %v3263_v1 }
  0x38   : > { %1091 = vmatpush1.bf16.msra.mxu0 %v3039_v14  ;;  %2932 = vmatpush1.bf16.msra.mxu1 %v3039_v14  ;;  %v3127_v14 = vld [vmem:[%s3344_s9 + $0x128] ss:$12 sps:$4 sm:$0xff]  }
  0x39   : > { %1092 = vmatprep.subr.bf16.mxu0 %v3263_v1  ;;  %2917 = vmatprep.subr.bf16.mxu1 %v3263_v1 }
  0x3c   : > { %1093 = vmatpush1.bf16.msra.mxu0 %v3040_v15  ;;  %2933 = vmatpush1.bf16.msra.mxu1 %v3040_v15  ;;  %v3128_v15 = vld [vmem:[%s3344_s9 + $0x150] ss:$12 sps:$4 sm:$0xff]  }
  0x3d   : > { %1094 = vmatprep.subr.bf16.mxu0 %v3263_v1  ;;  %2918 = vmatprep.subr.bf16.mxu1 %v3263_v1 }
  0x40   : > { %1095 = vmatpush1.bf16.msra.mxu0 %v3041_v16  ;;  %2934 = vmatpush1.bf16.msra.mxu1 %v3041_v16  ;;  %v3129_v16 = vld [vmem:[%s3344_s9 + $0x140] ss:$12 sps:$4 sm:$0xff]  }
  0x41   : > { %1096 = vmatprep.subr.bf16.mxu0 %v3263_v1  ;;  %2919 = vmatprep.subr.bf16.mxu1 %v3263_v1 }
  0x44   : > { %1097 = vmatpush1.bf16.msra.mxu0 %v3042_v17  ;;  %2935 = vmatpush1.bf16.msra.mxu1 %v3042_v17  ;;  %v3130_v17 = vld [vmem:[%s3344_s9 + $0x16c] ss:$12 sps:$4 sm:$0xff]  }
  0x45   : > { %1098 = vmatprep.subr.bf16.mxu0 %v3263_v1  ;;  %2920 = vmatprep.subr.bf16.mxu1 %v3263_v1  ;;  %v3110_v1 = vld [vmem:[%s3344_s9 + $0x10c] ss:$12 sps:$4 sm:$0xff]  }
  0x48   : > { %1099 = vmatpush1.bf16.msra.mxu0 %v3043_v18  ;;  %2936 = vmatpush1.bf16.msra.mxu1 %v3043_v18  ;;  %v3132_v18 = vld [vmem:[%s3344_s9 + $0x158] ss:$12 sps:$4 sm:$0xff]  }
  0x49   : > { %2835 = vmatprep.subr.bf16.mxu1 %v3050_v19 }
  0x4b   : > { %1101 = vmatmul.mubr.bf16.vlgmr.msra.gmra.mrb[0].mxu0 %v3044_v20  ;;  %1293 = vmatmul.mubr.bf16.vlgmr.msra.gmra.mrb[0].mxu1 %v3047_v21  ;;  %v3134_v20 = vld [vmem:[%s3344_s9 + $0x170] ss:$12 sps:$4 sm:$0xff]  }
  0x4c   : > { %2836 = vmatpush3.bf16.msra.mxu1 %v3050_v19  ;;  %1108 = vmatprep.mubr.bf16.mxu0 %v3051_v22  ;;  %v3133_v19 = vld [vmem:[%s3344_s9 + $0x168] ss:$12 sps:$4 sm:$0xff]   ;;  %v3135_v21 = vld [vmem:[%s3344_s9 + $0x184] ss:$12 sps:$4 sm:$0xff]  }
  0x4d   : > { %1300 = vmatprep.mubr.bf16.mxu1 %v3053_v23  ;;  %2837 = vmatprep.subr.bf16.mxu1 %v3063_v24  ;;  %v3137_v22 = vld [vmem:[%s3344_s9 + $0x188] ss:$12 sps:$4 sm:$0xff]   ;;  %v3138_v23 = vld [vmem:[%s3344_s9 + $0x180] ss:$12 sps:$4 sm:$0xff]  }
  0x50   : > { %2838 = vmatpush3.bf16.msra.mxu1 %v3063_v24  ;;  %v3139_v24 = vld [vmem:[%s3344_s9 + $0x1a0] ss:$12 sps:$4 sm:$0xff]  }
  0x51   : > { %2937 = vmatprep.subr.msk.bf16.mxu1 %vm1064_vm0, %v3082_v26  ;;  %v3142_v26 = vld [vmem:[%s3344_s9 + $0x1b8] ss:$12 sps:$4 sm:$0xff]  }
  0x53   : > { %1109 = vmatmul.mubr.bf16.gmra.mrb[4].mxu0 %v3055_v25  ;;  %1301 = vmatmul.mubr.bf16.gmra.mrb[4].mxu1 %v3056_v27  ;;  %v3140_v25 = vld [vmem:[%s3344_s9 + $0x19c] ss:$12 sps:$4 sm:$0xff]   ;;  %v3143_v27 = vld [vmem:[%s3344_s9 + $0x198] ss:$12 sps:$4 sm:$0xff]  }
  0x54   : > { %1116 = vmatprep.mubr.bf16.mxu0 %v3057_v28  ;;  %1308 = vmatprep.mubr.bf16.mxu1 %v3059_v29  ;;  %v3144_v28 = vld [vmem:[%s3344_s9 + $0x1d0] ss:$12 sps:$4 sm:$0xff]   ;;  %v3145_v29 = vld [vmem:[%s3344_s9 + $0x1b4] ss:$12 sps:$4 sm:$0xff]  }
  0x55   : > { %2840 = vmatpush3.bf16.msra.mxu1 %v1066_v30  ;;  %v3147_v30 = vld [vmem:[%s3344_s9 + $0x1e8] ss:$12 sps:$4 sm:$0xff]  }
  0x5b   : > { %1117 = vmatmul.mubr.bf16.gmra.mrb[8].mxu0 %v3061_v31  ;;  %1309 = vmatmul.mubr.bf16.gmra.mrb[8].mxu1 %v3062_v32  ;;  %v3148_v31 = vld [vmem:[%s3344_s9 + $0x1b0] ss:$12 sps:$4 sm:$0xff]   ;;  %v3149_v32 = vld [vmem:[%s3344_s9 + $0x200] ss:$12 sps:$4 sm:$0xff]  }
  0x5c   : > { %1124 = vmatprep.mubr.bf16.mxu0 %v3064_v33  ;;  %1316 = vmatprep.mubr.bf16.mxu1 %v3066_v34  ;;  %v3150_v33 = vld [vmem:[%s3344_s9 + $0x1cc] ss:$12 sps:$4 sm:$0xff]  }
  0x5d   : > { %v3152_v34 = vld [vmem:[%s3344_s9 + $0x218] ss:$12 sps:$4 sm:$0xff]  }
  0x63   : > { %1125 = vmatmul.mubr.bf16.gmra.mrb[12].mxu0 %v3068_v35  ;;  %1317 = vmatmul.mubr.bf16.gmra.mrb[12].mxu1 %v3069_v36  ;;  %v3153_v35 = vld [vmem:[%s3344_s9 + $0x1c8] ss:$12 sps:$4 sm:$0xff]   ;;  %v3154_v36 = vld [vmem:[%s3344_s9 + $0x230] ss:$12 sps:$4 sm:$0xff]  }
  0x64   : > { %1132 = vmatprep.mubr.bf16.mxu0 %v3070_v37  ;;  %1324 = vmatprep.mubr.bf16.mxu1 %v3072_v38  ;;  %v3155_v37 = vld [vmem:[%s3344_s9 + $0x1e4] ss:$12 sps:$4 sm:$0xff]   ;;  %v3157_v38 = vld [vmem:[%s3344_s9 + $0x248] ss:$12 sps:$4 sm:$0xff]  }
  0x6b   : > { %1133 = vmatmul.mubr.bf16.gmra.mrb[16].mxu0 %v3074_v39  ;;  %1325 = vmatmul.mubr.bf16.gmra.mrb[16].mxu1 %v3075_v40  ;;  %v3158_v39 = vld [vmem:[%s3344_s9 + $0x1e0] ss:$12 sps:$4 sm:$0xff]  }
  0x6c   : > { %1140 = vmatprep.mubr.bf16.mxu0 %v3076_v41  ;;  %1332 = vmatprep.mubr.bf16.mxu1 %v3078_v42  ;;  %v3159_v40 = vld [vmem:[%s3344_s9 + $0x260] ss:$12 sps:$4 sm:$0xff]   ;;  %v3160_v41 = vld [vmem:[%s3344_s9 + $0x1fc] ss:$12 sps:$4 sm:$0xff]   ;;  %v3162_v42 = vld [vmem:[%s3344_s9 + $0x278] ss:$12 sps:$4 sm:$0xff]  }
  0x73   : > { %1141 = vmatmul.mubr.bf16.gmra.mrb[20].mxu0 %v3080_v43  ;;  %1333 = vmatmul.mubr.bf16.gmra.mrb[20].mxu1 %v3081_v44  ;;  %v3163_v43 = vld [vmem:[%s3344_s9 + $0x1f8] ss:$12 sps:$4 sm:$0xff]   ;;  %v3164_v44 = vld [vmem:[%s3344_s9 + $0x290] ss:$12 sps:$4 sm:$0xff]  }
  0x74   : > { %1148 = vmatprep.mubr.bf16.mxu0 %v3083_v45  ;;  %1340 = vmatprep.mubr.bf16.mxu1 %v3085_v46  ;;  %v3165_v45 = vld [vmem:[%s3344_s9 + $0x214] ss:$12 sps:$4 sm:$0xff]  }
  0x75   : > { %v3167_v46 = vld [vmem:[%s3344_s9 + $0x2a8] ss:$12 sps:$4 sm:$0xff]  }
  0x7b   : > { %1149 = vmatmul.mubr.bf16.gmra.mrb[24].mxu0 %v3087_v47  ;;  %1341 = vmatmul.mubr.bf16.gmra.mrb[24].mxu1 %v3088_v48  ;;  %v3168_v47 = vld [vmem:[%s3344_s9 + $0x210] ss:$12 sps:$4 sm:$0xff]   ;;  %v3169_v48 = vld [vmem:[%s3344_s9 + $0x2c0] ss:$12 sps:$4 sm:$0xff]  }
  0x7c   : > { %1156 = vmatprep.mubr.bf16.mxu0 %v3089_v49  ;;  %1348 = vmatprep.mubr.bf16.mxu1 %v3091_v50  ;;  %v3170_v49 = vld [vmem:[%s3344_s9 + $0x22c] ss:$12 sps:$4 sm:$0xff]  }
  0x7d   : > { %v3172_v50 = vld [vmem:[%s3344_s9 + $0x2d8] ss:$12 sps:$4 sm:$0xff]  }
  0x83   : > { %1157 = vmatmul.mubr.bf16.gmra.mrb[28].mxu0 %v3093_v51  ;;  %1349 = vmatmul.mubr.bf16.gmra.mrb[28].mxu1 %v3094_v52  ;;  %v3173_v51 = vld [vmem:[%s3344_s9 + $0x228] ss:$12 sps:$4 sm:$0xff]   ;;  %v3174_v52 = vld [vmem:[%s3344_s9 + $0x2f0] ss:$12 sps:$4 sm:$0xff]  }
  0x84   : > { %1164 = vmatprep.mubr.bf16.mxu0 %v3095_v53  ;;  %2841 = vmatprep.mubr.msk.bf16.mxu1 %vm967_vm1, %v3097_v54 }
  0x8b   : > { %1165 = vmatmul.mubr.bf16.gmra.mrb[32].mxu0 %v3098_v55  ;;  %2842 = vmatmul.mubr.msk.bf16.vlgmr.msra.gmra.mrb[32].mxu1 %vm967_vm1, %v3099_v56 }
  0x8c   : > { %1172 = vmatprep.mubr.bf16.mxu0 %v3100_v57  ;;  %2845 = vmatprep.mubr.msk.bf16.mxu1 %vm967_vm1, %v3102_v58 }
  0x93   : > { %1173 = vmatmul.mubr.bf16.gmra.mrb[36].mxu0 %v3103_v59  ;;  %2846 = vmatmul.mubr.msk.bf16.gmra.mrb[36].mxu1 %vm967_vm1, %v3104_v60 }
  0x94   : > { %1180 = vmatprep.mubr.bf16.mxu0 %v3105_v61  ;;  %2849 = vmatprep.mubr.msk.bf16.mxu1 %vm967_vm1, %v3107_v62 }
  0x9b   : > { %1181 = vmatmul.mubr.bf16.gmra.mrb[40].mxu0 %v3108_v63  ;;  %2850 = vmatmul.mubr.msk.bf16.gmra.mrb[40].mxu1 %vm967_vm1, %v3109_v0 }
  0x9c   : > { %1188 = vmatprep.mubr.bf16.mxu0 %v3110_v1  ;;  %2853 = vmatprep.mubr.msk.bf16.mxu1 %vm967_vm1, %v3112_v2 }
  0xa3   : > { %1189 = vmatmul.mubr.bf16.gmra.mrb[44].mxu0 %v3113_v3  ;;  %2854 = vmatmul.mubr.msk.bf16.gmra.mrb[44].mxu1 %vm967_vm1, %v3114_v4 }
  0xa4   : > { %1196 = vmatprep.mubr.bf16.mxu0 %v3115_v5  ;;  %2857 = vmatprep.mubr.msk.bf16.mxu1 %vm967_vm1, %v3117_v6 }
  0xab   : > { %1197 = vmatmul.mubr.bf16.gmra.mrb[48].mxu0 %v3118_v7  ;;  %2858 = vmatmul.mubr.msk.bf16.gmra.mrb[48].mxu1 %vm967_vm1, %v3119_v8 }
  0xac   : > { %1204 = vmatprep.mubr.bf16.mxu0 %v3120_v9  ;;  %2861 = vmatprep.mubr.msk.bf16.mxu1 %vm967_vm1, %v3122_v10 }
  0xb3   : > { %1205 = vmatmul.mubr.bf16.gmra.mrb[52].mxu0 %v3123_v11  ;;  %2862 = vmatmul.mubr.msk.bf16.gmra.mrb[52].mxu1 %vm967_vm1, %v3124_v12 }
  0xb4   : > { %1212 = vmatprep.mubr.bf16.mxu0 %v3125_v13  ;;  %2865 = vmatprep.mubr.msk.bf16.mxu1 %vm967_vm1, %v3127_v14 }
  0xbb   : > { %1213 = vmatmul.mubr.bf16.gmra.mrb[56].mxu0 %v3128_v15  ;;  %2866 = vmatmul.mubr.msk.bf16.gmra.mrb[56].mxu1 %vm967_vm1, %v3129_v16 }
  0xbc   : > { %1220 = vmatprep.mubr.bf16.mxu0 %v3130_v17  ;;  %2869 = vmatprep.mubr.msk.bf16.mxu1 %vm967_vm1, %v3132_v18 }
  0xc3   : > { %1221 = vmatmul.mubr.bf16.gmra.mrb[60].mxu0 %v3133_v19  ;;  %2870 = vmatmul.mubr.msk.bf16.gmra.mrb[60].mxu1 %vm967_vm1, %v3134_v20 }
  0xc4   : > { %1228 = vmatprep.mubr.bf16.mxu0 %v3135_v21  ;;  %2873 = vmatprep.mubr.msk.bf16.mxu1 %vm967_vm1, %v3137_v22 }
  0xcb   : > { %1229 = vmatmul.mubr.bf16.gmra.mrb[64].mxu0 %v3138_v23  ;;  %2874 = vmatmul.mubr.msk.bf16.gmra.mrb[64].mxu1 %vm967_vm1, %v3139_v24 }
  0xcc   : > { %1236 = vmatprep.mubr.bf16.mxu0 %v3140_v25  ;;  %2877 = vmatprep.mubr.msk.bf16.mxu1 %vm967_vm1, %v3142_v26 }
  0xd3   : > { %1237 = vmatmul.mubr.bf16.gmra.mrb[68].mxu0 %v3143_v27  ;;  %2878 = vmatmul.mubr.msk.bf16.gmra.mrb[68].mxu1 %vm967_vm1, %v3144_v28 }
  0xd4   : > { %1244 = vmatprep.mubr.bf16.mxu0 %v3145_v29  ;;  %2881 = vmatprep.mubr.msk.bf16.mxu1 %vm967_vm1, %v3147_v30 }
  0xdb   : > { %1245 = vmatmul.mubr.bf16.gmra.mrb[72].mxu0 %v3148_v31  ;;  %2882 = vmatmul.mubr.msk.bf16.gmra.mrb[72].mxu1 %vm967_vm1, %v3149_v32 }
  0xdc   : > { %1252 = vmatprep.mubr.bf16.mxu0 %v3150_v33  ;;  %2885 = vmatprep.mubr.msk.bf16.mxu1 %vm967_vm1, %v3152_v34 }
  0xe3   : > { %1253 = vmatmul.mubr.bf16.gmra.mrb[76].mxu0 %v3153_v35  ;;  %2886 = vmatmul.mubr.msk.bf16.gmra.mrb[76].mxu1 %vm967_vm1, %v3154_v36 }
  0xe4   : > { %1260 = vmatprep.mubr.bf16.mxu0 %v3155_v37  ;;  %2889 = vmatprep.mubr.msk.bf16.mxu1 %vm967_vm1, %v3157_v38 }
  0xeb   : > { %1261 = vmatmul.mubr.bf16.gmra.mrb[80].mxu0 %v3158_v39  ;;  %2890 = vmatmul.mubr.msk.bf16.gmra.mrb[80].mxu1 %vm967_vm1, %v3159_v40 }
  0xec   : > { %1268 = vmatprep.mubr.bf16.mxu0 %v3160_v41  ;;  %2893 = vmatprep.mubr.msk.bf16.mxu1 %vm967_vm1, %v3162_v42 }
  0xf3   : > { %1269 = vmatmul.mubr.bf16.gmra.mrb[84].mxu0 %v3163_v43  ;;  %2894 = vmatmul.mubr.msk.bf16.gmra.mrb[84].mxu1 %vm967_vm1, %v3164_v44 }
  0xf4   : > { %1276 = vmatprep.mubr.bf16.mxu0 %v3165_v45  ;;  %2897 = vmatprep.mubr.msk.bf16.mxu1 %vm967_vm1, %v3167_v46 }
  0xfb   : > { %1277 = vmatmul.mubr.bf16.gmra.mrb[88].mxu0 %v3168_v47  ;;  %2898 = vmatmul.mubr.msk.bf16.gmra.mrb[88].mxu1 %vm967_vm1, %v3169_v48 }
  0xfc   : > { %1284 = vmatprep.mubr.bf16.mxu0 %v3170_v49  ;;  %2901 = vmatprep.mubr.msk.bf16.mxu1 %vm967_vm1, %v3172_v50 }
 0x103   : > { %1285 = vmatmul.mubr.bf16.gmra.mrb[92].mxu0 %v3173_v51  ;;  %2902 = vmatmul.mubr.msk.bf16.gmra.mrb[92].mxu1 %vm967_vm1, %v3174_v52 }
 0x11e   : > { %v3540_v53 = vpop.f32.mrb[0].mxu0  ;;  %v3542_v54 = vpop.f32.mrb[0].mxu1 }
 0x11f   : > { %v1104_v55 = vpop.f32.mrb[1].mxu0  ;;  %v1296_v56 = vpop.f32.mrb[1].mxu1 }
 0x120   : > { %v3544_v57 = vpop.f32.mrb[2].mxu0  ;;  %v3546_v58 = vpop.f32.mrb[2].mxu1  ;;  %v3603_v55 = vld [vmem:[%s4067_s2] ss:$0 sm:$0xff] }
 0x121   : > { %v1107_v59 = vpop.f32.mrb[3].mxu0  ;;  %v1299_v60 = vpop.f32.mrb[3].mxu1 }
 0x122   : > { %v1103_v59 = vadd.f32 %v3603_v55, %v3540_v53 }
 0x126   : > { %v1110_v61 = vpop.f32.mrb[4].mxu0  ;;  %v3548_v62 = vpop.f32.mrb[4].mxu1 }
 0x127   : > { %v1112_v63 = vpop.f32.mrb[5].mxu0  ;;  %v1304_v0 = vpop.f32.mrb[5].mxu1  ;;  %v1111_v56 = vadd.f32 %v3603_v55, %v1110_v61 }
 0x128   : > { %v1113_v1 = vpop.f32.mrb[6].mxu0  ;;  %v3550_v2 = vpop.f32.mrb[6].mxu1 }
 0x129   : > { %v1115_v3 = vpop.f32.mrb[7].mxu0  ;;  %v1307_v4 = vpop.f32.mrb[7].mxu1  ;;  %v1114_v0 = vadd.f32 %v3603_v55, %v1113_v1 }
 0x12e   : > { %v3552_v5 = vpop.f32.mrb[8].mxu0  ;;  %v3554_v6 = vpop.f32.mrb[8].mxu1 }
 0x12f   : > { %v1120_v7 = vpop.f32.mrb[9].mxu0  ;;  %v1312_v8 = vpop.f32.mrb[9].mxu1 }
 0x130   : > { %v3556_v9 = vpop.f32.mrb[10].mxu0  ;;  %v3558_v10 = vpop.f32.mrb[10].mxu1  ;;  %v1106_v8 = vadd.f32 %v3603_v55, %v3544_v57 }
 0x131   : > { %v1123_v11 = vpop.f32.mrb[11].mxu0  ;;  %v1315_v12 = vpop.f32.mrb[11].mxu1 }
 0x136   : > { %v3560_v13 = vpop.f32.mrb[12].mxu0  ;;  %v3562_v14 = vpop.f32.mrb[12].mxu1 }
 0x137   : > { %v1128_v15 = vpop.f32.mrb[13].mxu0  ;;  %v1320_v16 = vpop.f32.mrb[13].mxu1 }
 0x138   : > { %v3564_v17 = vpop.f32.mrb[14].mxu0  ;;  %v3566_v18 = vpop.f32.mrb[14].mxu1 }
 0x139   : > { %v1131_v19 = vpop.f32.mrb[15].mxu0  ;;  %v1323_v20 = vpop.f32.mrb[15].mxu1 }
 0x13e   : > { %v3568_v21 = vpop.f32.mrb[16].mxu0  ;;  %v3570_v22 = vpop.f32.mrb[16].mxu1 }
 0x13f   : > { %v1136_v23 = vpop.f32.mrb[17].mxu0  ;;  %v1328_v24 = vpop.f32.mrb[17].mxu1 }
 0x140   : > { %v3572_v25 = vpop.f32.mrb[18].mxu0  ;;  %v3574_v26 = vpop.f32.mrb[18].mxu1 }
 0x141   : > { %v1139_v27 = vpop.f32.mrb[19].mxu0  ;;  %v1331_v28 = vpop.f32.mrb[19].mxu1 }
 0x146   : > { %v3576_v29 = vpop.f32.mrb[20].mxu0  ;;  %v3578_v30 = vpop.f32.mrb[20].mxu1 }
 0x147   : > { %v1144_v31 = vpop.f32.mrb[21].mxu0  ;;  %v1336_v32 = vpop.f32.mrb[21].mxu1 }
 0x148   : > { %v3580_v33 = vpop.f32.mrb[22].mxu0  ;;  %v3582_v34 = vpop.f32.mrb[22].mxu1  ;;  %v1127_v31 = vadd.f32 %v3603_v55, %v3560_v13  ;;  %v1119_v32 = vadd.f32 %v3603_v55, %v3552_v5  ;;  %v1130_v13 = vadd.f32 %v3603_v55, %v3564_v17 }
 0x149   : > { %v1147_v35 = vpop.f32.mrb[23].mxu0  ;;  %v1339_v36 = vpop.f32.mrb[23].mxu1 }
 0x14e   : > { %v3584_v37 = vpop.f32.mrb[24].mxu0  ;;  %v3586_v38 = vpop.f32.mrb[24].mxu1 }
 0x14f   : > { %v1152_v39 = vpop.f32.mrb[25].mxu0  ;;  %v1344_v40 = vpop.f32.mrb[25].mxu1 }
 0x150   : > { %v3588_v41 = vpop.f32.mrb[26].mxu0  ;;  %v3590_v42 = vpop.f32.mrb[26].mxu1 }
 0x151   : > { %v1155_v43 = vpop.f32.mrb[27].mxu0  ;;  %v1347_v44 = vpop.f32.mrb[27].mxu1 }
 0x156   : > { %v3592_v45 = vpop.f32.mrb[28].mxu0  ;;  %v3594_v46 = vpop.f32.mrb[28].mxu1 }
 0x157   : > { %v1160_v47 = vpop.f32.mrb[29].mxu0  ;;  %v1352_v48 = vpop.f32.mrb[29].mxu1 }
 0x158   : > { %v3596_v49 = vpop.f32.mrb[30].mxu0  ;;  %v3598_v50 = vpop.f32.mrb[30].mxu1  ;;  %v1122_v47 = vadd.f32 %v3603_v55, %v3556_v9 }
 0x159   : > { %v1163_v51 = vpop.f32.mrb[31].mxu0  ;;  %v1355_v52 = vpop.f32.mrb[31].mxu1 }
 0x15e   : > { %v3609_v60 = vpop.f32.mrb[32].mxu0  ;;  %v2843_v63 = vpop.f32.mrb[32].mxu1 }
 0x15f   : > { %v1400_v3 = vadd.f32 %v2843_v63, %v1111_v56  ;;  %v1168_v4 = vpop.f32.mrb[33].mxu0  ;;  %v1391_v7 = vpop.f32.mrb[33].mxu1 }
 0x160   : > { %v1392_v11 = vadd.f32 %v1391_v7, %v1103_v59  ;;  %v3614_v12 = vpop.f32.mrb[34].mxu0  ;;  %v2844_v15 = vpop.f32.mrb[34].mxu1 }
 0x161   : > { %v1648_v61 = vmax.f32 %v1400_v3, 0.0  ;;  %v1403_v16 = vadd.f32 %v2844_v15, %v1114_v0  ;;  %v1171_v19 = vpop.f32.mrb[35].mxu0  ;;  %v1394_v53 = vpop.f32.mrb[35].mxu1  ;;  %v1135_v15 = vadd.f32 %v3603_v55, %v3568_v21 }
 0x162   : > { %v1646_v20 = vmax.f32 %v1392_v11, 0.0  ;;  %v1395_v23 = vadd.f32 %v1394_v53, %v1106_v8  ;;  %v1143_v8 = vadd.f32 %v3603_v55, %v3576_v29  ;;  %v1146_v53 = vadd.f32 %v3603_v55, %v3580_v33 }
 0x163   : > { %v2735_v24 = vpack.c.bf16 %v1648_v61, %v1648_v61  ;;  %v1649_v1 = vmax.f32 %v1403_v16, 0.0 }
 0x164   : > { %v2733_v27 = vpack.c.bf16 %v1646_v20, %v1646_v20  ;;  %v1647_v28 = vmax.f32 %v1395_v23, 0.0 }
 0x165   : > { %1969 = vst.msk [vmem:[%s3618_s12 + $0x8] sm:$0xf] %vm1966_vm2, %v2735_v24  ;;  %v2736_v57 = vpack.c.bf16 %v1649_v1, %v1649_v1  ;;  %v1138_v24 = vadd.f32 %v3603_v55, %v3572_v25 }
 0x166   : > { %1967 = vst.msk [vmem:[%s3618_s12] sm:$0xf] %vm1966_vm2, %v2733_v27  ;;  %v2734_v35 = vpack.c.bf16 %v1647_v28, %v1647_v28  ;;  %v3626_v36 = vpop.f32.mrb[36].mxu0  ;;  %v2847_v39 = vpop.f32.mrb[36].mxu1 }
 0x167   : > { %1970 = vst.msk [vmem:[%s3618_s12 + $0xc] sm:$0xf] %vm1966_vm2, %v2736_v57  ;;  %v1416_v40 = vadd.f32 %v2847_v39, %v1127_v31  ;;  %v1176_v43 = vpop.f32.mrb[37].mxu0  ;;  %v1407_v44 = vpop.f32.mrb[37].mxu1 }
 0x168   : > { %1968 = vst.msk [vmem:[%s3618_s12 + $0x4] sm:$0xf] %vm1966_vm2, %v2734_v35  ;;  %v1408_v5 = vadd.f32 %v1407_v44, %v1119_v32  ;;  %v3636_v48 = vpop.f32.mrb[38].mxu0  ;;  %v2848_v51 = vpop.f32.mrb[38].mxu1  ;;  %v1159_v43 = vadd.f32 %v3603_v55, %v3592_v45  ;;  %v1154_v45 = vadd.f32 %v3603_v55, %v3588_v41  ;;  %v1175_v41 = vadd.f32 %v3603_v55, %v3626_v36 }
 0x169   : > { %v1652_v52 = vmax.f32 %v1416_v40, 0.0  ;;  %v1419_v56 = vadd.f32 %v2848_v51, %v1130_v13  ;;  %v1179_v59 = vpop.f32.mrb[39].mxu0  ;;  %v1410_v17 = vpop.f32.mrb[39].mxu1  ;;  %v1170_v36 = vadd.f32 %v3603_v55, %v3614_v12 }
 0x16a   : > { %v1650_v63 = vmax.f32 %v1408_v5, 0.0  ;;  %v1411_v0 = vadd.f32 %v1410_v17, %v1122_v47  ;;  %v1151_v47 = vadd.f32 %v3603_v55, %v3584_v37 }
 0x16b   : > { %v2739_v3 = vpack.c.bf16 %v1652_v52, %v1652_v52  ;;  %v1653_v4 = vmax.f32 %v1419_v56, 0.0  ;;  %v1162_v56 = vadd.f32 %v3603_v55, %v3596_v49 }
 0x16c   : > { %v2737_v7 = vpack.c.bf16 %v1650_v63, %v1650_v63  ;;  %v1651_v9 = vmax.f32 %v1411_v0, 0.0 }
 0x16d   : > { %1973 = vst.msk [vmem:[%s3618_s12 + $0x18] sm:$0xf] %vm1966_vm2, %v2739_v3  ;;  %v2740_v11 = vpack.c.bf16 %v1653_v4, %v1653_v4 }
 0x16e   : > { %1971 = vst.msk [vmem:[%s3618_s12 + $0x10] sm:$0xf] %vm1966_vm2, %v2737_v7  ;;  %v2738_v61 = vpack.c.bf16 %v1651_v9, %v1651_v9  ;;  %v3646_v16 = vpop.f32.mrb[40].mxu0  ;;  %v2851_v19 = vpop.f32.mrb[40].mxu1 }
 0x16f   : > { %1974 = vst.msk [vmem:[%s3618_s12 + $0x1c] sm:$0xf] %vm1966_vm2, %v2740_v11  ;;  %v1432_v20 = vadd.f32 %v2851_v19, %v1143_v8  ;;  %v1184_v23 = vpop.f32.mrb[41].mxu0  ;;  %v1423_v29 = vpop.f32.mrb[41].mxu1 }
 0x170   : > { %1972 = vst.msk [vmem:[%s3618_s12 + $0x14] sm:$0xf] %vm1966_vm2, %v2738_v61  ;;  %v1424_v21 = vadd.f32 %v1423_v29, %v1135_v15  ;;  %v3656_v1 = vpop.f32.mrb[42].mxu0  ;;  %v2852_v27 = vpop.f32.mrb[42].mxu1  ;;  %v1167_v23 = vadd.f32 %v3603_v55, %v3609_v60 }
 0x171   : > { %v1656_v28 = vmax.f32 %v1432_v20, 0.0  ;;  %v1435_v31 = vadd.f32 %v2852_v27, %v1146_v53  ;;  %v1187_v57 = vpop.f32.mrb[43].mxu0  ;;  %v1426_v33 = vpop.f32.mrb[43].mxu1  ;;  %v1178_v27 = vadd.f32 %v3603_v55, %v3636_v48 }
 0x172   : > { %v1654_v32 = vmax.f32 %v1424_v21, 0.0  ;;  %v1427_v35 = vadd.f32 %v1426_v33, %v1138_v24 }
 0x173   : > { %v2743_v39 = vpack.c.bf16 %v1656_v28, %v1656_v28  ;;  %v1657_v13 = vmax.f32 %v1435_v31, 0.0 }
 0x174   : > { %v2741_v40 = vpack.c.bf16 %v1654_v32, %v1654_v32  ;;  %v1655_v25 = vmax.f32 %v1427_v35, 0.0 }
 0x175   : > { %1977 = vst.msk [vmem:[%s3618_s12 + $0x28] sm:$0xf] %vm1966_vm2, %v2743_v39  ;;  %v2744_v44 = vpack.c.bf16 %v1657_v13, %v1657_v13 }
 0x176   : > { %1975 = vst.msk [vmem:[%s3618_s12 + $0x20] sm:$0xf] %vm1966_vm2, %v2741_v40  ;;  %v2742_v5 = vpack.c.bf16 %v1655_v25, %v1655_v25  ;;  %v1190_v51 = vpop.f32.mrb[44].mxu0  ;;  %v2855_v52 = vpop.f32.mrb[44].mxu1 }
 0x177   : > { %1978 = vst.msk [vmem:[%s3618_s12 + $0x2c] sm:$0xf] %vm1966_vm2, %v2744_v44  ;;  %v1448_v59 = vadd.f32 %v2855_v52, %v1159_v43  ;;  %v1192_v17 = vpop.f32.mrb[45].mxu0  ;;  %v1439_v63 = vpop.f32.mrb[45].mxu1  ;;  %v1191_v12 = vadd.f32 %v3603_v55, %v1190_v51  ;;  %v1186_v51 = vadd.f32 %v3603_v55, %v3656_v1 }
 0x178   : > { %1976 = vst.msk [vmem:[%s3618_s12 + $0x24] sm:$0xf] %vm1966_vm2, %v2742_v5  ;;  %v1440_v37 = vadd.f32 %v1439_v63, %v1151_v47  ;;  %v1193_v0 = vpop.f32.mrb[46].mxu0  ;;  %v2856_v3 = vpop.f32.mrb[46].mxu1 }
 0x179   : > { %v1660_v4 = vmax.f32 %v1448_v59, 0.0  ;;  %v1451_v7 = vadd.f32 %v2856_v3, %v1162_v56  ;;  %v1195_v9 = vpop.f32.mrb[47].mxu0  ;;  %v1442_v8 = vpop.f32.mrb[47].mxu1  ;;  %v1183_v56 = vadd.f32 %v3603_v55, %v3646_v16 }
 0x17a   : > { %v1658_v49 = vmax.f32 %v1440_v37, 0.0  ;;  %v1443_v11 = vadd.f32 %v1442_v8, %v1154_v45  ;;  %v1194_v45 = vadd.f32 %v3603_v55, %v1193_v0 }
 0x17b   : > { %v2747_v15 = vpack.c.bf16 %v1660_v4, %v1660_v4  ;;  %v1661_v61 = vmax.f32 %v1451_v7, 0.0 }
 0x17c   : > { %v2745_v19 = vpack.c.bf16 %v1658_v49, %v1658_v49  ;;  %v1659_v53 = vmax.f32 %v1443_v11, 0.0 }
 0x17d   : > { %1981 = vst.msk [vmem:[%s3618_s12 + $0x38] sm:$0xf] %vm1966_vm2, %v2747_v15  ;;  %v2748_v20 = vpack.c.bf16 %v1661_v61, %v1661_v61 }
 0x17e   : > { %1979 = vst.msk [vmem:[%s3618_s12 + $0x30] sm:$0xf] %vm1966_vm2, %v2745_v19  ;;  %v2746_v29 = vpack.c.bf16 %v1659_v53, %v1659_v53  ;;  %v1198_v24 = vpop.f32.mrb[48].mxu0  ;;  %v2859_v21 = vpop.f32.mrb[48].mxu1 }
 0x17f   : > { %1982 = vst.msk [vmem:[%s3618_s12 + $0x3c] sm:$0xf] %vm1966_vm2, %v2748_v20  ;;  %v1464_v28 = vadd.f32 %v2859_v21, %v1175_v41  ;;  %v1200_v31 = vpop.f32.mrb[49].mxu0  ;;  %v1455_v57 = vpop.f32.mrb[49].mxu1 }
 0x180   : > { %1980 = vst.msk [vmem:[%s3618_s12 + $0x34] sm:$0xf] %vm1966_vm2, %v2746_v29  ;;  %v1456_v60 = vadd.f32 %v1455_v57, %v1167_v23  ;;  %v1201_v33 = vpop.f32.mrb[50].mxu0  ;;  %v2860_v32 = vpop.f32.mrb[50].mxu1  ;;  %v1199_v29 = vadd.f32 %v3603_v55, %v1198_v24 }
 0x181   : > { %v1664_v35 = vmax.f32 %v1464_v28, 0.0  ;;  %v1467_v39 = vadd.f32 %v2860_v32, %v1178_v27  ;;  %v1203_v13 = vpop.f32.mrb[51].mxu0  ;;  %v1458_v40 = vpop.f32.mrb[51].mxu1  ;;  %v1202_v32 = vadd.f32 %v3603_v55, %v1201_v33 }
 0x182   : > { %v1662_v48 = vmax.f32 %v1456_v60, 0.0  ;;  %v1459_v25 = vadd.f32 %v1458_v40, %v1170_v36 }
 0x183   : > { %v2751_v43 = vpack.c.bf16 %v1664_v35, %v1664_v35  ;;  %v1665_v44 = vmax.f32 %v1467_v39, 0.0 }
 0x184   : > { %v2749_v47 = vpack.c.bf16 %v1662_v48, %v1662_v48  ;;  %v1663_v5 = vmax.f32 %v1459_v25, 0.0 }
 0x185   : > { %1985 = vst.msk [vmem:[%s3618_s12 + $0x48] sm:$0xf] %vm1966_vm2, %v2751_v43  ;;  %v2752_v52 = vpack.c.bf16 %v1665_v44, %v1665_v44 }
 0x186   : > { %1983 = vst.msk [vmem:[%s3618_s12 + $0x40] sm:$0xf] %vm1966_vm2, %v2749_v47  ;;  %v2750_v59 = vpack.c.bf16 %v1663_v5, %v1663_v5  ;;  %v1206_v17 = vpop.f32.mrb[52].mxu0  ;;  %v2863_v63 = vpop.f32.mrb[52].mxu1 }
 0x187   : > { %1986 = vst.msk [vmem:[%s3618_s12 + $0x4c] sm:$0xf] %vm1966_vm2, %v2752_v52  ;;  %v1480_v37 = vadd.f32 %v2863_v63, %v1191_v12  ;;  %v1208_v3 = vpop.f32.mrb[53].mxu0  ;;  %v1471_v4 = vpop.f32.mrb[53].mxu1  ;;  %v1207_v1 = vadd.f32 %v3603_v55, %v1206_v17 }
 0x188   : > { %1984 = vst.msk [vmem:[%s3618_s12 + $0x44] sm:$0xf] %vm1966_vm2, %v2750_v59  ;;  %v1472_v7 = vadd.f32 %v1471_v4, %v1183_v56  ;;  %v1209_v16 = vpop.f32.mrb[54].mxu0  ;;  %v2864_v9 = vpop.f32.mrb[54].mxu1 }
 0x189   : > { %v1668_v8 = vmax.f32 %v1480_v37, 0.0  ;;  %v1483_v49 = vadd.f32 %v2864_v9, %v1194_v45  ;;  %v1211_v11 = vpop.f32.mrb[55].mxu0  ;;  %v1474_v15 = vpop.f32.mrb[55].mxu1  ;;  %v1210_v31 = vadd.f32 %v3603_v55, %v1209_v16 }
 0x18a   : > { %v1666_v0 = vmax.f32 %v1472_v7, 0.0  ;;  %v1475_v61 = vadd.f32 %v1474_v15, %v1186_v51 }
 0x18b   : > { %v2755_v19 = vpack.c.bf16 %v1668_v8, %v1668_v8  ;;  %v1669_v53 = vmax.f32 %v1483_v49, 0.0 }
 0x18c   : > { %v2753_v41 = vpack.c.bf16 %v1666_v0, %v1666_v0  ;;  %v1667_v20 = vmax.f32 %v1475_v61, 0.0 }
 0x18d   : > { %1989 = vst.msk [vmem:[%s3618_s12 + $0x58] sm:$0xf] %vm1966_vm2, %v2755_v19  ;;  %v2756_v23 = vpack.c.bf16 %v1669_v53, %v1669_v53 }
 0x18e   : > { %1987 = vst.msk [vmem:[%s3618_s12 + $0x50] sm:$0xf] %vm1966_vm2, %v2753_v41  ;;  %v2754_v21 = vpack.c.bf16 %v1667_v20, %v1667_v20  ;;  %v1214_v27 = vpop.f32.mrb[56].mxu0  ;;  %v2867_v28 = vpop.f32.mrb[56].mxu1 }
 0x18f   : > { %1990 = vst.msk [vmem:[%s3618_s12 + $0x5c] sm:$0xf] %vm1966_vm2, %v2756_v23  ;;  %v1496_v57 = vadd.f32 %v2867_v28, %v1207_v1  ;;  %v1216_v36 = vpop.f32.mrb[57].mxu0  ;;  %v1487_v60 = vpop.f32.mrb[57].mxu1  ;;  %v1215_v56 = vadd.f32 %v3603_v55, %v1214_v27 }
 0x190   : > { %1988 = vst.msk [vmem:[%s3618_s12 + $0x54] sm:$0xf] %vm1966_vm2, %v2754_v21  ;;  %v1488_v35 = vadd.f32 %v1487_v60, %v1199_v29  ;;  %v1217_v24 = vpop.f32.mrb[58].mxu0  ;;  %v2868_v39 = vpop.f32.mrb[58].mxu1 }
 0x191   : > { %v1672_v13 = vmax.f32 %v1496_v57, 0.0  ;;  %v1499_v40 = vadd.f32 %v2868_v39, %v1210_v31  ;;  %v1219_v48 = vpop.f32.mrb[59].mxu0  ;;  %v1490_v25 = vpop.f32.mrb[59].mxu1  ;;  %v1218_v4 = vadd.f32 %v3603_v55, %v1217_v24 }
 0x192   : > { %v1670_v43 = vmax.f32 %v1488_v35, 0.0  ;;  %v1491_v44 = vadd.f32 %v1490_v25, %v1202_v32 }
 0x193   : > { %v2759_v47 = vpack.c.bf16 %v1672_v13, %v1672_v13  ;;  %v1673_v5 = vmax.f32 %v1499_v40, 0.0 }
 0x194   : > { %v2757_v12 = vpack.c.bf16 %v1670_v43, %v1670_v43  ;;  %v1671_v52 = vmax.f32 %v1491_v44, 0.0 }
 0x195   : > { %1993 = vst.msk [vmem:[%s3618_s12 + $0x68] sm:$0xf] %vm1966_vm2, %v2759_v47  ;;  %v2760_v33 = vpack.c.bf16 %v1673_v5, %v1673_v5 }
 0x196   : > { %1991 = vst.msk [vmem:[%s3618_s12 + $0x60] sm:$0xf] %vm1966_vm2, %v2757_v12  ;;  %v2758_v59 = vpack.c.bf16 %v1671_v52, %v1671_v52  ;;  %v1222_v17 = vpop.f32.mrb[60].mxu0  ;;  %v2871_v63 = vpop.f32.mrb[60].mxu1 }
 0x197   : > { %1994 = vst.msk [vmem:[%s3618_s12 + $0x6c] sm:$0xf] %vm1966_vm2, %v2760_v33  ;;  %v1223_v45 = vadd.f32 %v3603_v55, %v1222_v17  ;;  %v1224_v37 = vpop.f32.mrb[61].mxu0  ;;  %v1503_v3 = vpop.f32.mrb[61].mxu1 }
 0x198   : > { %1992 = vst.msk [vmem:[%s3618_s12 + $0x64] sm:$0xf] %vm1966_vm2, %v2758_v59  ;;  %v1504_v51 = vadd.f32 %v1503_v3, %v1215_v56  ;;  %v1225_v7 = vpop.f32.mrb[62].mxu0  ;;  %v2872_v16 = vpop.f32.mrb[62].mxu1 }
 0x199   : > { %v1512_v9 = vadd.f32 %v2871_v63, %v1223_v45  ;;  %v1226_v8 = vadd.f32 %v3603_v55, %v1225_v7  ;;  %v1227_v49 = vpop.f32.mrb[63].mxu0  ;;  %v1506_v11 = vpop.f32.mrb[63].mxu1 }
 0x19a   : > { %v1674_v15 = vmax.f32 %v1504_v51, 0.0  ;;  %v1507_v0 = vadd.f32 %v1506_v11, %v1218_v4 }
 0x19b   : > { %v1676_v61 = vmax.f32 %v1512_v9, 0.0  ;;  %v1515_v19 = vadd.f32 %v2872_v16, %v1226_v8 }
 0x19c   : > { %v2761_v53 = vpack.c.bf16 %v1674_v15, %v1674_v15  ;;  %v1675_v41 = vmax.f32 %v1507_v0, 0.0 }
 0x19d   : > { %v2763_v20 = vpack.c.bf16 %v1676_v61, %v1676_v61  ;;  %v1677_v1 = vmax.f32 %v1515_v19, 0.0 }
 0x19e   : > { %1995 = vst.msk [vmem:[%s3618_s12 + $0x70] sm:$0xf] %vm1966_vm2, %v2761_v53  ;;  %v2762_v23 = vpack.c.bf16 %v1675_v41, %v1675_v41  ;;  %v1230_v29 = vpop.f32.mrb[64].mxu0  ;;  %v2875_v21 = vpop.f32.mrb[64].mxu1 }
 0x19f   : > { %1997 = vst.msk [vmem:[%s3618_s12 + $0x78] sm:$0xf] %vm1966_vm2, %v2763_v20  ;;  %v2764_v27 = vpack.c.bf16 %v1677_v1, %v1677_v1  ;;  %v1231_v28 = vadd.f32 %v3603_v55, %v1230_v29  ;;  %v1232_v31 = vpop.f32.mrb[65].mxu0  ;;  %v1519_v57 = vpop.f32.mrb[65].mxu1 }
 0x1a0   : > { %1996 = vst.msk [vmem:[%s3618_s12 + $0x74] sm:$0xf] %vm1966_vm2, %v2762_v23  ;;  %v1233_v36 = vpop.f32.mrb[66].mxu0  ;;  %v2876_v60 = vpop.f32.mrb[66].mxu1 }
 0x1a1   : > { %1998 = vst.msk [vmem:[%s3618_s12 + $0x7c] sm:$0xf] %vm1966_vm2, %v2764_v27  ;;  %v1520_v32 = vadd.f32 %v1519_v57, %v1231_v28  ;;  %v1234_v35 = vadd.f32 %v3603_v55, %v1233_v36  ;;  %v1235_v24 = vpop.f32.mrb[67].mxu0  ;;  %v1522_v39 = vpop.f32.mrb[67].mxu1 }
 0x1a3   : > { %v1678_v13 = vmax.f32 %v1520_v32, 0.0  ;;  %v1523_v40 = vadd.f32 %v1522_v39, %v1234_v35 }
 0x1a5   : > { %v2765_v48 = vpack.c.bf16 %v1678_v13, %v1678_v13  ;;  %v1679_v25 = vmax.f32 %v1523_v40, 0.0 }
 0x1a6   : > { %v1238_v43 = vpop.f32.mrb[68].mxu0  ;;  %v2879_v44 = vpop.f32.mrb[68].mxu1 }
 0x1a7   : > { %1999 = vst.msk [vmem:[%s3618_s12 + $0x80] sm:$0xf] %vm1966_vm2, %v2765_v48  ;;  %v2766_v47 = vpack.c.bf16 %v1679_v25, %v1679_v25  ;;  %v1239_v5 = vadd.f32 %v3603_v55, %v1238_v43  ;;  %v1240_v12 = vpop.f32.mrb[69].mxu0  ;;  %v1535_v52 = vpop.f32.mrb[69].mxu1  ;;  %v1303_v25 = vadd.f32 %v3603_v55, %v3548_v62  ;;  %v1298_v62 = vadd.f32 %v3603_v55, %v3546_v58 }
 0x1a8   : > { %v1241_v33 = vpop.f32.mrb[70].mxu0  ;;  %v2880_v56 = vpop.f32.mrb[70].mxu1 }
 0x1a9   : > { %2000 = vst.msk [vmem:[%s3618_s12 + $0x84] sm:$0xf] %vm1966_vm2, %v2766_v47  ;;  %v1528_v59 = vadd.f32 %v2875_v21, %v1239_v5  ;;  %v1242_v17 = vadd.f32 %v3603_v55, %v1241_v33  ;;  %v1243_v63 = vpop.f32.mrb[71].mxu0  ;;  %v1538_v45 = vpop.f32.mrb[71].mxu1  ;;  %v1295_v5 = vadd.f32 %v3603_v55, %v3542_v54 }
 0x1ab   : > { %v1680_v37 = vmax.f32 %v1528_v59, 0.0  ;;  %v1531_v3 = vadd.f32 %v2876_v60, %v1242_v17 }
 0x1ad   : > { %v2767_v4 = vpack.c.bf16 %v1680_v37, %v1680_v37  ;;  %v1681_v51 = vmax.f32 %v1531_v3, 0.0 }
 0x1ae   : > { %v1246_v7 = vpop.f32.mrb[72].mxu0  ;;  %v3744_v16 = vpop.f32.mrb[72].mxu1 }
 0x1af   : > { %2001 = vst.msk [vmem:[%s3618_s12 + $0x88] sm:$0xf] %vm1966_vm2, %v2767_v4  ;;  %v2768_v9 = vpack.c.bf16 %v1681_v51, %v1681_v51  ;;  %v1247_v8 = vadd.f32 %v3603_v55, %v1246_v7  ;;  %v1248_v49 = vpop.f32.mrb[73].mxu0  ;;  %v1551_v11 = vpop.f32.mrb[73].mxu1 }
 0x1b0   : > { %v1249_v15 = vpop.f32.mrb[74].mxu0  ;;  %v3749_v0 = vpop.f32.mrb[74].mxu1 }
 0x1b1   : > { %2002 = vst.msk [vmem:[%s3618_s12 + $0x8c] sm:$0xf] %vm1966_vm2, %v2768_v9  ;;  %v1536_v61 = vadd.f32 %v1535_v52, %v1247_v8  ;;  %v1250_v19 = vadd.f32 %v3603_v55, %v1249_v15  ;;  %v1251_v53 = vpop.f32.mrb[75].mxu0  ;;  %v1554_v41 = vpop.f32.mrb[75].mxu1 }
 0x1b3   : > { %v1682_v20 = vmax.f32 %v1536_v61, 0.0  ;;  %v1539_v1 = vadd.f32 %v1538_v45, %v1250_v19 }
 0x1b5   : > { %v2769_v23 = vpack.c.bf16 %v1682_v20, %v1682_v20  ;;  %v1683_v29 = vmax.f32 %v1539_v1, 0.0 }
 0x1b6   : > { %v1254_v21 = vpop.f32.mrb[76].mxu0  ;;  %v3754_v27 = vpop.f32.mrb[76].mxu1 }
 0x1b7   : > { %2003 = vst.msk [vmem:[%s3618_s12 + $0x90] sm:$0xf] %vm1966_vm2, %v2769_v23  ;;  %v2770_v28 = vpack.c.bf16 %v1683_v29, %v1683_v29  ;;  %v1255_v31 = vadd.f32 %v3603_v55, %v1254_v21  ;;  %v1256_v57 = vpop.f32.mrb[77].mxu0  ;;  %v3759_v36 = vpop.f32.mrb[77].mxu1  ;;  %v1311_v21 = vadd.f32 %v3603_v55, %v3554_v6  ;;  %v1314_v6 = vadd.f32 %v3603_v55, %v3558_v10 }
 0x1b8   : > { %v1257_v60 = vpop.f32.mrb[78].mxu0  ;;  %v3761_v32 = vpop.f32.mrb[78].mxu1  ;;  %v1322_v57 = vadd.f32 %v3603_v55, %v3566_v18 }
 0x1b9   : > { %2004 = vst.msk [vmem:[%s3618_s12 + $0x94] sm:$0xf] %vm1966_vm2, %v2770_v28  ;;  %v1544_v35 = vadd.f32 %v2879_v44, %v1255_v31  ;;  %v1258_v24 = vadd.f32 %v3603_v55, %v1257_v60  ;;  %v1259_v39 = vpop.f32.mrb[79].mxu0  ;;  %v3766_v13 = vpop.f32.mrb[79].mxu1  ;;  %v1306_v44 = vadd.f32 %v3603_v55, %v3550_v2 }
 0x1bb   : > { %v1684_v40 = vmax.f32 %v1544_v35, 0.0  ;;  %v1547_v48 = vadd.f32 %v2880_v56, %v1258_v24 }
 0x1bd   : > { %v2771_v43 = vpack.c.bf16 %v1684_v40, %v1684_v40  ;;  %v1685_v47 = vmax.f32 %v1547_v48, 0.0 }
 0x1be   : > { %v1262_v12 = vpop.f32.mrb[80].mxu0  ;;  %v2891_v52 = vpop.f32.mrb[80].mxu1 }
 0x1bf   : > { %2005 = vst.msk [vmem:[%s3618_s12 + $0x98] sm:$0xf] %vm1966_vm2, %v2771_v43  ;;  %v2772_v33 = vpack.c.bf16 %v1685_v47, %v1685_v47  ;;  %v1263_v59 = vadd.f32 %v3603_v55, %v1262_v12  ;;  %v1592_v56 = vadd.f32 %v2891_v52, %v1303_v25  ;;  %v1264_v17 = vpop.f32.mrb[81].mxu0  ;;  %v1583_v63 = vpop.f32.mrb[81].mxu1 }
 0x1c0   : > { %v1584_v45 = vadd.f32 %v1583_v63, %v1295_v5  ;;  %v1265_v37 = vpop.f32.mrb[82].mxu0  ;;  %v2892_v3 = vpop.f32.mrb[82].mxu1 }
 0x1c1   : > { %2006 = vst.msk [vmem:[%s3618_s12 + $0x9c] sm:$0xf] %vm1966_vm2, %v2772_v33  ;;  %v1552_v54 = vadd.f32 %v1551_v11, %v1263_v59  ;;  %v1696_v4 = vmax.f32 %v1592_v56, 0.0  ;;  %v1266_v2 = vadd.f32 %v3603_v55, %v1265_v37  ;;  %v1595_v51 = vadd.f32 %v2892_v3, %v1306_v44  ;;  %v1267_v7 = vpop.f32.mrb[83].mxu0  ;;  %v1586_v9 = vpop.f32.mrb[83].mxu1 }
 0x1c2   : > { %v1694_v8 = vmax.f32 %v1584_v45, 0.0  ;;  %v1587_v49 = vadd.f32 %v1586_v9, %v1298_v62  ;;  %v1319_v11 = vadd.f32 %v3603_v55, %v3562_v14 }
 0x1c3   : > { %v1686_v15 = vmax.f32 %v1552_v54, 0.0  ;;  %v2783_v61 = vpack.c.bf16 %v1696_v4, %v1696_v4  ;;  %v1555_v58 = vadd.f32 %v1554_v41, %v1266_v2  ;;  %v1697_v19 = vmax.f32 %v1595_v51, 0.0 }
 0x1c4   : > { %v2781_v53 = vpack.c.bf16 %v1694_v8, %v1694_v8  ;;  %v1695_v20 = vmax.f32 %v1587_v49, 0.0  ;;  %v1327_v54 = vadd.f32 %v3603_v55, %v3570_v22  ;;  %v1338_v51 = vadd.f32 %v3603_v55, %v3582_v34 }
 0x1c5   : > { %v2773_v1 = vpack.c.bf16 %v1686_v15, %v1686_v15  ;;  %2017 = vst.msk [vmem:[%s3618_s12 + $0xc8] sm:$0xf] %vm1966_vm2, %v2783_v61  ;;  %v1687_v23 = vmax.f32 %v1555_v58, 0.0  ;;  %v2784_v29 = vpack.c.bf16 %v1697_v19, %v1697_v19  ;;  %v1330_v22 = vadd.f32 %v3603_v55, %v3574_v26 }
 0x1c6   : > { %2015 = vst.msk [vmem:[%s3618_s12 + $0xc0] sm:$0xf] %vm1966_vm2, %v2781_v53  ;;  %v2782_v28 = vpack.c.bf16 %v1695_v20, %v1695_v20  ;;  %v1270_v41 = vpop.f32.mrb[84].mxu0  ;;  %v2895_v31 = vpop.f32.mrb[84].mxu1 }
 0x1c7   : > { %2007 = vst.msk [vmem:[%s3618_s12 + $0xa0] sm:$0xf] %vm1966_vm2, %v2773_v1  ;;  %v2774_v14 = vpack.c.bf16 %v1687_v23, %v1687_v23  ;;  %2018 = vst.msk [vmem:[%s3618_s12 + $0xcc] sm:$0xf] %vm1966_vm2, %v2784_v29  ;;  %v1271_v60 = vadd.f32 %v3603_v55, %v1270_v41  ;;  %v1608_v35 = vadd.f32 %v2895_v31, %v1319_v11  ;;  %v1272_v24 = vpop.f32.mrb[85].mxu0  ;;  %v1599_v39 = vpop.f32.mrb[85].mxu1 }
 0x1c8   : > { %2016 = vst.msk [vmem:[%s3618_s12 + $0xc4] sm:$0xf] %vm1966_vm2, %v2782_v28  ;;  %v1600_v40 = vadd.f32 %v1599_v39, %v1311_v21  ;;  %v1273_v48 = vpop.f32.mrb[86].mxu0  ;;  %v2896_v25 = vpop.f32.mrb[86].mxu1  ;;  %v1343_v24 = vadd.f32 %v3603_v55, %v3586_v38  ;;  %v1346_v38 = vadd.f32 %v3603_v55, %v3590_v42 }
 0x1c9   : > { %2008 = vst.msk [vmem:[%s3618_s12 + $0xa4] sm:$0xf] %vm1966_vm2, %v2774_v14  ;;  %v1560_v18 = vadd.f32 %v3744_v16, %v1271_v60  ;;  %v1700_v43 = vmax.f32 %v1608_v35, 0.0  ;;  %v1274_v47 = vadd.f32 %v3603_v55, %v1273_v48  ;;  %v1611_v5 = vadd.f32 %v2896_v25, %v1322_v57  ;;  %v1275_v12 = vpop.f32.mrb[87].mxu0  ;;  %v1602_v52 = vpop.f32.mrb[87].mxu1 }
 0x1ca   : > { %v1698_v44 = vmax.f32 %v1600_v40, 0.0  ;;  %v1603_v33 = vadd.f32 %v1602_v52, %v1314_v6  ;;  %v1335_v16 = vadd.f32 %v3603_v55, %v3578_v30  ;;  %v1354_v40 = vadd.f32 %v3603_v55, %v3598_v50 }
 0x1cb   : > { %v1688_v10 = vmax.f32 %v1560_v18, 0.0  ;;  %v2787_v59 = vpack.c.bf16 %v1700_v43, %v1700_v43  ;;  %v1563_v56 = vadd.f32 %v3749_v0, %v1274_v47  ;;  %v1701_v17 = vmax.f32 %v1611_v5, 0.0 }
 0x1cc   : > { %v2785_v63 = vpack.c.bf16 %v1698_v44, %v1698_v44  ;;  %v1699_v62 = vmax.f32 %v1603_v33, 0.0 }
 0x1cd   : > { %v2775_v45 = vpack.c.bf16 %v1688_v10, %v1688_v10  ;;  %2021 = vst.msk [vmem:[%s3618_s12 + $0xd8] sm:$0xf] %vm1966_vm2, %v2787_v59  ;;  %v1689_v37 = vmax.f32 %v1563_v56, 0.0  ;;  %v2788_v3 = vpack.c.bf16 %v1701_v17, %v1701_v17 }
 0x1ce   : > { %2019 = vst.msk [vmem:[%s3618_s12 + $0xd0] sm:$0xf] %vm1966_vm2, %v2785_v63  ;;  %v2786_v4 = vpack.c.bf16 %v1699_v62, %v1699_v62  ;;  %v1278_v0 = vpop.f32.mrb[88].mxu0  ;;  %v2899_v2 = vpop.f32.mrb[88].mxu1 }
 0x1cf   : > { %2009 = vst.msk [vmem:[%s3618_s12 + $0xa8] sm:$0xf] %vm1966_vm2, %v2775_v45  ;;  %v2776_v30 = vpack.c.bf16 %v1689_v37, %v1689_v37  ;;  %2022 = vst.msk [vmem:[%s3618_s12 + $0xdc] sm:$0xf] %vm1966_vm2, %v2788_v3  ;;  %v1279_v7 = vadd.f32 %v3603_v55, %v1278_v0  ;;  %v1624_v9 = vadd.f32 %v2899_v2, %v1335_v16  ;;  %v1280_v8 = vpop.f32.mrb[89].mxu0  ;;  %v1615_v49 = vpop.f32.mrb[89].mxu1 }
 0x1d0   : > { %2020 = vst.msk [vmem:[%s3618_s12 + $0xd4] sm:$0xf] %vm1966_vm2, %v2786_v4  ;;  %v1616_v15 = vadd.f32 %v1615_v49, %v1327_v54  ;;  %v1281_v61 = vpop.f32.mrb[90].mxu0  ;;  %v2900_v58 = vpop.f32.mrb[90].mxu1 }
 0x1d1   : > { %2010 = vst.msk [vmem:[%s3618_s12 + $0xac] sm:$0xf] %vm1966_vm2, %v2776_v30  ;;  %v1568_v34 = vadd.f32 %v3759_v36, %v1279_v7  ;;  %v1704_v19 = vmax.f32 %v1624_v9, 0.0  ;;  %v1282_v53 = vadd.f32 %v3603_v55, %v1281_v61  ;;  %v1627_v20 = vadd.f32 %v2900_v58, %v1338_v51  ;;  %v1283_v11 = vpop.f32.mrb[91].mxu0  ;;  %v1618_v1 = vpop.f32.mrb[91].mxu1 }
 0x1d2   : > { %v1702_v23 = vmax.f32 %v1616_v15, 0.0  ;;  %v1619_v29 = vadd.f32 %v1618_v1, %v1330_v22  ;;  %v1351_v36 = vadd.f32 %v3603_v55, %v3594_v46 }
 0x1d3   : > { %v1690_v26 = vmax.f32 %v1568_v34, 0.0  ;;  %v2791_v21 = vpack.c.bf16 %v1704_v19, %v1704_v19  ;;  %v1571_v28 = vadd.f32 %v3766_v13, %v1282_v53  ;;  %v1705_v41 = vmax.f32 %v1627_v20, 0.0 }
 0x1d4   : > { %v2789_v31 = vpack.c.bf16 %v1702_v23, %v1702_v23  ;;  %v1703_v57 = vmax.f32 %v1619_v29, 0.0 }
 0x1d5   : > { %v2777_v14 = vpack.c.bf16 %v1690_v26, %v1690_v26  ;;  %2025 = vst.msk [vmem:[%s3618_s12 + $0xe8] sm:$0xf] %vm1966_vm2, %v2791_v21  ;;  %v1691_v60 = vmax.f32 %v1571_v28, 0.0  ;;  %v2792_v35 = vpack.c.bf16 %v1705_v41, %v1705_v41 }
 0x1d6   : > { %2023 = vst.msk [vmem:[%s3618_s12 + $0xe0] sm:$0xf] %vm1966_vm2, %v2789_v31  ;;  %v2790_v39 = vpack.c.bf16 %v1703_v57, %v1703_v57  ;;  %v1286_v13 = vpop.f32.mrb[92].mxu0  ;;  %v2903_v6 = vpop.f32.mrb[92].mxu1 }
 0x1d7   : > { %2011 = vst.msk [vmem:[%s3618_s12 + $0xb0] sm:$0xf] %vm1966_vm2, %v2777_v14  ;;  %v2778_v46 = vpack.c.bf16 %v1691_v60, %v1691_v60  ;;  %2026 = vst.msk [vmem:[%s3618_s12 + $0xec] sm:$0xf] %vm1966_vm2, %v2792_v35  ;;  %v1287_v48 = vadd.f32 %v3603_v55, %v1286_v13  ;;  %v1640_v25 = vadd.f32 %v2903_v6, %v1351_v36  ;;  %v1288_v18 = vpop.f32.mrb[93].mxu0  ;;  %v1631_v43 = vpop.f32.mrb[93].mxu1 }
 0x1d8   : > { %2024 = vst.msk [vmem:[%s3618_s12 + $0xe4] sm:$0xf] %vm1966_vm2, %v2790_v39  ;;  %v1632_v47 = vadd.f32 %v1631_v43, %v1343_v24  ;;  %v1289_v5 = vpop.f32.mrb[94].mxu0  ;;  %v2904_v12 = vpop.f32.mrb[94].mxu1 }
 0x1d9   : > { %2012 = vst.msk [vmem:[%s3618_s12 + $0xb4] sm:$0xf] %vm1966_vm2, %v2778_v46  ;;  %v1576_v50 = vadd.f32 %v3754_v27, %v1287_v48  ;;  %v1708_v52 = vmax.f32 %v1640_v25, 0.0  ;;  %v1290_v44 = vadd.f32 %v3603_v55, %v1289_v5  ;;  %v1643_v33 = vadd.f32 %v2904_v12, %v1354_v40  ;;  %v1291_v10 = vpop.f32.mrb[95].mxu0  ;;  %v1634_v59 = vpop.f32.mrb[95].mxu1 }
 0x1da   : > { %v1706_v56 = vmax.f32 %v1632_v47, 0.0  ;;  %v1635_v42 = vadd.f32 %v1634_v59, %v1346_v38 }
 0x1db   : > { %v1692_v17 = vmax.f32 %v1576_v50, 0.0  ;;  %v2795_v63 = vpack.c.bf16 %v1708_v52, %v1708_v52  ;;  %v1579_v62 = vadd.f32 %v3761_v32, %v1290_v44  ;;  %v1709_v16 = vmax.f32 %v1643_v33, 0.0  ;;  %2037 = sbr.rel (!%p3309_p4) target bundleno = 573 (0x23d), region = 36 }
 0x1dc   : > { %v2793_v45 = vpack.c.bf16 %v1706_v56, %v1706_v56  ;;  %v1707_v27 = vmax.f32 %v1635_v42, 0.0 }
 0x1dd   : > { %v2779_v37 = vpack.c.bf16 %v1692_v17, %v1692_v17  ;;  %2029 = vst.msk [vmem:[%s3618_s12 + $0xf8] sm:$0xf] %vm1966_vm2, %v2795_v63  ;;  %v1693_v55 = vmax.f32 %v1579_v62, 0.0  ;;  %v2796_v3 = vpack.c.bf16 %v1709_v16, %v1709_v16 }
 0x1de   : > { %2027 = vst.msk [vmem:[%s3618_s12 + $0xf0] sm:$0xf] %vm1966_vm2, %v2793_v45  ;;  %v2794_v54 = vpack.c.bf16 %v1707_v27, %v1707_v27 }
 0x1df   : > { %2013 = vst.msk [vmem:[%s3618_s12 + $0xb8] sm:$0xf] %vm1966_vm2, %v2779_v37  ;;  %v2780_v4 = vpack.c.bf16 %v1693_v55, %v1693_v55  ;;  %2030 = vst.msk [vmem:[%s3618_s12 + $0xfc] sm:$0xf] %vm1966_vm2, %v2796_v3 }
 0x1e0   : > { %2028 = vst.msk [vmem:[%s3618_s12 + $0xf4] sm:$0xf] %vm1966_vm2, %v2794_v54 }
 0x1e1   : > { %2014 = vst.msk [vmem:[%s3618_s12 + $0xbc] sm:$0xf] %vm1966_vm2, %v2780_v4 }
 0x1e2   : > { %s4077_s29 = smov (!%p2040_p8, %s2039_s29), 64 }
 0x1e3   : > { %s2718_s7 = sshll.u32 %s4077_s29, 6 }
 0x1e4   : > { %p2721_p9 = scmp.eq.s32.totalorder %s2718_s7, 0 }
 0x1e5   : > { %s3879_s8 = sshrl.u32 (!%p2721_p9), %s4077_s29, 6 }
 0x1e6   : > { %2048 = sbr.rel (%p2721_p9) target bundleno = 573 (0x23d), region = 40  ;;  %p2722_p10 = scmp.le.s32.totalorder (!%p2721_p9), %s3879_s8, 0 }
 0x1ed   : > { %2453 = sbr.rel (%p2722_p10) target bundleno = 552 (0x228), region = 112  ;;  %s4070_s15 = smov (!%p2722_p10), %s3873_s6 }
 0x1ee   : > { %s4071_s20 = smov (!%p2722_p10), %s3618_s12  ;;  %s3888_s23 = smov (!%p2722_p10), 0  }
 0x1ef   : > { %s3890_s10 = smov (!%p2722_p10), 0  }
 0x1f4 LB: >> { %v2064_v32 = vld [vmem:[%s3237_s20] sm:$0xf]  ;;  %v2066_v0 = vld [vmem:[%s3237_s20 + $0x4] sm:$0xf]  ;;  %v2068_v2 = vld [vmem:[%s3237_s20 + $0x8] sm:$0xf]  ;;  %s3245_s10 = sphi %s3890_s10, %s2058_s10   ;;  %s3241_s23 = sphi %s3888_s23, %s4072_s23   ;;  %s3237_s20 = sphi %s4071_s20, %s2197_s20   ;;  %s3233_s15 = sphi %s4070_s15, %s2198_s15  }
 0x1f5   : >> { %2065 = vst [vmem:[%s3233_s15] sm:$0xf] %v2064_v32  ;;  %2067 = vst [vmem:[%s3233_s15 + $0x4] sm:$0xf] %v2066_v0  ;;  %v2070_v51 = vld [vmem:[%s3237_s20 + $0xc] sm:$0xf]  ;;  %s2192_s11 = sadd.s32 1, %s3241_s23 }
 0x1f6   : >> { %2069 = vst [vmem:[%s3233_s15 + $0x8] sm:$0xf] %v2068_v2  ;;  %v2072_v30 = vld [vmem:[%s3237_s20 + $0x10] sm:$0xf]  ;;  %v2074_v7 = vld [vmem:[%s3237_s20 + $0x14] sm:$0xf]  ;;  %p2193_p11 = scmp.ge.s32.totalorder %s2192_s11, %s3879_s8 }
 0x1f7   : >> { %2071 = vst [vmem:[%s3233_s15 + $0xc] sm:$0xf] %v2070_v51  ;;  %2073 = vst [vmem:[%s3233_s15 + $0x10] sm:$0xf] %v2072_v30  ;;  %v2076_v9 = vld [vmem:[%s3237_s20 + $0x18] sm:$0xf] }
 0x1f8   : >> { %2075 = vst [vmem:[%s3233_s15 + $0x14] sm:$0xf] %v2074_v7  ;;  %v2078_v8 = vld [vmem:[%s3237_s20 + $0x1c] sm:$0xf]  ;;  %v2080_v49 = vld [vmem:[%s3237_s20 + $0x20] sm:$0xf] }
 0x1f9   : >> { %2077 = vst [vmem:[%s3233_s15 + $0x18] sm:$0xf] %v2076_v9  ;;  %2079 = vst [vmem:[%s3233_s15 + $0x1c] sm:$0xf] %v2078_v8  ;;  %v2082_v22 = vld [vmem:[%s3237_s20 + $0x24] sm:$0xf] }
 0x1fa   : >> { %2081 = vst [vmem:[%s3233_s15 + $0x20] sm:$0xf] %v2080_v49  ;;  %v2084_v15 = vld [vmem:[%s3237_s20 + $0x28] sm:$0xf]  ;;  %v2086_v61 = vld [vmem:[%s3237_s20 + $0x2c] sm:$0xf] }
 0x1fb   : >> { %2083 = vst [vmem:[%s3233_s15 + $0x24] sm:$0xf] %v2082_v22  ;;  %2085 = vst [vmem:[%s3233_s15 + $0x28] sm:$0xf] %v2084_v15  ;;  %v2088_v58 = vld [vmem:[%s3237_s20 + $0x30] sm:$0xf] }
 0x1fc   : >> { %2087 = vst [vmem:[%s3233_s15 + $0x2c] sm:$0xf] %v2086_v61  ;;  %v2090_v34 = vld [vmem:[%s3237_s20 + $0x34] sm:$0xf]  ;;  %v2092_v19 = vld [vmem:[%s3237_s20 + $0x38] sm:$0xf] }
 0x1fd   : >> { %2089 = vst [vmem:[%s3233_s15 + $0x30] sm:$0xf] %v2088_v58  ;;  %2091 = vst [vmem:[%s3233_s15 + $0x34] sm:$0xf] %v2090_v34  ;;  %v2094_v53 = vld [vmem:[%s3237_s20 + $0x3c] sm:$0xf] }
 0x1fe   : >> { %2093 = vst [vmem:[%s3233_s15 + $0x38] sm:$0xf] %v2092_v19  ;;  %v2096_v20 = vld [vmem:[%s3237_s20 + $0x40] sm:$0xf]  ;;  %v2098_v11 = vld [vmem:[%s3237_s20 + $0x44] sm:$0xf] }
 0x1ff   : >> { %2095 = vst [vmem:[%s3233_s15 + $0x3c] sm:$0xf] %v2094_v53  ;;  %2097 = vst [vmem:[%s3233_s15 + $0x40] sm:$0xf] %v2096_v20  ;;  %v2100_v1 = vld [vmem:[%s3237_s20 + $0x48] sm:$0xf] }
 0x200   : >> { %2099 = vst [vmem:[%s3233_s15 + $0x44] sm:$0xf] %v2098_v11  ;;  %v2102_v23 = vld [vmem:[%s3237_s20 + $0x4c] sm:$0xf]  ;;  %v2104_v29 = vld [vmem:[%s3237_s20 + $0x50] sm:$0xf] }
 0x201   : >> { %2101 = vst [vmem:[%s3233_s15 + $0x48] sm:$0xf] %v2100_v1  ;;  %2103 = vst [vmem:[%s3233_s15 + $0x4c] sm:$0xf] %v2102_v23  ;;  %v2106_v26 = vld [vmem:[%s3237_s20 + $0x54] sm:$0xf] }
 0x202   : >> { %2105 = vst [vmem:[%s3233_s15 + $0x50] sm:$0xf] %v2104_v29  ;;  %v2108_v21 = vld [vmem:[%s3237_s20 + $0x58] sm:$0xf]  ;;  %v2110_v28 = vld [vmem:[%s3237_s20 + $0x5c] sm:$0xf] }
 0x203   : >> { %2107 = vst [vmem:[%s3233_s15 + $0x54] sm:$0xf] %v2106_v26  ;;  %2109 = vst [vmem:[%s3233_s15 + $0x58] sm:$0xf] %v2108_v21  ;;  %v2112_v41 = vld [vmem:[%s3237_s20 + $0x60] sm:$0xf] }
 0x204   : >> { %2111 = vst [vmem:[%s3233_s15 + $0x5c] sm:$0xf] %v2110_v28  ;;  %v2114_v31 = vld [vmem:[%s3237_s20 + $0x64] sm:$0xf]  ;;  %v2116_v57 = vld [vmem:[%s3237_s20 + $0x68] sm:$0xf] }
 0x205   : >> { %2113 = vst [vmem:[%s3233_s15 + $0x60] sm:$0xf] %v2112_v41  ;;  %2115 = vst [vmem:[%s3233_s15 + $0x64] sm:$0xf] %v2114_v31  ;;  %v2118_v36 = vld [vmem:[%s3237_s20 + $0x6c] sm:$0xf] }
 0x206   : >> { %2117 = vst [vmem:[%s3233_s15 + $0x68] sm:$0xf] %v2116_v57  ;;  %v2120_v14 = vld [vmem:[%s3237_s20 + $0x70] sm:$0xf]  ;;  %v2122_v60 = vld [vmem:[%s3237_s20 + $0x74] sm:$0xf] }
 0x207   : >> { %2119 = vst [vmem:[%s3233_s15 + $0x6c] sm:$0xf] %v2118_v36  ;;  %2121 = vst [vmem:[%s3233_s15 + $0x70] sm:$0xf] %v2120_v14  ;;  %v2124_v35 = vld [vmem:[%s3237_s20 + $0x78] sm:$0xf] }
 0x208   : >> { %2123 = vst [vmem:[%s3233_s15 + $0x74] sm:$0xf] %v2122_v60  ;;  %v2126_v24 = vld [vmem:[%s3237_s20 + $0x7c] sm:$0xf]  ;;  %v2128_v39 = vld [vmem:[%s3237_s20 + $0x80] sm:$0xf] }
 0x209   : >> { %2125 = vst [vmem:[%s3233_s15 + $0x78] sm:$0xf] %v2124_v35  ;;  %2127 = vst [vmem:[%s3233_s15 + $0x7c] sm:$0xf] %v2126_v24  ;;  %v2130_v13 = vld [vmem:[%s3237_s20 + $0x84] sm:$0xf] }
 0x20a   : >> { %2129 = vst [vmem:[%s3233_s15 + $0x80] sm:$0xf] %v2128_v39  ;;  %v2132_v6 = vld [vmem:[%s3237_s20 + $0x88] sm:$0xf]  ;;  %v2134_v40 = vld [vmem:[%s3237_s20 + $0x8c] sm:$0xf] }
 0x20b   : >> { %2131 = vst [vmem:[%s3233_s15 + $0x84] sm:$0xf] %v2130_v13  ;;  %2133 = vst [vmem:[%s3233_s15 + $0x88] sm:$0xf] %v2132_v6  ;;  %v2136_v46 = vld [vmem:[%s3237_s20 + $0x90] sm:$0xf] }
 0x20c   : >> { %2135 = vst [vmem:[%s3233_s15 + $0x8c] sm:$0xf] %v2134_v40  ;;  %v2138_v48 = vld [vmem:[%s3237_s20 + $0x94] sm:$0xf]  ;;  %v2140_v25 = vld [vmem:[%s3237_s20 + $0x98] sm:$0xf] }
 0x20d   : >> { %2137 = vst [vmem:[%s3233_s15 + $0x90] sm:$0xf] %v2136_v46  ;;  %2139 = vst [vmem:[%s3233_s15 + $0x94] sm:$0xf] %v2138_v48  ;;  %v2142_v18 = vld [vmem:[%s3237_s20 + $0x9c] sm:$0xf] }
 0x20e   : >> { %2141 = vst [vmem:[%s3233_s15 + $0x98] sm:$0xf] %v2140_v25  ;;  %v2144_v43 = vld [vmem:[%s3237_s20 + $0xa0] sm:$0xf]  ;;  %v2146_v38 = vld [vmem:[%s3237_s20 + $0xa4] sm:$0xf] }
 0x20f   : >> { %2143 = vst [vmem:[%s3233_s15 + $0x9c] sm:$0xf] %v2142_v18  ;;  %2145 = vst [vmem:[%s3233_s15 + $0xa0] sm:$0xf] %v2144_v43  ;;  %v2148_v47 = vld [vmem:[%s3237_s20 + $0xa8] sm:$0xf] }
 0x210   : >> { %2147 = vst [vmem:[%s3233_s15 + $0xa4] sm:$0xf] %v2146_v38  ;;  %v2150_v5 = vld [vmem:[%s3237_s20 + $0xac] sm:$0xf]  ;;  %v2152_v12 = vld [vmem:[%s3237_s20 + $0xb0] sm:$0xf] }
 0x211   : >> { %2149 = vst [vmem:[%s3233_s15 + $0xa8] sm:$0xf] %v2148_v47  ;;  %2151 = vst [vmem:[%s3233_s15 + $0xac] sm:$0xf] %v2150_v5  ;;  %v2154_v50 = vld [vmem:[%s3237_s20 + $0xb4] sm:$0xf] }
 0x212   : >> { %2153 = vst [vmem:[%s3233_s15 + $0xb0] sm:$0xf] %v2152_v12  ;;  %v2156_v52 = vld [vmem:[%s3237_s20 + $0xb8] sm:$0xf]  ;;  %v2158_v44 = vld [vmem:[%s3237_s20 + $0xbc] sm:$0xf] }
 0x213   : >> { %2155 = vst [vmem:[%s3233_s15 + $0xb4] sm:$0xf] %v2154_v50  ;;  %2157 = vst [vmem:[%s3233_s15 + $0xb8] sm:$0xf] %v2156_v52  ;;  %v2160_v33 = vld [vmem:[%s3237_s20 + $0xc0] sm:$0xf] }
 0x214   : >> { %2159 = vst [vmem:[%s3233_s15 + $0xbc] sm:$0xf] %v2158_v44  ;;  %v2162_v10 = vld [vmem:[%s3237_s20 + $0xc4] sm:$0xf]  ;;  %v2164_v59 = vld [vmem:[%s3237_s20 + $0xc8] sm:$0xf] }
 0x215   : >> { %2161 = vst [vmem:[%s3233_s15 + $0xc0] sm:$0xf] %v2160_v33  ;;  %2163 = vst [vmem:[%s3233_s15 + $0xc4] sm:$0xf] %v2162_v10  ;;  %v2166_v56 = vld [vmem:[%s3237_s20 + $0xcc] sm:$0xf] }
 0x216   : >> { %2165 = vst [vmem:[%s3233_s15 + $0xc8] sm:$0xf] %v2164_v59  ;;  %v2168_v42 = vld [vmem:[%s3237_s20 + $0xd0] sm:$0xf]  ;;  %v2170_v17 = vld [vmem:[%s3237_s20 + $0xd4] sm:$0xf] }
 0x217   : >> { %2167 = vst [vmem:[%s3233_s15 + $0xcc] sm:$0xf] %v2166_v56  ;;  %2169 = vst [vmem:[%s3233_s15 + $0xd0] sm:$0xf] %v2168_v42  ;;  %v2172_v63 = vld [vmem:[%s3237_s20 + $0xd8] sm:$0xf] }
 0x218   : >> { %2171 = vst [vmem:[%s3233_s15 + $0xd4] sm:$0xf] %v2170_v17  ;;  %v2174_v62 = vld [vmem:[%s3237_s20 + $0xdc] sm:$0xf]  ;;  %v2176_v16 = vld [vmem:[%s3237_s20 + $0xe0] sm:$0xf] }
 0x219   : >> { %2173 = vst [vmem:[%s3233_s15 + $0xd8] sm:$0xf] %v2172_v63  ;;  %2175 = vst [vmem:[%s3233_s15 + $0xdc] sm:$0xf] %v2174_v62  ;;  %v2178_v45 = vld [vmem:[%s3237_s20 + $0xe4] sm:$0xf] }
 0x21a   : >> { %2177 = vst [vmem:[%s3233_s15 + $0xe0] sm:$0xf] %v2176_v16  ;;  %v2180_v27 = vld [vmem:[%s3237_s20 + $0xe8] sm:$0xf]  ;;  %v2182_v37 = vld [vmem:[%s3237_s20 + $0xec] sm:$0xf] }
 0x21b   : >> { %2179 = vst [vmem:[%s3233_s15 + $0xe4] sm:$0xf] %v2178_v45  ;;  %2181 = vst [vmem:[%s3233_s15 + $0xe8] sm:$0xf] %v2180_v27  ;;  %v2184_v55 = vld [vmem:[%s3237_s20 + $0xf0] sm:$0xf] }
 0x21c   : >> { %2183 = vst [vmem:[%s3233_s15 + $0xec] sm:$0xf] %v2182_v37  ;;  %v2186_v3 = vld [vmem:[%s3237_s20 + $0xf4] sm:$0xf]  ;;  %v2188_v54 = vld [vmem:[%s3237_s20 + $0xf8] sm:$0xf] }
 0x21d   : >> { %2185 = vst [vmem:[%s3233_s15 + $0xf0] sm:$0xf] %v2184_v55  ;;  %2187 = vst [vmem:[%s3233_s15 + $0xf4] sm:$0xf] %v2186_v3  ;;  %v2190_v4 = vld [vmem:[%s3237_s20 + $0xfc] sm:$0xf] }
 0x21e   : >> { %2189 = vst [vmem:[%s3233_s15 + $0xf8] sm:$0xf] %v2188_v54  ;;  %2191 = vst [vmem:[%s3233_s15 + $0xfc] sm:$0xf] %v2190_v4  ;;  %s4079_s11 = smov (%p2193_p11, %s2192_s11), 0  ;;  %s2058_s10 = sadd.s32 1, %s3245_s10  }
 0x21f   : >> { %s2723_s14 = sshll.u32 %s4079_s11, 8  ;;  %p2057_p12 = scmp.ge.s32.totalorder %s2058_s10, %s3879_s8 }
 0x220   : >> { %s2197_s20 = scalar_lea.vmem %s3618_s12, %s2723_s14 [#allocation2]   ;;  %s2198_s15 = scalar_lea.vmem %s3873_s6, %s2723_s14  }
 0x221   : >> { %s4072_s23 = smov %s4079_s11  ;;  %2060 = sbr.rel (!%p2057_p12) target bundleno = 500 (0x1f4), region = 118 }
 0x228 PF: > { %s4047_s17 = sand.u32 63, %s4077_s29   ;;  %s2798_s18 = sshll.u32 %s3879_s8, 8 }
 0x229   : > { %s2203_s21 = scalar_lea.vmem %s3618_s12, %s2798_s18 [#allocation2]   ;;  %s2205_s22 = scalar_lea.vmem %s3873_s6, %s2798_s18  }
 0x22a   : > { %p2728_p13 = scmp.le.s32.totalorder %s4047_s17, 0 }
 0x22b   : > { %s3247_s24 = smov (!%p2728_p13), %s2205_s22   ;;  %s3251_s25 = smov (!%p2728_p13), %s2203_s21  }
 0x22c   : > { %2467 = sbr.rel (%p2728_p13) target bundleno = 573 (0x23d), region = 123  ;;  %s3255_s9 = smov (!%p2728_p13), 0  }
 0x22d   : > { %s3259_s26 = smov (!%p2728_p13), 0  }
 0x233 LB: >> { %v2215_v32 = vld [vmem:[%s3253_s25] sm:$0xf]  ;;  %s2217_s27 = sadd.s32 1, %s3257_s9  ;;  %s2209_s26 = sadd.s32 1, %s3261_s26   ;;  %s3261_s26 = sphi %s3259_s26, %s2209_s26   ;;  %s3257_s9 = sphi %s3255_s9, %s3256_s9   ;;  %s3253_s25 = sphi %s3251_s25, %s2222_s25   ;;  %s3249_s24 = sphi %s3247_s24, %s2223_s24  }
 0x234   : >> { %2216 = vst [vmem:[%s3249_s24] sm:$0xf] %v2215_v32  ;;  %p2218_p0 = scmp.ge.s32.totalorder %s2217_s27, %s4047_s17  ;;  %p2208_p1 = scmp.ge.s32.totalorder %s2209_s26, %s4047_s17 }
 0x236   : >> { %s4081_s27 = smov (%p2218_p0, %s2217_s27), 0  ;;  %2211 = sbr.rel (!%p2208_p1) target bundleno = 563 (0x233), region = 129 }
 0x237   : >> { %s2729_s28 = sshll.u32 %s4081_s27, 2  ;;  %s3256_s9 = smov %s4081_s27  }
 0x238   : >> { %s2222_s25 = scalar_lea.vmem %s2203_s21, %s2729_s28 [#allocation2]   ;;  %s2223_s24 = scalar_lea.vmem %s2205_s22, %s2729_s28  }
 0x23d PF: > { %p10_p2 = scmp.ge.s32.totalorder %s3299_s16, 6   ;;  %s4073_s12 = smov %s3225_s13 }
 0x23e   : > { %s4074_s13 = smov %s3307_s19  ;;  %s4075_s14 = smov %s3299_s16 }
 0x23f   :  { %12 = sbr.rel (!%p10_p2) target bundleno = 2 (0x2), region = 140 }

// kernel: tile.22
= control target key start
LH: loop header
LB: loop body
LE: loop exit
PB: predicated region body
PF: predicated region fallthrough
CT: control target
= control target key end

     0   :  { %s22_s0 = inlined_call_operand.vmem [shape: f32[32], index: 0, kind: input, shape index: {}]   ;;  %s23_s1 = inlined_call_operand.vmem [shape: f32[4,32], index: 1, kind: output, shape index: {}]  }
   0x1   :  { %v4_v0 = vld [vmem:[%s22_s0] ss:$0 sm:$0xff] }
   0x2   :  { %5 = vst [vmem:[%s23_s1] sm:$0xf] %v4_v0 }

// kernel: tile.23
= control target key start
LH: loop header
LB: loop body
LE: loop exit
PB: predicated region body
PF: predicated region fallthrough
CT: control target
= control target key end

     0   :  { %vm7_vm0 = vcmask 261120   ;;  %s37_s8 = smov 32   ;;  %s38_s9 = smov 64   ;;  %vm13_vm1 = vcmask 1048320   ;;  %vm19_vm2 = vcmask 785920   ;;  %vm25_vm3 = vcmask 523520   ;;  %s55_s0 = inlined_call_operand.vmem [shape: f32[4,32], index: 0, kind: input, shape index: {}]   ;;  %s56_s1 = inlined_call_operand.vmem [shape: f32[1,128], index: 1, kind: output, shape index: {}]  }
   0x1   :  { %v4_v0 = vld [vmem:[%s55_s0] sm:$0xf]  ;;  %s36_s0 = smov 96  }
   0x2   :  { %5 = vst [vmem:[#allocation1] sm:$0xf] %v4_v0 }
   0x9   :  { %v10_v1 = vld [vmem:[#allocation1 + $0x3] sm:$0x1]   ;;  %v22_v2 = vld [vmem:[#allocation1 + $0x1] sm:$0x1]   ;;  %v6_v3 = vld [vmem:[#allocation1] sm:$0x1]  }
   0xa   :  { %11 = vrot.lane.b32.xlu0 %v10_v1, %s36_s0  ;;  %23 = vrot.lane.b32.xlu1 %v22_v2, %s37_s8  ;;  %v16_v4 = vld [vmem:[#allocation1 + $0x2] sm:$0x1]   ;;  %8 = vst.msk [vmem:[#allocation0] sm:$0x1] %vm7_vm0, %v6_v3  }
   0xe   :  { %17 = vrot.lane.b32.xlu0 %v16_v4, %s38_s9 }
  0x7c   :  { %v12_v5 = vpop.permute.xlu0 %11   ;;  %v24_v6 = vpop.permute.xlu1 %23  }
  0x7d   :  { %14 = vst.msk [vmem:[#allocation0] sm:$0x1] %vm13_vm1, %v12_v5  }
  0x80   :  { %v18_v7 = vpop.permute.xlu0 %17  }
  0x81   :  { %20 = vst.msk [vmem:[#allocation0] sm:$0x1] %vm19_vm2, %v18_v7  }
  0x82   :  { %26 = vst.msk [vmem:[#allocation0] sm:$0x1] %vm25_vm3, %v24_v6  }
  0x89   :  { %v30_v8 = vld [vmem:[#allocation0] sm:$0x1] }
  0x8a   :  { %32 = vst [vmem:[%s56_s1] sm:$0x1] %v30_v8 }

// kernel: _lambda_.6
= control target key start
LH: loop header
LB: loop body
LE: loop exit
PB: predicated region body
PF: predicated region fallthrough
CT: control target
= control target key end

     0   :  { %s4883_s12 = smov 0   ;;  %s5711_s0 = inlined_call_operand.vmem [shape: bf16[441,1600], index: 0, kind: input, shape index: {}]   ;;  %s5712_s1 = inlined_call_operand.vmem [shape: bf16[1600,128], index: 1, kind: input, shape index: {}]   ;;  %s5713_s2 = inlined_call_operand.vmem [shape: f32[1,128], index: 2, kind: input, shape index: {}]   ;;  %s5714_s3 = inlined_call_operand.vmem [shape: bf16[441,128], index: 3, kind: output, shape index: {}]  }
   0x1 LB: > { %s3373_s13 = sadd.s32 4294967295, %s4861_s12   ;;  %p3377_p0 = scmp.ge.s32.totalorder %s4861_s12, 1  ;;  %s4861_s12 = sphi %s4883_s12, %s13_s12  }
   0x2   : > { %p139_p1 = scmp.lt.s32.totalorder %s4861_s12, 3 }
   0x4   : > { %p140_p2 = pnand %p3377_p0, %p139_p1 }
   0x5   : > { %v4489_v0 = vld [vmem:[%s5712_s1 + $0x40] sm:$0xff] (!%p140_p2)   ;;  %v4493_v4 = vld [vmem:[%s5712_s1 + $0x48] sm:$0xff] (!%p140_p2)   ;;  %v4497_v8 = vld [vmem:[%s5712_s1 + $0x50] sm:$0xff] (!%p140_p2)   ;;  %s164_s17 = smul.u32 (!%p140_p2), 28, %s3373_s13  ;;  %vm2091_vm0 = vcmask (!%p140_p2), 523264  }
   0x6   : > { %143 = sbr.rel (%p140_p2) target bundleno = 621 (0x26d), region = 32  ;;  %v4490_v1 = vld [vmem:[%s5712_s1 + $0xc0] sm:$0xff] (!%p140_p2)   ;;  %3818 = vmatprep.subr.bf16.mxu0 (!%p140_p2), %v4489_v0  ;;  %v4494_v5 = vld [vmem:[%s5712_s1 + $0xc8] sm:$0xff] (!%p140_p2)   ;;  %v4498_v9 = vld [vmem:[%s5712_s1 + $0xd0] sm:$0xff] (!%p140_p2)  }
   0x7   : > { %v4491_v2 = vld [vmem:[%s5712_s1] sm:$0xff] (!%p140_p2)   ;;  %3918 = vmatprep.subr.bf16.mxu1 (!%p140_p2), %v4490_v1  ;;  %v4495_v6 = vld [vmem:[%s5712_s1 + $0x8] sm:$0xff] (!%p140_p2)   ;;  %v4499_v10 = vld [vmem:[%s5712_s1 + $0x10] sm:$0xff] (!%p140_p2)   ;;  %p165_p3 = scmp.lt.s32.totalorder (!%p140_p2), %s164_s17, 55 }
   0x8   : > { %v4492_v3 = vld [vmem:[%s5712_s1 + $0x80] sm:$0xff] (!%p140_p2)   ;;  %3819 = vmatpush3.bf16.msra.mxu0 (!%p140_p2), %v4491_v2  ;;  %v4496_v7 = vld [vmem:[%s5712_s1 + $0x88] sm:$0xff] (!%p140_p2)   ;;  %v4500_v11 = vld [vmem:[%s5712_s1 + $0x90] sm:$0xff] (!%p140_p2)  }
   0x9   : > { %3919 = vmatpush3.bf16.msra.mxu1 (!%p140_p2), %v4492_v3  ;;  %3820 = vmatprep.subr.bf16.mxu0 (!%p140_p2), %v4493_v4  ;;  %v4501_v12 = vld [vmem:[%s5712_s1 + $0x58] sm:$0xff] (!%p140_p2)   ;;  %v4505_v16 = vld [vmem:[%s5712_s1 + $0x60] sm:$0xff] (!%p140_p2)   ;;  %v4509_v20 = vld [vmem:[%s5712_s1 + $0x68] sm:$0xff] (!%p140_p2)  }
   0xa   : > { %3920 = vmatprep.subr.bf16.mxu1 (!%p140_p2), %v4494_v5  ;;  %v4502_v13 = vld [vmem:[%s5712_s1 + $0xd8] sm:$0xff] (!%p140_p2)   ;;  %v4506_v17 = vld [vmem:[%s5712_s1 + $0xe0] sm:$0xff] (!%p140_p2)   ;;  %v4510_v21 = vld [vmem:[%s5712_s1 + $0xe8] sm:$0xff] (!%p140_p2)  }
   0xb   : > { %v4503_v14 = vld [vmem:[%s5712_s1 + $0x18] sm:$0xff] (!%p140_p2)   ;;  %v4507_v18 = vld [vmem:[%s5712_s1 + $0x20] sm:$0xff] (!%p140_p2)   ;;  %v4511_v22 = vld [vmem:[%s5712_s1 + $0x28] sm:$0xff] (!%p140_p2)  }
   0xc   : > { %3821 = vmatpush3.bf16.msra.mxu0 (!%p140_p2), %v4495_v6  ;;  %v4504_v15 = vld [vmem:[%s5712_s1 + $0x98] sm:$0xff] (!%p140_p2)   ;;  %v4508_v19 = vld [vmem:[%s5712_s1 + $0xa0] sm:$0xff] (!%p140_p2)   ;;  %v4512_v23 = vld [vmem:[%s5712_s1 + $0xa8] sm:$0xff] (!%p140_p2)  }
   0xd   : > { %3921 = vmatpush3.bf16.msra.mxu1 %v4496_v7  ;;  %3822 = vmatprep.subr.bf16.mxu0 %v4497_v8  ;;  %s5716_s17 = smov (!%p165_p3, %s164_s17), 55  ;;  %v4513_v24 = vld [vmem:[%s5712_s1 + $0x70] sm:$0xff]   ;;  %v4517_v28 = vld [vmem:[%s5712_s1 + $0x78] sm:$0xff]   ;;  %v4527_v36 = vld [vmem:[%s5712_s1 + $0x140] sm:$0xff]  }
   0xe   : > { %3922 = vmatprep.subr.bf16.mxu1 %v4498_v9  ;;  %v4514_v25 = vld [vmem:[%s5712_s1 + $0xf0] sm:$0xff]   ;;  %s4480_s16 = smul.u32 52, %s5716_s17  ;;  %v4518_v29 = vld [vmem:[%s5712_s1 + $0xf8] sm:$0xff]   ;;  %v4528_v37 = vld [vmem:[%s5712_s1 + $0x100] sm:$0xff]  }
   0xf   : > { %v4515_v26 = vld [vmem:[%s5712_s1 + $0x30] sm:$0xff]   ;;  %v4519_v30 = vld [vmem:[%s5712_s1 + $0x38] sm:$0xff]   ;;  %v4535_v42 = vld [vmem:[%s5712_s1 + $0x1c0] sm:$0xff]  }
  0x10   : > { %3823 = vmatpush3.bf16.msra.mxu0 %v4499_v10  ;;  %v4516_v27 = vld [vmem:[%s5712_s1 + $0xb0] sm:$0xff]   ;;  %s4989_s27 = scalar_lea.vmem %s5711_s0, %s4480_s16  ;;  %v4520_v31 = vld [vmem:[%s5712_s1 + $0xb8] sm:$0xff]   ;;  %v4536_v43 = vld [vmem:[%s5712_s1 + $0x180] sm:$0xff]  }
  0x11   : > { %3923 = vmatpush3.bf16.msra.mxu1 %v4500_v11  ;;  %3824 = vmatprep.subr.bf16.mxu0 %v4501_v12  ;;  %v4521_v32 = vld [vmem:[%s4989_s27] ss:$52 sps:$4 sm:$0xff]   ;;  %v4523_v33 = vld [vmem:[%s4989_s27 + $0x4] ss:$52 sps:$4 sm:$0xff]   ;;  %v4524_v34 = vld [vmem:[%s4989_s27 + $0x8] ss:$52 sps:$4 sm:$0xff]  }
  0x12   : > { %3924 = vmatprep.subr.bf16.mxu1 %v4502_v13  ;;  %v4526_v35 = vld [vmem:[%s4989_s27 + $0xc] ss:$52 sps:$4 sm:$0xff]   ;;  %2166 = vmatprep.mubr.bf16.mxu0 %v4523_v33  ;;  %v4531_v39 = vld [vmem:[%s4989_s27 + $0x74] ss:$52 sps:$4 sm:$0xff]   ;;  %v4534_v41 = vld [vmem:[%s4989_s27 + $0x70] ss:$52 sps:$4 sm:$0xff]  }
  0x13   : > { %2311 = vmatprep.mubr.bf16.mxu1 %v4526_v35  ;;  %v4529_v38 = vld [vmem:[%s4989_s27 + $0x6c] ss:$52 sps:$4 sm:$0xff]   ;;  %v4533_v40 = vld [vmem:[%s4989_s27 + $0x68] ss:$52 sps:$4 sm:$0xff]   ;;  %v4543_v48 = vld [vmem:[%s4989_s27 + $0xd0] ss:$52 sps:$4 sm:$0xff]  }
  0x14   : > { %3825 = vmatpush3.bf16.msra.mxu0 %v4503_v14  ;;  %v4537_v44 = vld [vmem:[%s5712_s1 + $0x148] sm:$0xff]   ;;  %v4540_v46 = vld [vmem:[%s4989_s27 + $0xdc] ss:$52 sps:$4 sm:$0xff]   ;;  %v4548_v53 = vld [vmem:[%s4989_s27 + $0x144] ss:$52 sps:$4 sm:$0xff]  }
  0x15   : > { %3925 = vmatpush3.bf16.msra.mxu1 %v4504_v15  ;;  %3826 = vmatprep.subr.bf16.mxu0 %v4505_v16  ;;  %v4538_v45 = vld [vmem:[%s4989_s27 + $0xd4] ss:$52 sps:$4 sm:$0xff]   ;;  %v4544_v50 = vld [vmem:[%s4989_s27 + $0xd8] ss:$52 sps:$4 sm:$0xff]   ;;  %v4546_v51 = vld [vmem:[%s4989_s27 + $0x13c] ss:$52 sps:$4 sm:$0xff]  }
  0x16   : > { %3926 = vmatprep.subr.bf16.mxu1 %v4506_v17  ;;  %v4542_v47 = vld [vmem:[%s5712_s1 + $0x108] sm:$0xff]   ;;  %v4553_v54 = vld [vmem:[%s5712_s1 + $0x150] sm:$0xff]   ;;  %v4555_v58 = vld [vmem:[%s4989_s27 + $0x1a4] ss:$52 sps:$4 sm:$0xff]  }
  0x17   : > { %v4545_v49 = vld [vmem:[%s5712_s1 + $0x1c8] sm:$0xff]   ;;  %v4554_v55 = vld [vmem:[%s5712_s1 + $0x110] sm:$0xff]   ;;  %v4569_v62 = vld [vmem:[%s5712_s1 + $0x158] sm:$0xff]  }
  0x18   : > { %3827 = vmatpush3.bf16.msra.mxu0 %v4507_v18  ;;  %v4550_v52 = vld [vmem:[%s5712_s1 + $0x188] sm:$0xff]   ;;  %v4552_v57 = vld [vmem:[%s4989_s27 + $0x140] ss:$52 sps:$4 sm:$0xff]   ;;  %v4570_v63 = vld [vmem:[%s5712_s1 + $0x118] sm:$0xff]  }
  0x19   : > { %3927 = vmatpush3.bf16.msra.mxu1 %v4508_v19  ;;  %3828 = vmatprep.subr.bf16.mxu0 %v4509_v20  ;;  %v4551_v56 = vld [vmem:[%s4989_s27 + $0x138] ss:$52 sps:$4 sm:$0xff]   ;;  %v4561_v59 = vld [vmem:[%s5712_s1 + $0x1d0] sm:$0xff]   ;;  %v4560_v1 = vld [vmem:[%s4989_s27 + $0x1a8] ss:$52 sps:$4 sm:$0xff]  }
  0x1a   : > { %3928 = vmatprep.subr.bf16.mxu1 %v4510_v21  ;;  %v4562_v60 = vld [vmem:[%s5712_s1 + $0x190] sm:$0xff]   ;;  %v4557_v61 = vld [vmem:[%s4989_s27 + $0x1ac] ss:$52 sps:$4 sm:$0xff]   ;;  %v4577_v4 = vld [vmem:[%s5712_s1 + $0x1d8] sm:$0xff]  }
  0x1b   : > { %v4559_v0 = vld [vmem:[%s4989_s27 + $0x1a0] ss:$52 sps:$4 sm:$0xff]   ;;  %v4578_v5 = vld [vmem:[%s5712_s1 + $0x198] sm:$0xff]   ;;  %v4568_v9 = vld [vmem:[%s4989_s27 + $0x210] ss:$52 sps:$4 sm:$0xff]  }
  0x1c   : > { %3829 = vmatpush3.bf16.msra.mxu0 %v4511_v22  ;;  %v4563_v2 = vld [vmem:[%s4989_s27 + $0x20c] ss:$52 sps:$4 sm:$0xff]   ;;  %v4565_v3 = vld [vmem:[%s4989_s27 + $0x214] ss:$52 sps:$4 sm:$0xff]   ;;  %v4573_v11 = vld [vmem:[%s4989_s27 + $0x27c] ss:$52 sps:$4 sm:$0xff]  }
  0x1d   : > { %3929 = vmatpush3.bf16.msra.mxu1 %v4512_v23  ;;  %3830 = vmatprep.subr.bf16.mxu0 %v4513_v24  ;;  %v4585_v6 = vld [vmem:[%s5712_s1 + $0x160] sm:$0xff]   ;;  %v4567_v8 = vld [vmem:[%s4989_s27 + $0x208] ss:$52 sps:$4 sm:$0xff]   ;;  %v4576_v17 = vld [vmem:[%s4989_s27 + $0x278] ss:$52 sps:$4 sm:$0xff]  }
  0x1e   : > { %3930 = vmatprep.subr.bf16.mxu1 %v4514_v25  ;;  %v4586_v7 = vld [vmem:[%s5712_s1 + $0x120] sm:$0xff]   ;;  %v4571_v10 = vld [vmem:[%s4989_s27 + $0x274] ss:$52 sps:$4 sm:$0xff]   ;;  %v4579_v18 = vld [vmem:[%s4989_s27 + $0x2dc] ss:$52 sps:$4 sm:$0xff]  }
  0x1f   : > { %v4593_v12 = vld [vmem:[%s5712_s1 + $0x1e0] sm:$0xff]   ;;  %v4595_v14 = vld [vmem:[%s5712_s1 + $0x168] sm:$0xff]   ;;  %v4611_v22 = vld [vmem:[%s5712_s1 + $0x170] sm:$0xff]  }
  0x20   : > { %3831 = vmatpush3.bf16.msra.mxu0 %v4515_v26  ;;  %v4594_v13 = vld [vmem:[%s5712_s1 + $0x1a0] sm:$0xff]   ;;  %v4600_v16 = vld [vmem:[%s5712_s1 + $0x128] sm:$0xff]   ;;  %v4612_v23 = vld [vmem:[%s5712_s1 + $0x130] sm:$0xff]  }
  0x21   : > { %3931 = vmatpush3.bf16.msra.mxu1 %v4516_v27  ;;  %3832 = vmatprep.subr.bf16.mxu0 %v4517_v28  ;;  %v4575_v15 = vld [vmem:[%s4989_s27 + $0x270] ss:$52 sps:$4 sm:$0xff]   ;;  %v4603_v19 = vld [vmem:[%s5712_s1 + $0x1e8] sm:$0xff]   ;;  %v4584_v25 = vld [vmem:[%s4989_s27 + $0x2e0] ss:$52 sps:$4 sm:$0xff]  }
  0x22   : > { %3932 = vmatprep.subr.bf16.mxu1 %v4518_v29  ;;  %v4581_v20 = vld [vmem:[%s4989_s27 + $0x2e4] ss:$52 sps:$4 sm:$0xff]   ;;  %v4608_v21 = vld [vmem:[%s5712_s1 + $0x1a8] sm:$0xff]   ;;  %v4619_v28 = vld [vmem:[%s5712_s1 + $0x1f0] sm:$0xff]  }
  0x23   : > { %v4583_v24 = vld [vmem:[%s4989_s27 + $0x2d8] ss:$52 sps:$4 sm:$0xff]   ;;  %v4620_v29 = vld [vmem:[%s5712_s1 + $0x1b0] sm:$0xff]  }
  0x24   : > { %3833 = vmatpush3.bf16.msra.mxu0 %v4519_v30  ;;  %v4587_v26 = vld [vmem:[%s4989_s27 + $0x344] ss:$52 sps:$4 sm:$0xff]   ;;  %v4589_v27 = vld [vmem:[%s4989_s27 + $0x34c] ss:$52 sps:$4 sm:$0xff]   ;;  %v4598_v35 = vld [vmem:[%s4989_s27 + $0x3b4] ss:$52 sps:$4 sm:$0xff]  }
  0x25   : > { %3933 = vmatpush3.bf16.msra.mxu1 %v4520_v31  ;;  %4018 = vmatprep.subr.bf16.mxu0 %v4527_v36  ;;  %v4591_v30 = vld [vmem:[%s4989_s27 + $0x340] ss:$52 sps:$4 sm:$0xff]   ;;  %v4592_v31 = vld [vmem:[%s4989_s27 + $0x348] ss:$52 sps:$4 sm:$0xff]  }
  0x26   : > { %4118 = vmatprep.subr.bf16.mxu1 %v4535_v42  ;;  %v4628_v33 = vld [vmem:[%s5712_s1 + $0x138] sm:$0xff]  }
  0x27   : > { %2167 = vmatmul.mubr.bf16.vlgmr.msra.gmra.mrb[0].mxu0 %v4521_v32  ;;  %v4627_v32 = vld [vmem:[%s5712_s1 + $0x178] sm:$0xff]  }
  0x28   : > { %2312 = vmatmul.mubr.bf16.vlgmr.msra.gmra.mrb[0].mxu1 %v4524_v34  ;;  %4019 = vmatpush3.bf16.msra.mxu0 %v4528_v37  ;;  %v4596_v34 = vld [vmem:[%s4989_s27 + $0x3ac] ss:$52 sps:$4 sm:$0xff]   ;;  %v4635_v36 = vld [vmem:[%s5712_s1 + $0x1f8] sm:$0xff]  }
  0x29   : > { %2174 = vmatprep.mubr.bf16.mxu0 %v4529_v38  ;;  %2319 = vmatprep.mubr.bf16.mxu1 %v4531_v39  ;;  %v4636_v37 = vld [vmem:[%s5712_s1 + $0x1b8] sm:$0xff]   ;;  %v4602_v39 = vld [vmem:[%s4989_s27 + $0x3b0] ss:$52 sps:$4 sm:$0xff]  }
  0x2a   : > { %4119 = vmatpush3.bf16.msra.mxu1 %v4536_v43  ;;  %4020 = vmatprep.subr.bf16.mxu0 %v4537_v44  ;;  %v4601_v38 = vld [vmem:[%s4989_s27 + $0x3a8] ss:$52 sps:$4 sm:$0xff]   ;;  %v4651_v43 = vld [vmem:[%s5712_s1 + $0x2c0] sm:$0xff]  }
  0x2b   : > { %4120 = vmatprep.subr.bf16.mxu1 %v4545_v49  ;;  %v4606_v42 = vld [vmem:[%s4989_s27 + $0x41c] ss:$52 sps:$4 sm:$0xff]   ;;  %v4618_v49 = vld [vmem:[%s4989_s27 + $0x480] ss:$52 sps:$4 sm:$0xff]  }
  0x2c   : > { %4021 = vmatpush3.bf16.msra.mxu0 %v4542_v47  ;;  %v4609_v44 = vld [vmem:[%s4989_s27 + $0x410] ss:$52 sps:$4 sm:$0xff]  }
  0x2d   : > { %4022 = vmatprep.subr.bf16.mxu0 %v4553_v54  ;;  %v4615_v47 = vld [vmem:[%s4989_s27 + $0x484] ss:$52 sps:$4 sm:$0xff]   ;;  %v4629_v54 = vld [vmem:[%s4989_s27 + $0x54c] ss:$52 sps:$4 sm:$0xff]  }
  0x2e   : > { %4121 = vmatpush3.bf16.msra.mxu1 %v4550_v52  ;;  %v4625_v52 = vld [vmem:[%s4989_s27 + $0x4e0] ss:$52 sps:$4 sm:$0xff]  }
  0x2f   : > { %2175 = vmatmul.mubr.bf16.gmra.mrb[4].mxu0 %v4533_v40  ;;  %4122 = vmatprep.subr.bf16.mxu1 %v4561_v59  ;;  %v4643_v40 = vld [vmem:[%s5712_s1 + $0x240] sm:$0xff]   ;;  %v4642_v59 = vld [vmem:[%s4989_s27 + $0x1c] ss:$52 sps:$4 sm:$0xff]  }
  0x30   : > { %2320 = vmatmul.mubr.bf16.gmra.mrb[4].mxu1 %v4534_v41  ;;  %2182 = vmatprep.mubr.bf16.mxu0 %v4538_v45  ;;  %v4604_v41 = vld [vmem:[%s4989_s27 + $0x414] ss:$52 sps:$4 sm:$0xff]   ;;  %v4610_v45 = vld [vmem:[%s4989_s27 + $0x418] ss:$52 sps:$4 sm:$0xff]  }
  0x31   : > { %2327 = vmatprep.mubr.bf16.mxu1 %v4540_v46  ;;  %4023 = vmatpush3.bf16.msra.mxu0 %v4554_v55  ;;  %v4613_v46 = vld [vmem:[%s4989_s27 + $0x47c] ss:$52 sps:$4 sm:$0xff]   ;;  %v4631_v55 = vld [vmem:[%s4989_s27 + $0x554] ss:$52 sps:$4 sm:$0xff]  }
  0x32   : > { %4123 = vmatpush3.bf16.msra.mxu1 %v4562_v60  ;;  %4024 = vmatprep.subr.bf16.mxu0 %v4569_v62  ;;  %v4637_v60 = vld [vmem:[%s4989_s27 + $0x10] ss:$52 sps:$4 sm:$0xff]  }
  0x33   : > { %4124 = vmatprep.subr.bf16.mxu1 %v4577_v4  ;;  %v4644_v62 = vld [vmem:[%s5712_s1 + $0x200] sm:$0xff]   ;;  %v4658_v4 = vld [vmem:[%s5712_s1 + $0x208] sm:$0xff]  }
  0x35   : > { %4025 = vmatpush3.bf16.msra.mxu0 %v4570_v63  ;;  %v4645_v63 = vld [vmem:[%s4989_s27 + $0x7c] ss:$52 sps:$4 sm:$0xff]  }
  0x36   : > { %4125 = vmatpush3.bf16.msra.mxu1 %v4578_v5  ;;  %4026 = vmatprep.subr.bf16.mxu0 %v4585_v6  ;;  %v4649_v5 = vld [vmem:[%s4989_s27 + $0x78] ss:$52 sps:$4 sm:$0xff]   ;;  %v4669_v6 = vld [vmem:[%s5712_s1 + $0x250] sm:$0xff]  }
  0x37   : > { %2183 = vmatmul.mubr.bf16.gmra.mrb[8].mxu0 %v4543_v48  ;;  %4126 = vmatprep.subr.bf16.mxu1 %v4593_v12  ;;  %v4617_v48 = vld [vmem:[%s4989_s27 + $0x478] ss:$52 sps:$4 sm:$0xff]   ;;  %v4670_v12 = vld [vmem:[%s5712_s1 + $0x210] sm:$0xff]  }
  0x38   : > { %2328 = vmatmul.mubr.bf16.gmra.mrb[8].mxu1 %v4544_v50  ;;  %2190 = vmatprep.mubr.bf16.mxu0 %v4546_v51  ;;  %v4621_v50 = vld [vmem:[%s4989_s27 + $0x4e4] ss:$52 sps:$4 sm:$0xff]   ;;  %v4623_v51 = vld [vmem:[%s4989_s27 + $0x4ec] ss:$52 sps:$4 sm:$0xff]  }
  0x39   : > { %2335 = vmatprep.mubr.bf16.mxu1 %v4548_v53  ;;  %4027 = vmatpush3.bf16.msra.mxu0 %v4586_v7  ;;  %v4626_v53 = vld [vmem:[%s4989_s27 + $0x4e8] ss:$52 sps:$4 sm:$0xff]   ;;  %v4650_v7 = vld [vmem:[%s4989_s27 + $0x80] ss:$52 sps:$4 sm:$0xff]  }
  0x3a   : > { %4127 = vmatpush3.bf16.msra.mxu1 %v4594_v13  ;;  %4028 = vmatprep.subr.bf16.mxu0 %v4595_v14  ;;  %v4678_v13 = vld [vmem:[%s5712_s1 + $0x290] sm:$0xff]   ;;  %v4685_v14 = vld [vmem:[%s5712_s1 + $0x258] sm:$0xff]  }
  0x3b   : > { %4128 = vmatprep.subr.bf16.mxu1 %v4603_v19  ;;  %v4660_v19 = vld [vmem:[%s4989_s27 + $0xe8] ss:$52 sps:$4 sm:$0xff]  }
  0x3d   : > { %4029 = vmatpush3.bf16.msra.mxu0 %v4600_v16  ;;  %v4659_v16 = vld [vmem:[%s4989_s27 + $0xe0] ss:$52 sps:$4 sm:$0xff]  }
  0x3e   : > { %4129 = vmatpush3.bf16.msra.mxu1 %v4608_v21  ;;  %4030 = vmatprep.subr.bf16.mxu0 %v4611_v22  ;;  %v4701_v21 = vld [vmem:[%s5712_s1 + $0x260] sm:$0xff]  }
  0x3f   : > { %2191 = vmatmul.mubr.bf16.gmra.mrb[12].mxu0 %v4551_v56  ;;  %4130 = vmatprep.subr.bf16.mxu1 %v4619_v28  ;;  %v4633_v56 = vld [vmem:[%s4989_s27 + $0x548] ss:$52 sps:$4 sm:$0xff]   ;;  %v4709_v22 = vld [vmem:[%s5712_s1 + $0x2e0] sm:$0xff]  }
  0x40   : > { %2336 = vmatmul.mubr.bf16.gmra.mrb[12].mxu1 %v4552_v57  ;;  %2198 = vmatprep.mubr.bf16.mxu0 %v4555_v58  ;;  %v4634_v57 = vld [vmem:[%s4989_s27 + $0x550] ss:$52 sps:$4 sm:$0xff]   ;;  %v4639_v58 = vld [vmem:[%s4989_s27 + $0x14] ss:$52 sps:$4 sm:$0xff]  }
  0x41   : > { %2343 = vmatprep.mubr.bf16.mxu1 %v4557_v61  ;;  %4031 = vmatpush3.bf16.msra.mxu0 %v4612_v23  ;;  %v4640_v61 = vld [vmem:[%s4989_s27 + $0x18] ss:$52 sps:$4 sm:$0xff]   ;;  %v4664_v23 = vld [vmem:[%s4989_s27 + $0x154] ss:$52 sps:$4 sm:$0xff]  }
  0x42   : > { %4131 = vmatpush3.bf16.msra.mxu1 %v4620_v29  ;;  %4032 = vmatprep.subr.bf16.mxu0 %v4627_v32  ;;  %v4716_v28 = vld [vmem:[%s5712_s1 + $0x228] sm:$0xff]   ;;  %v4727_v32 = vld [vmem:[%s5712_s1 + $0x270] sm:$0xff]  }
  0x43   : > { %4132 = vmatprep.subr.bf16.mxu1 %v4635_v36  ;;  %v4667_v29 = vld [vmem:[%s4989_s27 + $0x148] ss:$52 sps:$4 sm:$0xff]   ;;  %v4728_v36 = vld [vmem:[%s5712_s1 + $0x230] sm:$0xff]  }
  0x45   : > { %4033 = vmatpush3.bf16.msra.mxu0 %v4628_v33  ;;  %v4671_v33 = vld [vmem:[%s4989_s27 + $0x1b4] ss:$52 sps:$4 sm:$0xff]  }
  0x46   : > { %4133 = vmatpush3.bf16.msra.mxu1 %v4636_v37  ;;  %4218 = vmatprep.subr.bf16.mxu0 %v4643_v40  ;;  %v4736_v37 = vld [vmem:[%s5712_s1 + $0x2b0] sm:$0xff]   ;;  %v4744_v40 = vld [vmem:[%s5712_s1 + $0x238] sm:$0xff]  }
  0x47   : > { %2199 = vmatmul.mubr.bf16.gmra.mrb[16].mxu0 %v4559_v0  ;;  %4318 = vmatprep.subr.bf16.mxu1 %v4651_v43  ;;  %v4647_v0 = vld [vmem:[%s4989_s27 + $0x84] ss:$52 sps:$4 sm:$0xff]  }
  0x48   : > { %2344 = vmatmul.mubr.bf16.gmra.mrb[16].mxu1 %v4560_v1  ;;  %2206 = vmatprep.mubr.bf16.mxu0 %v4563_v2  ;;  %v4652_v1 = vld [vmem:[%s5712_s1 + $0x280] sm:$0xff]   ;;  %v4653_v2 = vld [vmem:[%s5712_s1 + $0x248] sm:$0xff]  }
  0x49   : > { %2351 = vmatprep.mubr.bf16.mxu1 %v4565_v3  ;;  %v4661_v3 = vld [vmem:[%s5712_s1 + $0x2c8] sm:$0xff]   ;;  %v4675_v43 = vld [vmem:[%s4989_s27 + $0x1b0] ss:$52 sps:$4 sm:$0xff]  }
  0x4f   : > { %2207 = vmatmul.mubr.bf16.gmra.mrb[20].mxu0 %v4567_v8  ;;  %v4654_v8 = vld [vmem:[%s4989_s27 + $0xe4] ss:$52 sps:$4 sm:$0xff]  }
  0x50   : > { %2352 = vmatmul.mubr.bf16.gmra.mrb[20].mxu1 %v4568_v9  ;;  %2214 = vmatprep.mubr.bf16.mxu0 %v4571_v10  ;;  %v4666_v9 = vld [vmem:[%s5712_s1 + $0x288] sm:$0xff]   ;;  %v4677_v10 = vld [vmem:[%s5712_s1 + $0x2d0] sm:$0xff]  }
  0x51   : > { %2359 = vmatprep.mubr.bf16.mxu1 %v4573_v11  ;;  %v4656_v11 = vld [vmem:[%s4989_s27 + $0xec] ss:$52 sps:$4 sm:$0xff]  }
  0x57   : > { %2215 = vmatmul.mubr.bf16.gmra.mrb[24].mxu0 %v4575_v15  ;;  %v4693_v15 = vld [vmem:[%s5712_s1 + $0x2d8] sm:$0xff]  }
  0x58   : > { %2360 = vmatmul.mubr.bf16.gmra.mrb[24].mxu1 %v4576_v17  ;;  %2222 = vmatprep.mubr.bf16.mxu0 %v4579_v18  ;;  %v4686_v17 = vld [vmem:[%s5712_s1 + $0x218] sm:$0xff]  }
  0x59   : > { %2367 = vmatprep.mubr.bf16.mxu1 %v4581_v20  ;;  %v4694_v18 = vld [vmem:[%s5712_s1 + $0x298] sm:$0xff]   ;;  %v4662_v20 = vld [vmem:[%s4989_s27 + $0x14c] ss:$52 sps:$4 sm:$0xff]  }
  0x5f   : > { %2223 = vmatmul.mubr.bf16.gmra.mrb[28].mxu0 %v4583_v24  ;;  %v4702_v24 = vld [vmem:[%s5712_s1 + $0x220] sm:$0xff]  }
  0x60   : > { %2368 = vmatmul.mubr.bf16.gmra.mrb[28].mxu1 %v4584_v25  ;;  %2230 = vmatprep.mubr.bf16.mxu0 %v4587_v26  ;;  %v4710_v25 = vld [vmem:[%s5712_s1 + $0x2a0] sm:$0xff]   ;;  %v4711_v26 = vld [vmem:[%s5712_s1 + $0x268] sm:$0xff]  }
  0x61   : > { %2375 = vmatprep.mubr.bf16.mxu1 %v4589_v27  ;;  %v4719_v27 = vld [vmem:[%s5712_s1 + $0x2e8] sm:$0xff]  }
  0x67   : > { %2231 = vmatmul.mubr.bf16.gmra.mrb[32].mxu0 %v4591_v30  ;;  %v4724_v30 = vld [vmem:[%s5712_s1 + $0x2a8] sm:$0xff]  }
  0x68   : > { %2376 = vmatmul.mubr.bf16.gmra.mrb[32].mxu1 %v4592_v31  ;;  %2238 = vmatprep.mubr.bf16.mxu0 %v4596_v34  ;;  %v4668_v31 = vld [vmem:[%s4989_s27 + $0x150] ss:$52 sps:$4 sm:$0xff]  }
  0x69   : > { %2383 = vmatprep.mubr.bf16.mxu1 %v4598_v35  ;;  %v4673_v34 = vld [vmem:[%s4989_s27 + $0x1bc] ss:$52 sps:$4 sm:$0xff]  }
  0x6a   : > { %v4735_v35 = vld [vmem:[%s5712_s1 + $0x2f0] sm:$0xff]  }
  0x6f   : > { %2239 = vmatmul.mubr.bf16.gmra.mrb[36].mxu0 %v4601_v38  ;;  %v4743_v38 = vld [vmem:[%s5712_s1 + $0x278] sm:$0xff]  }
  0x70   : > { %2384 = vmatmul.mubr.bf16.gmra.mrb[36].mxu1 %v4602_v39  ;;  %2246 = vmatprep.mubr.bf16.mxu0 %v4604_v41  ;;  %v4751_v39 = vld [vmem:[%s5712_s1 + $0x2f8] sm:$0xff]  }
  0x71   : > { %2391 = vmatprep.mubr.bf16.mxu1 %v4606_v42  ;;  %v4752_v41 = vld [vmem:[%s5712_s1 + $0x2b8] sm:$0xff]   ;;  %v5266_v42 = vld [vmem:[%s5712_s1 + $0x300] sm:$0xff]  }
  0x77   : > { %2247 = vmatmul.mubr.bf16.gmra.mrb[40].mxu0 %v4609_v44  ;;  %v4676_v44 = vld [vmem:[%s4989_s27 + $0x1b8] ss:$52 sps:$4 sm:$0xff]  }
  0x78   : > { %2392 = vmatmul.mubr.bf16.gmra.mrb[40].mxu1 %v4610_v45  ;;  %2254 = vmatprep.mubr.bf16.mxu0 %v4613_v46  ;;  %v4679_v45 = vld [vmem:[%s4989_s27 + $0x21c] ss:$52 sps:$4 sm:$0xff]   ;;  %v4681_v46 = vld [vmem:[%s4989_s27 + $0x224] ss:$52 sps:$4 sm:$0xff]  }
  0x79   : > { %2399 = vmatprep.mubr.bf16.mxu1 %v4615_v47  ;;  %v4683_v47 = vld [vmem:[%s4989_s27 + $0x218] ss:$52 sps:$4 sm:$0xff]  }
  0x7f   : > { %2255 = vmatmul.mubr.bf16.gmra.mrb[44].mxu0 %v4617_v48  ;;  %v4684_v48 = vld [vmem:[%s4989_s27 + $0x220] ss:$52 sps:$4 sm:$0xff]  }
  0x80   : > { %2400 = vmatmul.mubr.bf16.gmra.mrb[44].mxu1 %v4618_v49  ;;  %2262 = vmatprep.mubr.bf16.mxu0 %v4621_v50  ;;  %v4687_v49 = vld [vmem:[%s4989_s27 + $0x284] ss:$52 sps:$4 sm:$0xff]   ;;  %v4689_v50 = vld [vmem:[%s4989_s27 + $0x28c] ss:$52 sps:$4 sm:$0xff]  }
  0x81   : > { %2407 = vmatprep.mubr.bf16.mxu1 %v4623_v51  ;;  %v4691_v51 = vld [vmem:[%s4989_s27 + $0x280] ss:$52 sps:$4 sm:$0xff]  }
  0x87   : > { %2263 = vmatmul.mubr.bf16.gmra.mrb[48].mxu0 %v4625_v52  ;;  %v4692_v52 = vld [vmem:[%s4989_s27 + $0x288] ss:$52 sps:$4 sm:$0xff]  }
  0x88   : > { %2408 = vmatmul.mubr.bf16.gmra.mrb[48].mxu1 %v4626_v53  ;;  %2270 = vmatprep.mubr.bf16.mxu0 %v4629_v54  ;;  %v4695_v53 = vld [vmem:[%s4989_s27 + $0x2ec] ss:$52 sps:$4 sm:$0xff]   ;;  %v4697_v54 = vld [vmem:[%s4989_s27 + $0x2f4] ss:$52 sps:$4 sm:$0xff]  }
  0x89   : > { %2415 = vmatprep.mubr.bf16.mxu1 %v4631_v55  ;;  %v4699_v55 = vld [vmem:[%s4989_s27 + $0x2e8] ss:$52 sps:$4 sm:$0xff]  }
  0x8f   : > { %2271 = vmatmul.mubr.bf16.gmra.mrb[52].mxu0 %v4633_v56  ;;  %v4700_v56 = vld [vmem:[%s4989_s27 + $0x2f0] ss:$52 sps:$4 sm:$0xff]  }
  0x90   : > { %2416 = vmatmul.mubr.bf16.gmra.mrb[52].mxu1 %v4634_v57  ;;  %2456 = vmatprep.mubr.bf16.mxu0 %v4639_v58  ;;  %v4703_v57 = vld [vmem:[%s4989_s27 + $0x354] ss:$52 sps:$4 sm:$0xff]   ;;  %v4705_v58 = vld [vmem:[%s4989_s27 + $0x35c] ss:$52 sps:$4 sm:$0xff]  }
  0x91   : > { %2601 = vmatprep.mubr.bf16.mxu1 %v4642_v59  ;;  %v4707_v59 = vld [vmem:[%s4989_s27 + $0x350] ss:$52 sps:$4 sm:$0xff]  }
  0x97   : > { %2457 = vmatmul.mubr.bf16.vlgmr.msra.gmra.mrb[56].mxu0 %v4637_v60  ;;  %v4708_v60 = vld [vmem:[%s4989_s27 + $0x358] ss:$52 sps:$4 sm:$0xff]  }
  0x98   : > { %2602 = vmatmul.mubr.bf16.vlgmr.msra.gmra.mrb[56].mxu1 %v4640_v61  ;;  %4219 = vmatpush3.bf16.msra.mxu0 %v4644_v62  ;;  %v4712_v61 = vld [vmem:[%s4989_s27 + $0x3bc] ss:$52 sps:$4 sm:$0xff]   ;;  %v4714_v62 = vld [vmem:[%s4989_s27 + $0x3c4] ss:$52 sps:$4 sm:$0xff]  }
  0x99   : > { %2464 = vmatprep.mubr.bf16.mxu0 %v4645_v63  ;;  %2609 = vmatprep.mubr.bf16.mxu1 %v4647_v0  ;;  %v4717_v63 = vld [vmem:[%s4989_s27 + $0x3b8] ss:$52 sps:$4 sm:$0xff]   ;;  %v4718_v0 = vld [vmem:[%s4989_s27 + $0x3c0] ss:$52 sps:$4 sm:$0xff]  }
  0x9a   : > { %4319 = vmatpush3.bf16.msra.mxu1 %v4652_v1  ;;  %4220 = vmatprep.subr.bf16.mxu0 %v4653_v2  ;;  %v4720_v1 = vld [vmem:[%s4989_s27 + $0x424] ss:$52 sps:$4 sm:$0xff]   ;;  %v4722_v2 = vld [vmem:[%s4989_s27 + $0x42c] ss:$52 sps:$4 sm:$0xff]  }
  0x9b   : > { %4320 = vmatprep.subr.bf16.mxu1 %v4661_v3  ;;  %v4725_v3 = vld [vmem:[%s4989_s27 + $0x420] ss:$52 sps:$4 sm:$0xff]  }
  0x9c   : > { %4221 = vmatpush3.bf16.msra.mxu0 %v4658_v4  ;;  %v4726_v4 = vld [vmem:[%s4989_s27 + $0x428] ss:$52 sps:$4 sm:$0xff]  }
  0x9d   : > { %4222 = vmatprep.subr.bf16.mxu0 %v4669_v6  ;;  %v4731_v6 = vld [vmem:[%s4989_s27 + $0x494] ss:$52 sps:$4 sm:$0xff]  }
  0x9e   : > { %4321 = vmatpush3.bf16.msra.mxu1 %v4666_v9  ;;  %v4737_v9 = vld [vmem:[%s4989_s27 + $0x4f4] ss:$52 sps:$4 sm:$0xff]  }
  0x9f   : > { %2465 = vmatmul.mubr.bf16.gmra.mrb[60].mxu0 %v4649_v5  ;;  %4322 = vmatprep.subr.bf16.mxu1 %v4677_v10  ;;  %v4729_v5 = vld [vmem:[%s4989_s27 + $0x48c] ss:$52 sps:$4 sm:$0xff]   ;;  %v4739_v10 = vld [vmem:[%s4989_s27 + $0x4fc] ss:$52 sps:$4 sm:$0xff]  }
  0xa0   : > { %2610 = vmatmul.mubr.bf16.gmra.mrb[60].mxu1 %v4650_v7  ;;  %2472 = vmatprep.mubr.bf16.mxu0 %v4654_v8  ;;  %v4733_v7 = vld [vmem:[%s4989_s27 + $0x488] ss:$52 sps:$4 sm:$0xff]   ;;  %v4734_v8 = vld [vmem:[%s4989_s27 + $0x490] ss:$52 sps:$4 sm:$0xff]  }
  0xa1   : > { %2617 = vmatprep.mubr.bf16.mxu1 %v4656_v11  ;;  %4223 = vmatpush3.bf16.msra.mxu0 %v4670_v12  ;;  %v4741_v11 = vld [vmem:[%s4989_s27 + $0x4f0] ss:$52 sps:$4 sm:$0xff]   ;;  %v4742_v12 = vld [vmem:[%s4989_s27 + $0x4f8] ss:$52 sps:$4 sm:$0xff]  }
  0xa2   : > { %4323 = vmatpush3.bf16.msra.mxu1 %v4678_v13  ;;  %4224 = vmatprep.subr.bf16.mxu0 %v4685_v14  ;;  %v4745_v13 = vld [vmem:[%s4989_s27 + $0x55c] ss:$52 sps:$4 sm:$0xff]   ;;  %v4747_v14 = vld [vmem:[%s4989_s27 + $0x564] ss:$52 sps:$4 sm:$0xff]  }
  0xa3   : > { %4324 = vmatprep.subr.bf16.mxu1 %v4693_v15 }
  0xa5   : > { %4225 = vmatpush3.bf16.msra.mxu0 %v4686_v17 }
  0xa6   : > { %4325 = vmatpush3.bf16.msra.mxu1 %v4694_v18  ;;  %4226 = vmatprep.subr.bf16.mxu0 %v4701_v21 }
  0xa7   : > { %2473 = vmatmul.mubr.bf16.gmra.mrb[64].mxu0 %v4659_v16  ;;  %4326 = vmatprep.subr.bf16.mxu1 %v4709_v22  ;;  %v5309_v16 = vld [vmem:[%s5713_s2] ss:$0 sm:$0xff] }
  0xa8   : > { %2618 = vmatmul.mubr.bf16.gmra.mrb[64].mxu1 %v4660_v19  ;;  %2480 = vmatprep.mubr.bf16.mxu0 %v4662_v20  ;;  %v4749_v19 = vld [vmem:[%s4989_s27 + $0x558] ss:$52 sps:$4 sm:$0xff]  }
  0xa9   : > { %2625 = vmatprep.mubr.bf16.mxu1 %v4664_v23  ;;  %4227 = vmatpush3.bf16.msra.mxu0 %v4702_v24  ;;  %v4750_v23 = vld [vmem:[%s4989_s27 + $0x560] ss:$52 sps:$4 sm:$0xff]   ;;  %v4755_v24 = vld [vmem:[%s4989_s27 + $0x24] ss:$52 sps:$4 sm:$0xff]  }
  0xaa   : > { %4327 = vmatpush3.bf16.msra.mxu1 %v4710_v25  ;;  %4228 = vmatprep.subr.bf16.mxu0 %v4711_v26 }
  0xab   : > { %4328 = vmatprep.subr.bf16.mxu1 %v4719_v27 }
  0xad   : > { %4229 = vmatpush3.bf16.msra.mxu0 %v4716_v28  ;;  %v4758_v28 = vld [vmem:[%s4989_s27 + $0x2c] ss:$52 sps:$4 sm:$0xff]  }
  0xae   : > { %4329 = vmatpush3.bf16.msra.mxu1 %v4724_v30  ;;  %4230 = vmatprep.subr.bf16.mxu0 %v4727_v32 }
  0xaf   : > { %2481 = vmatmul.mubr.bf16.gmra.mrb[68].mxu0 %v4667_v29  ;;  %4330 = vmatprep.subr.bf16.mxu1 %v4735_v35 }
  0xb0   : > { %2626 = vmatmul.mubr.bf16.gmra.mrb[68].mxu1 %v4668_v31  ;;  %2488 = vmatprep.mubr.bf16.mxu0 %v4671_v33 }
  0xb1   : > { %2633 = vmatprep.mubr.bf16.mxu1 %v4673_v34  ;;  %4231 = vmatpush3.bf16.msra.mxu0 %v4728_v36 }
  0xb2   : > { %4331 = vmatpush3.bf16.msra.mxu1 %v4736_v37  ;;  %4232 = vmatprep.subr.bf16.mxu0 %v4743_v38 }
  0xb3   : > { %4332 = vmatprep.subr.bf16.mxu1 %v4751_v39  ;;  %v4753_v39 = vld [vmem:[%s4989_s27 + $0x20] ss:$52 sps:$4 sm:$0xff]  }
  0xb5   : > { %4233 = vmatpush3.bf16.msra.mxu0 %v4744_v40 }
  0xb6   : > { %4333 = vmatpush3.bf16.msra.mxu1 %v4752_v41  ;;  %4436 = vmatprep.subr.bf16.mxu0 %v5266_v42 }
  0xb7   : > { %2489 = vmatmul.mubr.bf16.gmra.mrb[72].mxu0 %v4675_v43  ;;  %4472 = vmatprep.subr.bf16.mxu1 %v5266_v42 }
  0xb8   : > { %2634 = vmatmul.mubr.bf16.gmra.mrb[72].mxu1 %v4676_v44  ;;  %2496 = vmatprep.mubr.bf16.mxu0 %v4679_v45  ;;  %v4756_v44 = vld [vmem:[%s4989_s27 + $0x28] ss:$52 sps:$4 sm:$0xff]  }
  0xb9   : > { %2641 = vmatprep.mubr.bf16.mxu1 %v4681_v46 }
  0xbf   : > { %2497 = vmatmul.mubr.bf16.gmra.mrb[76].mxu0 %v4683_v47 }
  0xc0   : > { %2642 = vmatmul.mubr.bf16.gmra.mrb[76].mxu1 %v4684_v48  ;;  %2504 = vmatprep.mubr.bf16.mxu0 %v4687_v49  ;;  %v4760_v48 = vld [vmem:[%s4989_s27 + $0x8c] ss:$52 sps:$4 sm:$0xff]   ;;  %v4762_v49 = vld [vmem:[%s4989_s27 + $0x94] ss:$52 sps:$4 sm:$0xff]  }
  0xc1   : > { %2649 = vmatprep.mubr.bf16.mxu1 %v4689_v50 }
  0xc7   : > { %2505 = vmatmul.mubr.bf16.gmra.mrb[80].mxu0 %v4691_v51 }
  0xc8   : > { %2650 = vmatmul.mubr.bf16.gmra.mrb[80].mxu1 %v4692_v52  ;;  %2512 = vmatprep.mubr.bf16.mxu0 %v4695_v53  ;;  %v4778_v53 = vld [vmem:[%s5712_s1 + $0x308] sm:$0xff]  }
  0xc9   : > { %2657 = vmatprep.mubr.bf16.mxu1 %v4697_v54 }
  0xcf   : > { %2513 = vmatmul.mubr.bf16.gmra.mrb[84].mxu0 %v4699_v55 }
  0xd0   : > { %2658 = vmatmul.mubr.bf16.gmra.mrb[84].mxu1 %v4700_v56  ;;  %2520 = vmatprep.mubr.bf16.mxu0 %v4703_v57  ;;  %v4803_v57 = vld [vmem:[%s5712_s1 + $0x310] sm:$0xff]  }
  0xd1   : > { %2665 = vmatprep.mubr.bf16.mxu1 %v4705_v58 }
  0xd7   : > { %2521 = vmatmul.mubr.bf16.gmra.mrb[88].mxu0 %v4707_v59 }
  0xd8   : > { %2666 = vmatmul.mubr.bf16.gmra.mrb[88].mxu1 %v4708_v60  ;;  %2528 = vmatprep.mubr.bf16.mxu0 %v4712_v61 }
  0xd9   : > { %2673 = vmatprep.mubr.bf16.mxu1 %v4714_v62  ;;  %v4764_v62 = vld [vmem:[%s4989_s27 + $0x88] ss:$52 sps:$4 sm:$0xff]  }
  0xdf   : > { %2529 = vmatmul.mubr.bf16.gmra.mrb[92].mxu0 %v4717_v63 }
  0xe0   : > { %2674 = vmatmul.mubr.bf16.gmra.mrb[92].mxu1 %v4718_v0  ;;  %2536 = vmatprep.mubr.bf16.mxu0 %v4720_v1 }
  0xe1   : > { %2681 = vmatprep.mubr.bf16.mxu1 %v4722_v2  ;;  %v4765_v2 = vld [vmem:[%s4989_s27 + $0x90] ss:$52 sps:$4 sm:$0xff]  }
  0xe7   : > { %2537 = vmatmul.mubr.bf16.gmra.mrb[96].mxu0 %v4725_v3  ;;  %v4766_v3 = vld [vmem:[%s4989_s27 + $0xf4] ss:$52 sps:$4 sm:$0xff]  }
  0xe8   : > { %2682 = vmatmul.mubr.bf16.gmra.mrb[96].mxu1 %v4726_v4  ;;  %2544 = vmatprep.mubr.bf16.mxu0 %v4729_v5 }
  0xe9   : > { %2689 = vmatprep.mubr.bf16.mxu1 %v4731_v6 }
  0xef   : > { %2545 = vmatmul.mubr.bf16.gmra.mrb[100].mxu0 %v4733_v7  ;;  %v4768_v7 = vld [vmem:[%s4989_s27 + $0xfc] ss:$52 sps:$4 sm:$0xff]  }
  0xf0   : > { %2690 = vmatmul.mubr.bf16.gmra.mrb[100].mxu1 %v4734_v8  ;;  %2552 = vmatprep.mubr.bf16.mxu0 %v4737_v9 }
  0xf1   : > { %2697 = vmatprep.mubr.bf16.mxu1 %v4739_v10  ;;  %v4822_v10 = vld [vmem:[%s5712_s1 + $0x318] sm:$0xff]  }
  0xf7   : > { %2553 = vmatmul.mubr.bf16.gmra.mrb[104].mxu0 %v4741_v11 }
  0xf8   : > { %2698 = vmatmul.mubr.bf16.gmra.mrb[104].mxu1 %v4742_v12  ;;  %2560 = vmatprep.mubr.bf16.mxu0 %v4745_v13 }
  0xf9   : > { %2705 = vmatprep.mubr.bf16.mxu1 %v4747_v14 }
  0xfa   : > { %v3834_v15 = vpop.f32.mrb[0].mxu0 }
  0xfb   : > { %v3835_v17 = vpop.f32.mrb[1].mxu0  ;;  %v3934_v18 = vpop.f32.mrb[0].mxu1 }
  0xfc   : > { %v3836_v20 = vadd.f32 %v3835_v17, %v3834_v15  ;;  %v3837_v21 = vpop.f32.mrb[2].mxu0  ;;  %v3935_v22 = vpop.f32.mrb[1].mxu1 }
  0xfd   : > { %v3838_v25 = vpop.f32.mrb[3].mxu0  ;;  %v3936_v26 = vadd.f32 %v3935_v22, %v3934_v18  ;;  %v3937_v27 = vpop.f32.mrb[2].mxu1 }
  0xfe   : > { %v2169_v29 = vadd.f32 %v3836_v20, %v5309_v16  ;;  %v3839_v30 = vadd.f32 %v3838_v25, %v3837_v21  ;;  %v3938_v31 = vpop.f32.mrb[3].mxu1 }
  0xff   : > { %v3939_v32 = vadd.f32 %v3938_v31, %v3937_v27  ;;  %2561 = vmatmul.mubr.bf16.gmra.mrb[108].mxu0 %v4749_v19  ;;  %v4770_v19 = vld [vmem:[%s4989_s27 + $0xf0] ss:$52 sps:$4 sm:$0xff]  }
 0x100   : > { %v2172_v33 = vadd.f32 %v3839_v30, %v5309_v16  ;;  %v5317_v34 = vadd.f32 %v3936_v26, %v2169_v29  ;;  %2706 = vmatmul.mubr.bf16.gmra.mrb[108].mxu1 %v4750_v23  ;;  %2746 = vmatprep.mubr.bf16.mxu0 %v4755_v24  ;;  %v4771_v23 = vld [vmem:[%s4989_s27 + $0xf8] ss:$52 sps:$4 sm:$0xff]   ;;  %v4772_v24 = vld [vmem:[%s4989_s27 + $0x15c] ss:$52 sps:$4 sm:$0xff]  }
 0x101   : > { %2891 = vmatprep.mubr.bf16.mxu1 %v4758_v28  ;;  %v4774_v28 = vld [vmem:[%s4989_s27 + $0x164] ss:$52 sps:$4 sm:$0xff]  }
 0x102   : > { %v5319_v35 = vadd.f32 %v3939_v32, %v2172_v33  ;;  %v3840_v36 = vpop.f32.mrb[4].mxu0 }
 0x103   : > { %v3841_v37 = vpop.f32.mrb[5].mxu0  ;;  %v3940_v38 = vpop.f32.mrb[4].mxu1 }
 0x104   : > { %v3842_v40 = vadd.f32 %v3841_v37, %v3840_v36  ;;  %v3843_v41 = vpop.f32.mrb[6].mxu0  ;;  %v3941_v43 = vpop.f32.mrb[5].mxu1 }
 0x105   : > { %v3844_v45 = vpop.f32.mrb[7].mxu0  ;;  %v3942_v46 = vadd.f32 %v3941_v43, %v3940_v38  ;;  %v3943_v47 = vpop.f32.mrb[6].mxu1 }
 0x106   : > { %v2177_v50 = vadd.f32 %v3842_v40, %v5309_v16  ;;  %v3845_v51 = vadd.f32 %v3844_v45, %v3843_v41  ;;  %v3944_v52 = vpop.f32.mrb[7].mxu1  ;;  %v4776_v41 = vld [vmem:[%s4989_s27 + $0x158] ss:$52 sps:$4 sm:$0xff]  }
 0x107   : > { %v3945_v54 = vadd.f32 %v3944_v52, %v3943_v47  ;;  %2747 = vmatmul.mubr.bf16.vlgmr.msra.gmra.mrb[112].mxu0 %v4753_v39  ;;  %v4779_v47 = vld [vmem:[%s4989_s27 + $0x1c4] ss:$52 sps:$4 sm:$0xff]  }
 0x108   : > { %v2180_v55 = vadd.f32 %v3845_v51, %v5309_v16  ;;  %v5330_v56 = vadd.f32 %v3942_v46, %v2177_v50  ;;  %2892 = vmatmul.mubr.bf16.vlgmr.msra.gmra.mrb[112].mxu1 %v4756_v44  ;;  %4437 = vmatpush3.bf16.msra.mxu0 %v5266_v42  ;;  %v4777_v46 = vld [vmem:[%s4989_s27 + $0x160] ss:$52 sps:$4 sm:$0xff]  }
 0x109   : > { %2754 = vmatprep.mubr.bf16.mxu0 %v4760_v48  ;;  %2899 = vmatprep.mubr.bf16.mxu1 %v4762_v49  ;;  %v4781_v51 = vld [vmem:[%s4989_s27 + $0x1cc] ss:$52 sps:$4 sm:$0xff]  }
 0x10a   : > { %v5336_v58 = vadd.f32 %v3945_v54, %v2180_v55  ;;  %v3846_v59 = vpop.f32.mrb[8].mxu0  ;;  %4476 = vmatpush3.bf16.msra.mxu1 %v5266_v42  ;;  %4438 = vmatprep.subr.bf16.mxu0 %v4778_v53 }
 0x10b   : > { %v3847_v60 = vpop.f32.mrb[9].mxu0  ;;  %v3946_v61 = vpop.f32.mrb[8].mxu1  ;;  %4473 = vmatprep.subr.bf16.mxu1 %v4778_v53 }
 0x10c   : > { %v3848_v63 = vadd.f32 %v3847_v60, %v3846_v59  ;;  %v3849_v0 = vpop.f32.mrb[10].mxu0  ;;  %v3947_v1 = vpop.f32.mrb[9].mxu1  ;;  %4439 = vmatpush3.bf16.msra.mxu0 %v4778_v53 }
 0x10d   : > { %v3850_v4 = vpop.f32.mrb[11].mxu0  ;;  %v3948_v5 = vadd.f32 %v3947_v1, %v3946_v61  ;;  %v3949_v6 = vpop.f32.mrb[10].mxu1  ;;  %4440 = vmatprep.subr.bf16.mxu0 %v4803_v57 }
 0x10e   : > { %v2185_v8 = vadd.f32 %v3848_v63, %v5309_v16  ;;  %v3851_v9 = vadd.f32 %v3850_v4, %v3849_v0  ;;  %v3950_v42 = vpop.f32.mrb[11].mxu1  ;;  %4477 = vmatpush3.bf16.msra.mxu1 %v4778_v53  ;;  %v4783_v0 = vld [vmem:[%s4989_s27 + $0x1c0] ss:$52 sps:$4 sm:$0xff]   ;;  %v4784_v4 = vld [vmem:[%s4989_s27 + $0x1c8] ss:$52 sps:$4 sm:$0xff]  }
 0x10f   : > { %v3951_v11 = vadd.f32 %v3950_v42, %v3949_v6  ;;  %2755 = vmatmul.mubr.bf16.gmra.mrb[116].mxu0 %v4764_v62  ;;  %4474 = vmatprep.subr.bf16.mxu1 %v4803_v57 }
 0x110   : > { %v2188_v12 = vadd.f32 %v3851_v9, %v5309_v16  ;;  %v5348_v13 = vadd.f32 %v3948_v5, %v2185_v8  ;;  %2900 = vmatmul.mubr.bf16.gmra.mrb[116].mxu1 %v4765_v2  ;;  %2762 = vmatprep.mubr.bf16.mxu0 %v4766_v3  ;;  %v4785_v5 = vld [vmem:[%s4989_s27 + $0x22c] ss:$52 sps:$4 sm:$0xff]   ;;  %v4787_v9 = vld [vmem:[%s4989_s27 + $0x234] ss:$52 sps:$4 sm:$0xff]  }
 0x111   : > { %2907 = vmatprep.mubr.bf16.mxu1 %v4768_v7  ;;  %4441 = vmatpush3.bf16.msra.mxu0 %v4803_v57 }
 0x112   : > { %v5350_v14 = vadd.f32 %v3951_v11, %v2188_v12  ;;  %v3852_v15 = vpop.f32.mrb[12].mxu0  ;;  %4478 = vmatpush3.bf16.msra.mxu1 %v4803_v57  ;;  %4442 = vmatprep.subr.bf16.mxu0 %v4822_v10 }
 0x113   : > { %v3853_v17 = vpop.f32.mrb[13].mxu0  ;;  %v3952_v18 = vpop.f32.mrb[12].mxu1  ;;  %4475 = vmatprep.subr.bf16.mxu1 %v4822_v10 }
 0x114   : > { %v3854_v20 = vadd.f32 %v3853_v17, %v3852_v15  ;;  %v3855_v21 = vpop.f32.mrb[14].mxu0  ;;  %v3953_v22 = vpop.f32.mrb[13].mxu1 }
 0x115   : > { %v3856_v25 = vpop.f32.mrb[15].mxu0  ;;  %v3954_v26 = vadd.f32 %v3953_v22, %v3952_v18  ;;  %v3955_v27 = vpop.f32.mrb[14].mxu1  ;;  %4443 = vmatpush3.bf16.msra.mxu0 %v4822_v10  ;;  %v4789_v22 = vld [vmem:[%s4989_s27 + $0x228] ss:$52 sps:$4 sm:$0xff]  }
 0x116   : > { %v2193_v29 = vadd.f32 %v3854_v20, %v5309_v16  ;;  %v3857_v30 = vadd.f32 %v3856_v25, %v3855_v21  ;;  %v3956_v31 = vpop.f32.mrb[15].mxu1  ;;  %4479 = vmatpush3.bf16.msra.mxu1 %v4822_v10 }
 0x117   : > { %v3957_v32 = vadd.f32 %v3956_v31, %v3955_v27  ;;  %2763 = vmatmul.mubr.bf16.gmra.mrb[120].mxu0 %v4770_v19  ;;  %v4791_v27 = vld [vmem:[%s4989_s27 + $0x294] ss:$52 sps:$4 sm:$0xff]   ;;  %v4793_v31 = vld [vmem:[%s4989_s27 + $0x29c] ss:$52 sps:$4 sm:$0xff]  }
 0x118   : > { %v2196_v33 = vadd.f32 %v3857_v30, %v5309_v16  ;;  %v5358_v36 = vadd.f32 %v3954_v26, %v2193_v29  ;;  %2908 = vmatmul.mubr.bf16.gmra.mrb[120].mxu1 %v4771_v23  ;;  %2770 = vmatprep.mubr.bf16.mxu0 %v4772_v24  ;;  %v4790_v26 = vld [vmem:[%s4989_s27 + $0x230] ss:$52 sps:$4 sm:$0xff]  }
 0x119   : > { %2915 = vmatprep.mubr.bf16.mxu1 %v4774_v28 }
 0x11a   : > { %v5360_v37 = vadd.f32 %v3957_v32, %v2196_v33  ;;  %v3858_v38 = vpop.f32.mrb[16].mxu0 }
 0x11b   : > { %v3859_v39 = vpop.f32.mrb[17].mxu0  ;;  %v3958_v40 = vpop.f32.mrb[16].mxu1 }
 0x11c   : > { %v3860_v43 = vadd.f32 %v3859_v39, %v3858_v38  ;;  %v3861_v44 = vpop.f32.mrb[18].mxu0  ;;  %v3959_v45 = vpop.f32.mrb[17].mxu1 }
 0x11d   : > { %v3862_v48 = vpop.f32.mrb[19].mxu0  ;;  %v3960_v49 = vadd.f32 %v3959_v45, %v3958_v40  ;;  %v3961_v50 = vpop.f32.mrb[18].mxu1 }
 0x11e   : > { %v2201_v52 = vadd.f32 %v3860_v43, %v5309_v16  ;;  %v3863_v53 = vadd.f32 %v3862_v48, %v3861_v44  ;;  %v3962_v54 = vpop.f32.mrb[19].mxu1 }
 0x11f   : > { %v3963_v55 = vadd.f32 %v3962_v54, %v3961_v50  ;;  %2771 = vmatmul.mubr.bf16.gmra.mrb[124].mxu0 %v4776_v41 }
 0x120   : > { %v2204_v57 = vadd.f32 %v3863_v53, %v5309_v16  ;;  %v5368_v59 = vadd.f32 %v3960_v49, %v2201_v52  ;;  %2916 = vmatmul.mubr.bf16.gmra.mrb[124].mxu1 %v4777_v46  ;;  %2778 = vmatprep.mubr.bf16.mxu0 %v4779_v47  ;;  %v4795_v47 = vld [vmem:[%s4989_s27 + $0x290] ss:$52 sps:$4 sm:$0xff]  }
 0x121   : > { %2923 = vmatprep.mubr.bf16.mxu1 %v4781_v51  ;;  %v4796_v51 = vld [vmem:[%s4989_s27 + $0x298] ss:$52 sps:$4 sm:$0xff]   ;;  %v4797_v52 = vld [vmem:[%s4989_s27 + $0x2fc] ss:$52 sps:$4 sm:$0xff]  }
 0x122   : > { %v5370_v60 = vadd.f32 %v3963_v55, %v2204_v57  ;;  %v3864_v61 = vpop.f32.mrb[20].mxu0  ;;  %v4799_v57 = vld [vmem:[%s4989_s27 + $0x304] ss:$52 sps:$4 sm:$0xff]  }
 0x123   : > { %v3865_v62 = vpop.f32.mrb[21].mxu0  ;;  %v3964_v63 = vpop.f32.mrb[20].mxu1 }
 0x124   : > { %v3866_v1 = vadd.f32 %v3865_v62, %v3864_v61  ;;  %v3867_v2 = vpop.f32.mrb[22].mxu0  ;;  %v3965_v3 = vpop.f32.mrb[21].mxu1 }
 0x125   : > { %v3868_v6 = vpop.f32.mrb[23].mxu0  ;;  %v3966_v7 = vadd.f32 %v3965_v3, %v3964_v63  ;;  %v3967_v8 = vpop.f32.mrb[22].mxu1 }
 0x126   : > { %v2209_v42 = vadd.f32 %v3866_v1, %v5309_v16  ;;  %v3869_v10 = vadd.f32 %v3868_v6, %v3867_v2  ;;  %v3968_v11 = vpop.f32.mrb[23].mxu1 }
 0x127   : > { %v3969_v12 = vadd.f32 %v3968_v11, %v3967_v8  ;;  %2779 = vmatmul.mubr.bf16.gmra.mrb[128].mxu0 %v4783_v0  ;;  %v4804_v11 = vld [vmem:[%s4989_s27 + $0x364] ss:$52 sps:$4 sm:$0xff]  }
 0x128   : > { %v2212_v15 = vadd.f32 %v3869_v10, %v5309_v16  ;;  %v5378_v17 = vadd.f32 %v3966_v7, %v2209_v42  ;;  %2924 = vmatmul.mubr.bf16.gmra.mrb[128].mxu1 %v4784_v4  ;;  %2786 = vmatprep.mubr.bf16.mxu0 %v4785_v5  ;;  %v4801_v7 = vld [vmem:[%s4989_s27 + $0x2f8] ss:$52 sps:$4 sm:$0xff]   ;;  %v4802_v10 = vld [vmem:[%s4989_s27 + $0x300] ss:$52 sps:$4 sm:$0xff]  }
 0x129   : > { %2931 = vmatprep.mubr.bf16.mxu1 %v4787_v9 }
 0x12a   : > { %v5380_v18 = vadd.f32 %v3969_v12, %v2212_v15  ;;  %v3870_v19 = vpop.f32.mrb[24].mxu0 }
 0x12b   : > { %v3871_v20 = vpop.f32.mrb[25].mxu0  ;;  %v3970_v21 = vpop.f32.mrb[24].mxu1 }
 0x12c   : > { %v3872_v23 = vadd.f32 %v3871_v20, %v3870_v19  ;;  %v3873_v24 = vpop.f32.mrb[26].mxu0  ;;  %v3971_v25 = vpop.f32.mrb[25].mxu1  ;;  %v4806_v20 = vld [vmem:[%s4989_s27 + $0x36c] ss:$52 sps:$4 sm:$0xff]  }
 0x12d   : > { %v3874_v28 = vpop.f32.mrb[27].mxu0  ;;  %v3972_v29 = vadd.f32 %v3971_v25, %v3970_v21  ;;  %v3973_v30 = vpop.f32.mrb[26].mxu1 }
 0x12e   : > { %v2217_v32 = vadd.f32 %v3872_v23, %v5309_v16  ;;  %v3875_v33 = vadd.f32 %v3874_v28, %v3873_v24  ;;  %v3974_v38 = vpop.f32.mrb[27].mxu1 }
 0x12f   : > { %v3975_v39 = vadd.f32 %v3974_v38, %v3973_v30  ;;  %2787 = vmatmul.mubr.bf16.gmra.mrb[132].mxu0 %v4789_v22 }
 0x130   : > { %v2220_v40 = vadd.f32 %v3875_v33, %v5309_v16  ;;  %v5388_v41 = vadd.f32 %v3972_v29, %v2217_v32  ;;  %2932 = vmatmul.mubr.bf16.gmra.mrb[132].mxu1 %v4790_v26  ;;  %2794 = vmatprep.mubr.bf16.mxu0 %v4791_v27 }
 0x131   : > { %2939 = vmatprep.mubr.bf16.mxu1 %v4793_v31  ;;  %v4808_v31 = vld [vmem:[%s4989_s27 + $0x360] ss:$52 sps:$4 sm:$0xff]  }
 0x132   : > { %v5390_v43 = vadd.f32 %v3975_v39, %v2220_v40  ;;  %v3876_v44 = vpop.f32.mrb[28].mxu0  ;;  %v4809_v39 = vld [vmem:[%s4989_s27 + $0x368] ss:$52 sps:$4 sm:$0xff]   ;;  %v4810_v40 = vld [vmem:[%s4989_s27 + $0x3cc] ss:$52 sps:$4 sm:$0xff]  }
 0x133   : > { %v3877_v45 = vpop.f32.mrb[29].mxu0  ;;  %v3976_v46 = vpop.f32.mrb[28].mxu1 }
 0x134   : > { %v3878_v48 = vadd.f32 %v3877_v45, %v3876_v44  ;;  %v3879_v49 = vpop.f32.mrb[30].mxu0  ;;  %v3977_v50 = vpop.f32.mrb[29].mxu1 }
 0x135   : > { %v3880_v53 = vpop.f32.mrb[31].mxu0  ;;  %v3978_v54 = vadd.f32 %v3977_v50, %v3976_v46  ;;  %v3979_v55 = vpop.f32.mrb[30].mxu1 }
 0x136   : > { %v2225_v61 = vadd.f32 %v3878_v48, %v5309_v16  ;;  %v3881_v62 = vadd.f32 %v3880_v53, %v3879_v49  ;;  %v3980_v63 = vpop.f32.mrb[31].mxu1 }
 0x137   : > { %v3981_v0 = vadd.f32 %v3980_v63, %v3979_v55  ;;  %2795 = vmatmul.mubr.bf16.gmra.mrb[136].mxu0 %v4795_v47  ;;  %v4812_v47 = vld [vmem:[%s4989_s27 + $0x3d4] ss:$52 sps:$4 sm:$0xff]  }
 0x138   : > { %v2228_v1 = vadd.f32 %v3881_v62, %v5309_v16  ;;  %v5398_v2 = vadd.f32 %v3978_v54, %v2225_v61  ;;  %2940 = vmatmul.mubr.bf16.gmra.mrb[136].mxu1 %v4796_v51  ;;  %2802 = vmatprep.mubr.bf16.mxu0 %v4797_v52  ;;  %v4814_v62 = vld [vmem:[%s4989_s27 + $0x3c8] ss:$52 sps:$4 sm:$0xff]  }
 0x139   : > { %2947 = vmatprep.mubr.bf16.mxu1 %v4799_v57 }
 0x13a   : > { %v5400_v3 = vadd.f32 %v3981_v0, %v2228_v1  ;;  %v3882_v4 = vpop.f32.mrb[32].mxu0 }
 0x13b   : > { %v3883_v5 = vpop.f32.mrb[33].mxu0  ;;  %v3982_v6 = vpop.f32.mrb[32].mxu1 }
 0x13c   : > { %v3884_v8 = vadd.f32 %v3883_v5, %v3882_v4  ;;  %v3885_v9 = vpop.f32.mrb[34].mxu0  ;;  %v3983_v42 = vpop.f32.mrb[33].mxu1  ;;  %v4815_v4 = vld [vmem:[%s4989_s27 + $0x3d0] ss:$52 sps:$4 sm:$0xff]   ;;  %v4816_v5 = vld [vmem:[%s4989_s27 + $0x434] ss:$52 sps:$4 sm:$0xff]  }
 0x13d   : > { %v3886_v12 = vpop.f32.mrb[35].mxu0  ;;  %v3984_v15 = vadd.f32 %v3983_v42, %v3982_v6  ;;  %v3985_v19 = vpop.f32.mrb[34].mxu1 }
 0x13e   : > { %v2233_v21 = vadd.f32 %v3884_v8, %v5309_v16  ;;  %v3887_v22 = vadd.f32 %v3886_v12, %v3885_v9  ;;  %v3986_v23 = vpop.f32.mrb[35].mxu1  ;;  %v4818_v9 = vld [vmem:[%s4989_s27 + $0x43c] ss:$52 sps:$4 sm:$0xff]  }
 0x13f   : > { %v3987_v24 = vadd.f32 %v3986_v23, %v3985_v19  ;;  %2803 = vmatmul.mubr.bf16.gmra.mrb[140].mxu0 %v4801_v7 }
 0x140   : > { %v2236_v25 = vadd.f32 %v3887_v22, %v5309_v16  ;;  %v5408_v26 = vadd.f32 %v3984_v15, %v2233_v21  ;;  %2948 = vmatmul.mubr.bf16.gmra.mrb[140].mxu1 %v4802_v10  ;;  %2810 = vmatprep.mubr.bf16.mxu0 %v4804_v11 }
 0x141   : > { %2955 = vmatprep.mubr.bf16.mxu1 %v4806_v20 }
 0x142   : > { %v5410_v27 = vadd.f32 %v3987_v24, %v2236_v25  ;;  %v3888_v28 = vpop.f32.mrb[36].mxu0  ;;  %v4820_v24 = vld [vmem:[%s4989_s27 + $0x430] ss:$52 sps:$4 sm:$0xff]  }
 0x143   : > { %v3889_v29 = vpop.f32.mrb[37].mxu0  ;;  %v3988_v30 = vpop.f32.mrb[36].mxu1 }
 0x144   : > { %v3890_v32 = vadd.f32 %v3889_v29, %v3888_v28  ;;  %v3891_v33 = vpop.f32.mrb[38].mxu0  ;;  %v3989_v38 = vpop.f32.mrb[37].mxu1 }
 0x145   : > { %v3892_v44 = vpop.f32.mrb[39].mxu0  ;;  %v3990_v45 = vadd.f32 %v3989_v38, %v3988_v30  ;;  %v3991_v46 = vpop.f32.mrb[38].mxu1  ;;  %v4821_v30 = vld [vmem:[%s4989_s27 + $0x438] ss:$52 sps:$4 sm:$0xff]  }
 0x146   : > { %v2241_v48 = vadd.f32 %v3890_v32, %v5309_v16  ;;  %v3893_v49 = vadd.f32 %v3892_v44, %v3891_v33  ;;  %v3992_v50 = vpop.f32.mrb[39].mxu1 }
 0x147   : > { %v3993_v51 = vadd.f32 %v3992_v50, %v3991_v46  ;;  %2811 = vmatmul.mubr.bf16.gmra.mrb[144].mxu0 %v4808_v31  ;;  %v4823_v31 = vld [vmem:[%s4989_s27 + $0x49c] ss:$52 sps:$4 sm:$0xff]  }
 0x148   : > { %v2244_v52 = vadd.f32 %v3893_v49, %v5309_v16  ;;  %v5418_v53 = vadd.f32 %v3990_v45, %v2241_v48  ;;  %2956 = vmatmul.mubr.bf16.gmra.mrb[144].mxu1 %v4809_v39  ;;  %2818 = vmatprep.mubr.bf16.mxu0 %v4810_v40  ;;  %v4825_v39 = vld [vmem:[%s4989_s27 + $0x4a4] ss:$52 sps:$4 sm:$0xff]  }
 0x149   : > { %2963 = vmatprep.mubr.bf16.mxu1 %v4812_v47 }
 0x14a   : > { %v5420_v54 = vadd.f32 %v3993_v51, %v2244_v52  ;;  %v3894_v55 = vpop.f32.mrb[40].mxu0 }
 0x14b   : > { %v3895_v57 = vpop.f32.mrb[41].mxu0  ;;  %v3994_v61 = vpop.f32.mrb[40].mxu1 }
 0x14c   : > { %v3896_v63 = vadd.f32 %v3895_v57, %v3894_v55  ;;  %v3897_v0 = vpop.f32.mrb[42].mxu0  ;;  %v3995_v1 = vpop.f32.mrb[41].mxu1  ;;  %v4827_v55 = vld [vmem:[%s4989_s27 + $0x498] ss:$52 sps:$4 sm:$0xff]  }
 0x14d   : > { %v3898_v6 = vpop.f32.mrb[43].mxu0  ;;  %v3996_v7 = vadd.f32 %v3995_v1, %v3994_v61  ;;  %v3997_v8 = vpop.f32.mrb[42].mxu1 }
 0x14e   : > { %v2249_v42 = vadd.f32 %v3896_v63, %v5309_v16  ;;  %v3899_v10 = vadd.f32 %v3898_v6, %v3897_v0  ;;  %v3998_v11 = vpop.f32.mrb[43].mxu1  ;;  %v4828_v63 = vld [vmem:[%s4989_s27 + $0x4a0] ss:$52 sps:$4 sm:$0xff]   ;;  %v4829_v0 = vld [vmem:[%s4989_s27 + $0x504] ss:$52 sps:$4 sm:$0xff]  }
 0x14f   : > { %v3999_v12 = vadd.f32 %v3998_v11, %v3997_v8  ;;  %2819 = vmatmul.mubr.bf16.gmra.mrb[148].mxu0 %v4814_v62  ;;  %v4831_v6 = vld [vmem:[%s4989_s27 + $0x50c] ss:$52 sps:$4 sm:$0xff]  }
 0x150   : > { %v2252_v15 = vadd.f32 %v3899_v10, %v5309_v16  ;;  %v5428_v19 = vadd.f32 %v3996_v7, %v2249_v42  ;;  %2964 = vmatmul.mubr.bf16.gmra.mrb[148].mxu1 %v4815_v4  ;;  %2826 = vmatprep.mubr.bf16.mxu0 %v4816_v5 }
 0x151   : > { %2971 = vmatprep.mubr.bf16.mxu1 %v4818_v9 }
 0x152   : > { %v5430_v20 = vadd.f32 %v3999_v12, %v2252_v15  ;;  %v3900_v21 = vpop.f32.mrb[44].mxu0 }
 0x153   : > { %v3901_v22 = vpop.f32.mrb[45].mxu0  ;;  %v4000_v23 = vpop.f32.mrb[44].mxu1 }
 0x154   : > { %v3902_v25 = vadd.f32 %v3901_v22, %v3900_v21  ;;  %v3903_v28 = vpop.f32.mrb[46].mxu0  ;;  %v4001_v29 = vpop.f32.mrb[45].mxu1 }
 0x155   : > { %v3904_v32 = vpop.f32.mrb[47].mxu0  ;;  %v4002_v33 = vadd.f32 %v4001_v29, %v4000_v23  ;;  %v4003_v38 = vpop.f32.mrb[46].mxu1  ;;  %v4833_v23 = vld [vmem:[%s4989_s27 + $0x500] ss:$52 sps:$4 sm:$0xff]   ;;  %v4834_v29 = vld [vmem:[%s4989_s27 + $0x508] ss:$52 sps:$4 sm:$0xff]  }
 0x156   : > { %v2257_v40 = vadd.f32 %v3902_v25, %v5309_v16  ;;  %v3905_v44 = vadd.f32 %v3904_v32, %v3903_v28  ;;  %v4004_v45 = vpop.f32.mrb[47].mxu1 }
 0x157   : > { %v4005_v46 = vadd.f32 %v4004_v45, %v4003_v38  ;;  %2827 = vmatmul.mubr.bf16.gmra.mrb[152].mxu0 %v4820_v24  ;;  %v4837_v38 = vld [vmem:[%s4989_s27 + $0x574] ss:$52 sps:$4 sm:$0xff]  }
 0x158   : > { %v2260_v47 = vadd.f32 %v3905_v44, %v5309_v16  ;;  %v5438_v48 = vadd.f32 %v4002_v33, %v2257_v40  ;;  %2972 = vmatmul.mubr.bf16.gmra.mrb[152].mxu1 %v4821_v30  ;;  %2834 = vmatprep.mubr.bf16.mxu0 %v4823_v31  ;;  %v4835_v30 = vld [vmem:[%s4989_s27 + $0x56c] ss:$52 sps:$4 sm:$0xff]  }
 0x159   : > { %2979 = vmatprep.mubr.bf16.mxu1 %v4825_v39 }
 0x15a   : > { %v5440_v49 = vadd.f32 %v4005_v46, %v2260_v47  ;;  %v3906_v50 = vpop.f32.mrb[48].mxu0 }
 0x15b   : > { %v3907_v51 = vpop.f32.mrb[49].mxu0  ;;  %v4006_v52 = vpop.f32.mrb[48].mxu1 }
 0x15c   : > { %v3908_v57 = vadd.f32 %v3907_v51, %v3906_v50  ;;  %v3909_v61 = vpop.f32.mrb[50].mxu0  ;;  %v4007_v62 = vpop.f32.mrb[49].mxu1 }
 0x15d   : > { %v3910_v1 = vpop.f32.mrb[51].mxu0  ;;  %v4008_v4 = vadd.f32 %v4007_v62, %v4006_v52  ;;  %v4009_v5 = vpop.f32.mrb[50].mxu1 }
 0x15e   : > { %v2265_v7 = vadd.f32 %v3908_v57, %v5309_v16  ;;  %v3911_v8 = vadd.f32 %v3910_v1, %v3909_v61  ;;  %v4010_v9 = vpop.f32.mrb[51].mxu1  ;;  %v4839_v57 = vld [vmem:[%s4989_s27 + $0x568] ss:$52 sps:$4 sm:$0xff]   ;;  %v4841_v1 = vld [vmem:[%s4989_s27 + $0x30] ss:$52 sps:$4 sm:$0xff]  }
 0x15f   : > { %v4011_v42 = vadd.f32 %v4010_v9, %v4009_v5  ;;  %2835 = vmatmul.mubr.bf16.gmra.mrb[156].mxu0 %v4827_v55 }
 0x160   : > { %v2268_v10 = vadd.f32 %v3911_v8, %v5309_v16  ;;  %v5448_v11 = vadd.f32 %v4008_v4, %v2265_v7  ;;  %2980 = vmatmul.mubr.bf16.gmra.mrb[156].mxu1 %v4828_v63  ;;  %2842 = vmatprep.mubr.bf16.mxu0 %v4829_v0  ;;  %v4840_v0 = vld [vmem:[%s4989_s27 + $0x570] ss:$52 sps:$4 sm:$0xff]  }
 0x161   : > { %2987 = vmatprep.mubr.bf16.mxu1 %v4831_v6  ;;  %v4842_v6 = vld [vmem:[%s4989_s27 + $0x370] ss:$52 sps:$4 sm:$0xff]  }
 0x162   : > { %v5450_v12 = vadd.f32 %v4011_v42, %v2268_v10  ;;  %v3912_v15 = vpop.f32.mrb[52].mxu0 }
 0x163   : > { %v3913_v21 = vpop.f32.mrb[53].mxu0  ;;  %v4012_v22 = vpop.f32.mrb[52].mxu1 }
 0x164   : > { %v3914_v24 = vadd.f32 %v3913_v21, %v3912_v15  ;;  %v3915_v25 = vpop.f32.mrb[54].mxu0  ;;  %v4013_v28 = vpop.f32.mrb[53].mxu1 }
 0x165   : > { %v3916_v31 = vpop.f32.mrb[55].mxu0  ;;  %v4014_v32 = vadd.f32 %v4013_v28, %v4012_v22  ;;  %v4015_v33 = vpop.f32.mrb[54].mxu1 }
 0x166   : > { %v2273_v39 = vadd.f32 %v3914_v24, %v5309_v16  ;;  %v3917_v40 = vadd.f32 %v3916_v31, %v3915_v25  ;;  %v4016_v44 = vpop.f32.mrb[55].mxu1  ;;  %v4843_v24 = vld [vmem:[%s4989_s27 + $0x98] ss:$52 sps:$4 sm:$0xff]   ;;  %v4845_v31 = vld [vmem:[%s4989_s27 + $0x100] ss:$52 sps:$4 sm:$0xff]  }
 0x167   : > { %v4017_v45 = vadd.f32 %v4016_v44, %v4015_v33  ;;  %2843 = vmatmul.mubr.bf16.gmra.mrb[160].mxu0 %v4833_v23 }
 0x168   : > { %v2276_v46 = vadd.f32 %v3917_v40, %v5309_v16  ;;  %v5458_v47 = vadd.f32 %v4014_v32, %v2273_v39  ;;  %2988 = vmatmul.mubr.bf16.gmra.mrb[160].mxu1 %v4834_v29  ;;  %2850 = vmatprep.mubr.bf16.mxu0 %v4835_v30  ;;  %v4844_v30 = vld [vmem:[%s4989_s27 + $0x3d8] ss:$52 sps:$4 sm:$0xff]  }
 0x169   : > { %2995 = vmatprep.mubr.bf16.mxu1 %v4837_v38  ;;  %v4846_v38 = vld [vmem:[%s4989_s27 + $0x440] ss:$52 sps:$4 sm:$0xff]  }
 0x16a   : > { %v5460_v50 = vadd.f32 %v4017_v45, %v2276_v46  ;;  %v4034_v51 = vpop.f32.mrb[56].mxu0 }
 0x16b   : > { %v4035_v52 = vpop.f32.mrb[57].mxu0  ;;  %v4134_v55 = vpop.f32.mrb[56].mxu1 }
 0x16c   : > { %v4036_v61 = vadd.f32 %v4035_v52, %v4034_v51  ;;  %v4037_v62 = vpop.f32.mrb[58].mxu0  ;;  %v4135_v63 = vpop.f32.mrb[57].mxu1 }
 0x16d   : > { %v4038_v4 = vpop.f32.mrb[59].mxu0  ;;  %v4136_v5 = vadd.f32 %v4135_v63, %v4134_v55  ;;  %v4137_v16 = vpop.f32.mrb[58].mxu1 }
 0x16e   : > { %v2459_v7 = vadd.f32 %v4036_v61, %v5317_v34  ;;  %v4039_v8 = vadd.f32 %v4038_v4, %v4037_v62  ;;  %v4138_v9 = vpop.f32.mrb[59].mxu1  ;;  %v4847_v61 = vld [vmem:[%s4989_s27 + $0x168] ss:$52 sps:$4 sm:$0xff]  }
 0x16f   : > { %v4139_v42 = vadd.f32 %v4138_v9, %v4137_v16  ;;  %2851 = vmatmul.mubr.bf16.gmra.mrb[164].mxu0 %v4839_v57 }
 0x170   : > { %v2462_v10 = vadd.f32 %v4039_v8, %v5319_v35  ;;  %v5468_v15 = vadd.f32 %v4136_v5, %v2459_v7  ;;  %2996 = vmatmul.mubr.bf16.gmra.mrb[164].mxu1 %v4840_v0  ;;  %4444 = vmatprep.mubr.msk.bf16.mxu0 %vm2091_vm0, %v4841_v1  ;;  %v4848_v1 = vld [vmem:[%s4989_s27 + $0x4a8] ss:$52 sps:$4 sm:$0xff]  }
 0x171   : > { %4460 = vmatprep.mubr.msk.bf16.mxu1 %vm2091_vm0, %v4842_v6  ;;  %v4850_v6 = vld [vmem:[%s4989_s27 + $0x510] ss:$52 sps:$4 sm:$0xff]  }
 0x172   : > { %v5472_v21 = vadd.f32 %v4139_v42, %v2462_v10  ;;  %v4040_v22 = vpop.f32.mrb[60].mxu0 }
 0x173   : > { %v4041_v34 = vpop.f32.mrb[61].mxu0  ;;  %v4140_v23 = vpop.f32.mrb[60].mxu1 }
 0x174   : > { %v4042_v25 = vadd.f32 %v4041_v34, %v4040_v22  ;;  %v4043_v28 = vpop.f32.mrb[62].mxu0  ;;  %v4141_v29 = vpop.f32.mrb[61].mxu1 }
 0x175   : > { %v4044_v35 = vpop.f32.mrb[63].mxu0  ;;  %v4142_v32 = vadd.f32 %v4141_v29, %v4140_v23  ;;  %v4143_v33 = vpop.f32.mrb[62].mxu1 }
 0x176   : > { %v2467_v39 = vadd.f32 %v4042_v25, %v5330_v56  ;;  %v4045_v40 = vadd.f32 %v4044_v35, %v4043_v28  ;;  %v4144_v44 = vpop.f32.mrb[63].mxu1  ;;  %v4851_v25 = vld [vmem:[%s4989_s27 + $0x238] ss:$52 sps:$4 sm:$0xff]   ;;  %v4853_v35 = vld [vmem:[%s4989_s27 + $0x2a0] ss:$52 sps:$4 sm:$0xff]  }
 0x177   : > { %v4145_v45 = vadd.f32 %v4144_v44, %v4143_v33  ;;  %4445 = vmatmul.mubr.msk.bf16.vlgmr.msra.gmra.mrb[168].mxu0 %vm2091_vm0, %v4843_v24 }
 0x178   : > { %v2470_v46 = vadd.f32 %v4045_v40, %v5336_v58  ;;  %v5481_v51 = vadd.f32 %v4142_v32, %v2467_v39  ;;  %4461 = vmatmul.mubr.msk.bf16.vlgmr.msra.gmra.mrb[168].mxu1 %vm2091_vm0, %v4844_v30  ;;  %4448 = vmatprep.mubr.msk.bf16.mxu0 %vm2091_vm0, %v4845_v31  ;;  %v4849_v58 = vld [vmem:[%s4989_s27 + $0x1d0] ss:$52 sps:$4 sm:$0xff]   ;;  %v4852_v31 = vld [vmem:[%s4989_s27 + $0x578] ss:$52 sps:$4 sm:$0xff]  }
 0x179   : > { %4464 = vmatprep.mubr.msk.bf16.mxu1 %vm2091_vm0, %v4846_v38 }
 0x17a   : > { %v5486_v52 = vadd.f32 %v4145_v45, %v2470_v46  ;;  %v4046_v56 = vpop.f32.mrb[64].mxu0 }
 0x17b   : > { %v4047_v55 = vpop.f32.mrb[65].mxu0  ;;  %v4146_v57 = vpop.f32.mrb[64].mxu1 }
 0x17c   : > { %v4048_v62 = vadd.f32 %v4047_v55, %v4046_v56  ;;  %v4049_v63 = vpop.f32.mrb[66].mxu0  ;;  %v4147_v0 = vpop.f32.mrb[65].mxu1 }
 0x17d   : > { %v4050_v4 = vpop.f32.mrb[67].mxu0  ;;  %v4148_v5 = vadd.f32 %v4147_v0, %v4146_v57  ;;  %v4149_v16 = vpop.f32.mrb[66].mxu1 }
 0x17e   : > { %v2475_v7 = vadd.f32 %v4048_v62, %v5348_v13  ;;  %v4051_v8 = vadd.f32 %v4050_v4, %v4049_v63  ;;  %v4150_v9 = vpop.f32.mrb[67].mxu1  ;;  %v4854_v62 = vld [vmem:[%s4989_s27 + $0x308] ss:$52 sps:$4 sm:$0xff]   ;;  %s3379_s27 = sshll.u32 %s5716_s17, 2 }
 0x17f   : > { %v4151_v42 = vadd.f32 %v4150_v9, %v4149_v16  ;;  %4449 = vmatmul.mubr.msk.bf16.gmra.mrb[172].mxu0 %vm2091_vm0, %v4847_v61  ;;  %s5672_s28 = scalar_lea.vmem %s5714_s3, %s3379_s27 }
 0x180   : > { %v2478_v10 = vadd.f32 %v4051_v8, %v5350_v14  ;;  %v5495_v22 = vadd.f32 %v4148_v5, %v2475_v7  ;;  %4465 = vmatmul.mubr.msk.bf16.gmra.mrb[172].mxu1 %vm2091_vm0, %v4848_v1  ;;  %4452 = vmatprep.mubr.msk.bf16.mxu0 %vm2091_vm0, %v4849_v58 }
 0x181   : > { %4468 = vmatprep.mubr.msk.bf16.mxu1 %vm2091_vm0, %v4850_v6 }
 0x182   : > { %v5500_v34 = vadd.f32 %v4151_v42, %v2478_v10  ;;  %v4052_v13 = vpop.f32.mrb[68].mxu0 }
 0x183   : > { %v4053_v23 = vpop.f32.mrb[69].mxu0  ;;  %v4152_v24 = vpop.f32.mrb[68].mxu1 }
 0x184   : > { %v4054_v28 = vadd.f32 %v4053_v23, %v4052_v13  ;;  %v4055_v29 = vpop.f32.mrb[70].mxu0  ;;  %v4153_v30 = vpop.f32.mrb[69].mxu1 }
 0x185   : > { %v4056_v14 = vpop.f32.mrb[71].mxu0  ;;  %v4154_v32 = vadd.f32 %v4153_v30, %v4152_v24  ;;  %v4155_v33 = vpop.f32.mrb[70].mxu1 }
 0x186   : > { %v2483_v38 = vadd.f32 %v4054_v28, %v5358_v36  ;;  %v4057_v39 = vadd.f32 %v4056_v14, %v4055_v29  ;;  %v4156_v40 = vpop.f32.mrb[71].mxu1 }
 0x187   : > { %v4157_v44 = vadd.f32 %v4156_v40, %v4155_v33  ;;  %4453 = vmatmul.mubr.msk.bf16.gmra.mrb[176].mxu0 %vm2091_vm0, %v4851_v25 }
 0x188   : > { %v2486_v45 = vadd.f32 %v4057_v39, %v5360_v37  ;;  %v5508_v46 = vadd.f32 %v4154_v32, %v2483_v38  ;;  %4469 = vmatmul.mubr.msk.bf16.gmra.mrb[176].mxu1 %vm2091_vm0, %v4852_v31  ;;  %4456 = vmatprep.mubr.msk.bf16.mxu0 %vm2091_vm0, %v4853_v35 }
 0x18a   : > { %v5512_v56 = vadd.f32 %v4157_v44, %v2486_v45  ;;  %v4058_v55 = vpop.f32.mrb[72].mxu0 }
 0x18b   : > { %v4059_v57 = vpop.f32.mrb[73].mxu0  ;;  %v4158_v61 = vpop.f32.mrb[72].mxu1 }
 0x18c   : > { %v4060_v36 = vadd.f32 %v4059_v57, %v4058_v55  ;;  %v4061_v63 = vpop.f32.mrb[74].mxu0  ;;  %v4159_v0 = vpop.f32.mrb[73].mxu1 }
 0x18d   : > { %v4062_v1 = vpop.f32.mrb[75].mxu0  ;;  %v4160_v58 = vadd.f32 %v4159_v0, %v4158_v61  ;;  %v4161_v4 = vpop.f32.mrb[74].mxu1 }
 0x18e   : > { %v2491_v37 = vadd.f32 %v4060_v36, %v5368_v59  ;;  %v4063_v5 = vadd.f32 %v4062_v1, %v4061_v63  ;;  %v4162_v16 = vpop.f32.mrb[75].mxu1 }
 0x18f   : > { %v4163_v6 = vadd.f32 %v4162_v16, %v4161_v4  ;;  %4457 = vmatmul.mubr.msk.bf16.gmra.mrb[180].mxu0 %vm2091_vm0, %v4854_v62 }
 0x190   : > { %v2494_v7 = vadd.f32 %v4063_v5, %v5370_v60  ;;  %v5518_v8 = vadd.f32 %v4160_v58, %v2491_v37 }
 0x192   : > { %v5520_v9 = vadd.f32 %v4163_v6, %v2494_v7  ;;  %v4064_v42 = vpop.f32.mrb[76].mxu0 }
 0x193   : > { %v4065_v10 = vpop.f32.mrb[77].mxu0  ;;  %v4164_v13 = vpop.f32.mrb[76].mxu1 }
 0x194   : > { %v4066_v23 = vadd.f32 %v4065_v10, %v4064_v42  ;;  %v4067_v24 = vpop.f32.mrb[78].mxu0  ;;  %v4165_v25 = vpop.f32.mrb[77].mxu1 }
 0x195   : > { %v4068_v28 = vpop.f32.mrb[79].mxu0  ;;  %v4166_v29 = vadd.f32 %v4165_v25, %v4164_v13  ;;  %v4167_v59 = vpop.f32.mrb[78].mxu1 }
 0x196   : > { %v2499_v30 = vadd.f32 %v4066_v23, %v5378_v17  ;;  %v4069_v31 = vadd.f32 %v4068_v28, %v4067_v24  ;;  %v4168_v35 = vpop.f32.mrb[79].mxu1 }
 0x197   : > { %v4169_v14 = vadd.f32 %v4168_v35, %v4167_v59 }
 0x198   : > { %v2502_v60 = vadd.f32 %v4069_v31, %v5380_v18  ;;  %v5524_v32 = vadd.f32 %v4166_v29, %v2499_v30 }
 0x19a   : > { %v5526_v33 = vadd.f32 %v4169_v14, %v2502_v60  ;;  %v4070_v38 = vpop.f32.mrb[80].mxu0 }
 0x19b   : > { %v4071_v39 = vpop.f32.mrb[81].mxu0  ;;  %v4170_v40 = vpop.f32.mrb[80].mxu1 }
 0x19c   : > { %v4072_v44 = vadd.f32 %v4071_v39, %v4070_v38  ;;  %v4073_v45 = vpop.f32.mrb[82].mxu0  ;;  %v4171_v55 = vpop.f32.mrb[81].mxu1 }
 0x19d   : > { %v4074_v57 = vpop.f32.mrb[83].mxu0  ;;  %v4172_v61 = vadd.f32 %v4171_v55, %v4170_v40  ;;  %v4173_v62 = vpop.f32.mrb[82].mxu1 }
 0x19e   : > { %v2507_v17 = vadd.f32 %v4072_v44, %v5388_v41  ;;  %v4075_v36 = vadd.f32 %v4074_v57, %v4073_v45  ;;  %v4174_v63 = vpop.f32.mrb[83].mxu1 }
 0x19f   : > { %v4175_v0 = vadd.f32 %v4174_v63, %v4173_v62 }
 0x1a0   : > { %v2510_v18 = vadd.f32 %v4075_v36, %v5390_v43  ;;  %v5530_v1 = vadd.f32 %v4172_v61, %v2507_v17 }
 0x1a2   : > { %v5532_v58 = vadd.f32 %v4175_v0, %v2510_v18  ;;  %v4076_v4 = vpop.f32.mrb[84].mxu0 }
 0x1a3   : > { %v4077_v37 = vpop.f32.mrb[85].mxu0  ;;  %v4176_v5 = vpop.f32.mrb[84].mxu1 }
 0x1a4   : > { %v4078_v16 = vadd.f32 %v4077_v37, %v4076_v4  ;;  %v4079_v6 = vpop.f32.mrb[86].mxu0  ;;  %v4177_v7 = vpop.f32.mrb[85].mxu1 }
 0x1a5   : > { %v4080_v42 = vpop.f32.mrb[87].mxu0  ;;  %v4178_v10 = vadd.f32 %v4177_v7, %v4176_v5  ;;  %v4179_v13 = vpop.f32.mrb[86].mxu1 }
 0x1a6   : > { %v2515_v41 = vadd.f32 %v4078_v16, %v5398_v2  ;;  %v4081_v23 = vadd.f32 %v4080_v42, %v4079_v6  ;;  %v4180_v24 = vpop.f32.mrb[87].mxu1 }
 0x1a7   : > { %v4181_v25 = vadd.f32 %v4180_v24, %v4179_v13 }
 0x1a8   : > { %v2518_v43 = vadd.f32 %v4081_v23, %v5400_v3  ;;  %v5536_v28 = vadd.f32 %v4178_v10, %v2515_v41 }
 0x1aa   : > { %v5538_v29 = vadd.f32 %v4181_v25, %v2518_v43  ;;  %v4082_v59 = vpop.f32.mrb[88].mxu0 }
 0x1ab   : > { %v4083_v30 = vpop.f32.mrb[89].mxu0  ;;  %v4182_v31 = vpop.f32.mrb[88].mxu1 }
 0x1ac   : > { %v4084_v35 = vadd.f32 %v4083_v30, %v4082_v59  ;;  %v4085_v14 = vpop.f32.mrb[90].mxu0  ;;  %v4183_v60 = vpop.f32.mrb[89].mxu1 }
 0x1ad   : > { %v4086_v38 = vpop.f32.mrb[91].mxu0  ;;  %v4184_v39 = vadd.f32 %v4183_v60, %v4182_v31  ;;  %v4185_v40 = vpop.f32.mrb[90].mxu1 }
 0x1ae   : > { %v2523_v2 = vadd.f32 %v4084_v35, %v5408_v26  ;;  %v4087_v44 = vadd.f32 %v4086_v38, %v4085_v14  ;;  %v4186_v45 = vpop.f32.mrb[91].mxu1 }
 0x1af   : > { %v4187_v55 = vadd.f32 %v4186_v45, %v4185_v40 }
 0x1b0   : > { %v2526_v3 = vadd.f32 %v4087_v44, %v5410_v27  ;;  %v5542_v57 = vadd.f32 %v4184_v39, %v2523_v2 }
 0x1b2   : > { %v5544_v61 = vadd.f32 %v4187_v55, %v2526_v3  ;;  %v4088_v62 = vpop.f32.mrb[92].mxu0 }
 0x1b3   : > { %v4089_v17 = vpop.f32.mrb[93].mxu0  ;;  %v4188_v36 = vpop.f32.mrb[92].mxu1 }
 0x1b4   : > { %v4090_v63 = vadd.f32 %v4089_v17, %v4088_v62  ;;  %v4091_v0 = vpop.f32.mrb[94].mxu0  ;;  %v4189_v18 = vpop.f32.mrb[93].mxu1 }
 0x1b5   : > { %v4092_v4 = vpop.f32.mrb[95].mxu0  ;;  %v4190_v37 = vadd.f32 %v4189_v18, %v4188_v36  ;;  %v4191_v5 = vpop.f32.mrb[94].mxu1 }
 0x1b6   : > { %v2531_v26 = vadd.f32 %v4090_v63, %v5418_v53  ;;  %v4093_v16 = vadd.f32 %v4092_v4, %v4091_v0  ;;  %v4192_v6 = vpop.f32.mrb[95].mxu1 }
 0x1b7   : > { %v4193_v7 = vadd.f32 %v4192_v6, %v4191_v5 }
 0x1b8   : > { %v2534_v27 = vadd.f32 %v4093_v16, %v5420_v54  ;;  %v5548_v42 = vadd.f32 %v4190_v37, %v2531_v26 }
 0x1ba   : > { %v5550_v10 = vadd.f32 %v4193_v7, %v2534_v27  ;;  %v4094_v13 = vpop.f32.mrb[96].mxu0 }
 0x1bb   : > { %v4095_v41 = vpop.f32.mrb[97].mxu0  ;;  %v4194_v23 = vpop.f32.mrb[96].mxu1 }
 0x1bc   : > { %v4096_v24 = vadd.f32 %v4095_v41, %v4094_v13  ;;  %v4097_v25 = vpop.f32.mrb[98].mxu0  ;;  %v4195_v43 = vpop.f32.mrb[97].mxu1 }
 0x1bd   : > { %v4098_v59 = vpop.f32.mrb[99].mxu0  ;;  %v4196_v30 = vadd.f32 %v4195_v43, %v4194_v23  ;;  %v4197_v31 = vpop.f32.mrb[98].mxu1 }
 0x1be   : > { %v2539_v53 = vadd.f32 %v4096_v24, %v5428_v19  ;;  %v4099_v35 = vadd.f32 %v4098_v59, %v4097_v25  ;;  %v4198_v14 = vpop.f32.mrb[99].mxu1 }
 0x1bf   : > { %v4199_v60 = vadd.f32 %v4198_v14, %v4197_v31 }
 0x1c0   : > { %v2542_v54 = vadd.f32 %v4099_v35, %v5430_v20  ;;  %v5554_v38 = vadd.f32 %v4196_v30, %v2539_v53 }
 0x1c2   : > { %v5556_v39 = vadd.f32 %v4199_v60, %v2542_v54  ;;  %v4100_v40 = vpop.f32.mrb[100].mxu0 }
 0x1c3   : > { %v4101_v2 = vpop.f32.mrb[101].mxu0  ;;  %v4200_v44 = vpop.f32.mrb[100].mxu1 }
 0x1c4   : > { %v4102_v45 = vadd.f32 %v4101_v2, %v4100_v40  ;;  %v4103_v55 = vpop.f32.mrb[102].mxu0  ;;  %v4201_v3 = vpop.f32.mrb[101].mxu1 }
 0x1c5   : > { %v4104_v62 = vpop.f32.mrb[103].mxu0  ;;  %v4202_v17 = vadd.f32 %v4201_v3, %v4200_v44  ;;  %v4203_v36 = vpop.f32.mrb[102].mxu1 }
 0x1c6   : > { %v2547_v19 = vadd.f32 %v4102_v45, %v5438_v48  ;;  %v4105_v63 = vadd.f32 %v4104_v62, %v4103_v55  ;;  %v4204_v0 = vpop.f32.mrb[103].mxu1 }
 0x1c7   : > { %v4205_v18 = vadd.f32 %v4204_v0, %v4203_v36 }
 0x1c8   : > { %v2550_v20 = vadd.f32 %v4105_v63, %v5440_v49  ;;  %v5560_v4 = vadd.f32 %v4202_v17, %v2547_v19 }
 0x1ca   : > { %v5562_v37 = vadd.f32 %v4205_v18, %v2550_v20  ;;  %v4106_v5 = vpop.f32.mrb[104].mxu0 }
 0x1cb   : > { %v4107_v26 = vpop.f32.mrb[105].mxu0  ;;  %v4206_v16 = vpop.f32.mrb[104].mxu1 }
 0x1cc   : > { %v4108_v6 = vadd.f32 %v4107_v26, %v4106_v5  ;;  %v4109_v7 = vpop.f32.mrb[106].mxu0  ;;  %v4207_v27 = vpop.f32.mrb[105].mxu1 }
 0x1cd   : > { %v4110_v13 = vpop.f32.mrb[107].mxu0  ;;  %v4208_v41 = vadd.f32 %v4207_v27, %v4206_v16  ;;  %v4209_v23 = vpop.f32.mrb[106].mxu1 }
 0x1ce   : > { %v2555_v48 = vadd.f32 %v4108_v6, %v5448_v11  ;;  %v4111_v24 = vadd.f32 %v4110_v13, %v4109_v7  ;;  %v4210_v25 = vpop.f32.mrb[107].mxu1 }
 0x1cf   : > { %v4211_v43 = vadd.f32 %v4210_v25, %v4209_v23 }
 0x1d0   : > { %v2558_v49 = vadd.f32 %v4111_v24, %v5450_v12  ;;  %v5566_v59 = vadd.f32 %v4208_v41, %v2555_v48 }
 0x1d2   : > { %v5568_v30 = vadd.f32 %v4211_v43, %v2558_v49  ;;  %v4112_v31 = vpop.f32.mrb[108].mxu0 }
 0x1d3   : > { %v4113_v53 = vpop.f32.mrb[109].mxu0  ;;  %v4212_v35 = vpop.f32.mrb[108].mxu1 }
 0x1d4   : > { %v4114_v14 = vadd.f32 %v4113_v53, %v4112_v31  ;;  %v4115_v60 = vpop.f32.mrb[110].mxu0  ;;  %v4213_v54 = vpop.f32.mrb[109].mxu1 }
 0x1d5   : > { %v4116_v40 = vpop.f32.mrb[111].mxu0  ;;  %v4214_v2 = vadd.f32 %v4213_v54, %v4212_v35  ;;  %v4215_v44 = vpop.f32.mrb[110].mxu1 }
 0x1d6   : > { %v2563_v11 = vadd.f32 %v4114_v14, %v5458_v47  ;;  %v4117_v45 = vadd.f32 %v4116_v40, %v4115_v60  ;;  %v4216_v55 = vpop.f32.mrb[111].mxu1 }
 0x1d7   : > { %v4217_v3 = vadd.f32 %v4216_v55, %v4215_v44 }
 0x1d8   : > { %v2566_v12 = vadd.f32 %v4117_v45, %v5460_v50  ;;  %v5572_v62 = vadd.f32 %v4214_v2, %v2563_v11 }
 0x1da   : > { %v5574_v17 = vadd.f32 %v4217_v3, %v2566_v12  ;;  %v4234_v36 = vpop.f32.mrb[112].mxu0 }
 0x1db   : > { %v4235_v19 = vpop.f32.mrb[113].mxu0  ;;  %v4334_v63 = vpop.f32.mrb[112].mxu1 }
 0x1dc   : > { %v4236_v0 = vadd.f32 %v4235_v19, %v4234_v36  ;;  %v4237_v18 = vpop.f32.mrb[114].mxu0  ;;  %v4335_v20 = vpop.f32.mrb[113].mxu1 }
 0x1dd   : > { %v4238_v5 = vpop.f32.mrb[115].mxu0  ;;  %v4336_v26 = vadd.f32 %v4335_v20, %v4334_v63  ;;  %v4337_v16 = vpop.f32.mrb[114].mxu1 }
 0x1de   : > { %v2749_v47 = vadd.f32 %v4236_v0, %v5468_v15  ;;  %v4239_v6 = vadd.f32 %v4238_v5, %v4237_v18  ;;  %v4338_v7 = vpop.f32.mrb[115].mxu1 }
 0x1df   : > { %v4339_v27 = vadd.f32 %v4338_v7, %v4337_v16 }
 0x1e0   : > { %v2752_v50 = vadd.f32 %v4239_v6, %v5472_v21  ;;  %v5578_v13 = vadd.f32 %v4336_v26, %v2749_v47 }
 0x1e2   : > { %v4240_v41 = vpop.f32.mrb[116].mxu0  ;;  %v5580_v23 = vadd.f32 %v4339_v27, %v2752_v50 }
 0x1e3   : > { %v4241_v48 = vpop.f32.mrb[117].mxu0  ;;  %v4340_v24 = vpop.f32.mrb[116].mxu1 }
 0x1e4   : > { %v4242_v25 = vadd.f32 %v4241_v48, %v4240_v41  ;;  %v4243_v43 = vpop.f32.mrb[118].mxu0  ;;  %v4341_v49 = vpop.f32.mrb[117].mxu1 }
 0x1e5   : > { %v4244_v31 = vpop.f32.mrb[119].mxu0  ;;  %v4342_v53 = vadd.f32 %v4341_v49, %v4340_v24  ;;  %v4343_v35 = vpop.f32.mrb[118].mxu1 }
 0x1e6   : > { %v2757_v15 = vadd.f32 %v4242_v25, %v5481_v51  ;;  %v4245_v14 = vadd.f32 %v4244_v31, %v4243_v43  ;;  %v4344_v60 = vpop.f32.mrb[119].mxu1 }
 0x1e7   : > { %v4345_v54 = vadd.f32 %v4344_v60, %v4343_v35 }
 0x1e8   : > { %v2760_v21 = vadd.f32 %v4245_v14, %v5486_v52  ;;  %v5584_v40 = vadd.f32 %v4342_v53, %v2757_v15 }
 0x1ea   : > { %v4246_v2 = vpop.f32.mrb[120].mxu0  ;;  %v5586_v44 = vadd.f32 %v4345_v54, %v2760_v21 }
 0x1eb   : > { %v4247_v11 = vpop.f32.mrb[121].mxu0  ;;  %v4346_v45 = vpop.f32.mrb[120].mxu1 }
 0x1ec   : > { %v4248_v55 = vadd.f32 %v4247_v11, %v4246_v2  ;;  %v4249_v3 = vpop.f32.mrb[122].mxu0  ;;  %v4347_v12 = vpop.f32.mrb[121].mxu1 }
 0x1ed   : > { %v4250_v36 = vpop.f32.mrb[123].mxu0  ;;  %v4348_v19 = vadd.f32 %v4347_v12, %v4346_v45  ;;  %v4349_v63 = vpop.f32.mrb[122].mxu1 }
 0x1ee   : > { %v2765_v51 = vadd.f32 %v4248_v55, %v5495_v22  ;;  %v4251_v0 = vadd.f32 %v4250_v36, %v4249_v3  ;;  %v4350_v18 = vpop.f32.mrb[123].mxu1 }
 0x1ef   : > { %v4351_v20 = vadd.f32 %v4350_v18, %v4349_v63 }
 0x1f0   : > { %v2768_v52 = vadd.f32 %v4251_v0, %v5500_v34  ;;  %v5590_v5 = vadd.f32 %v4348_v19, %v2765_v51 }
 0x1f2   : > { %v4252_v26 = vpop.f32.mrb[124].mxu0  ;;  %v5592_v16 = vadd.f32 %v4351_v20, %v2768_v52 }
 0x1f3   : > { %v4253_v47 = vpop.f32.mrb[125].mxu0  ;;  %v4352_v6 = vpop.f32.mrb[124].mxu1 }
 0x1f4   : > { %v4254_v7 = vadd.f32 %v4253_v47, %v4252_v26  ;;  %v4255_v27 = vpop.f32.mrb[126].mxu0  ;;  %v4353_v50 = vpop.f32.mrb[125].mxu1 }
 0x1f5   : > { %v4256_v41 = vpop.f32.mrb[127].mxu0  ;;  %v4354_v48 = vadd.f32 %v4353_v50, %v4352_v6  ;;  %v4355_v24 = vpop.f32.mrb[126].mxu1 }
 0x1f6   : > { %v2773_v22 = vadd.f32 %v4254_v7, %v5508_v46  ;;  %v4257_v25 = vadd.f32 %v4256_v41, %v4255_v27  ;;  %v4356_v43 = vpop.f32.mrb[127].mxu1 }
 0x1f7   : > { %v4357_v49 = vadd.f32 %v4356_v43, %v4355_v24 }
 0x1f8   : > { %v2776_v34 = vadd.f32 %v4257_v25, %v5512_v56  ;;  %v5596_v31 = vadd.f32 %v4354_v48, %v2773_v22 }
 0x1fa   : > { %v4258_v53 = vpop.f32.mrb[128].mxu0  ;;  %v5598_v35 = vadd.f32 %v4357_v49, %v2776_v34 }
 0x1fb   : > { %v4259_v15 = vpop.f32.mrb[129].mxu0  ;;  %v4358_v14 = vpop.f32.mrb[128].mxu1 }
 0x1fc   : > { %v4260_v60 = vadd.f32 %v4259_v15, %v4258_v53  ;;  %v4261_v54 = vpop.f32.mrb[130].mxu0  ;;  %v4359_v21 = vpop.f32.mrb[129].mxu1 }
 0x1fd   : > { %v4262_v2 = vpop.f32.mrb[131].mxu0  ;;  %v4360_v11 = vadd.f32 %v4359_v21, %v4358_v14  ;;  %v4361_v45 = vpop.f32.mrb[130].mxu1 }
 0x1fe   : > { %v2781_v46 = vadd.f32 %v4260_v60, %v5518_v8  ;;  %v4263_v55 = vadd.f32 %v4262_v2, %v4261_v54  ;;  %v4362_v3 = vpop.f32.mrb[131].mxu1 }
 0x1ff   : > { %v4363_v12 = vadd.f32 %v4362_v3, %v4361_v45 }
 0x200   : > { %v2784_v56 = vadd.f32 %v4263_v55, %v5520_v9  ;;  %v5602_v36 = vadd.f32 %v4360_v11, %v2781_v46 }
 0x202   : > { %v4264_v19 = vpop.f32.mrb[132].mxu0  ;;  %v5604_v63 = vadd.f32 %v4363_v12, %v2784_v56 }
 0x203   : > { %v4265_v51 = vpop.f32.mrb[133].mxu0  ;;  %v4364_v0 = vpop.f32.mrb[132].mxu1 }
 0x204   : > { %v4266_v18 = vadd.f32 %v4265_v51, %v4264_v19  ;;  %v4267_v20 = vpop.f32.mrb[134].mxu0  ;;  %v4365_v52 = vpop.f32.mrb[133].mxu1 }
 0x205   : > { %v4268_v26 = vpop.f32.mrb[135].mxu0  ;;  %v4366_v47 = vadd.f32 %v4365_v52, %v4364_v0  ;;  %v4367_v6 = vpop.f32.mrb[134].mxu1 }
 0x206   : > { %v2789_v8 = vadd.f32 %v4266_v18, %v5524_v32  ;;  %v4269_v7 = vadd.f32 %v4268_v26, %v4267_v20  ;;  %v4368_v27 = vpop.f32.mrb[135].mxu1 }
 0x207   : > { %v4369_v50 = vadd.f32 %v4368_v27, %v4367_v6 }
 0x208   : > { %v2792_v9 = vadd.f32 %v4269_v7, %v5526_v33  ;;  %v5608_v41 = vadd.f32 %v4366_v47, %v2789_v8 }
 0x20a   : > { %v4270_v48 = vpop.f32.mrb[136].mxu0  ;;  %v5610_v24 = vadd.f32 %v4369_v50, %v2792_v9 }
 0x20b   : > { %v4271_v22 = vpop.f32.mrb[137].mxu0  ;;  %v4370_v25 = vpop.f32.mrb[136].mxu1 }
 0x20c   : > { %v4272_v43 = vadd.f32 %v4271_v22, %v4270_v48  ;;  %v4273_v49 = vpop.f32.mrb[138].mxu0  ;;  %v4371_v34 = vpop.f32.mrb[137].mxu1 }
 0x20d   : > { %v4274_v53 = vpop.f32.mrb[139].mxu0  ;;  %v4372_v15 = vadd.f32 %v4371_v34, %v4370_v25  ;;  %v4373_v14 = vpop.f32.mrb[138].mxu1 }
 0x20e   : > { %v2797_v32 = vadd.f32 %v4272_v43, %v5530_v1  ;;  %v4275_v60 = vadd.f32 %v4274_v53, %v4273_v49  ;;  %v4374_v54 = vpop.f32.mrb[139].mxu1 }
 0x20f   : > { %v4375_v21 = vadd.f32 %v4374_v54, %v4373_v14 }
 0x210   : > { %v2800_v33 = vadd.f32 %v4275_v60, %v5532_v58  ;;  %v5614_v2 = vadd.f32 %v4372_v15, %v2797_v32 }
 0x212   : > { %v4276_v11 = vpop.f32.mrb[140].mxu0  ;;  %v5616_v45 = vadd.f32 %v4375_v21, %v2800_v33 }
 0x213   : > { %v4277_v46 = vpop.f32.mrb[141].mxu0  ;;  %v4376_v55 = vpop.f32.mrb[140].mxu1 }
 0x214   : > { %v4278_v3 = vadd.f32 %v4277_v46, %v4276_v11  ;;  %v4279_v12 = vpop.f32.mrb[142].mxu0  ;;  %v4377_v56 = vpop.f32.mrb[141].mxu1 }
 0x215   : > { %v4280_v19 = vpop.f32.mrb[143].mxu0  ;;  %v4378_v51 = vadd.f32 %v4377_v56, %v4376_v55  ;;  %v4379_v0 = vpop.f32.mrb[142].mxu1 }
 0x216   : > { %v2805_v1 = vadd.f32 %v4278_v3, %v5536_v28  ;;  %v4281_v18 = vadd.f32 %v4280_v19, %v4279_v12  ;;  %v4380_v20 = vpop.f32.mrb[143].mxu1 }
 0x217   : > { %v4381_v52 = vadd.f32 %v4380_v20, %v4379_v0 }
 0x218   : > { %v2808_v58 = vadd.f32 %v4281_v18, %v5538_v29  ;;  %v5620_v26 = vadd.f32 %v4378_v51, %v2805_v1 }
 0x21a   : > { %v4282_v47 = vpop.f32.mrb[144].mxu0  ;;  %v5622_v6 = vadd.f32 %v4381_v52, %v2808_v58 }
 0x21b   : > { %v4283_v8 = vpop.f32.mrb[145].mxu0  ;;  %v4382_v7 = vpop.f32.mrb[144].mxu1 }
 0x21c   : > { %v4284_v27 = vadd.f32 %v4283_v8, %v4282_v47  ;;  %v4285_v50 = vpop.f32.mrb[146].mxu0  ;;  %v4383_v9 = vpop.f32.mrb[145].mxu1 }
 0x21d   : > { %v4286_v48 = vpop.f32.mrb[147].mxu0  ;;  %v4384_v22 = vadd.f32 %v4383_v9, %v4382_v7  ;;  %v4385_v25 = vpop.f32.mrb[146].mxu1 }
 0x21e   : > { %v2813_v28 = vadd.f32 %v4284_v27, %v5542_v57  ;;  %v4287_v43 = vadd.f32 %v4286_v48, %v4285_v50  ;;  %v4386_v49 = vpop.f32.mrb[147].mxu1 }
 0x21f   : > { %v4387_v34 = vadd.f32 %v4386_v49, %v4385_v25 }
 0x220   : > { %v2816_v29 = vadd.f32 %v4287_v43, %v5544_v61  ;;  %v5626_v53 = vadd.f32 %v4384_v22, %v2813_v28 }
 0x222   : > { %v4288_v15 = vpop.f32.mrb[148].mxu0  ;;  %v5628_v14 = vadd.f32 %v4387_v34, %v2816_v29 }
 0x223   : > { %v4289_v32 = vpop.f32.mrb[149].mxu0  ;;  %v4388_v60 = vpop.f32.mrb[148].mxu1 }
 0x224   : > { %v4290_v54 = vadd.f32 %v4289_v32, %v4288_v15  ;;  %v4291_v21 = vpop.f32.mrb[150].mxu0  ;;  %v4389_v33 = vpop.f32.mrb[149].mxu1 }
 0x225   : > { %v4292_v11 = vpop.f32.mrb[151].mxu0  ;;  %v4390_v46 = vadd.f32 %v4389_v33, %v4388_v60  ;;  %v4391_v55 = vpop.f32.mrb[150].mxu1 }
 0x226   : > { %v2821_v57 = vadd.f32 %v4290_v54, %v5548_v42  ;;  %v4293_v3 = vadd.f32 %v4292_v11, %v4291_v21  ;;  %v4392_v12 = vpop.f32.mrb[151].mxu1 }
 0x227   : > { %v4393_v56 = vadd.f32 %v4392_v12, %v4391_v55 }
 0x228   : > { %v2824_v61 = vadd.f32 %v4293_v3, %v5550_v10  ;;  %v5632_v19 = vadd.f32 %v4390_v46, %v2821_v57 }
 0x22a   : > { %v4294_v51 = vpop.f32.mrb[152].mxu0  ;;  %v5634_v0 = vadd.f32 %v4393_v56, %v2824_v61 }
 0x22b   : > { %v4295_v1 = vpop.f32.mrb[153].mxu0  ;;  %v4394_v18 = vpop.f32.mrb[152].mxu1 }
 0x22c   : > { %v4296_v20 = vadd.f32 %v4295_v1, %v4294_v51  ;;  %v4297_v52 = vpop.f32.mrb[154].mxu0  ;;  %v4395_v58 = vpop.f32.mrb[153].mxu1 }
 0x22d   : > { %v4298_v47 = vpop.f32.mrb[155].mxu0  ;;  %v4396_v8 = vadd.f32 %v4395_v58, %v4394_v18  ;;  %v4397_v7 = vpop.f32.mrb[154].mxu1 }
 0x22e   : > { %v2829_v42 = vadd.f32 %v4296_v20, %v5554_v38  ;;  %v4299_v27 = vadd.f32 %v4298_v47, %v4297_v52  ;;  %v4398_v50 = vpop.f32.mrb[155].mxu1 }
 0x22f   : > { %v4399_v9 = vadd.f32 %v4398_v50, %v4397_v7 }
 0x230   : > { %v2832_v10 = vadd.f32 %v4299_v27, %v5556_v39  ;;  %v5638_v48 = vadd.f32 %v4396_v8, %v2829_v42 }
 0x232   : > { %v4300_v22 = vpop.f32.mrb[156].mxu0  ;;  %v5640_v25 = vadd.f32 %v4399_v9, %v2832_v10 }
 0x233   : > { %v4301_v28 = vpop.f32.mrb[157].mxu0  ;;  %v4400_v43 = vpop.f32.mrb[156].mxu1 }
 0x234   : > { %v4302_v49 = vadd.f32 %v4301_v28, %v4300_v22  ;;  %v4303_v34 = vpop.f32.mrb[158].mxu0  ;;  %v4401_v29 = vpop.f32.mrb[157].mxu1 }
 0x235   : > { %v4304_v15 = vpop.f32.mrb[159].mxu0  ;;  %v4402_v32 = vadd.f32 %v4401_v29, %v4400_v43  ;;  %v4403_v60 = vpop.f32.mrb[158].mxu1 }
 0x236   : > { %v2837_v38 = vadd.f32 %v4302_v49, %v5560_v4  ;;  %v4305_v54 = vadd.f32 %v4304_v15, %v4303_v34  ;;  %v4404_v21 = vpop.f32.mrb[159].mxu1 }
 0x237   : > { %v4405_v33 = vadd.f32 %v4404_v21, %v4403_v60 }
 0x238   : > { %v2840_v39 = vadd.f32 %v4305_v54, %v5562_v37  ;;  %v5644_v11 = vadd.f32 %v4402_v32, %v2837_v38 }
 0x23a   : > { %v4306_v46 = vpop.f32.mrb[160].mxu0  ;;  %v5646_v55 = vadd.f32 %v4405_v33, %v2840_v39 }
 0x23b   : > { %v4307_v57 = vpop.f32.mrb[161].mxu0  ;;  %v4406_v3 = vpop.f32.mrb[160].mxu1 }
 0x23c   : > { %v4308_v12 = vadd.f32 %v4307_v57, %v4306_v46  ;;  %v4309_v56 = vpop.f32.mrb[162].mxu0  ;;  %v4407_v61 = vpop.f32.mrb[161].mxu1 }
 0x23d   : > { %v4310_v51 = vpop.f32.mrb[163].mxu0  ;;  %v4408_v1 = vadd.f32 %v4407_v61, %v4406_v3  ;;  %v4409_v18 = vpop.f32.mrb[162].mxu1 }
 0x23e   : > { %v2845_v4 = vadd.f32 %v4308_v12, %v5566_v59  ;;  %v4311_v20 = vadd.f32 %v4310_v51, %v4309_v56  ;;  %v4410_v52 = vpop.f32.mrb[163].mxu1 }
 0x23f   : > { %v4411_v58 = vadd.f32 %v4410_v52, %v4409_v18 }
 0x240   : > { %v2848_v37 = vadd.f32 %v4311_v20, %v5568_v30  ;;  %v5650_v47 = vadd.f32 %v4408_v1, %v2845_v4 }
 0x242   : > { %v4312_v8 = vpop.f32.mrb[164].mxu0  ;;  %v5652_v7 = vadd.f32 %v4411_v58, %v2848_v37 }
 0x243   : > { %v4313_v42 = vpop.f32.mrb[165].mxu0  ;;  %v4412_v27 = vpop.f32.mrb[164].mxu1 }
 0x244   : > { %v4314_v50 = vadd.f32 %v4313_v42, %v4312_v8  ;;  %v4315_v9 = vpop.f32.mrb[166].mxu0  ;;  %v4413_v10 = vpop.f32.mrb[165].mxu1 }
 0x245   : > { %v4316_v22 = vpop.f32.mrb[167].mxu0  ;;  %v4414_v28 = vadd.f32 %v4413_v10, %v4412_v27  ;;  %v4415_v43 = vpop.f32.mrb[166].mxu1 }
 0x246   : > { %v2853_v59 = vadd.f32 %v4314_v50, %v5572_v62  ;;  %v4317_v49 = vadd.f32 %v4316_v22, %v4315_v9  ;;  %v4416_v34 = vpop.f32.mrb[167].mxu1 }
 0x247   : > { %v4417_v29 = vadd.f32 %v4416_v34, %v4415_v43 }
 0x248   : > { %v2856_v30 = vadd.f32 %v4317_v49, %v5574_v17  ;;  %v5656_v15 = vadd.f32 %v4414_v28, %v2853_v59 }
 0x24a   : > { %v4446_v32 = vpop.f32.mrb[168].mxu0  ;;  %v5658_v60 = vadd.f32 %v4417_v29, %v2856_v30 }
 0x24b   : > { %v3047_v38 = vadd.f32 %v4446_v32, %v5584_v40  ;;  %v4462_v54 = vpop.f32.mrb[168].mxu1  ;;  %v3038_v21 = vpop.f32.mrb[169].mxu0 }
 0x24c   : > { %v3111_v33 = vadd.f32 %v4462_v54, %v5632_v19  ;;  %v3039_v39 = vadd.f32 %v3038_v21, %v5578_v13  ;;  %v3102_v62 = vpop.f32.mrb[169].mxu1  ;;  %v4447_v46 = vpop.f32.mrb[170].mxu0 }
 0x24d   : > { %v3103_v57 = vadd.f32 %v3102_v62, %v5626_v53  ;;  %v3050_v17 = vadd.f32 %v4447_v46, %v5586_v44  ;;  %v4463_v3 = vpop.f32.mrb[170].mxu1  ;;  %v3041_v12 = vpop.f32.mrb[171].mxu0  ;;  %v3151_v51 = vmax.f32 %v3047_v38, 0.0 }
 0x24e   : > { %v3114_v56 = vadd.f32 %v4463_v3, %v5634_v0  ;;  %v3042_v61 = vadd.f32 %v3041_v12, %v5580_v23  ;;  %v3105_v40 = vpop.f32.mrb[171].mxu1  ;;  %v3167_v18 = vmax.f32 %v3111_v33, 0.0  ;;  %v3149_v13 = vmax.f32 %v3039_v39, 0.0 }
 0x24f   : > { %v3152_v1 = vmax.f32 %v3050_v17, 0.0  ;;  %v3106_v19 = vadd.f32 %v3105_v40, %v5628_v14  ;;  %v3165_v0 = vmax.f32 %v3103_v57, 0.0 }
 0x250   : > { %v3168_v44 = vmax.f32 %v3114_v56, 0.0  ;;  %v3150_v53 = vmax.f32 %v3042_v61, 0.0 }
 0x251   : > { %v3743_v4 = vpack.c.bf16 %v3152_v1, %v3151_v51  ;;  %v3166_v23 = vmax.f32 %v3106_v19, 0.0 }
 0x252   : > { %v3783_v20 = vpack.c.bf16 %v3168_v44, %v3167_v18  ;;  %v3738_v52 = vpack.c.bf16 %v3150_v53, %v3149_v13  ;;  %v4450_v58 = vpop.f32.mrb[172].mxu0 }
 0x253   : > { %3805 = vst [vmem:[%s5672_s28 + $0x8] sm:$0xff] %v3743_v4   ;;  %v3778_v14 = vpack.c.bf16 %v3166_v23, %v3165_v0  ;;  %v3063_v37 = vadd.f32 %v4450_v58, %v5596_v31  ;;  %v4466_v8 = vpop.f32.mrb[172].mxu1  ;;  %v3054_v42 = vpop.f32.mrb[173].mxu0 }
 0x254   : > { %3813 = vst [vmem:[%s5672_s28 + $0x48] sm:$0xff] %v3783_v20   ;;  %3739 = vst [vmem:[%s5672_s28] sm:$0xff] %v3738_v52   ;;  %v3127_v27 = vadd.f32 %v4466_v8, %v5644_v11  ;;  %v3055_v50 = vadd.f32 %v3054_v42, %v5590_v5  ;;  %v3118_v9 = vpop.f32.mrb[173].mxu1  ;;  %v4451_v10 = vpop.f32.mrb[174].mxu0 }
 0x255   : > { %3812 = vst [vmem:[%s5672_s28 + $0x40] sm:$0xff] %v3778_v14   ;;  %v3119_v22 = vadd.f32 %v3118_v9, %v5638_v48  ;;  %v3066_v28 = vadd.f32 %v4451_v10, %v5598_v35  ;;  %v4467_v43 = vpop.f32.mrb[174].mxu1  ;;  %v3057_v59 = vpop.f32.mrb[175].mxu0  ;;  %v3155_v29 = vmax.f32 %v3063_v37, 0.0 }
 0x256   : > { %v3130_v49 = vadd.f32 %v4467_v43, %v5646_v55  ;;  %v3058_v31 = vadd.f32 %v3057_v59, %v5592_v16  ;;  %v3121_v34 = vpop.f32.mrb[175].mxu1  ;;  %v3171_v5 = vmax.f32 %v3127_v27, 0.0  ;;  %v3153_v32 = vmax.f32 %v3055_v50, 0.0 }
 0x257   : > { %v3156_v30 = vmax.f32 %v3066_v28, 0.0  ;;  %v3122_v11 = vadd.f32 %v3121_v34, %v5640_v25  ;;  %v3169_v54 = vmax.f32 %v3119_v22, 0.0 }
 0x258   : > { %v3172_v38 = vmax.f32 %v3130_v49, 0.0  ;;  %v3154_v48 = vmax.f32 %v3058_v31, 0.0 }
 0x259   : > { %v3753_v35 = vpack.c.bf16 %v3156_v30, %v3155_v29  ;;  %v3170_v21 = vmax.f32 %v3122_v11, 0.0 }
 0x25a   : > { %v3793_v33 = vpack.c.bf16 %v3172_v38, %v3171_v5  ;;  %v3748_v55 = vpack.c.bf16 %v3154_v48, %v3153_v32  ;;  %v4454_v39 = vpop.f32.mrb[176].mxu0 }
 0x25b   : > { %3807 = vst [vmem:[%s5672_s28 + $0x18] sm:$0xff] %v3753_v35   ;;  %v3788_v16 = vpack.c.bf16 %v3170_v21, %v3169_v54  ;;  %v3079_v62 = vadd.f32 %v4454_v39, %v5608_v41  ;;  %v4470_v46 = vpop.f32.mrb[176].mxu1  ;;  %v3070_v57 = vpop.f32.mrb[177].mxu0 }
 0x25c   : > { %3815 = vst [vmem:[%s5672_s28 + $0x58] sm:$0xff] %v3793_v33   ;;  %3806 = vst [vmem:[%s5672_s28 + $0x10] sm:$0xff] %v3748_v55   ;;  %v3143_v25 = vadd.f32 %v4470_v46, %v5656_v15  ;;  %v3071_v17 = vadd.f32 %v3070_v57, %v5602_v36  ;;  %v3134_v3 = vpop.f32.mrb[177].mxu1  ;;  %v4455_v12 = vpop.f32.mrb[178].mxu0 }
 0x25d   : > { %3814 = vst [vmem:[%s5672_s28 + $0x50] sm:$0xff] %v3788_v16   ;;  %v3135_v56 = vadd.f32 %v3134_v3, %v5650_v47  ;;  %v3082_v61 = vadd.f32 %v4455_v12, %v5610_v24  ;;  %v4471_v40 = vpop.f32.mrb[178].mxu1  ;;  %v3073_v51 = vpop.f32.mrb[179].mxu0  ;;  %v3159_v18 = vmax.f32 %v3079_v62, 0.0 }
 0x25e   : > { %v3146_v1 = vadd.f32 %v4471_v40, %v5658_v60  ;;  %v3074_v41 = vadd.f32 %v3073_v51, %v5604_v63  ;;  %v3137_v19 = vpop.f32.mrb[179].mxu1  ;;  %v3175_v15 = vmax.f32 %v3143_v25, 0.0  ;;  %v3157_v44 = vmax.f32 %v3071_v17, 0.0 }
 0x25f   : > { %v3160_v13 = vmax.f32 %v3082_v61, 0.0  ;;  %v3138_v36 = vadd.f32 %v3137_v19, %v5652_v7  ;;  %v3173_v24 = vmax.f32 %v3135_v56, 0.0 }
 0x260   : > { %v3176_v53 = vmax.f32 %v3146_v1, 0.0  ;;  %v3158_v47 = vmax.f32 %v3074_v41, 0.0 }
 0x261   : > { %v3763_v0 = vpack.c.bf16 %v3160_v13, %v3159_v18  ;;  %v3174_v4 = vmax.f32 %v3138_v36, 0.0 }
 0x262   : > { %v3803_v23 = vpack.c.bf16 %v3176_v53, %v3175_v15  ;;  %v3758_v60 = vpack.c.bf16 %v3158_v47, %v3157_v44  ;;  %v4458_v20 = vpop.f32.mrb[180].mxu0 }
 0x263   : > { %3809 = vst [vmem:[%s5672_s28 + $0x28] sm:$0xff] %v3763_v0   ;;  %v3798_v63 = vpack.c.bf16 %v3174_v4, %v3173_v24  ;;  %v3095_v52 = vadd.f32 %v4458_v20, %v5620_v26  ;;  %v3086_v58 = vpop.f32.mrb[181].mxu0 }
 0x264   : > { %3817 = vst [vmem:[%s5672_s28 + $0x68] sm:$0xff] %v3803_v23   ;;  %3808 = vst [vmem:[%s5672_s28 + $0x20] sm:$0xff] %v3758_v60   ;;  %v3087_v7 = vadd.f32 %v3086_v58, %v5614_v2  ;;  %v4459_v14 = vpop.f32.mrb[182].mxu0 }
 0x265   : > { %3816 = vst [vmem:[%s5672_s28 + $0x60] sm:$0xff] %v3798_v63   ;;  %v3098_v37 = vadd.f32 %v4459_v14, %v5622_v6  ;;  %v3089_v8 = vpop.f32.mrb[183].mxu0  ;;  %v3163_v27 = vmax.f32 %v3095_v52, 0.0 }
 0x266   : > { %v3090_v42 = vadd.f32 %v3089_v8, %v5616_v45  ;;  %v3161_v9 = vmax.f32 %v3087_v7, 0.0 }
 0x267   : > { %v3164_v50 = vmax.f32 %v3098_v37, 0.0 }
 0x268   : > { %v3162_v10 = vmax.f32 %v3090_v42, 0.0 }
 0x269   : > { %v3773_v22 = vpack.c.bf16 %v3164_v50, %v3163_v27 }
 0x26a   : > { %v3768_v26 = vpack.c.bf16 %v3162_v10, %v3161_v9 }
 0x26b   : > { %3811 = vst [vmem:[%s5672_s28 + $0x38] sm:$0xff] %v3773_v22  }
 0x26c   : > { %3810 = vst [vmem:[%s5672_s28 + $0x30] sm:$0xff] %v3768_v26  }
 0x26d PF: > { %s13_s12 = sadd.s32 1, %s4861_s12  }
 0x26e   : > { %p10_p4 = scmp.ge.s32.totalorder %s13_s12, 4  }
 0x270   :  { %12 = sbr.rel (!%p10_p4) target bundleno = 1 (0x1), region = 62 }

// kernel: _lambda_.7
= control target key start
LH: loop header
LB: loop body
LE: loop exit
PB: predicated region body
PF: predicated region fallthrough
CT: control target
= control target key end

     0   :  { %vm3589_vm0 = vcmask 1040384   ;;  %vm3590_vm1 = vsmask.f32 256  ;;  %s6341_s1 = inlined_call_operand.vmem [shape: bf16[3200,128], index: 1, kind: input, shape index: {}]   ;;  %s6342_s0 = inlined_call_operand.vmem [shape: bf16[81,3200], index: 0, kind: input, shape index: {}]   ;;  %s6343_s2 = inlined_call_operand.vmem [shape: f32[1,128], index: 2, kind: input, shape index: {}]   ;;  %s6344_s3 = inlined_call_operand.vmem [shape: bf16[81,128], index: 3, kind: output, shape index: {}]  }
   0x1   :  { %v4683_v0 = vld [vmem:[%s6341_s1 + $0x40] sm:$0xff]   ;;  %v4687_v4 = vld [vmem:[%s6341_s1 + $0x48] sm:$0xff]   ;;  %v4691_v8 = vld [vmem:[%s6341_s1 + $0x50] sm:$0xff]  }
   0x2   :  { %v4684_v1 = vld [vmem:[%s6341_s1 + $0xc0] sm:$0xff]   ;;  %4001 = vmatprep.subr.bf16.mxu0 %v4683_v0  ;;  %v4688_v5 = vld [vmem:[%s6341_s1 + $0xc8] sm:$0xff]   ;;  %v4692_v9 = vld [vmem:[%s6341_s1 + $0xd0] sm:$0xff]  }
   0x3   :  { %v4685_v2 = vld [vmem:[%s6341_s1] sm:$0xff]   ;;  %4053 = vmatprep.subr.bf16.mxu1 %v4684_v1  ;;  %v4689_v6 = vld [vmem:[%s6341_s1 + $0x8] sm:$0xff]   ;;  %v4693_v10 = vld [vmem:[%s6341_s1 + $0x10] sm:$0xff]  }
   0x4   :  { %v4686_v3 = vld [vmem:[%s6341_s1 + $0x80] sm:$0xff]   ;;  %4002 = vmatpush3.bf16.msra.mxu0 %v4685_v2  ;;  %v4690_v7 = vld [vmem:[%s6341_s1 + $0x88] sm:$0xff]   ;;  %v4694_v11 = vld [vmem:[%s6341_s1 + $0x90] sm:$0xff]  }
   0x5   :  { %4054 = vmatpush3.bf16.msra.mxu1 %v4686_v3  ;;  %4003 = vmatprep.subr.bf16.mxu0 %v4687_v4  ;;  %v4695_v12 = vld [vmem:[%s6341_s1 + $0x58] sm:$0xff]   ;;  %v4699_v16 = vld [vmem:[%s6341_s1 + $0x60] sm:$0xff]   ;;  %v4703_v20 = vld [vmem:[%s6341_s1 + $0x68] sm:$0xff]  }
   0x6   :  { %4055 = vmatprep.subr.bf16.mxu1 %v4688_v5  ;;  %v4696_v13 = vld [vmem:[%s6341_s1 + $0xd8] sm:$0xff]   ;;  %v4700_v17 = vld [vmem:[%s6341_s1 + $0xe0] sm:$0xff]   ;;  %v4704_v21 = vld [vmem:[%s6341_s1 + $0xe8] sm:$0xff]  }
   0x7   :  { %v4697_v14 = vld [vmem:[%s6341_s1 + $0x18] sm:$0xff]   ;;  %v4701_v18 = vld [vmem:[%s6341_s1 + $0x20] sm:$0xff]   ;;  %v4705_v22 = vld [vmem:[%s6341_s1 + $0x28] sm:$0xff]  }
   0x8   :  { %4004 = vmatpush3.bf16.msra.mxu0 %v4689_v6  ;;  %v4698_v15 = vld [vmem:[%s6341_s1 + $0x98] sm:$0xff]   ;;  %v4702_v19 = vld [vmem:[%s6341_s1 + $0xa0] sm:$0xff]   ;;  %v4706_v23 = vld [vmem:[%s6341_s1 + $0xa8] sm:$0xff]  }
   0x9   :  { %4056 = vmatpush3.bf16.msra.mxu1 %v4690_v7  ;;  %4005 = vmatprep.subr.bf16.mxu0 %v4691_v8  ;;  %v4707_v24 = vld [vmem:[%s6341_s1 + $0x70] sm:$0xff]   ;;  %v4711_v28 = vld [vmem:[%s6341_s1 + $0x78] sm:$0xff]   ;;  %v4715_v32 = vld [vmem:[%s6342_s0] ss:$100 sps:$4 sm:$0xff]  }
   0xa   :  { %4057 = vmatprep.subr.bf16.mxu1 %v4692_v9  ;;  %v4708_v25 = vld [vmem:[%s6341_s1 + $0xf0] sm:$0xff]   ;;  %v4712_v29 = vld [vmem:[%s6341_s1 + $0xf8] sm:$0xff]   ;;  %v4717_v33 = vld [vmem:[%s6342_s0 + $0x4] ss:$100 sps:$4 sm:$0xff]  }
   0xb   :  { %v4709_v26 = vld [vmem:[%s6341_s1 + $0x30] sm:$0xff]   ;;  %v4713_v30 = vld [vmem:[%s6341_s1 + $0x38] sm:$0xff]   ;;  %v4718_v34 = vld [vmem:[%s6342_s0 + $0x8] ss:$100 sps:$4 sm:$0xff]   ;;  %2515 = vmatprep.mubr.bf16.mxu0 %v4717_v33 }
   0xc   :  { %4006 = vmatpush3.bf16.msra.mxu0 %v4693_v10  ;;  %v4710_v27 = vld [vmem:[%s6341_s1 + $0xb0] sm:$0xff]   ;;  %v4714_v31 = vld [vmem:[%s6341_s1 + $0xb8] sm:$0xff]   ;;  %v4721_v36 = vld [vmem:[%s6341_s1 + $0x1c0] sm:$0xff]  }
   0xd   :  { %4058 = vmatpush3.bf16.msra.mxu1 %v4694_v11  ;;  %4007 = vmatprep.subr.bf16.mxu0 %v4695_v12  ;;  %v4720_v35 = vld [vmem:[%s6342_s0 + $0xc] ss:$100 sps:$4 sm:$0xff]   ;;  %v4722_v37 = vld [vmem:[%s6341_s1 + $0x180] sm:$0xff]   ;;  %v4726_v40 = vld [vmem:[%s6342_s0 + $0xd4] ss:$100 sps:$4 sm:$0xff]  }
   0xe   :  { %4059 = vmatprep.subr.bf16.mxu1 %v4696_v13  ;;  %2595 = vmatprep.mubr.bf16.mxu1 %v4720_v35  ;;  %v4723_v38 = vld [vmem:[%s6341_s1 + $0x1c8] sm:$0xff]   ;;  %v4730_v43 = vld [vmem:[%s6342_s0 + $0xd0] ss:$100 sps:$4 sm:$0xff]   ;;  %v4731_v44 = vld [vmem:[%s6341_s1 + $0x140] sm:$0xff]  }
   0xf   :  { %v4724_v39 = vld [vmem:[%s6342_s0 + $0xcc] ss:$100 sps:$4 sm:$0xff]   ;;  %v4732_v45 = vld [vmem:[%s6341_s1 + $0x100] sm:$0xff]   ;;  %v4736_v49 = vld [vmem:[%s6342_s0 + $0x194] ss:$100 sps:$4 sm:$0xff]  }
  0x10   :  { %4008 = vmatpush3.bf16.msra.mxu0 %v4697_v14  ;;  %v4728_v41 = vld [vmem:[%s6341_s1 + $0x188] sm:$0xff]   ;;  %v4733_v46 = vld [vmem:[%s6341_s1 + $0x1d0] sm:$0xff]   ;;  %v4738_v50 = vld [vmem:[%s6342_s0 + $0x19c] ss:$100 sps:$4 sm:$0xff]  }
  0x11   :  { %4060 = vmatpush3.bf16.msra.mxu1 %v4698_v15  ;;  %4009 = vmatprep.subr.bf16.mxu0 %v4699_v16  ;;  %v4729_v42 = vld [vmem:[%s6342_s0 + $0xc8] ss:$100 sps:$4 sm:$0xff]   ;;  %v4734_v47 = vld [vmem:[%s6341_s1 + $0x190] sm:$0xff]   ;;  %v4742_v53 = vld [vmem:[%s6342_s0 + $0x198] ss:$100 sps:$4 sm:$0xff]  }
  0x12   :  { %4061 = vmatprep.subr.bf16.mxu1 %v4700_v17  ;;  %v4735_v48 = vld [vmem:[%s6341_s1 + $0x148] sm:$0xff]   ;;  %v4741_v52 = vld [vmem:[%s6342_s0 + $0x190] ss:$100 sps:$4 sm:$0xff]   ;;  %v4743_v54 = vld [vmem:[%s6341_s1 + $0x1d8] sm:$0xff]  }
  0x13   :  { %v4740_v51 = vld [vmem:[%s6341_s1 + $0x108] sm:$0xff]   ;;  %v4744_v55 = vld [vmem:[%s6341_s1 + $0x198] sm:$0xff]   ;;  %v4745_v56 = vld [vmem:[%s6341_s1 + $0x150] sm:$0xff]  }
  0x14   :  { %4010 = vmatpush3.bf16.msra.mxu0 %v4701_v18  ;;  %v4746_v57 = vld [vmem:[%s6341_s1 + $0x110] sm:$0xff]   ;;  %v4747_v58 = vld [vmem:[%s6342_s0 + $0x25c] ss:$100 sps:$4 sm:$0xff]   ;;  %v4749_v59 = vld [vmem:[%s6342_s0 + $0x264] ss:$100 sps:$4 sm:$0xff]  }
  0x15   :  { %4062 = vmatpush3.bf16.msra.mxu1 %v4702_v19  ;;  %4011 = vmatprep.subr.bf16.mxu0 %v4703_v20  ;;  %v4751_v60 = vld [vmem:[%s6342_s0 + $0x258] ss:$100 sps:$4 sm:$0xff]   ;;  %v4752_v61 = vld [vmem:[%s6342_s0 + $0x260] ss:$100 sps:$4 sm:$0xff]   ;;  %v4757_v2 = vld [vmem:[%s6341_s1 + $0x1e8] sm:$0xff]  }
  0x16   :  { %4063 = vmatprep.subr.bf16.mxu1 %v4704_v21  ;;  %v4753_v62 = vld [vmem:[%s6341_s1 + $0x1e0] sm:$0xff]   ;;  %v4755_v0 = vld [vmem:[%s6341_s1 + $0x158] sm:$0xff]   ;;  %v4760_v4 = vld [vmem:[%s6342_s0 + $0x32c] ss:$100 sps:$4 sm:$0xff]  }
  0x17   :  { %v4754_v63 = vld [vmem:[%s6341_s1 + $0x1a0] sm:$0xff]   ;;  %v4756_v1 = vld [vmem:[%s6341_s1 + $0x118] sm:$0xff]   ;;  %v4762_v5 = vld [vmem:[%s6341_s1 + $0x1a8] sm:$0xff]  }
  0x18   :  { %4012 = vmatpush3.bf16.msra.mxu0 %v4705_v22  ;;  %v4758_v3 = vld [vmem:[%s6342_s0 + $0x324] ss:$100 sps:$4 sm:$0xff]   ;;  %v4768_v11 = vld [vmem:[%s6341_s1 + $0x1f0] sm:$0xff]   ;;  %v4777_v22 = vld [vmem:[%s6341_s1 + $0x1f8] sm:$0xff]  }
  0x19   :  { %4064 = vmatpush3.bf16.msra.mxu1 %v4706_v23  ;;  %4013 = vmatprep.subr.bf16.mxu0 %v4707_v24  ;;  %v4763_v6 = vld [vmem:[%s6342_s0 + $0x320] ss:$100 sps:$4 sm:$0xff]   ;;  %v4764_v7 = vld [vmem:[%s6342_s0 + $0x328] ss:$100 sps:$4 sm:$0xff]   ;;  %v4770_v13 = vld [vmem:[%s6341_s1 + $0x1b0] sm:$0xff]  }
  0x1a   :  { %4065 = vmatprep.subr.bf16.mxu1 %v4708_v25  ;;  %v4765_v8 = vld [vmem:[%s6341_s1 + $0x160] sm:$0xff]   ;;  %v4767_v10 = vld [vmem:[%s6341_s1 + $0x168] sm:$0xff]   ;;  %v146_v15 = vld [vmem:[%s6342_s0 + $0x3f0] sm:$0x11] }
  0x1b   :  { %v4766_v9 = vld [vmem:[%s6341_s1 + $0x120] sm:$0xff]   ;;  %v4769_v12 = vld [vmem:[%s6341_s1 + $0x128] sm:$0xff]   ;;  %v3728_v17 = vcombine.high %v146_v15, %v146_v15  ;;  %v4775_v19 = vld [vmem:[%s6341_s1 + $0x170] sm:$0xff]   ;;  %v3727_v20 = vcombine.low %v146_v15, %v146_v15 }
  0x1c   :  { %4014 = vmatpush3.bf16.msra.mxu0 %v4709_v26  ;;  %v145_v14 = vld [vmem:[%s6342_s0 + $0x3e8] sm:$0x11]  ;;  %v4776_v21 = vld [vmem:[%s6341_s1 + $0x130] sm:$0xff]   ;;  %v4778_v23 = vld [vmem:[%s6341_s1 + $0x1b8] sm:$0xff]  }
  0x1d   :  { %4066 = vmatpush3.bf16.msra.mxu1 %v4710_v27  ;;  %4015 = vmatprep.subr.bf16.mxu0 %v4711_v28  ;;  %v3726_v16 = vcombine.high %v145_v14, %v145_v14  ;;  %v3725_v18 = vcombine.low %v145_v14, %v145_v14  ;;  %v4779_v24 = vld [vmem:[%s6341_s1 + $0x178] sm:$0xff]   ;;  %v4781_v26 = vld [vmem:[%s6342_s0 + $0x10] ss:$100 sps:$4 sm:$0xff]   ;;  %v4794_v35 = vld [vmem:[%s6341_s1 + $0x288] sm:$0xff]  }
  0x1e   :  { %4067 = vmatprep.subr.bf16.mxu1 %v4712_v29  ;;  %v4780_v25 = vld [vmem:[%s6341_s1 + $0x138] sm:$0xff]   ;;  %vm3591_vm2 = vmand %vm3589_vm0, %vm3590_vm1 }
  0x1f   :  { %v4783_v27 = vld [vmem:[%s6342_s0 + $0x14] ss:$100 sps:$4 sm:$0xff]   ;;  %v4786_v29 = vld [vmem:[%s6342_s0 + $0x1c] ss:$100 sps:$4 sm:$0xff]  }
  0x20   :  { %4016 = vmatpush3.bf16.msra.mxu0 %v4713_v30  ;;  %v4784_v28 = vld [vmem:[%s6342_s0 + $0x18] ss:$100 sps:$4 sm:$0xff]   ;;  %v4787_v30 = vld [vmem:[%s6341_s1 + $0x2c0] sm:$0xff]  }
  0x21   :  { %4068 = vmatpush3.bf16.msra.mxu1 %v4714_v31  ;;  %4105 = vmatprep.subr.bf16.mxu0 %v4731_v44  ;;  %v4788_v31 = vld [vmem:[%s6341_s1 + $0x280] sm:$0xff]   ;;  %v4804_v44 = vld [vmem:[%s6342_s0 + $0x1ac] ss:$100 sps:$4 sm:$0xff]   ;;  %v4843_v15 = vld [vmem:[%s6341_s1 + $0x2f8] sm:$0xff]  }
  0x22   :  { %4157 = vmatprep.subr.bf16.mxu1 %v4721_v36  ;;  %v4790_v33 = vld [vmem:[%s6342_s0 + $0xdc] ss:$100 sps:$4 sm:$0xff]  }
  0x23   :  { %2516 = vmatmul.mubr.bf16.vlgmr.msra.gmra.mrb[0].mxu0 %v4715_v32  ;;  %v4789_v32 = vld [vmem:[%s6341_s1 + $0x2c8] sm:$0xff]   ;;  %v4795_v36 = vld [vmem:[%s6342_s0 + $0xd8] ss:$100 sps:$4 sm:$0xff]  }
  0x24   :  { %2596 = vmatmul.mubr.bf16.vlgmr.msra.gmra.mrb[0].mxu1 %v4718_v34  ;;  %2523 = vmatprep.mubr.bf16.mxu0 %v4724_v39  ;;  %v4792_v34 = vld [vmem:[%s6342_s0 + $0xe4] ss:$100 sps:$4 sm:$0xff]  }
  0x25   :  { %4158 = vmatpush3.bf16.msra.mxu1 %v4722_v37  ;;  %2603 = vmatprep.mubr.bf16.mxu1 %v4726_v40  ;;  %v4796_v37 = vld [vmem:[%s6342_s0 + $0xe0] ss:$100 sps:$4 sm:$0xff]   ;;  %v4799_v40 = vld [vmem:[%s6341_s1 + $0x2d0] sm:$0xff]  }
  0x26   :  { %4159 = vmatprep.subr.bf16.mxu1 %v4723_v38  ;;  %4106 = vmatpush3.bf16.msra.mxu0 %v4732_v45  ;;  %v4797_v38 = vld [vmem:[%s6341_s1 + $0x240] sm:$0xff]   ;;  %v4806_v45 = vld [vmem:[%s6341_s1 + $0x208] sm:$0xff]  }
  0x27   :  { %4107 = vmatprep.subr.bf16.mxu0 %v4735_v48  ;;  %v4798_v39 = vld [vmem:[%s6341_s1 + $0x200] sm:$0xff]   ;;  %v4809_v48 = vld [vmem:[%s6341_s1 + $0x2d8] sm:$0xff]  }
  0x29   :  { %4160 = vmatpush3.bf16.msra.mxu1 %v4728_v41  ;;  %v4800_v41 = vld [vmem:[%s6341_s1 + $0x290] sm:$0xff]  }
  0x2a   :  { %4161 = vmatprep.subr.bf16.mxu1 %v4733_v46  ;;  %4108 = vmatpush3.bf16.msra.mxu0 %v4740_v51  ;;  %v4807_v46 = vld [vmem:[%s6342_s0 + $0x1a0] ss:$100 sps:$4 sm:$0xff]   ;;  %v4812_v51 = vld [vmem:[%s6341_s1 + $0x210] sm:$0xff]  }
  0x2b   :  { %2524 = vmatmul.mubr.bf16.gmra.mrb[4].mxu0 %v4729_v42  ;;  %4109 = vmatprep.subr.bf16.mxu0 %v4745_v56  ;;  %v4801_v42 = vld [vmem:[%s6341_s1 + $0x248] sm:$0xff]   ;;  %v4819_v56 = vld [vmem:[%s6341_s1 + $0x2e0] sm:$0xff]  }
  0x2c   :  { %2604 = vmatmul.mubr.bf16.gmra.mrb[4].mxu1 %v4730_v43  ;;  %2531 = vmatprep.mubr.bf16.mxu0 %v4736_v49  ;;  %v4802_v43 = vld [vmem:[%s6342_s0 + $0x1a4] ss:$100 sps:$4 sm:$0xff]   ;;  %v4810_v49 = vld [vmem:[%s6341_s1 + $0x298] sm:$0xff]  }
  0x2d   :  { %4162 = vmatpush3.bf16.msra.mxu1 %v4734_v47  ;;  %2611 = vmatprep.mubr.bf16.mxu1 %v4738_v50  ;;  %v4808_v47 = vld [vmem:[%s6342_s0 + $0x1a8] ss:$100 sps:$4 sm:$0xff]   ;;  %v4811_v50 = vld [vmem:[%s6341_s1 + $0x250] sm:$0xff]  }
  0x2e   :  { %4163 = vmatprep.subr.bf16.mxu1 %v4743_v54  ;;  %4110 = vmatpush3.bf16.msra.mxu0 %v4746_v57  ;;  %v4817_v54 = vld [vmem:[%s6342_s0 + $0x268] ss:$100 sps:$4 sm:$0xff]   ;;  %v4820_v57 = vld [vmem:[%s6341_s1 + $0x2a0] sm:$0xff]  }
  0x2f   :  { %4111 = vmatprep.subr.bf16.mxu0 %v4755_v0  ;;  %v4829_v0 = vld [vmem:[%s6342_s0 + $0x330] ss:$100 sps:$4 sm:$0xff]  }
  0x31   :  { %4164 = vmatpush3.bf16.msra.mxu1 %v4744_v55  ;;  %v4818_v55 = vld [vmem:[%s6342_s0 + $0x270] ss:$100 sps:$4 sm:$0xff]  }
  0x32   :  { %4165 = vmatprep.subr.bf16.mxu1 %v4753_v62  ;;  %4112 = vmatpush3.bf16.msra.mxu0 %v4756_v1  ;;  %v4826_v62 = vld [vmem:[%s6342_s0 + $0x33c] ss:$100 sps:$4 sm:$0xff]  }
  0x33   :  { %2532 = vmatmul.mubr.bf16.gmra.mrb[8].mxu0 %v4741_v52  ;;  %4113 = vmatprep.subr.bf16.mxu0 %v4765_v8  ;;  %v4813_v52 = vld [vmem:[%s6342_s0 + $0x26c] ss:$100 sps:$4 sm:$0xff]   ;;  %v4830_v1 = vld [vmem:[%s6342_s0 + $0x338] ss:$100 sps:$4 sm:$0xff]  }
  0x34   :  { %2612 = vmatmul.mubr.bf16.gmra.mrb[8].mxu1 %v4742_v53  ;;  %2539 = vmatprep.mubr.bf16.mxu0 %v4747_v58  ;;  %v4815_v53 = vld [vmem:[%s6342_s0 + $0x274] ss:$100 sps:$4 sm:$0xff]  }
  0x35   :  { %2619 = vmatprep.mubr.bf16.mxu1 %v4749_v59  ;;  %4166 = vmatpush3.bf16.msra.mxu1 %v4754_v63  ;;  %v4821_v58 = vld [vmem:[%s6341_s1 + $0x258] sm:$0xff]   ;;  %v4828_v63 = vld [vmem:[%s6341_s1 + $0x2a8] sm:$0xff]  }
  0x36   :  { %4167 = vmatprep.subr.bf16.mxu1 %v4757_v2  ;;  %4114 = vmatpush3.bf16.msra.mxu0 %v4766_v9  ;;  %v4822_v59 = vld [vmem:[%s6341_s1 + $0x218] sm:$0xff]   ;;  %v4831_v2 = vld [vmem:[%s6341_s1 + $0x260] sm:$0xff]  }
  0x37   :  { %4115 = vmatprep.subr.bf16.mxu0 %v4767_v10  ;;  %v147_v8 = vld [vmem:[%s6342_s0 + $0x3f8] sm:$0x11]  ;;  %v148_v9 = vld [vmem:[%s6342_s0 + $0x400] sm:$0x11] }
  0x38   :  { %v3730_v10 = vcombine.high %v147_v8, %v147_v8  ;;  %v3729_v14 = vcombine.low %v147_v8, %v147_v8  ;;  %v4909_v8 = vld [vmem:[%s6341_s1 + $0x3f8] sm:$0xff]  }
  0x39   :  { %4168 = vmatpush3.bf16.msra.mxu1 %v4762_v5  ;;  %v4834_v5 = vld [vmem:[%s6341_s1 + $0x2f0] sm:$0xff]  }
  0x3a   :  { %4169 = vmatprep.subr.bf16.mxu1 %v4768_v11  ;;  %4116 = vmatpush3.bf16.msra.mxu0 %v4769_v12  ;;  %v3732_v11 = vcombine.high %v148_v9, %v148_v9  ;;  %v4841_v12 = vld [vmem:[%s6341_s1 + $0x270] sm:$0xff]  }
  0x3b   :  { %2540 = vmatmul.mubr.bf16.gmra.mrb[12].mxu0 %v4751_v60  ;;  %4117 = vmatprep.subr.bf16.mxu0 %v4775_v19  ;;  %v4823_v60 = vld [vmem:[%s6341_s1 + $0x2e8] sm:$0xff]   ;;  %v4846_v19 = vld [vmem:[%s6341_s1 + $0x238] sm:$0xff]  }
  0x3c   :  { %2620 = vmatmul.mubr.bf16.gmra.mrb[12].mxu1 %v4752_v61  ;;  %2547 = vmatprep.mubr.bf16.mxu0 %v4758_v3  ;;  %v4824_v61 = vld [vmem:[%s6342_s0 + $0x334] ss:$100 sps:$4 sm:$0xff]   ;;  %v4832_v3 = vld [vmem:[%s6341_s1 + $0x220] sm:$0xff]  }
  0x3d   :  { %2627 = vmatprep.mubr.bf16.mxu1 %v4760_v4  ;;  %4170 = vmatpush3.bf16.msra.mxu1 %v4770_v13  ;;  %v4833_v4 = vld [vmem:[%s6341_s1 + $0x268] sm:$0xff]   ;;  %v4842_v13 = vld [vmem:[%s6341_s1 + $0x230] sm:$0xff]  }
  0x3e   :  { %4171 = vmatprep.subr.bf16.mxu1 %v4777_v22  ;;  %4118 = vmatpush3.bf16.msra.mxu0 %v4776_v21  ;;  %v4847_v21 = vld [vmem:[%s6342_s0 + $0x20] ss:$100 sps:$4 sm:$0xff]   ;;  %v4852_v22 = vld [vmem:[%s6342_s0 + $0x2c] ss:$100 sps:$4 sm:$0xff]  }
  0x3f   :  { %4119 = vmatprep.subr.bf16.mxu0 %v4779_v24  ;;  %v4853_v24 = vld [vmem:[%s6341_s1 + $0x3c0] sm:$0xff]  }
  0x41   :  { %4172 = vmatpush3.bf16.msra.mxu1 %v4778_v23  ;;  %v4850_v23 = vld [vmem:[%s6342_s0 + $0x28] ss:$100 sps:$4 sm:$0xff]  }
  0x42   :  { %4120 = vmatpush3.bf16.msra.mxu0 %v4780_v25  ;;  %4261 = vmatprep.subr.bf16.mxu1 %v4787_v30  ;;  %v4854_v25 = vld [vmem:[%s6341_s1 + $0x380] sm:$0xff]   ;;  %v4861_v30 = vld [vmem:[%s6342_s0 + $0xe8] ss:$100 sps:$4 sm:$0xff]  }
  0x43   :  { %2548 = vmatmul.mubr.bf16.gmra.mrb[16].mxu0 %v4763_v6  ;;  %4209 = vmatprep.subr.bf16.mxu0 %v4797_v38  ;;  %v4835_v6 = vld [vmem:[%s6341_s1 + $0x228] sm:$0xff]   ;;  %v4870_v38 = vld [vmem:[%s6342_s0 + $0x1bc] ss:$100 sps:$4 sm:$0xff]  }
  0x44   :  { %2628 = vmatmul.mubr.bf16.gmra.mrb[16].mxu1 %v4764_v7  ;;  %2555 = vmatprep.mubr.bf16.mxu0 %v3726_v16  ;;  %v4836_v7 = vld [vmem:[%s6341_s1 + $0x2b0] sm:$0xff]   ;;  %v3731_v16 = vcombine.low %v148_v9, %v148_v9  ;;  %v4910_v9 = vld [vmem:[%s6341_s1 + $0x3b8] sm:$0xff]  }
  0x45   :  { %2635 = vmatprep.mubr.bf16.mxu1 %v3728_v17  ;;  %v4844_v17 = vld [vmem:[%s6341_s1 + $0x2b8] sm:$0xff]  }
  0x4b   :  { %2556 = vmatmul.mubr.bf16.gmra.mrb[20].mxu0 %v3725_v18  ;;  %v4845_v18 = vld [vmem:[%s6341_s1 + $0x278] sm:$0xff]  }
  0x4c   :  { %2636 = vmatmul.mubr.bf16.gmra.mrb[20].mxu1 %v3727_v20  ;;  %2675 = vmatprep.mubr.bf16.mxu0 %v4783_v27  ;;  %v4849_v20 = vld [vmem:[%s6342_s0 + $0x24] ss:$100 sps:$4 sm:$0xff]   ;;  %v4856_v27 = vld [vmem:[%s6342_s0 + $0xec] ss:$100 sps:$4 sm:$0xff]  }
  0x4d   :  { %2755 = vmatprep.mubr.bf16.mxu1 %v4786_v29  ;;  %v4860_v29 = vld [vmem:[%s6341_s1 + $0x388] sm:$0xff]  }
  0x53   :  { %2676 = vmatmul.mubr.bf16.vlgmr.msra.gmra.mrb[24].mxu0 %v4781_v26  ;;  %v4855_v26 = vld [vmem:[%s6341_s1 + $0x3c8] sm:$0xff]  }
  0x54   :  { %2756 = vmatmul.mubr.bf16.vlgmr.msra.gmra.mrb[24].mxu1 %v4784_v28  ;;  %2683 = vmatprep.mubr.bf16.mxu0 %v4790_v33  ;;  %v4858_v28 = vld [vmem:[%s6342_s0 + $0xf4] ss:$100 sps:$4 sm:$0xff]   ;;  %v4864_v33 = vld [vmem:[%s6341_s1 + $0x300] sm:$0xff]  }
  0x55   :  { %4262 = vmatpush3.bf16.msra.mxu1 %v4788_v31  ;;  %2763 = vmatprep.mubr.bf16.mxu1 %v4792_v34  ;;  %v4863_v31 = vld [vmem:[%s6341_s1 + $0x340] sm:$0xff]   ;;  %v4865_v34 = vld [vmem:[%s6341_s1 + $0x3d0] sm:$0xff]  }
  0x56   :  { %4263 = vmatprep.subr.bf16.mxu1 %v4789_v32  ;;  %4210 = vmatpush3.bf16.msra.mxu0 %v4798_v39  ;;  %v4862_v32 = vld [vmem:[%s6342_s0 + $0xf0] ss:$100 sps:$4 sm:$0xff]   ;;  %v4872_v39 = vld [vmem:[%s6341_s1 + $0x308] sm:$0xff]  }
  0x57   :  { %4211 = vmatprep.subr.bf16.mxu0 %v4801_v42  ;;  %v4874_v42 = vld [vmem:[%s6342_s0 + $0x1b8] ss:$100 sps:$4 sm:$0xff]  }
  0x59   :  { %4264 = vmatpush3.bf16.msra.mxu1 %v4794_v35  ;;  %v4866_v35 = vld [vmem:[%s6341_s1 + $0x390] sm:$0xff]  }
  0x5a   :  { %4265 = vmatprep.subr.bf16.mxu1 %v4799_v40  ;;  %4212 = vmatpush3.bf16.msra.mxu0 %v4806_v45  ;;  %v4873_v40 = vld [vmem:[%s6342_s0 + $0x1b0] ss:$100 sps:$4 sm:$0xff]  }
  0x5b   :  { %2684 = vmatmul.mubr.bf16.gmra.mrb[28].mxu0 %v4795_v36  ;;  %4213 = vmatprep.subr.bf16.mxu0 %v4811_v50  ;;  %v4867_v36 = vld [vmem:[%s6341_s1 + $0x348] sm:$0xff]   ;;  %v4878_v45 = vld [vmem:[%s6341_s1 + $0x310] sm:$0xff]   ;;  %v4886_v50 = vld [vmem:[%s6341_s1 + $0x3a0] sm:$0xff]  }
  0x5c   :  { %2764 = vmatmul.mubr.bf16.gmra.mrb[28].mxu1 %v4796_v37  ;;  %2691 = vmatprep.mubr.bf16.mxu0 %v4802_v43  ;;  %v4868_v37 = vld [vmem:[%s6342_s0 + $0x1b4] ss:$100 sps:$4 sm:$0xff]  }
  0x5d   :  { %4266 = vmatpush3.bf16.msra.mxu1 %v4800_v41  ;;  %2771 = vmatprep.mubr.bf16.mxu1 %v4804_v44  ;;  %v4875_v41 = vld [vmem:[%s6341_s1 + $0x3d8] sm:$0xff]   ;;  %v4877_v44 = vld [vmem:[%s6341_s1 + $0x350] sm:$0xff]  }
  0x5e   :  { %4267 = vmatprep.subr.bf16.mxu1 %v4809_v48  ;;  %4214 = vmatpush3.bf16.msra.mxu0 %v4812_v51  ;;  %v4876_v43 = vld [vmem:[%s6341_s1 + $0x398] sm:$0xff]   ;;  %v4885_v48 = vld [vmem:[%s6341_s1 + $0x3e0] sm:$0xff]  }
  0x5f   :  { %4215 = vmatprep.subr.bf16.mxu0 %v4821_v58  ;;  %v4884_v51 = vld [vmem:[%s6342_s0 + $0x280] ss:$100 sps:$4 sm:$0xff]  }
  0x60   :  { %v4895_v58 = vld [vmem:[%s6342_s0 + $0x340] ss:$100 sps:$4 sm:$0xff]  }
  0x61   :  { %4268 = vmatpush3.bf16.msra.mxu1 %v4810_v49  ;;  %v4883_v49 = vld [vmem:[%s6342_s0 + $0x278] ss:$100 sps:$4 sm:$0xff]  }
  0x62   :  { %4269 = vmatprep.subr.bf16.mxu1 %v4819_v56  ;;  %4216 = vmatpush3.bf16.msra.mxu0 %v4822_v59  ;;  %v4892_v56 = vld [vmem:[%s6342_s0 + $0x34c] ss:$100 sps:$4 sm:$0xff]   ;;  %v4897_v59 = vld [vmem:[%s6341_s1 + $0x360] sm:$0xff]  }
  0x63   :  { %2692 = vmatmul.mubr.bf16.gmra.mrb[32].mxu0 %v4807_v46  ;;  %4217 = vmatprep.subr.bf16.mxu0 %v4831_v2  ;;  %v4879_v46 = vld [vmem:[%s6342_s0 + $0x27c] ss:$100 sps:$4 sm:$0xff]   ;;  %v149_v2 = vld [vmem:[%s6342_s0 + $0x408] sm:$0x11] }
  0x64   :  { %2772 = vmatmul.mubr.bf16.gmra.mrb[32].mxu1 %v4808_v47  ;;  %2699 = vmatprep.mubr.bf16.mxu0 %v4813_v52  ;;  %v4881_v47 = vld [vmem:[%s6342_s0 + $0x284] ss:$100 sps:$4 sm:$0xff]   ;;  %v4887_v52 = vld [vmem:[%s6341_s1 + $0x358] sm:$0xff]  }
  0x65   :  { %2779 = vmatprep.mubr.bf16.mxu1 %v4815_v53  ;;  %4270 = vmatpush3.bf16.msra.mxu1 %v4820_v57  ;;  %v4888_v53 = vld [vmem:[%s6341_s1 + $0x318] sm:$0xff]   ;;  %v4894_v57 = vld [vmem:[%s6341_s1 + $0x3a8] sm:$0xff]  }
  0x66   :  { %4271 = vmatprep.subr.bf16.mxu1 %v4823_v60  ;;  %4218 = vmatpush3.bf16.msra.mxu0 %v4832_v3  ;;  %v4896_v60 = vld [vmem:[%s6342_s0 + $0x348] ss:$100 sps:$4 sm:$0xff]   ;;  %v150_v3 = vld [vmem:[%s6342_s0 + $0x410] sm:$0x11] }
  0x67   :  { %4219 = vmatprep.subr.bf16.mxu0 %v4833_v4  ;;  %v3734_v4 = vcombine.high %v149_v2, %v149_v2 }
  0x69   :  { %4272 = vmatpush3.bf16.msra.mxu1 %v4828_v63  ;;  %v4900_v63 = vld [vmem:[%s6341_s1 + $0x3f0] sm:$0xff]  }
  0x6a   :  { %4273 = vmatprep.subr.bf16.mxu1 %v4834_v5  ;;  %4220 = vmatpush3.bf16.msra.mxu0 %v4835_v6  ;;  %v3736_v5 = vcombine.high %v150_v3, %v150_v3  ;;  %v4907_v6 = vld [vmem:[%s6341_s1 + $0x370] sm:$0xff]  }
  0x6b   :  { %2700 = vmatmul.mubr.bf16.gmra.mrb[36].mxu0 %v4817_v54  ;;  %4221 = vmatprep.subr.bf16.mxu0 %v4841_v12  ;;  %v4889_v54 = vld [vmem:[%s6341_s1 + $0x3e8] sm:$0xff]   ;;  %v3735_v12 = vcombine.low %v150_v3, %v150_v3  ;;  %v4976_v3 = vld [vmem:[%s6341_s1 + $0x4b8] sm:$0xff]  }
  0x6c   :  { %2780 = vmatmul.mubr.bf16.gmra.mrb[36].mxu1 %v4818_v55  ;;  %2707 = vmatprep.mubr.bf16.mxu0 %v4824_v61  ;;  %v4890_v55 = vld [vmem:[%s6342_s0 + $0x344] ss:$100 sps:$4 sm:$0xff]  }
  0x6d   :  { %2787 = vmatprep.mubr.bf16.mxu1 %v4826_v62  ;;  %4274 = vmatpush3.bf16.msra.mxu1 %v4836_v7  ;;  %v4898_v61 = vld [vmem:[%s6341_s1 + $0x320] sm:$0xff]   ;;  %v4899_v62 = vld [vmem:[%s6341_s1 + $0x368] sm:$0xff]   ;;  %v4908_v7 = vld [vmem:[%s6341_s1 + $0x330] sm:$0xff]  }
  0x6e   :  { %4275 = vmatprep.subr.bf16.mxu1 %v4843_v15  ;;  %4222 = vmatpush3.bf16.msra.mxu0 %v4842_v13  ;;  %v4912_v13 = vld [vmem:[%s6341_s1 + $0x338] sm:$0xff]  }
  0x6f   :  { %4223 = vmatprep.subr.bf16.mxu0 %v4845_v18  ;;  %v4918_v15 = vld [vmem:[%s6342_s0 + $0x3c] ss:$100 sps:$4 sm:$0xff]  }
  0x70   :  { %v4916_v18 = vld [vmem:[%s6342_s0 + $0x38] ss:$100 sps:$4 sm:$0xff]  }
  0x71   :  { %4276 = vmatpush3.bf16.msra.mxu1 %v4844_v17  ;;  %v4913_v17 = vld [vmem:[%s6342_s0 + $0x30] ss:$100 sps:$4 sm:$0xff]  }
  0x72   :  { %4224 = vmatpush3.bf16.msra.mxu0 %v4846_v19  ;;  %4365 = vmatprep.subr.bf16.mxu1 %v4853_v24  ;;  %v4922_v19 = vld [vmem:[%s6342_s0 + $0xfc] ss:$100 sps:$4 sm:$0xff]  }
  0x73   :  { %2708 = vmatmul.mubr.bf16.gmra.mrb[40].mxu0 %v4829_v0  ;;  %4313 = vmatprep.subr.bf16.mxu0 %v4863_v31  ;;  %v4901_v0 = vld [vmem:[%s6341_s1 + $0x328] sm:$0xff]   ;;  %v4929_v24 = vld [vmem:[%s6341_s1 + $0x440] sm:$0xff]  }
  0x74   :  { %2788 = vmatmul.mubr.bf16.gmra.mrb[40].mxu1 %v4830_v1  ;;  %2715 = vmatprep.mubr.bf16.mxu0 %v3730_v10  ;;  %v4902_v1 = vld [vmem:[%s6341_s1 + $0x3b0] sm:$0xff]   ;;  %v3733_v10 = vcombine.low %v149_v2, %v149_v2  ;;  %v4934_v31 = vld [vmem:[%s6342_s0 + $0x1c4] ss:$100 sps:$4 sm:$0xff]   ;;  %v4975_v2 = vld [vmem:[%s6341_s1 + $0x4f8] sm:$0xff]  }
  0x75   :  { %2795 = vmatprep.mubr.bf16.mxu1 %v3732_v11  ;;  %v4911_v11 = vld [vmem:[%s6341_s1 + $0x378] sm:$0xff]  }
  0x7b   :  { %2716 = vmatmul.mubr.bf16.gmra.mrb[44].mxu0 %v3729_v14  ;;  %v4915_v14 = vld [vmem:[%s6342_s0 + $0x34] ss:$100 sps:$4 sm:$0xff]  }
  0x7c   :  { %2796 = vmatmul.mubr.bf16.gmra.mrb[44].mxu1 %v3731_v16  ;;  %2835 = vmatprep.mubr.bf16.mxu0 %v4849_v20  ;;  %v4919_v16 = vld [vmem:[%s6341_s1 + $0x4c0] sm:$0xff]  }
  0x7d   :  { %2915 = vmatprep.mubr.bf16.mxu1 %v4852_v22  ;;  %v4920_v20 = vld [vmem:[%s6341_s1 + $0x480] sm:$0xff]   ;;  %v4921_v22 = vld [vmem:[%s6341_s1 + $0x4c8] sm:$0xff]  }
  0x83   :  { %2836 = vmatmul.mubr.bf16.vlgmr.msra.gmra.mrb[48].mxu0 %v4847_v21  ;;  %v4924_v21 = vld [vmem:[%s6342_s0 + $0x104] ss:$100 sps:$4 sm:$0xff]  }
  0x84   :  { %2916 = vmatmul.mubr.bf16.vlgmr.msra.gmra.mrb[48].mxu1 %v4850_v23  ;;  %2843 = vmatprep.mubr.bf16.mxu0 %v4856_v27  ;;  %v4926_v23 = vld [vmem:[%s6341_s1 + $0x488] sm:$0xff]   ;;  %v4928_v27 = vld [vmem:[%s6342_s0 + $0x100] ss:$100 sps:$4 sm:$0xff]  }
  0x85   :  { %4366 = vmatpush3.bf16.msra.mxu1 %v4854_v25  ;;  %2923 = vmatprep.mubr.bf16.mxu1 %v4858_v28  ;;  %v4930_v25 = vld [vmem:[%s6341_s1 + $0x400] sm:$0xff]   ;;  %v4931_v28 = vld [vmem:[%s6341_s1 + $0x4d0] sm:$0xff]  }
  0x86   :  { %4367 = vmatprep.subr.bf16.mxu1 %v4855_v26  ;;  %4314 = vmatpush3.bf16.msra.mxu0 %v4864_v33  ;;  %v4927_v26 = vld [vmem:[%s6342_s0 + $0xf8] ss:$100 sps:$4 sm:$0xff]   ;;  %v4938_v33 = vld [vmem:[%s6341_s1 + $0x408] sm:$0xff]  }
  0x87   :  { %4315 = vmatprep.subr.bf16.mxu0 %v4867_v36  ;;  %v4939_v36 = vld [vmem:[%s6342_s0 + $0x1c0] ss:$100 sps:$4 sm:$0xff]  }
  0x89   :  { %4368 = vmatpush3.bf16.msra.mxu1 %v4860_v29  ;;  %v4932_v29 = vld [vmem:[%s6341_s1 + $0x490] sm:$0xff]  }
  0x8a   :  { %4369 = vmatprep.subr.bf16.mxu1 %v4865_v34  ;;  %4316 = vmatpush3.bf16.msra.mxu0 %v4872_v39  ;;  %v4941_v34 = vld [vmem:[%s6341_s1 + $0x4d8] sm:$0xff]   ;;  %v4940_v39 = vld [vmem:[%s6342_s0 + $0x1c8] ss:$100 sps:$4 sm:$0xff]  }
  0x8b   :  { %2844 = vmatmul.mubr.bf16.gmra.mrb[52].mxu0 %v4861_v30  ;;  %4317 = vmatprep.subr.bf16.mxu0 %v4877_v44  ;;  %v4933_v30 = vld [vmem:[%s6341_s1 + $0x448] sm:$0xff]   ;;  %v4953_v44 = vld [vmem:[%s6341_s1 + $0x458] sm:$0xff]  }
  0x8c   :  { %2924 = vmatmul.mubr.bf16.gmra.mrb[52].mxu1 %v4862_v32  ;;  %2851 = vmatprep.mubr.bf16.mxu0 %v4868_v37  ;;  %v4936_v32 = vld [vmem:[%s6342_s0 + $0x1cc] ss:$100 sps:$4 sm:$0xff]  }
  0x8d   :  { %4370 = vmatpush3.bf16.msra.mxu1 %v4866_v35  ;;  %2931 = vmatprep.mubr.bf16.mxu1 %v4870_v38  ;;  %v4942_v35 = vld [vmem:[%s6341_s1 + $0x498] sm:$0xff]   ;;  %v4943_v37 = vld [vmem:[%s6341_s1 + $0x450] sm:$0xff]  }
  0x8e   :  { %4371 = vmatprep.subr.bf16.mxu1 %v4875_v41  ;;  %4318 = vmatpush3.bf16.msra.mxu0 %v4878_v45  ;;  %v4944_v38 = vld [vmem:[%s6341_s1 + $0x410] sm:$0xff]   ;;  %v4949_v45 = vld [vmem:[%s6342_s0 + $0x288] ss:$100 sps:$4 sm:$0xff]  }
  0x8f   :  { %4319 = vmatprep.subr.bf16.mxu0 %v4887_v52  ;;  %v4947_v41 = vld [vmem:[%s6342_s0 + $0x294] ss:$100 sps:$4 sm:$0xff]   ;;  %v4963_v52 = vld [vmem:[%s6341_s1 + $0x460] sm:$0xff]  }
  0x91   :  { %4372 = vmatpush3.bf16.msra.mxu1 %v4876_v43  ;;  %v4952_v43 = vld [vmem:[%s6341_s1 + $0x4a0] sm:$0xff]  }
  0x92   :  { %4373 = vmatprep.subr.bf16.mxu1 %v4885_v48  ;;  %4320 = vmatpush3.bf16.msra.mxu0 %v4888_v53  ;;  %v4950_v48 = vld [vmem:[%s6342_s0 + $0x290] ss:$100 sps:$4 sm:$0xff]   ;;  %v4964_v53 = vld [vmem:[%s6341_s1 + $0x420] sm:$0xff]  }
  0x93   :  { %2852 = vmatmul.mubr.bf16.gmra.mrb[56].mxu0 %v4873_v40  ;;  %4321 = vmatprep.subr.bf16.mxu0 %v4897_v59  ;;  %v4945_v40 = vld [vmem:[%s6342_s0 + $0x28c] ss:$100 sps:$4 sm:$0xff]  }
  0x94   :  { %2932 = vmatmul.mubr.bf16.gmra.mrb[56].mxu1 %v4874_v42  ;;  %2859 = vmatprep.mubr.bf16.mxu0 %v4879_v46  ;;  %v4951_v42 = vld [vmem:[%s6341_s1 + $0x4e0] sm:$0xff]   ;;  %v4954_v46 = vld [vmem:[%s6341_s1 + $0x418] sm:$0xff]   ;;  %v4968_v59 = vld [vmem:[%s6341_s1 + $0x4b0] sm:$0xff]  }
  0x95   :  { %2939 = vmatprep.mubr.bf16.mxu1 %v4881_v47  ;;  %4374 = vmatpush3.bf16.msra.mxu1 %v4886_v50  ;;  %v4955_v47 = vld [vmem:[%s6341_s1 + $0x4e8] sm:$0xff]   ;;  %v4958_v50 = vld [vmem:[%s6342_s0 + $0x35c] ss:$100 sps:$4 sm:$0xff]  }
  0x96   :  { %4375 = vmatprep.subr.bf16.mxu1 %v4889_v54  ;;  %4322 = vmatpush3.bf16.msra.mxu0 %v4898_v61  ;;  %v4961_v54 = vld [vmem:[%s6342_s0 + $0x350] ss:$100 sps:$4 sm:$0xff]   ;;  %v152_v61 = vld [vmem:[%s6342_s0 + $0x420] sm:$0x11] }
  0x97   :  { %4323 = vmatprep.subr.bf16.mxu0 %v4899_v62 }
  0x99   :  { %4376 = vmatpush3.bf16.msra.mxu1 %v4894_v57  ;;  %v4966_v57 = vld [vmem:[%s6341_s1 + $0x4f0] sm:$0xff]  }
  0x9a   :  { %4377 = vmatprep.subr.bf16.mxu1 %v4900_v63  ;;  %4324 = vmatpush3.bf16.msra.mxu0 %v4901_v0  ;;  %v3740_v63 = vcombine.high %v152_v61, %v152_v61  ;;  %v4973_v0 = vld [vmem:[%s6341_s1 + $0x470] sm:$0xff]  }
  0x9b   :  { %2860 = vmatmul.mubr.bf16.gmra.mrb[60].mxu0 %v4883_v49  ;;  %4325 = vmatprep.subr.bf16.mxu0 %v4907_v6  ;;  %v4956_v49 = vld [vmem:[%s6342_s0 + $0x354] ss:$100 sps:$4 sm:$0xff]  }
  0x9c   :  { %2940 = vmatmul.mubr.bf16.gmra.mrb[60].mxu1 %v4884_v51  ;;  %2867 = vmatprep.mubr.bf16.mxu0 %v4890_v55  ;;  %v4960_v51 = vld [vmem:[%s6341_s1 + $0x4a8] sm:$0xff]  }
  0x9d   :  { %2947 = vmatprep.mubr.bf16.mxu1 %v4892_v56  ;;  %4378 = vmatpush3.bf16.msra.mxu1 %v4902_v1  ;;  %v4965_v55 = vld [vmem:[%s6341_s1 + $0x468] sm:$0xff]   ;;  %v4962_v56 = vld [vmem:[%s6342_s0 + $0x358] ss:$100 sps:$4 sm:$0xff]   ;;  %v4974_v1 = vld [vmem:[%s6341_s1 + $0x430] sm:$0xff]  }
  0x9e   :  { %4379 = vmatprep.subr.bf16.mxu1 %v4909_v8  ;;  %4326 = vmatpush3.bf16.msra.mxu0 %v4908_v7  ;;  %v3739_v7 = vcombine.low %v152_v61, %v152_v61  ;;  %v4981_v8 = vld [vmem:[%s6342_s0 + $0x44] ss:$100 sps:$4 sm:$0xff]  }
  0x9f   :  { %4327 = vmatprep.subr.bf16.mxu0 %v4911_v11  ;;  %v4979_v11 = vld [vmem:[%s6342_s0 + $0x40] ss:$100 sps:$4 sm:$0xff]  }
  0xa1   :  { %4380 = vmatpush3.bf16.msra.mxu1 %v4910_v9  ;;  %v4984_v9 = vld [vmem:[%s6342_s0 + $0x4c] ss:$100 sps:$4 sm:$0xff]  }
  0xa2   :  { %4328 = vmatpush3.bf16.msra.mxu0 %v4912_v13  ;;  %4469 = vmatprep.subr.bf16.mxu1 %v4919_v16  ;;  %v4986_v13 = vld [vmem:[%s6341_s1 + $0x580] sm:$0xff]   ;;  %v4990_v16 = vld [vmem:[%s6342_s0 + $0x114] ss:$100 sps:$4 sm:$0xff]  }
  0xa3   :  { %2868 = vmatmul.mubr.bf16.gmra.mrb[64].mxu0 %v4895_v58  ;;  %4417 = vmatprep.subr.bf16.mxu0 %v4929_v24  ;;  %v4967_v58 = vld [vmem:[%s6341_s1 + $0x428] sm:$0xff]   ;;  %v4998_v24 = vld [vmem:[%s6341_s1 + $0x590] sm:$0xff]  }
  0xa4   :  { %2948 = vmatmul.mubr.bf16.gmra.mrb[64].mxu1 %v4896_v60  ;;  %2875 = vmatprep.mubr.bf16.mxu0 %v3734_v4  ;;  %v151_v60 = vld [vmem:[%s6342_s0 + $0x418] sm:$0x11] }
  0xa5   :  { %2955 = vmatprep.mubr.bf16.mxu1 %v3736_v5  ;;  %v3738_v62 = vcombine.high %v151_v60, %v151_v60  ;;  %v4977_v4 = vld [vmem:[%s6341_s1 + $0x478] sm:$0xff]   ;;  %v3737_v6 = vcombine.low %v151_v60, %v151_v60  ;;  %v5030_v60 = vld [vmem:[%s6341_s1 + $0x520] sm:$0xff]  }
  0xa6   :  { %v4978_v5 = vld [vmem:[%s6341_s1 + $0x438] sm:$0xff]  }
  0xab   :  { %2876 = vmatmul.mubr.bf16.gmra.mrb[68].mxu0 %v3733_v10  ;;  %v4985_v10 = vld [vmem:[%s6341_s1 + $0x5c0] sm:$0xff]  }
  0xac   :  { %2956 = vmatmul.mubr.bf16.gmra.mrb[68].mxu1 %v3735_v12  ;;  %2995 = vmatprep.mubr.bf16.mxu0 %v4915_v14  ;;  %v4982_v12 = vld [vmem:[%s6342_s0 + $0x48] ss:$100 sps:$4 sm:$0xff]  }
  0xad   :  { %3075 = vmatprep.mubr.bf16.mxu1 %v4918_v15  ;;  %v4988_v14 = vld [vmem:[%s6342_s0 + $0x10c] ss:$100 sps:$4 sm:$0xff]  }
  0xae   :  { %v4987_v15 = vld [vmem:[%s6341_s1 + $0x5c8] sm:$0xff]  }
  0xb3   :  { %2996 = vmatmul.mubr.bf16.vlgmr.msra.gmra.mrb[72].mxu0 %v4913_v17  ;;  %v4995_v17 = vld [vmem:[%s6341_s1 + $0x540] sm:$0xff]  }
  0xb4   :  { %3076 = vmatmul.mubr.bf16.vlgmr.msra.gmra.mrb[72].mxu1 %v4916_v18  ;;  %3003 = vmatprep.mubr.bf16.mxu0 %v4922_v19  ;;  %v4996_v18 = vld [vmem:[%s6341_s1 + $0x500] sm:$0xff]   ;;  %v4992_v19 = vld [vmem:[%s6341_s1 + $0x588] sm:$0xff]  }
  0xb5   :  { %4470 = vmatpush3.bf16.msra.mxu1 %v4920_v20  ;;  %3083 = vmatprep.mubr.bf16.mxu1 %v4924_v21  ;;  %v4993_v20 = vld [vmem:[%s6342_s0 + $0x108] ss:$100 sps:$4 sm:$0xff]  }
  0xb6   :  { %4471 = vmatprep.subr.bf16.mxu1 %v4921_v22  ;;  %4418 = vmatpush3.bf16.msra.mxu0 %v4930_v25  ;;  %v4999_v21 = vld [vmem:[%s6341_s1 + $0x548] sm:$0xff]   ;;  %v4997_v22 = vld [vmem:[%s6341_s1 + $0x5d0] sm:$0xff]  }
  0xb7   :  { %4419 = vmatprep.subr.bf16.mxu0 %v4933_v30  ;;  %v5000_v25 = vld [vmem:[%s6342_s0 + $0x1d4] ss:$100 sps:$4 sm:$0xff]  }
  0xb8   :  { %v5009_v30 = vld [vmem:[%s6341_s1 + $0x550] sm:$0xff]  }
  0xb9   :  { %4472 = vmatpush3.bf16.msra.mxu1 %v4926_v23  ;;  %v4994_v23 = vld [vmem:[%s6342_s0 + $0x110] ss:$100 sps:$4 sm:$0xff]  }
  0xba   :  { %4473 = vmatprep.subr.bf16.mxu1 %v4931_v28  ;;  %4420 = vmatpush3.bf16.msra.mxu0 %v4938_v33  ;;  %v5007_v28 = vld [vmem:[%s6341_s1 + $0x5d8] sm:$0xff]  }
  0xbb   :  { %3004 = vmatmul.mubr.bf16.gmra.mrb[76].mxu0 %v4927_v26  ;;  %4421 = vmatprep.subr.bf16.mxu0 %v4943_v37  ;;  %v5004_v26 = vld [vmem:[%s6341_s1 + $0x508] sm:$0xff]   ;;  %v5006_v33 = vld [vmem:[%s6342_s0 + $0x1d8] ss:$100 sps:$4 sm:$0xff]   ;;  %v5018_v37 = vld [vmem:[%s6341_s1 + $0x5a0] sm:$0xff]  }
  0xbc   :  { %3084 = vmatmul.mubr.bf16.gmra.mrb[76].mxu1 %v4928_v27  ;;  %3011 = vmatprep.mubr.bf16.mxu0 %v4934_v31  ;;  %v5002_v27 = vld [vmem:[%s6342_s0 + $0x1dc] ss:$100 sps:$4 sm:$0xff]   ;;  %v5010_v31 = vld [vmem:[%s6341_s1 + $0x510] sm:$0xff]  }
  0xbd   :  { %4474 = vmatpush3.bf16.msra.mxu1 %v4932_v29  ;;  %3091 = vmatprep.mubr.bf16.mxu1 %v4936_v32  ;;  %v5008_v29 = vld [vmem:[%s6341_s1 + $0x598] sm:$0xff]   ;;  %v5005_v32 = vld [vmem:[%s6342_s0 + $0x1d0] ss:$100 sps:$4 sm:$0xff]  }
  0xbe   :  { %4475 = vmatprep.subr.bf16.mxu1 %v4941_v34  ;;  %4422 = vmatpush3.bf16.msra.mxu0 %v4944_v38  ;;  %v5011_v34 = vld [vmem:[%s6342_s0 + $0x29c] ss:$100 sps:$4 sm:$0xff]  }
  0xbf   :  { %4423 = vmatprep.subr.bf16.mxu0 %v4953_v44  ;;  %v5019_v38 = vld [vmem:[%s6341_s1 + $0x558] sm:$0xff]   ;;  %v5016_v44 = vld [vmem:[%s6342_s0 + $0x2a0] ss:$100 sps:$4 sm:$0xff]  }
  0xc1   :  { %4476 = vmatpush3.bf16.msra.mxu1 %v4942_v35  ;;  %v5013_v35 = vld [vmem:[%s6342_s0 + $0x2a4] ss:$100 sps:$4 sm:$0xff]  }
  0xc2   :  { %4477 = vmatprep.subr.bf16.mxu1 %v4951_v42  ;;  %4424 = vmatpush3.bf16.msra.mxu0 %v4954_v46  ;;  %v5015_v42 = vld [vmem:[%s6342_s0 + $0x298] ss:$100 sps:$4 sm:$0xff]  }
  0xc3   :  { %3012 = vmatmul.mubr.bf16.gmra.mrb[80].mxu0 %v4939_v36  ;;  %4425 = vmatprep.subr.bf16.mxu0 %v4963_v52  ;;  %v5017_v36 = vld [vmem:[%s6341_s1 + $0x5e0] sm:$0xff]  }
  0xc4   :  { %3092 = vmatmul.mubr.bf16.gmra.mrb[80].mxu1 %v4940_v39  ;;  %3019 = vmatprep.mubr.bf16.mxu0 %v4945_v40  ;;  %v5020_v39 = vld [vmem:[%s6341_s1 + $0x518] sm:$0xff]   ;;  %v5021_v40 = vld [vmem:[%s6341_s1 + $0x5e8] sm:$0xff]   ;;  %v5029_v52 = vld [vmem:[%s6341_s1 + $0x560] sm:$0xff]  }
  0xc5   :  { %3099 = vmatprep.mubr.bf16.mxu1 %v4947_v41  ;;  %4478 = vmatpush3.bf16.msra.mxu1 %v4952_v43  ;;  %v5959_v41 = vld [vmem:[%s6343_s2] ss:$0 sm:$0xff] }
  0xc6   :  { %4479 = vmatprep.subr.bf16.mxu1 %v4955_v47  ;;  %4426 = vmatpush3.bf16.msra.mxu0 %v4964_v53 }
  0xc7   :  { %4427 = vmatprep.subr.bf16.mxu0 %v4965_v55 }
  0xc9   :  { %4480 = vmatpush3.bf16.msra.mxu1 %v4960_v51  ;;  %v5026_v51 = vld [vmem:[%s6341_s1 + $0x5a8] sm:$0xff]  }
  0xca   :  { %4481 = vmatprep.subr.bf16.mxu1 %v4966_v57  ;;  %4428 = vmatpush3.bf16.msra.mxu0 %v4967_v58 }
  0xcb   :  { %3020 = vmatmul.mubr.bf16.gmra.mrb[84].mxu0 %v4949_v45  ;;  %4429 = vmatprep.subr.bf16.mxu0 %v4973_v0  ;;  %v5031_v0 = vld [vmem:[%s6341_s1 + $0x568] sm:$0xff]  }
  0xcc   :  { %3100 = vmatmul.mubr.bf16.gmra.mrb[84].mxu1 %v4950_v48  ;;  %3027 = vmatprep.mubr.bf16.mxu0 %v4956_v49 }
  0xcd   :  { %3107 = vmatprep.mubr.bf16.mxu1 %v4958_v50  ;;  %4482 = vmatpush3.bf16.msra.mxu1 %v4968_v59  ;;  %v5022_v50 = vld [vmem:[%s6342_s0 + $0x364] ss:$100 sps:$4 sm:$0xff]  }
  0xce   :  { %4483 = vmatprep.subr.bf16.mxu1 %v4975_v2  ;;  %4430 = vmatpush3.bf16.msra.mxu0 %v4974_v1  ;;  %v5027_v1 = vld [vmem:[%s6342_s0 + $0x360] ss:$100 sps:$4 sm:$0xff]   ;;  %v5032_v2 = vld [vmem:[%s6341_s1 + $0x5f0] sm:$0xff]  }
  0xcf   :  { %4431 = vmatprep.subr.bf16.mxu0 %v4977_v4 }
  0xd1   :  { %4484 = vmatpush3.bf16.msra.mxu1 %v4976_v3 }
  0xd2   :  { %4432 = vmatpush3.bf16.msra.mxu0 %v4978_v5  ;;  %4573 = vmatprep.subr.bf16.mxu1 %v4985_v10  ;;  %v5028_v5 = vld [vmem:[%s6342_s0 + $0x368] ss:$100 sps:$4 sm:$0xff]  }
  0xd3   :  { %3028 = vmatmul.mubr.bf16.gmra.mrb[88].mxu0 %v4961_v54  ;;  %4521 = vmatprep.subr.bf16.mxu0 %v4995_v17  ;;  %v153_v10 = vld [vmem:[%s6342_s0 + $0x428] sm:$0x11] }
  0xd4   :  { %3108 = vmatmul.mubr.bf16.gmra.mrb[88].mxu1 %v4962_v56  ;;  %3035 = vmatprep.mubr.bf16.mxu0 %v3738_v62  ;;  %v5024_v56 = vld [vmem:[%s6342_s0 + $0x36c] ss:$100 sps:$4 sm:$0xff]  }
  0xd5   :  { %3115 = vmatprep.mubr.bf16.mxu1 %v3740_v63 }
  0xdb   :  { %3036 = vmatmul.mubr.bf16.gmra.mrb[92].mxu0 %v3737_v6  ;;  %v5033_v6 = vld [vmem:[%s6341_s1 + $0x528] sm:$0xff]  }
  0xdc   :  { %3116 = vmatmul.mubr.bf16.gmra.mrb[92].mxu1 %v3739_v7  ;;  %3155 = vmatprep.mubr.bf16.mxu0 %v4981_v8 }
  0xdd   :  { %3235 = vmatprep.mubr.bf16.mxu1 %v4984_v9  ;;  %v5034_v9 = vld [vmem:[%s6341_s1 + $0x5b0] sm:$0xff]  }
  0xe3   :  { %3156 = vmatmul.mubr.bf16.vlgmr.msra.gmra.mrb[96].mxu0 %v4979_v11  ;;  %v5039_v11 = vld [vmem:[%s6341_s1 + $0x570] sm:$0xff]  }
  0xe4   :  { %3236 = vmatmul.mubr.bf16.vlgmr.msra.gmra.mrb[96].mxu1 %v4982_v12  ;;  %3163 = vmatprep.mubr.bf16.mxu0 %v4988_v14 }
  0xe5   :  { %4574 = vmatpush3.bf16.msra.mxu1 %v4986_v13  ;;  %3243 = vmatprep.mubr.bf16.mxu1 %v4990_v16  ;;  %v154_v16 = vld [vmem:[%s6342_s0 + $0x430] sm:$0x11] }
  0xe6   :  { %4575 = vmatprep.subr.bf16.mxu1 %v4987_v15  ;;  %4522 = vmatpush3.bf16.msra.mxu0 %v4996_v18  ;;  %v3742_v15 = vcombine.high %v153_v10, %v153_v10 }
  0xe7   :  { %4523 = vmatprep.subr.bf16.mxu0 %v4999_v21 }
  0xe9   :  { %4576 = vmatpush3.bf16.msra.mxu1 %v4992_v19 }
  0xea   :  { %4577 = vmatprep.subr.bf16.mxu1 %v4997_v22  ;;  %4524 = vmatpush3.bf16.msra.mxu0 %v5004_v26  ;;  %v5041_v26 = vld [vmem:[%s6341_s1 + $0x5f8] sm:$0xff]  }
  0xeb   :  { %3164 = vmatmul.mubr.bf16.gmra.mrb[100].mxu0 %v4993_v20  ;;  %4525 = vmatprep.subr.bf16.mxu0 %v5009_v30  ;;  %v3744_v20 = vcombine.high %v154_v16, %v154_v16  ;;  %v5043_v30 = vld [vmem:[%s6341_s1 + $0x578] sm:$0xff]  }
  0xec   :  { %3244 = vmatmul.mubr.bf16.gmra.mrb[100].mxu1 %v4994_v23  ;;  %3171 = vmatprep.mubr.bf16.mxu0 %v5000_v25 }
  0xed   :  { %4578 = vmatpush3.bf16.msra.mxu1 %v4998_v24  ;;  %3251 = vmatprep.mubr.bf16.mxu1 %v5002_v27  ;;  %v5040_v24 = vld [vmem:[%s6341_s1 + $0x530] sm:$0xff]  }
  0xee   :  { %4579 = vmatprep.subr.bf16.mxu1 %v5007_v28  ;;  %4526 = vmatpush3.bf16.msra.mxu0 %v5010_v31 }
  0xef   :  { %4527 = vmatprep.subr.bf16.mxu0 %v5019_v38 }
  0xf1   :  { %4580 = vmatpush3.bf16.msra.mxu1 %v5008_v29  ;;  %v5042_v29 = vld [vmem:[%s6341_s1 + $0x5b8] sm:$0xff]  }
  0xf2   :  { %4581 = vmatprep.subr.bf16.mxu1 %v5017_v36  ;;  %4528 = vmatpush3.bf16.msra.mxu0 %v5020_v39  ;;  %v3741_v36 = vcombine.low %v153_v10, %v153_v10 }
  0xf3   :  { %3172 = vmatmul.mubr.bf16.gmra.mrb[104].mxu0 %v5005_v32  ;;  %4529 = vmatprep.subr.bf16.mxu0 %v5029_v52 }
  0xf4   :  { %3252 = vmatmul.mubr.bf16.gmra.mrb[104].mxu1 %v5006_v33  ;;  %3179 = vmatprep.mubr.bf16.mxu0 %v5011_v34  ;;  %v5044_v33 = vld [vmem:[%s6341_s1 + $0x538] sm:$0xff]  }
  0xf5   :  { %3259 = vmatprep.mubr.bf16.mxu1 %v5013_v35  ;;  %4582 = vmatpush3.bf16.msra.mxu1 %v5018_v37 }
  0xf6   :  { %v4017_v43 = vpop.f32.mrb[0].mxu0  ;;  %4583 = vmatprep.subr.bf16.mxu1 %v5021_v40  ;;  %4530 = vmatpush3.bf16.msra.mxu0 %v5030_v60  ;;  %v3743_v40 = vcombine.low %v154_v16, %v154_v16  ;;  %v5058_v16 = vld [vmem:[%s6342_s0 + $0x120] ss:$100 sps:$4 sm:$0xff]  }
  0xf7   :  { %v4069_v45 = vpop.f32.mrb[0].mxu1  ;;  %v4018_v46 = vpop.f32.mrb[1].mxu0  ;;  %4531 = vmatprep.subr.bf16.mxu0 %v5031_v0  ;;  %v5053_v0 = vld [vmem:[%s6342_s0 + $0x11c] ss:$100 sps:$4 sm:$0xff]  }
  0xf8   :  { %v4019_v47 = vadd.f32 %v4018_v46, %v4017_v43  ;;  %v4070_v48 = vpop.f32.mrb[1].mxu1  ;;  %v4020_v49 = vpop.f32.mrb[2].mxu0  ;;  %v5051_v43 = vld [vmem:[%s6341_s1 + $0x600] sm:$0xff]  }
  0xf9   :  { %v4071_v53 = vadd.f32 %v4070_v48, %v4069_v45  ;;  %v4072_v54 = vpop.f32.mrb[2].mxu1  ;;  %v4021_v55 = vpop.f32.mrb[3].mxu0  ;;  %4584 = vmatpush3.bf16.msra.mxu1 %v5026_v51 }
  0xfa   :  { %v2518_v57 = vadd.f32 %v4019_v47, %v5959_v41  ;;  %v4022_v58 = vadd.f32 %v4021_v55, %v4020_v49  ;;  %v4073_v59 = vpop.f32.mrb[3].mxu1  ;;  %4585 = vmatprep.subr.bf16.mxu1 %v5032_v2  ;;  %4532 = vmatpush3.bf16.msra.mxu0 %v5033_v6  ;;  %v5050_v47 = vld [vmem:[%s6342_s0 + $0x5c] ss:$100 sps:$4 sm:$0xff]  }
  0xfb   :  { %v4074_v61 = vadd.f32 %v4073_v59, %v4072_v54  ;;  %3180 = vmatmul.mubr.bf16.gmra.mrb[108].mxu0 %v5015_v42  ;;  %4533 = vmatprep.subr.bf16.mxu0 %v5039_v11  ;;  %v5047_v42 = vld [vmem:[%s6342_s0 + $0x54] ss:$100 sps:$4 sm:$0xff]  }
  0xfc   :  { %v5983_v62 = vadd.f32 %v4071_v53, %v2518_v57  ;;  %v2521_v63 = vadd.f32 %v4022_v58, %v5959_v41  ;;  %3260 = vmatmul.mubr.bf16.gmra.mrb[108].mxu1 %v5016_v44  ;;  %3187 = vmatprep.mubr.bf16.mxu0 %v5022_v50  ;;  %v5045_v54 = vld [vmem:[%s6342_s0 + $0x50] ss:$100 sps:$4 sm:$0xff]   ;;  %v5048_v57 = vld [vmem:[%s6342_s0 + $0x58] ss:$100 sps:$4 sm:$0xff]  }
  0xfd   :  { %3267 = vmatprep.mubr.bf16.mxu1 %v5024_v56  ;;  %4586 = vmatpush3.bf16.msra.mxu1 %v5034_v9  ;;  %v5052_v9 = vld [vmem:[%s6341_s1 + $0x608] sm:$0xff]  }
  0xfe   :  { %v5995_v3 = vadd.f32 %v4074_v61, %v2521_v63  ;;  %v4023_v4 = vpop.f32.mrb[4].mxu0  ;;  %4534 = vmatpush3.bf16.msra.mxu0 %v5040_v24  ;;  %4587 = vmatprep.subr.bf16.mxu1 %v5041_v26 }
  0xff   :  { %v4075_v7 = vpop.f32.mrb[4].mxu1  ;;  %v4024_v8 = vpop.f32.mrb[5].mxu0  ;;  %4535 = vmatprep.subr.bf16.mxu0 %v5043_v30 }
 0x100   :  { %v4025_v12 = vadd.f32 %v4024_v8, %v4023_v4  ;;  %v4076_v13 = vpop.f32.mrb[5].mxu1  ;;  %v4026_v14 = vpop.f32.mrb[6].mxu0 }
 0x101   :  { %v4077_v17 = vadd.f32 %v4076_v13, %v4075_v7  ;;  %v4078_v18 = vpop.f32.mrb[6].mxu1  ;;  %v4027_v19 = vpop.f32.mrb[7].mxu0  ;;  %4588 = vmatpush3.bf16.msra.mxu1 %v5042_v29  ;;  %v5057_v13 = vld [vmem:[%s6342_s0 + $0x118] ss:$100 sps:$4 sm:$0xff]  }
 0x102   :  { %v2526_v21 = vadd.f32 %v4025_v12, %v5959_v41  ;;  %v4028_v22 = vadd.f32 %v4027_v19, %v4026_v14  ;;  %v4079_v23 = vpop.f32.mrb[7].mxu1  ;;  %4536 = vmatpush3.bf16.msra.mxu0 %v5044_v33  ;;  %4667 = vmatprep.subr.bf16.mxu1 %v5051_v43  ;;  %v5066_v33 = vld [vmem:[%s6341_s1 + $0x618] sm:$0xff]  }
 0x103   :  { %v4080_v25 = vadd.f32 %v4079_v23, %v4078_v18  ;;  %3188 = vmatmul.mubr.bf16.gmra.mrb[112].mxu0 %v5027_v1  ;;  %4639 = vmatprep.subr.bf16.mxu0 %v5051_v43  ;;  %v5060_v23 = vld [vmem:[%s6342_s0 + $0x1e4] ss:$100 sps:$4 sm:$0xff]  }
 0x104   :  { %v6022_v27 = vadd.f32 %v4077_v17, %v2526_v21  ;;  %v2529_v28 = vadd.f32 %v4028_v22, %v5959_v41  ;;  %3268 = vmatmul.mubr.bf16.gmra.mrb[112].mxu1 %v5028_v5  ;;  %3195 = vmatprep.mubr.bf16.mxu0 %v3742_v15  ;;  %v5055_v5 = vld [vmem:[%s6342_s0 + $0x124] ss:$100 sps:$4 sm:$0xff]   ;;  %v5059_v17 = vld [vmem:[%s6341_s1 + $0x610] sm:$0xff]  }
 0x105   :  { %3275 = vmatprep.mubr.bf16.mxu1 %v3744_v20 }
 0x106   :  { %v6031_v31 = vadd.f32 %v4080_v25, %v2529_v28  ;;  %v4029_v32 = vpop.f32.mrb[8].mxu0  ;;  %v5062_v28 = vld [vmem:[%s6342_s0 + $0x1ec] ss:$100 sps:$4 sm:$0xff]  }
 0x107   :  { %v4081_v34 = vpop.f32.mrb[8].mxu1  ;;  %v4030_v35 = vpop.f32.mrb[9].mxu0 }
 0x108   :  { %v4031_v37 = vadd.f32 %v4030_v35, %v4029_v32  ;;  %v4082_v38 = vpop.f32.mrb[9].mxu1  ;;  %v4032_v39 = vpop.f32.mrb[10].mxu0 }
 0x109   :  { %v4083_v44 = vadd.f32 %v4082_v38, %v4081_v34  ;;  %v4084_v45 = vpop.f32.mrb[10].mxu1  ;;  %v4033_v46 = vpop.f32.mrb[11].mxu0 }
 0x10a   :  { %v2534_v48 = vadd.f32 %v4031_v37, %v5959_v41  ;;  %v4034_v49 = vadd.f32 %v4033_v46, %v4032_v39  ;;  %v4085_v50 = vpop.f32.mrb[11].mxu1  ;;  %v5064_v37 = vld [vmem:[%s6342_s0 + $0x1e0] ss:$100 sps:$4 sm:$0xff]  }
 0x10b   :  { %v4086_v51 = vadd.f32 %v4085_v50, %v4084_v45  ;;  %3196 = vmatmul.mubr.bf16.gmra.mrb[116].mxu0 %v3741_v36 }
 0x10c   :  { %v6046_v52 = vadd.f32 %v4083_v44, %v2534_v48  ;;  %v2537_v53 = vadd.f32 %v4034_v49, %v5959_v41  ;;  %3276 = vmatmul.mubr.bf16.gmra.mrb[116].mxu1 %v3743_v40  ;;  %3315 = vmatprep.mubr.bf16.mxu0 %v5047_v42  ;;  %v5065_v40 = vld [vmem:[%s6342_s0 + $0x1e8] ss:$100 sps:$4 sm:$0xff]   ;;  %v5073_v42 = vld [vmem:[%s6341_s1 + $0x620] sm:$0xff]  }
 0x10d   :  { %3395 = vmatprep.mubr.bf16.mxu1 %v5050_v47  ;;  %v5067_v48 = vld [vmem:[%s6342_s0 + $0x2ac] ss:$100 sps:$4 sm:$0xff]  }
 0x10e   :  { %v6052_v55 = vadd.f32 %v4086_v51, %v2537_v53  ;;  %v4035_v56 = vpop.f32.mrb[12].mxu0  ;;  %v5069_v53 = vld [vmem:[%s6342_s0 + $0x2b4] ss:$100 sps:$4 sm:$0xff]  }
 0x10f   :  { %v4087_v58 = vpop.f32.mrb[12].mxu1  ;;  %v4036_v59 = vpop.f32.mrb[13].mxu0 }
 0x110   :  { %v4037_v60 = vadd.f32 %v4036_v59, %v4035_v56  ;;  %v4088_v61 = vpop.f32.mrb[13].mxu1  ;;  %v4038_v63 = vpop.f32.mrb[14].mxu0 }
 0x111   :  { %v4089_v1 = vadd.f32 %v4088_v61, %v4087_v58  ;;  %v4090_v2 = vpop.f32.mrb[14].mxu1  ;;  %v4039_v4 = vpop.f32.mrb[15].mxu0 }
 0x112   :  { %v2542_v6 = vadd.f32 %v4037_v60, %v5959_v41  ;;  %v4040_v7 = vadd.f32 %v4039_v4, %v4038_v63  ;;  %v4091_v8 = vpop.f32.mrb[15].mxu1  ;;  %v5071_v63 = vld [vmem:[%s6342_s0 + $0x2a8] ss:$100 sps:$4 sm:$0xff]   ;;  %v5072_v4 = vld [vmem:[%s6342_s0 + $0x2b0] ss:$100 sps:$4 sm:$0xff]  }
 0x113   :  { %v4092_v10 = vadd.f32 %v4091_v8, %v4090_v2  ;;  %3316 = vmatmul.mubr.bf16.vlgmr.msra.gmra.mrb[120].mxu0 %v5045_v54 }
 0x114   :  { %v6067_v11 = vadd.f32 %v4089_v1, %v2542_v6  ;;  %v2545_v12 = vadd.f32 %v4040_v7, %v5959_v41  ;;  %3396 = vmatmul.mubr.bf16.vlgmr.msra.gmra.mrb[120].mxu1 %v5048_v57  ;;  %3323 = vmatprep.mubr.bf16.mxu0 %v5053_v0  ;;  %v5074_v57 = vld [vmem:[%s6341_s1 + $0x628] sm:$0xff]  }
 0x115   :  { %4675 = vmatpush3.bf16.msra.mxu1 %v5051_v43  ;;  %3403 = vmatprep.mubr.bf16.mxu1 %v5055_v5  ;;  %v5075_v5 = vld [vmem:[%s6342_s0 + $0x374] ss:$100 sps:$4 sm:$0xff]  }
 0x116   :  { %v6073_v14 = vadd.f32 %v4092_v10, %v2545_v12  ;;  %v4041_v15 = vpop.f32.mrb[16].mxu0  ;;  %4668 = vmatprep.subr.bf16.mxu1 %v5052_v9  ;;  %4640 = vmatpush3.bf16.msra.mxu0 %v5051_v43 }
 0x117   :  { %v4093_v18 = vpop.f32.mrb[16].mxu1  ;;  %v4042_v19 = vpop.f32.mrb[17].mxu0  ;;  %4641 = vmatprep.subr.bf16.mxu0 %v5052_v9 }
 0x118   :  { %v4043_v20 = vadd.f32 %v4042_v19, %v4041_v15  ;;  %v4094_v21 = vpop.f32.mrb[17].mxu1  ;;  %v4044_v22 = vpop.f32.mrb[18].mxu0  ;;  %v5086_v15 = vld [vmem:[%s6341_s1 + $0x638] sm:$0xff]  }
 0x119   :  { %v4095_v24 = vadd.f32 %v4094_v21, %v4093_v18  ;;  %v4096_v25 = vpop.f32.mrb[18].mxu1  ;;  %v4045_v26 = vpop.f32.mrb[19].mxu0  ;;  %4676 = vmatpush3.bf16.msra.mxu1 %v5052_v9  ;;  %v156_v21 = vld [vmem:[%s6342_s0 + $0x440] sm:$0x11] }
 0x11a   :  { %v2550_v29 = vadd.f32 %v4043_v20, %v5959_v41  ;;  %v4046_v30 = vadd.f32 %v4045_v26, %v4044_v22  ;;  %v4097_v32 = vpop.f32.mrb[19].mxu1  ;;  %4669 = vmatprep.subr.bf16.mxu1 %v5059_v17  ;;  %4642 = vmatpush3.bf16.msra.mxu0 %v5052_v9  ;;  %v5077_v9 = vld [vmem:[%s6342_s0 + $0x37c] ss:$100 sps:$4 sm:$0xff]  }
 0x11b   :  { %v4098_v34 = vadd.f32 %v4097_v32, %v4096_v25  ;;  %3324 = vmatmul.mubr.bf16.gmra.mrb[124].mxu0 %v5057_v13  ;;  %4643 = vmatprep.subr.bf16.mxu0 %v5059_v17 }
 0x11c   :  { %v6091_v35 = vadd.f32 %v4095_v24, %v2550_v29  ;;  %v2553_v36 = vadd.f32 %v4046_v30, %v5959_v41  ;;  %3404 = vmatmul.mubr.bf16.gmra.mrb[124].mxu1 %v5058_v16  ;;  %3331 = vmatprep.mubr.bf16.mxu0 %v5060_v23 }
 0x11d   :  { %4677 = vmatpush3.bf16.msra.mxu1 %v5059_v17  ;;  %3411 = vmatprep.mubr.bf16.mxu1 %v5062_v28  ;;  %v5080_v28 = vld [vmem:[%s6342_s0 + $0x378] ss:$100 sps:$4 sm:$0xff]  }
 0x11e   :  { %v6097_v38 = vadd.f32 %v4098_v34, %v2553_v36  ;;  %v4047_v39 = vpop.f32.mrb[20].mxu0  ;;  %4670 = vmatprep.subr.bf16.mxu1 %v5066_v33  ;;  %4644 = vmatpush3.bf16.msra.mxu0 %v5059_v17  ;;  %v3748_v34 = vcombine.high %v156_v21, %v156_v21 }
 0x11f   :  { %v4099_v43 = vpop.f32.mrb[20].mxu1  ;;  %v4048_v44 = vpop.f32.mrb[21].mxu0  ;;  %4645 = vmatprep.subr.bf16.mxu0 %v5066_v33 }
 0x120   :  { %v4049_v45 = vadd.f32 %v4048_v44, %v4047_v39  ;;  %v4100_v46 = vpop.f32.mrb[21].mxu1  ;;  %v4050_v47 = vpop.f32.mrb[22].mxu0 }
 0x121   :  { %v4101_v49 = vadd.f32 %v4100_v46, %v4099_v43  ;;  %v4102_v50 = vpop.f32.mrb[22].mxu1  ;;  %v4051_v51 = vpop.f32.mrb[23].mxu0  ;;  %4678 = vmatpush3.bf16.msra.mxu1 %v5066_v33 }
 0x122   :  { %v2558_v54 = vadd.f32 %v4049_v45, %v5959_v41  ;;  %v4103_v56 = vpop.f32.mrb[23].mxu1  ;;  %4671 = vmatprep.subr.bf16.mxu1 %v5073_v42  ;;  %4646 = vmatpush3.bf16.msra.mxu0 %v5066_v33  ;;  %v5081_v41 = vld [vmem:[%s6341_s1 + $0x630] sm:$0xff]   ;;  %v3747_v51 = vcombine.low %v156_v21, %v156_v21 }
 0x123   :  { %3332 = vmatmul.mubr.bf16.gmra.mrb[128].mxu0 %v5064_v37  ;;  %4647 = vmatprep.subr.bf16.mxu0 %v5073_v42 }
 0x124   :  { %v6115_v58 = vadd.f32 %v4101_v49, %v2558_v54  ;;  %3412 = vmatmul.mubr.bf16.gmra.mrb[128].mxu1 %v5065_v40  ;;  %3339 = vmatprep.mubr.bf16.mxu0 %v5067_v48 }
 0x125   :  { %3419 = vmatprep.mubr.bf16.mxu1 %v5069_v53  ;;  %4679 = vmatpush3.bf16.msra.mxu1 %v5073_v42  ;;  %v5087_v53 = vld [vmem:[%s6342_s0 + $0x60] ss:$100 sps:$4 sm:$0xff]  }
 0x126   :  { %v4121_v59 = vpop.f32.mrb[24].mxu0  ;;  %4672 = vmatprep.subr.bf16.mxu1 %v5074_v57  ;;  %4648 = vmatpush3.bf16.msra.mxu0 %v5073_v42 }
 0x127   :  { %v4173_v60 = vpop.f32.mrb[24].mxu1  ;;  %v4122_v61 = vpop.f32.mrb[25].mxu0  ;;  %4649 = vmatprep.subr.bf16.mxu0 %v5074_v57 }
 0x128   :  { %v4123_v0 = vadd.f32 %v4122_v61, %v4121_v59  ;;  %v4174_v1 = vpop.f32.mrb[25].mxu1  ;;  %v4124_v2 = vpop.f32.mrb[26].mxu0 }
 0x129   :  { %v4175_v6 = vadd.f32 %v4174_v1, %v4173_v60  ;;  %v4176_v7 = vpop.f32.mrb[26].mxu1  ;;  %v4125_v8 = vpop.f32.mrb[27].mxu0  ;;  %4680 = vmatpush3.bf16.msra.mxu1 %v5074_v57 }
 0x12a   :  { %v2678_v10 = vadd.f32 %v4123_v0, %v5983_v62  ;;  %v4126_v12 = vadd.f32 %v4125_v8, %v4124_v2  ;;  %v4177_v13 = vpop.f32.mrb[27].mxu1  ;;  %4673 = vmatprep.subr.bf16.mxu1 %v5081_v41  ;;  %4650 = vmatpush3.bf16.msra.mxu0 %v5074_v57  ;;  %v155_v62 = vld [vmem:[%s6342_s0 + $0x438] sm:$0x11]  ;;  %v5088_v57 = vld [vmem:[%s6342_s0 + $0x1f0] ss:$100 sps:$4 sm:$0xff]  }
 0x12b   :  { %v4178_v16 = vadd.f32 %v4177_v13, %v4176_v7  ;;  %3340 = vmatmul.mubr.bf16.gmra.mrb[132].mxu0 %v5071_v63  ;;  %4651 = vmatprep.subr.bf16.mxu0 %v5081_v41  ;;  %v3746_v29 = vcombine.high %v155_v62, %v155_v62  ;;  %v3745_v48 = vcombine.low %v155_v62, %v155_v62  ;;  %v5091_v13 = vld [vmem:[%s6342_s0 + $0x380] ss:$100 sps:$4 sm:$0xff]  }
 0x12c   :  { %v6136_v17 = vadd.f32 %v4175_v6, %v2678_v10  ;;  %v2681_v18 = vadd.f32 %v4126_v12, %v5995_v3  ;;  %3420 = vmatmul.mubr.bf16.gmra.mrb[132].mxu1 %v5072_v4  ;;  %3347 = vmatprep.mubr.bf16.mxu0 %v5075_v5  ;;  %v5079_v3 = vld [vmem:[%s6342_s0 + $0x370] ss:$100 sps:$4 sm:$0xff]  }
 0x12d   :  { %3427 = vmatprep.mubr.bf16.mxu1 %v5077_v9  ;;  %4681 = vmatpush3.bf16.msra.mxu1 %v5081_v41  ;;  %v5090_v9 = vld [vmem:[%s6342_s0 + $0x2b8] ss:$100 sps:$4 sm:$0xff]  }
 0x12e   :  { %v6142_v19 = vadd.f32 %v4178_v16, %v2681_v18  ;;  %v4127_v20 = vpop.f32.mrb[28].mxu0  ;;  %4652 = vmatpush3.bf16.msra.mxu0 %v5081_v41  ;;  %4674 = vmatprep.subr.bf16.mxu1 %v5086_v15 }
 0x12f   :  { %v4179_v22 = vpop.f32.mrb[28].mxu1  ;;  %v4128_v23 = vpop.f32.mrb[29].mxu0  ;;  %4653 = vmatprep.subr.bf16.mxu0 %v5086_v15 }
 0x130   :  { %v4129_v24 = vadd.f32 %v4128_v23, %v4127_v20  ;;  %v4180_v25 = vpop.f32.mrb[29].mxu1  ;;  %v4130_v26 = vpop.f32.mrb[30].mxu0 }
 0x131   :  { %v4181_v30 = vadd.f32 %v4180_v25, %v4179_v22  ;;  %v4182_v32 = vpop.f32.mrb[30].mxu1  ;;  %v4131_v33 = vpop.f32.mrb[31].mxu0  ;;  %4682 = vmatpush3.bf16.msra.mxu1 %v5086_v15 }
 0x132   :  { %v2686_v36 = vadd.f32 %v4129_v24, %v6022_v27  ;;  %v4132_v37 = vadd.f32 %v4131_v33, %v4130_v26  ;;  %v4183_v39 = vpop.f32.mrb[31].mxu1  ;;  %4654 = vmatpush3.bf16.msra.mxu0 %v5086_v15 }
 0x133   :  { %v4184_v40 = vadd.f32 %v4183_v39, %v4182_v32  ;;  %3348 = vmatmul.mubr.bf16.gmra.mrb[136].mxu0 %v5079_v3 }
 0x134   :  { %v6154_v42 = vadd.f32 %v4181_v30, %v2686_v36  ;;  %v2689_v43 = vadd.f32 %v4132_v37, %v6031_v31  ;;  %3428 = vmatmul.mubr.bf16.gmra.mrb[136].mxu1 %v5080_v28  ;;  %3355 = vmatprep.mubr.bf16.mxu0 %v3746_v29 }
 0x135   :  { %3435 = vmatprep.mubr.bf16.mxu1 %v3748_v34 }
 0x136   :  { %v6157_v44 = vadd.f32 %v4184_v40, %v2689_v43  ;;  %v4133_v45 = vpop.f32.mrb[32].mxu0 }
 0x137   :  { %v4185_v46 = vpop.f32.mrb[32].mxu1  ;;  %v4134_v47 = vpop.f32.mrb[33].mxu0 }
 0x138   :  { %v4135_v49 = vadd.f32 %v4134_v47, %v4133_v45  ;;  %v4186_v27 = vpop.f32.mrb[33].mxu1  ;;  %v4136_v50 = vpop.f32.mrb[34].mxu0 }
 0x139   :  { %v4187_v54 = vadd.f32 %v4186_v27, %v4185_v46  ;;  %v4188_v56 = vpop.f32.mrb[34].mxu1  ;;  %v4137_v31 = vpop.f32.mrb[35].mxu0 }
 0x13a   :  { %v2694_v59 = vadd.f32 %v4135_v49, %v6046_v52  ;;  %v4138_v41 = vadd.f32 %v4137_v31, %v4136_v50  ;;  %v4189_v60 = vpop.f32.mrb[35].mxu1  ;;  %v5089_v52 = vld [vmem:[%s6342_s0 + $0x128] ss:$100 sps:$4 sm:$0xff]  }
 0x13b   :  { %v4190_v61 = vadd.f32 %v4189_v60, %v4188_v56  ;;  %3356 = vmatmul.mubr.bf16.gmra.mrb[140].mxu0 %v3745_v48 }
 0x13c   :  { %v6166_v63 = vadd.f32 %v4187_v54, %v2694_v59  ;;  %v2697_v0 = vadd.f32 %v4138_v41, %v6052_v55  ;;  %3436 = vmatmul.mubr.bf16.gmra.mrb[140].mxu1 %v3747_v51  ;;  %4655 = vmatprep.mubr.bf16.mxu0 %v5087_v53 }
 0x13d   :  { %4659 = vmatprep.mubr.bf16.mxu1 %v5088_v57 }
 0x13e   :  { %v6169_v1 = vadd.f32 %v4190_v61, %v2697_v0  ;;  %v4139_v2 = vpop.f32.mrb[36].mxu0 }
 0x13f   :  { %v4191_v4 = vpop.f32.mrb[36].mxu1  ;;  %v4140_v5 = vpop.f32.mrb[37].mxu0 }
 0x140   :  { %v4141_v6 = vadd.f32 %v4140_v5, %v4139_v2  ;;  %v4192_v7 = vpop.f32.mrb[37].mxu1  ;;  %v4142_v8 = vpop.f32.mrb[38].mxu0 }
 0x141   :  { %v4193_v55 = vadd.f32 %v4192_v7, %v4191_v4  ;;  %v4194_v10 = vpop.f32.mrb[38].mxu1  ;;  %v4143_v12 = vpop.f32.mrb[39].mxu0 }
 0x142   :  { %v2702_v15 = vadd.f32 %v4141_v6, %v6067_v11  ;;  %v4144_v16 = vadd.f32 %v4143_v12, %v4142_v8  ;;  %v4195_v18 = vpop.f32.mrb[39].mxu1  ;;  %v5092_v11 = vld [vmem:[%s6342_s0 + $0x448] ss:$0 sps:$4 sm:$0x11]  }
 0x143   :  { %v4196_v62 = vadd.f32 %v4195_v18, %v4194_v10  ;;  %4656 = vmatmul.mubr.bf16.vlgmr.msra.gmra.mrb[144].mxu0 %v5089_v52 }
 0x144   :  { %v6181_v20 = vadd.f32 %v4193_v55, %v2702_v15  ;;  %v2705_v21 = vadd.f32 %v4144_v16, %v6073_v14  ;;  %4660 = vmatmul.mubr.bf16.vlgmr.msra.gmra.mrb[144].mxu1 %v5090_v9 }
 0x145   :  { %4663 = vmatprep.mubr.bf16.mxu1 %v5091_v13 }
 0x146   :  { %v6184_v22 = vadd.f32 %v4196_v62, %v2705_v21  ;;  %v4145_v23 = vpop.f32.mrb[40].mxu0 }
 0x147   :  { %v4197_v3 = vpop.f32.mrb[40].mxu1  ;;  %v4146_v24 = vpop.f32.mrb[41].mxu0 }
 0x148   :  { %v4147_v25 = vadd.f32 %v4146_v24, %v4145_v23  ;;  %v4198_v26 = vpop.f32.mrb[41].mxu1  ;;  %v4148_v28 = vpop.f32.mrb[42].mxu0 }
 0x149   :  { %v4199_v29 = vadd.f32 %v4198_v26, %v4197_v3  ;;  %v4200_v30 = vpop.f32.mrb[42].mxu1  ;;  %v4149_v32 = vpop.f32.mrb[43].mxu0 }
 0x14a   :  { %v2710_v33 = vadd.f32 %v4147_v25, %v6091_v35  ;;  %v4150_v14 = vadd.f32 %v4149_v32, %v4148_v28  ;;  %v4201_v34 = vpop.f32.mrb[43].mxu1 }
 0x14b   :  { %v4202_v36 = vadd.f32 %v4201_v34, %v4200_v30 }
 0x14c   :  { %v6190_v37 = vadd.f32 %v4199_v29, %v2710_v33  ;;  %v2713_v39 = vadd.f32 %v4150_v14, %v6097_v38  ;;  %4664 = vmatmul.mubr.bf16.gmra.mrb[148].mxu1 %v5092_v11 }
 0x14e   :  { %v6193_v40 = vadd.f32 %v4202_v36, %v2713_v39  ;;  %v4151_v43 = vpop.f32.mrb[44].mxu0 }
 0x14f   :  { %v4203_v45 = vpop.f32.mrb[44].mxu1  ;;  %v4152_v46 = vpop.f32.mrb[45].mxu0 }
 0x150   :  { %v4153_v47 = vadd.f32 %v4152_v46, %v4151_v43  ;;  %v4204_v48 = vpop.f32.mrb[45].mxu1  ;;  %v4154_v49 = vpop.f32.mrb[46].mxu0 }
 0x151   :  { %v4205_v27 = vadd.f32 %v4204_v48, %v4203_v45  ;;  %v4206_v50 = vpop.f32.mrb[46].mxu1  ;;  %v4155_v51 = vpop.f32.mrb[47].mxu0 }
 0x152   :  { %v2718_v35 = vadd.f32 %v4153_v47, %v6115_v58  ;;  %v4207_v53 = vpop.f32.mrb[47].mxu1 }
 0x154   :  { %v6196_v54 = vadd.f32 %v4205_v27, %v2718_v35 }
 0x156   :  { %v4225_v56 = vpop.f32.mrb[48].mxu0 }
 0x157   :  { %v4277_v31 = vpop.f32.mrb[48].mxu1  ;;  %v4226_v38 = vpop.f32.mrb[49].mxu0 }
 0x158   :  { %v4227_v57 = vadd.f32 %v4226_v38, %v4225_v56  ;;  %v4278_v59 = vpop.f32.mrb[49].mxu1  ;;  %v4228_v41 = vpop.f32.mrb[50].mxu0 }
 0x159   :  { %v4279_v60 = vadd.f32 %v4278_v59, %v4277_v31  ;;  %v4280_v61 = vpop.f32.mrb[50].mxu1  ;;  %v4229_v0 = vpop.f32.mrb[51].mxu0 }
 0x15a   :  { %v2838_v2 = vadd.f32 %v4227_v57, %v6136_v17  ;;  %v4230_v4 = vadd.f32 %v4229_v0, %v4228_v41  ;;  %v4281_v5 = vpop.f32.mrb[51].mxu1 }
 0x15b   :  { %v4282_v52 = vadd.f32 %v4281_v5, %v4280_v61 }
 0x15c   :  { %v6199_v6 = vadd.f32 %v4279_v60, %v2838_v2  ;;  %v2841_v58 = vadd.f32 %v4230_v4, %v6142_v19 }
 0x15e   :  { %v6202_v7 = vadd.f32 %v4282_v52, %v2841_v58  ;;  %v4231_v8 = vpop.f32.mrb[52].mxu0 }
 0x15f   :  { %v4283_v9 = vpop.f32.mrb[52].mxu1  ;;  %v4232_v55 = vpop.f32.mrb[53].mxu0 }
 0x160   :  { %v4233_v10 = vadd.f32 %v4232_v55, %v4231_v8  ;;  %v4284_v12 = vpop.f32.mrb[53].mxu1  ;;  %v4234_v13 = vpop.f32.mrb[54].mxu0 }
 0x161   :  { %v4285_v15 = vadd.f32 %v4284_v12, %v4283_v9  ;;  %v4286_v16 = vpop.f32.mrb[54].mxu1  ;;  %v4235_v18 = vpop.f32.mrb[55].mxu0 }
 0x162   :  { %v2846_v17 = vadd.f32 %v4233_v10, %v6154_v42  ;;  %v4236_v62 = vadd.f32 %v4235_v18, %v4234_v13  ;;  %v4287_v21 = vpop.f32.mrb[55].mxu1 }
 0x163   :  { %v4288_v23 = vadd.f32 %v4287_v21, %v4286_v16 }
 0x164   :  { %v6205_v3 = vadd.f32 %v4285_v15, %v2846_v17  ;;  %v2849_v19 = vadd.f32 %v4236_v62, %v6157_v44 }
 0x166   :  { %v6208_v24 = vadd.f32 %v4288_v23, %v2849_v19  ;;  %v4237_v25 = vpop.f32.mrb[56].mxu0 }
 0x167   :  { %v4289_v26 = vpop.f32.mrb[56].mxu1  ;;  %v4238_v28 = vpop.f32.mrb[57].mxu0 }
 0x168   :  { %v4239_v11 = vadd.f32 %v4238_v28, %v4237_v25  ;;  %v4290_v29 = vpop.f32.mrb[57].mxu1  ;;  %v4240_v30 = vpop.f32.mrb[58].mxu0 }
 0x169   :  { %v4291_v32 = vadd.f32 %v4290_v29, %v4289_v26  ;;  %v4292_v33 = vpop.f32.mrb[58].mxu1  ;;  %v4241_v14 = vpop.f32.mrb[59].mxu0 }
 0x16a   :  { %v2854_v42 = vadd.f32 %v4239_v11, %v6166_v63  ;;  %v4242_v34 = vadd.f32 %v4241_v14, %v4240_v30  ;;  %v4293_v36 = vpop.f32.mrb[59].mxu1 }
 0x16b   :  { %v4294_v39 = vadd.f32 %v4293_v36, %v4292_v33 }
 0x16c   :  { %v6211_v43 = vadd.f32 %v4291_v32, %v2854_v42  ;;  %v2857_v44 = vadd.f32 %v4242_v34, %v6169_v1 }
 0x16e   :  { %v6214_v45 = vadd.f32 %v4294_v39, %v2857_v44  ;;  %v4243_v46 = vpop.f32.mrb[60].mxu0 }
 0x16f   :  { %v4295_v47 = vpop.f32.mrb[60].mxu1  ;;  %v4244_v48 = vpop.f32.mrb[61].mxu0 }
 0x170   :  { %v4245_v49 = vadd.f32 %v4244_v48, %v4243_v46  ;;  %v4296_v27 = vpop.f32.mrb[61].mxu1  ;;  %v4246_v50 = vpop.f32.mrb[62].mxu0 }
 0x171   :  { %v4297_v51 = vadd.f32 %v4296_v27, %v4295_v47  ;;  %v4298_v35 = vpop.f32.mrb[62].mxu1  ;;  %v4247_v53 = vpop.f32.mrb[63].mxu0 }
 0x172   :  { %v2862_v63 = vadd.f32 %v4245_v49, %v6181_v20  ;;  %v4248_v56 = vadd.f32 %v4247_v53, %v4246_v50  ;;  %v4299_v31 = vpop.f32.mrb[63].mxu1 }
 0x173   :  { %v4300_v38 = vadd.f32 %v4299_v31, %v4298_v35 }
 0x174   :  { %v6217_v57 = vadd.f32 %v4297_v51, %v2862_v63  ;;  %v2865_v1 = vadd.f32 %v4248_v56, %v6184_v22 }
 0x176   :  { %v6220_v59 = vadd.f32 %v4300_v38, %v2865_v1  ;;  %v4249_v41 = vpop.f32.mrb[64].mxu0 }
 0x177   :  { %v4301_v60 = vpop.f32.mrb[64].mxu1  ;;  %v4250_v61 = vpop.f32.mrb[65].mxu0 }
 0x178   :  { %v4251_v0 = vadd.f32 %v4250_v61, %v4249_v41  ;;  %v4302_v2 = vpop.f32.mrb[65].mxu1  ;;  %v4252_v4 = vpop.f32.mrb[66].mxu0 }
 0x179   :  { %v4303_v5 = vadd.f32 %v4302_v2, %v4301_v60  ;;  %v4304_v52 = vpop.f32.mrb[66].mxu1  ;;  %v4253_v58 = vpop.f32.mrb[67].mxu0 }
 0x17a   :  { %v2870_v20 = vadd.f32 %v4251_v0, %v6190_v37  ;;  %v4254_v8 = vadd.f32 %v4253_v58, %v4252_v4  ;;  %v4305_v9 = vpop.f32.mrb[67].mxu1 }
 0x17b   :  { %v4306_v55 = vadd.f32 %v4305_v9, %v4304_v52 }
 0x17c   :  { %v6223_v10 = vadd.f32 %v4303_v5, %v2870_v20  ;;  %v2873_v22 = vadd.f32 %v4254_v8, %v6193_v40 }
 0x17e   :  { %v6226_v12 = vadd.f32 %v4306_v55, %v2873_v22  ;;  %v4255_v13 = vpop.f32.mrb[68].mxu0 }
 0x17f   :  { %v4307_v15 = vpop.f32.mrb[68].mxu1  ;;  %v4256_v16 = vpop.f32.mrb[69].mxu0 }
 0x180   :  { %v4257_v18 = vadd.f32 %v4256_v16, %v4255_v13  ;;  %v4308_v17 = vpop.f32.mrb[69].mxu1  ;;  %v4258_v62 = vpop.f32.mrb[70].mxu0 }
 0x181   :  { %v4309_v21 = vadd.f32 %v4308_v17, %v4307_v15  ;;  %v4310_v23 = vpop.f32.mrb[70].mxu1  ;;  %v4259_v19 = vpop.f32.mrb[71].mxu0 }
 0x182   :  { %v2878_v37 = vadd.f32 %v4257_v18, %v6196_v54  ;;  %v4311_v25 = vpop.f32.mrb[71].mxu1 }
 0x184   :  { %v6229_v26 = vadd.f32 %v4309_v21, %v2878_v37 }
 0x186   :  { %v4329_v28 = vpop.f32.mrb[72].mxu0 }
 0x187   :  { %v4381_v11 = vpop.f32.mrb[72].mxu1  ;;  %v4330_v29 = vpop.f32.mrb[73].mxu0 }
 0x188   :  { %v4331_v40 = vadd.f32 %v4330_v29, %v4329_v28  ;;  %v4382_v30 = vpop.f32.mrb[73].mxu1  ;;  %v4332_v32 = vpop.f32.mrb[74].mxu0 }
 0x189   :  { %v4383_v33 = vadd.f32 %v4382_v30, %v4381_v11  ;;  %v4384_v14 = vpop.f32.mrb[74].mxu1  ;;  %v4333_v42 = vpop.f32.mrb[75].mxu0 }
 0x18a   :  { %v2998_v34 = vadd.f32 %v4331_v40, %v6199_v6  ;;  %v4334_v36 = vadd.f32 %v4333_v42, %v4332_v32  ;;  %v4385_v39 = vpop.f32.mrb[75].mxu1 }
 0x18b   :  { %v4386_v44 = vadd.f32 %v4385_v39, %v4384_v14 }
 0x18c   :  { %v6232_v46 = vadd.f32 %v4383_v33, %v2998_v34  ;;  %v3001_v54 = vadd.f32 %v4334_v36, %v6202_v7 }
 0x18e   :  { %v6235_v47 = vadd.f32 %v4386_v44, %v3001_v54  ;;  %v4335_v48 = vpop.f32.mrb[76].mxu0 }
 0x18f   :  { %v4387_v49 = vpop.f32.mrb[76].mxu1  ;;  %v4336_v27 = vpop.f32.mrb[77].mxu0 }
 0x190   :  { %v4337_v50 = vadd.f32 %v4336_v27, %v4335_v48  ;;  %v4388_v51 = vpop.f32.mrb[77].mxu1  ;;  %v4338_v35 = vpop.f32.mrb[78].mxu0 }
 0x191   :  { %v4389_v53 = vadd.f32 %v4388_v51, %v4387_v49  ;;  %v4390_v63 = vpop.f32.mrb[78].mxu1  ;;  %v4339_v56 = vpop.f32.mrb[79].mxu0 }
 0x192   :  { %v3006_v6 = vadd.f32 %v4337_v50, %v6205_v3  ;;  %v4340_v31 = vadd.f32 %v4339_v56, %v4338_v35  ;;  %v4391_v38 = vpop.f32.mrb[79].mxu1 }
 0x193   :  { %v4392_v1 = vadd.f32 %v4391_v38, %v4390_v63 }
 0x194   :  { %v6238_v41 = vadd.f32 %v4389_v53, %v3006_v6  ;;  %v3009_v7 = vadd.f32 %v4340_v31, %v6208_v24 }
 0x196   :  { %v6241_v60 = vadd.f32 %v4392_v1, %v3009_v7  ;;  %v4341_v61 = vpop.f32.mrb[80].mxu0 }
 0x197   :  { %v4393_v0 = vpop.f32.mrb[80].mxu1  ;;  %v4342_v2 = vpop.f32.mrb[81].mxu0 }
 0x198   :  { %v4343_v4 = vadd.f32 %v4342_v2, %v4341_v61  ;;  %v4394_v5 = vpop.f32.mrb[81].mxu1  ;;  %v4344_v52 = vpop.f32.mrb[82].mxu0 }
 0x199   :  { %v4395_v58 = vadd.f32 %v4394_v5, %v4393_v0  ;;  %v4396_v20 = vpop.f32.mrb[82].mxu1  ;;  %v4345_v8 = vpop.f32.mrb[83].mxu0 }
 0x19a   :  { %v3014_v3 = vadd.f32 %v4343_v4, %v6211_v43  ;;  %v4346_v9 = vadd.f32 %v4345_v8, %v4344_v52  ;;  %v4397_v55 = vpop.f32.mrb[83].mxu1 }
 0x19b   :  { %v4398_v22 = vadd.f32 %v4397_v55, %v4396_v20 }
 0x19c   :  { %v6244_v13 = vadd.f32 %v4395_v58, %v3014_v3  ;;  %v3017_v24 = vadd.f32 %v4346_v9, %v6214_v45 }
 0x19e   :  { %v6247_v15 = vadd.f32 %v4398_v22, %v3017_v24  ;;  %v4347_v16 = vpop.f32.mrb[84].mxu0 }
 0x19f   :  { %v4399_v18 = vpop.f32.mrb[84].mxu1  ;;  %v4348_v17 = vpop.f32.mrb[85].mxu0 }
 0x1a0   :  { %v4349_v62 = vadd.f32 %v4348_v17, %v4347_v16  ;;  %v4400_v21 = vpop.f32.mrb[85].mxu1  ;;  %v4350_v23 = vpop.f32.mrb[86].mxu0 }
 0x1a1   :  { %v4401_v19 = vadd.f32 %v4400_v21, %v4399_v18  ;;  %v4402_v37 = vpop.f32.mrb[86].mxu1  ;;  %v4351_v25 = vpop.f32.mrb[87].mxu0 }
 0x1a2   :  { %v3022_v43 = vadd.f32 %v4349_v62, %v6217_v57  ;;  %v4352_v28 = vadd.f32 %v4351_v25, %v4350_v23  ;;  %v4403_v11 = vpop.f32.mrb[87].mxu1 }
 0x1a3   :  { %v4404_v29 = vadd.f32 %v4403_v11, %v4402_v37 }
 0x1a4   :  { %v6250_v40 = vadd.f32 %v4401_v19, %v3022_v43  ;;  %v3025_v45 = vadd.f32 %v4352_v28, %v6220_v59 }
 0x1a6   :  { %v6253_v30 = vadd.f32 %v4404_v29, %v3025_v45  ;;  %v4353_v32 = vpop.f32.mrb[88].mxu0 }
 0x1a7   :  { %v4405_v33 = vpop.f32.mrb[88].mxu1  ;;  %v4354_v14 = vpop.f32.mrb[89].mxu0 }
 0x1a8   :  { %v4355_v42 = vadd.f32 %v4354_v14, %v4353_v32  ;;  %v4406_v34 = vpop.f32.mrb[89].mxu1  ;;  %v4356_v36 = vpop.f32.mrb[90].mxu0 }
 0x1a9   :  { %v4407_v39 = vadd.f32 %v4406_v34, %v4405_v33  ;;  %v4408_v44 = vpop.f32.mrb[90].mxu1  ;;  %v4357_v54 = vpop.f32.mrb[91].mxu0 }
 0x1aa   :  { %v3030_v57 = vadd.f32 %v4355_v42, %v6223_v10  ;;  %v4358_v48 = vadd.f32 %v4357_v54, %v4356_v36  ;;  %v4409_v49 = vpop.f32.mrb[91].mxu1 }
 0x1ab   :  { %v4410_v27 = vadd.f32 %v4409_v49, %v4408_v44 }
 0x1ac   :  { %v6256_v50 = vadd.f32 %v4407_v39, %v3030_v57  ;;  %v3033_v59 = vadd.f32 %v4358_v48, %v6226_v12 }
 0x1ae   :  { %v6259_v51 = vadd.f32 %v4410_v27, %v3033_v59  ;;  %v4359_v35 = vpop.f32.mrb[92].mxu0 }
 0x1af   :  { %v4411_v53 = vpop.f32.mrb[92].mxu1  ;;  %v4360_v63 = vpop.f32.mrb[93].mxu0 }
 0x1b0   :  { %v4361_v56 = vadd.f32 %v4360_v63, %v4359_v35  ;;  %v4412_v6 = vpop.f32.mrb[93].mxu1  ;;  %v4362_v31 = vpop.f32.mrb[94].mxu0 }
 0x1b1   :  { %v4413_v38 = vadd.f32 %v4412_v6, %v4411_v53  ;;  %v4414_v1 = vpop.f32.mrb[94].mxu1  ;;  %v4363_v7 = vpop.f32.mrb[95].mxu0 }
 0x1b2   :  { %v3038_v10 = vadd.f32 %v4361_v56, %v6229_v26  ;;  %v4415_v61 = vpop.f32.mrb[95].mxu1 }
 0x1b4   :  { %v6262_v0 = vadd.f32 %v4413_v38, %v3038_v10 }
 0x1b6   :  { %v4433_v2 = vpop.f32.mrb[96].mxu0 }
 0x1b7   :  { %v4485_v4 = vpop.f32.mrb[96].mxu1  ;;  %v4434_v5 = vpop.f32.mrb[97].mxu0 }
 0x1b8   :  { %v4435_v12 = vadd.f32 %v4434_v5, %v4433_v2  ;;  %v4486_v52 = vpop.f32.mrb[97].mxu1  ;;  %v4436_v58 = vpop.f32.mrb[98].mxu0 }
 0x1b9   :  { %v4487_v20 = vadd.f32 %v4486_v52, %v4485_v4  ;;  %v4488_v8 = vpop.f32.mrb[98].mxu1  ;;  %v4437_v3 = vpop.f32.mrb[99].mxu0 }
 0x1ba   :  { %v3158_v9 = vadd.f32 %v4435_v12, %v6232_v46  ;;  %v4438_v55 = vadd.f32 %v4437_v3, %v4436_v58  ;;  %v4489_v22 = vpop.f32.mrb[99].mxu1 }
 0x1bb   :  { %v4490_v24 = vadd.f32 %v4489_v22, %v4488_v8 }
 0x1bc   :  { %v6265_v16 = vadd.f32 %v4487_v20, %v3158_v9  ;;  %v3161_v26 = vadd.f32 %v4438_v55, %v6235_v47 }
 0x1be   :  { %v6268_v18 = vadd.f32 %v4490_v24, %v3161_v26  ;;  %v4439_v17 = vpop.f32.mrb[100].mxu0 }
 0x1bf   :  { %v4491_v62 = vpop.f32.mrb[100].mxu1  ;;  %v4440_v21 = vpop.f32.mrb[101].mxu0 }
 0x1c0   :  { %v4441_v23 = vadd.f32 %v4440_v21, %v4439_v17  ;;  %v4492_v19 = vpop.f32.mrb[101].mxu1  ;;  %v4442_v37 = vpop.f32.mrb[102].mxu0 }
 0x1c1   :  { %v4493_v25 = vadd.f32 %v4492_v19, %v4491_v62  ;;  %v4494_v43 = vpop.f32.mrb[102].mxu1  ;;  %v4443_v28 = vpop.f32.mrb[103].mxu0 }
 0x1c2   :  { %v3166_v46 = vadd.f32 %v4441_v23, %v6238_v41  ;;  %v4444_v11 = vadd.f32 %v4443_v28, %v4442_v37  ;;  %v4495_v29 = vpop.f32.mrb[103].mxu1 }
 0x1c3   :  { %v4496_v45 = vadd.f32 %v4495_v29, %v4494_v43 }
 0x1c4   :  { %v6271_v32 = vadd.f32 %v4493_v25, %v3166_v46  ;;  %v3169_v47 = vadd.f32 %v4444_v11, %v6241_v60 }
 0x1c6   :  { %v6274_v33 = vadd.f32 %v4496_v45, %v3169_v47  ;;  %v4445_v14 = vpop.f32.mrb[104].mxu0 }
 0x1c7   :  { %v4497_v42 = vpop.f32.mrb[104].mxu1  ;;  %v4446_v34 = vpop.f32.mrb[105].mxu0 }
 0x1c8   :  { %v4447_v36 = vadd.f32 %v4446_v34, %v4445_v14  ;;  %v4498_v39 = vpop.f32.mrb[105].mxu1  ;;  %v4448_v44 = vpop.f32.mrb[106].mxu0 }
 0x1c9   :  { %v4499_v54 = vadd.f32 %v4498_v39, %v4497_v42  ;;  %v4500_v57 = vpop.f32.mrb[106].mxu1  ;;  %v4449_v48 = vpop.f32.mrb[107].mxu0 }
 0x1ca   :  { %v3174_v41 = vadd.f32 %v4447_v36, %v6244_v13  ;;  %v4450_v49 = vadd.f32 %v4449_v48, %v4448_v44  ;;  %v4501_v27 = vpop.f32.mrb[107].mxu1 }
 0x1cb   :  { %v4502_v59 = vadd.f32 %v4501_v27, %v4500_v57 }
 0x1cc   :  { %v6277_v35 = vadd.f32 %v4499_v54, %v3174_v41  ;;  %v3177_v60 = vadd.f32 %v4450_v49, %v6247_v15 }
 0x1ce   :  { %v6280_v53 = vadd.f32 %v4502_v59, %v3177_v60  ;;  %v4451_v63 = vpop.f32.mrb[108].mxu0 }
 0x1cf   :  { %v4503_v56 = vpop.f32.mrb[108].mxu1  ;;  %v4452_v6 = vpop.f32.mrb[109].mxu0 }
 0x1d0   :  { %v4453_v31 = vadd.f32 %v4452_v6, %v4451_v63  ;;  %v4504_v38 = vpop.f32.mrb[109].mxu1  ;;  %v4454_v1 = vpop.f32.mrb[110].mxu0 }
 0x1d1   :  { %v4505_v7 = vadd.f32 %v4504_v38, %v4503_v56  ;;  %v4506_v10 = vpop.f32.mrb[110].mxu1  ;;  %v4455_v61 = vpop.f32.mrb[111].mxu0 }
 0x1d2   :  { %v3182_v13 = vadd.f32 %v4453_v31, %v6250_v40  ;;  %v4456_v2 = vadd.f32 %v4455_v61, %v4454_v1  ;;  %v4507_v4 = vpop.f32.mrb[111].mxu1 }
 0x1d3   :  { %v4508_v5 = vadd.f32 %v4507_v4, %v4506_v10 }
 0x1d4   :  { %v6283_v12 = vadd.f32 %v4505_v7, %v3182_v13  ;;  %v3185_v15 = vadd.f32 %v4456_v2, %v6253_v30 }
 0x1d6   :  { %v6286_v52 = vadd.f32 %v4508_v5, %v3185_v15  ;;  %v4457_v58 = vpop.f32.mrb[112].mxu0 }
 0x1d7   :  { %v4509_v20 = vpop.f32.mrb[112].mxu1  ;;  %v4458_v8 = vpop.f32.mrb[113].mxu0 }
 0x1d8   :  { %v4459_v3 = vadd.f32 %v4458_v8, %v4457_v58  ;;  %v4510_v9 = vpop.f32.mrb[113].mxu1  ;;  %v4460_v55 = vpop.f32.mrb[114].mxu0 }
 0x1d9   :  { %v4511_v22 = vadd.f32 %v4510_v9, %v4509_v20  ;;  %v4512_v24 = vpop.f32.mrb[114].mxu1  ;;  %v4461_v26 = vpop.f32.mrb[115].mxu0 }
 0x1da   :  { %v3190_v40 = vadd.f32 %v4459_v3, %v6256_v50  ;;  %v4462_v17 = vadd.f32 %v4461_v26, %v4460_v55  ;;  %v4513_v62 = vpop.f32.mrb[115].mxu1 }
 0x1db   :  { %v4514_v21 = vadd.f32 %v4513_v62, %v4512_v24 }
 0x1dc   :  { %v6289_v23 = vadd.f32 %v4511_v22, %v3190_v40  ;;  %v3193_v30 = vadd.f32 %v4462_v17, %v6259_v51 }
 0x1de   :  { %v6292_v19 = vadd.f32 %v4514_v21, %v3193_v30  ;;  %v4463_v37 = vpop.f32.mrb[116].mxu0 }
 0x1df   :  { %v4515_v25 = vpop.f32.mrb[116].mxu1  ;;  %v4464_v43 = vpop.f32.mrb[117].mxu0 }
 0x1e0   :  { %v4465_v28 = vadd.f32 %v4464_v43, %v4463_v37  ;;  %v4516_v46 = vpop.f32.mrb[117].mxu1  ;;  %v4466_v11 = vpop.f32.mrb[118].mxu0 }
 0x1e1   :  { %v4517_v29 = vadd.f32 %v4516_v46, %v4515_v25  ;;  %v4518_v45 = vpop.f32.mrb[118].mxu1  ;;  %v4467_v47 = vpop.f32.mrb[119].mxu0 }
 0x1e2   :  { %v3198_v50 = vadd.f32 %v4465_v28, %v6262_v0  ;;  %v4519_v14 = vpop.f32.mrb[119].mxu1 }
 0x1e4   :  { %v6295_v42 = vadd.f32 %v4517_v29, %v3198_v50 }
 0x1e6   :  { %v4537_v34 = vpop.f32.mrb[120].mxu0 }
 0x1e7   :  { %v4589_v36 = vpop.f32.mrb[120].mxu1  ;;  %v4538_v39 = vpop.f32.mrb[121].mxu0 }
 0x1e8   :  { %v4539_v51 = vadd.f32 %v4538_v39, %v4537_v34  ;;  %v4590_v44 = vpop.f32.mrb[121].mxu1  ;;  %v4540_v54 = vpop.f32.mrb[122].mxu0 }
 0x1e9   :  { %v4591_v57 = vadd.f32 %v4590_v44, %v4589_v36  ;;  %v4592_v48 = vpop.f32.mrb[122].mxu1  ;;  %v4541_v41 = vpop.f32.mrb[123].mxu0 }
 0x1ea   :  { %v3318_v49 = vadd.f32 %v4539_v51, %v6265_v16  ;;  %v4542_v27 = vadd.f32 %v4541_v41, %v4540_v54  ;;  %v4593_v59 = vpop.f32.mrb[123].mxu1 }
 0x1eb   :  { %v4594_v60 = vadd.f32 %v4593_v59, %v4592_v48 }
 0x1ec   :  { %v3321_v63 = vadd.f32 %v4542_v27, %v6268_v18  ;;  %v6299_v0 = vadd.f32 %v4591_v57, %v3318_v49 }
 0x1ee   :  { %v4543_v56 = vpop.f32.mrb[124].mxu0  ;;  %v6301_v6 = vadd.f32 %v4594_v60, %v3321_v63 }
 0x1ef   :  { %v4595_v31 = vpop.f32.mrb[124].mxu1  ;;  %v4544_v38 = vpop.f32.mrb[125].mxu0 }
 0x1f0   :  { %v4545_v1 = vadd.f32 %v4544_v38, %v4543_v56  ;;  %v4596_v7 = vpop.f32.mrb[125].mxu1  ;;  %v4546_v10 = vpop.f32.mrb[126].mxu0 }
 0x1f1   :  { %v4597_v61 = vadd.f32 %v4596_v7, %v4595_v31  ;;  %v4598_v13 = vpop.f32.mrb[126].mxu1  ;;  %v4547_v2 = vpop.f32.mrb[127].mxu0 }
 0x1f2   :  { %v3326_v16 = vadd.f32 %v4545_v1, %v6271_v32  ;;  %v4548_v4 = vadd.f32 %v4547_v2, %v4546_v10  ;;  %v4599_v5 = vpop.f32.mrb[127].mxu1 }
 0x1f3   :  { %v4600_v15 = vadd.f32 %v4599_v5, %v4598_v13 }
 0x1f4   :  { %v3329_v18 = vadd.f32 %v4548_v4, %v6274_v33  ;;  %v6305_v58 = vadd.f32 %v4597_v61, %v3326_v16 }
 0x1f6   :  { %v4549_v20 = vpop.f32.mrb[128].mxu0  ;;  %v6307_v8 = vadd.f32 %v4600_v15, %v3329_v18 }
 0x1f7   :  { %v4601_v3 = vpop.f32.mrb[128].mxu1  ;;  %v4550_v9 = vpop.f32.mrb[129].mxu0 }
 0x1f8   :  { %v4551_v55 = vadd.f32 %v4550_v9, %v4549_v20  ;;  %v4602_v22 = vpop.f32.mrb[129].mxu1  ;;  %v4552_v24 = vpop.f32.mrb[130].mxu0 }
 0x1f9   :  { %v4603_v26 = vadd.f32 %v4602_v22, %v4601_v3  ;;  %v4604_v40 = vpop.f32.mrb[130].mxu1  ;;  %v4553_v17 = vpop.f32.mrb[131].mxu0 }
 0x1fa   :  { %v3334_v32 = vadd.f32 %v4551_v55, %v6277_v35  ;;  %v4554_v62 = vadd.f32 %v4553_v17, %v4552_v24  ;;  %v4605_v21 = vpop.f32.mrb[131].mxu1 }
 0x1fb   :  { %v4606_v30 = vadd.f32 %v4605_v21, %v4604_v40 }
 0x1fc   :  { %v3337_v33 = vadd.f32 %v4554_v62, %v6280_v53  ;;  %v3414_v37 = vadd.f32 %v4603_v26, %v3334_v32 }
 0x1fe   :  { %v4555_v25 = vpop.f32.mrb[132].mxu0  ;;  %v3417_v43 = vadd.f32 %v4606_v30, %v3337_v33 }
 0x1ff   :  { %v4607_v28 = vpop.f32.mrb[132].mxu1  ;;  %v4556_v46 = vpop.f32.mrb[133].mxu0 }
 0x200   :  { %v4557_v11 = vadd.f32 %v4556_v46, %v4555_v25  ;;  %v4608_v29 = vpop.f32.mrb[133].mxu1  ;;  %v4558_v45 = vpop.f32.mrb[134].mxu0 }
 0x201   :  { %v4609_v47 = vadd.f32 %v4608_v29, %v4607_v28  ;;  %v4610_v50 = vpop.f32.mrb[134].mxu1  ;;  %v4559_v14 = vpop.f32.mrb[135].mxu0 }
 0x202   :  { %v3342_v34 = vadd.f32 %v4557_v11, %v6283_v12  ;;  %v4560_v36 = vadd.f32 %v4559_v14, %v4558_v45  ;;  %v4611_v35 = vpop.f32.mrb[135].mxu1 }
 0x203   :  { %v4612_v39 = vadd.f32 %v4611_v35, %v4610_v50 }
 0x204   :  { %v3345_v51 = vadd.f32 %v4560_v36, %v6286_v52  ;;  %v3422_v44 = vadd.f32 %v4609_v47, %v3342_v34 }
 0x206   :  { %v4561_v53 = vpop.f32.mrb[136].mxu0  ;;  %v3425_v54 = vadd.f32 %v4612_v39, %v3345_v51 }
 0x207   :  { %v4613_v57 = vpop.f32.mrb[136].mxu1  ;;  %v4562_v48 = vpop.f32.mrb[137].mxu0 }
 0x208   :  { %v4563_v41 = vadd.f32 %v4562_v48, %v4561_v53  ;;  %v4614_v49 = vpop.f32.mrb[137].mxu1  ;;  %v4564_v27 = vpop.f32.mrb[138].mxu0  ;;  %v3592_v53 = vld [vmem:[%s6344_s3 + $0x28] sm:$0x1] }
 0x209   :  { %v4615_v59 = vadd.f32 %v4614_v49, %v4613_v57  ;;  %v4616_v60 = vpop.f32.mrb[138].mxu1  ;;  %v4565_v63 = vpop.f32.mrb[139].mxu0 }
 0x20a   :  { %v3350_v56 = vadd.f32 %v4563_v41, %v6289_v23  ;;  %v4566_v31 = vadd.f32 %v4565_v63, %v4564_v27  ;;  %v4617_v12 = vpop.f32.mrb[139].mxu1 }
 0x20b   :  { %v4618_v38 = vadd.f32 %v4617_v12, %v4616_v60 }
 0x20c   :  { %v3353_v1 = vadd.f32 %v4566_v31, %v6292_v19  ;;  %v3430_v7 = vadd.f32 %v4615_v59, %v3350_v56 }
 0x20e   :  { %v4567_v52 = vpop.f32.mrb[140].mxu0  ;;  %v3433_v10 = vadd.f32 %v4618_v38, %v3353_v1 }
 0x20f   :  { %v4619_v61 = vpop.f32.mrb[140].mxu1  ;;  %v4568_v13 = vpop.f32.mrb[141].mxu0 }
 0x210   :  { %v4569_v2 = vadd.f32 %v4568_v13, %v4567_v52  ;;  %v4620_v16 = vpop.f32.mrb[141].mxu1  ;;  %v4570_v4 = vpop.f32.mrb[142].mxu0 }
 0x211   :  { %v4621_v5 = vadd.f32 %v4620_v16, %v4619_v61  ;;  %v4622_v15 = vpop.f32.mrb[142].mxu1  ;;  %v4571_v18 = vpop.f32.mrb[143].mxu0 }
 0x212   :  { %v3358_v20 = vadd.f32 %v4569_v2, %v6295_v42  ;;  %v4623_v3 = vpop.f32.mrb[143].mxu1 }
 0x214   :  { %v3438_v23 = vadd.f32 %v4621_v5, %v3358_v20 }
 0x216   :  { %v4657_v9 = vpop.f32.mrb[144].mxu0 }
 0x217   :  { %v3486_v55 = vadd.f32 %v4657_v9, %v6305_v58  ;;  %v4661_v22 = vpop.f32.mrb[144].mxu1  ;;  %v3477_v19 = vpop.f32.mrb[145].mxu0 }
 0x218   :  { %v3502_v24 = vadd.f32 %v4661_v22, %v3422_v44  ;;  %v3478_v26 = vadd.f32 %v3477_v19, %v6299_v0  ;;  %v3493_v40 = vpop.f32.mrb[145].mxu1  ;;  %v4658_v17 = vpop.f32.mrb[146].mxu0 }
 0x219   :  { %v3494_v32 = vadd.f32 %v3493_v40, %v3414_v37  ;;  %v3489_v62 = vadd.f32 %v4658_v17, %v6307_v8  ;;  %v4662_v21 = vpop.f32.mrb[146].mxu1  ;;  %v3480_v30 = vpop.f32.mrb[147].mxu0  ;;  %v3525_v28 = vmax.f32 %v3486_v55, 0.0 }
 0x21a   :  { %v3505_v33 = vadd.f32 %v4662_v21, %v3425_v54  ;;  %v3481_v42 = vadd.f32 %v3480_v30, %v6301_v6  ;;  %v3496_v25 = vpop.f32.mrb[147].mxu1  ;;  %v3529_v58 = vmax.f32 %v3502_v24, 0.0  ;;  %v3523_v29 = vmax.f32 %v3478_v26, 0.0 }
 0x21b   :  { %v3526_v46 = vmax.f32 %v3489_v62, 0.0  ;;  %v3497_v11 = vadd.f32 %v3496_v25, %v3417_v43  ;;  %v3527_v50 = vmax.f32 %v3494_v32, 0.0 }
 0x21c   :  { %v3530_v45 = vmax.f32 %v3505_v33, 0.0  ;;  %v3524_v47 = vmax.f32 %v3481_v42, 0.0 }
 0x21d   :  { %v3980_v0 = vpack.c.bf16 %v3526_v46, %v3525_v28  ;;  %v3528_v14 = vmax.f32 %v3497_v11, 0.0 }
 0x21e   :  { %v3990_v34 = vpack.c.bf16 %v3530_v45, %v3529_v58  ;;  %v3975_v37 = vpack.c.bf16 %v3524_v47, %v3523_v29 }
 0x21f   :  { %3997 = vst [vmem:[%s6344_s3 + $0x8] sm:$0xff] %v3980_v0   ;;  %v3985_v8 = vpack.c.bf16 %v3528_v14, %v3527_v50  ;;  %v4665_v36 = vpop.f32.mrb[148].mxu1 }
 0x220   :  { %3999 = vst [vmem:[%s6344_s3 + $0x18] sm:$0xff] %v3990_v34   ;;  %3976 = vst [vmem:[%s6344_s3] sm:$0xff] %v3975_v37   ;;  %v3518_v6 = vadd.f32 %v4665_v36, %v3438_v23  ;;  %v3509_v43 = vpop.f32.mrb[149].mxu1 }
 0x221   :  { %3998 = vst [vmem:[%s6344_s3 + $0x10] sm:$0xff] %v3985_v8   ;;  %v3510_v35 = vadd.f32 %v3509_v43, %v3430_v7  ;;  %v4666_v39 = vpop.f32.mrb[150].mxu1 }
 0x222   :  { %v3533_v51 = vmax.f32 %v3518_v6, 0.0  ;;  %v3512_v44 = vpop.f32.mrb[151].mxu1 }
 0x223   :  { %v3513_v54 = vadd.f32 %v3512_v44, %v3433_v10  ;;  %v3531_v48 = vmax.f32 %v3510_v35, 0.0 }
 0x224   :  { %v3971_v57 = vpack.c.bf16 %v3533_v51, %v3533_v51 }
 0x225   :  { %v3532_v41 = vmax.f32 %v3513_v54, 0.0 }
 0x226   :  { %v3593_v49 = vsel %vm3591_vm2, %v3971_v57, %v3592_v53 }
 0x227   :  { %3594 = vst [vmem:[%s6344_s3 + $0x28] sm:$0x1] %v3593_v49  ;;  %v3995_v27 = vpack.c.bf16 %v3532_v41, %v3531_v48 }
 0x229   :  { %4000 = vst [vmem:[%s6344_s3 + $0x20] sm:$0xff] %v3995_v27  }

// kernel: tile.30
= control target key start
LH: loop header
LB: loop body
LE: loop exit
PB: predicated region body
PF: predicated region fallthrough
CT: control target
= control target key end

     0   :  { %s22_s0 = inlined_call_operand.vmem [shape: f32[64], index: 0, kind: input, shape index: {}]   ;;  %s23_s1 = inlined_call_operand.vmem [shape: f32[2,64], index: 1, kind: output, shape index: {}]  }
   0x1   :  { %v4_v0 = vld [vmem:[%s22_s0] ss:$0 sm:$0xff] }
   0x2   :  { %5 = vst [vmem:[%s23_s1] sm:$0x3] %v4_v0 }

// kernel: tile.31
= control target key start
LH: loop header
LB: loop body
LE: loop exit
PB: predicated region body
PF: predicated region fallthrough
CT: control target
= control target key end

     0   :  { %vm7_vm0 = vcmask 523264   ;;  %vm13_vm1 = vcmask 1048064   ;;  %s39_s0 = inlined_call_operand.vmem [shape: f32[2,64], index: 0, kind: input, shape index: {}]   ;;  %s40_s1 = inlined_call_operand.vmem [shape: f32[1,128], index: 1, kind: output, shape index: {}]  }
   0x1   :  { %v4_v0 = vld [vmem:[%s39_s0] sm:$0x3]  ;;  %s22_s0 = smov 64  }
   0x2   :  { %5 = vst [vmem:[#allocation1] sm:$0x3] %v4_v0 }
   0x9   :  { %v10_v1 = vld [vmem:[#allocation1 + $0x1] sm:$0x1]   ;;  %v6_v2 = vld [vmem:[#allocation1] sm:$0x1]  }
   0xa   :  { %11 = vrot.lane.b32.xlu0 %v10_v1, %s22_s0  ;;  %8 = vst.msk [vmem:[#allocation0] sm:$0x1] %vm7_vm0, %v6_v2  }
  0x7c   :  { %v12_v3 = vpop.permute.xlu0 %11  }
  0x7d   :  { %14 = vst.msk [vmem:[#allocation0] sm:$0x1] %vm13_vm1, %v12_v3  }
  0x84   :  { %v18_v4 = vld [vmem:[#allocation0] sm:$0x1] }
  0x85   :  { %20 = vst [vmem:[%s40_s1] sm:$0x1] %v18_v4 }

// kernel: _lambda_.8
= control target key start
LH: loop header
LB: loop body
LE: loop exit
PB: predicated region body
PF: predicated region fallthrough
CT: control target
= control target key end

     0   :  { %vm953_vm0 = vcmask 523264   ;;  %s2166_s1 = inlined_call_operand.vmem [shape: bf16[1600,128], index: 1, kind: input, shape index: {}]   ;;  %s2167_s0 = inlined_call_operand.vmem [shape: bf16[18,1600], index: 0, kind: input, shape index: {}]   ;;  %s2168_s2 = inlined_call_operand.vmem [shape: f32[1,128], index: 2, kind: input, shape index: {}]   ;;  %s2169_s3 = inlined_call_operand.vmem [shape: bf16[18,128], index: 3, kind: output, shape index: {}]  }
   0x1   :  { %v1645_v0 = vld [vmem:[%s2166_s1 + $0x40] sm:$0xff]   ;;  %v1649_v4 = vld [vmem:[%s2166_s1 + $0x48] sm:$0xff]   ;;  %v1653_v8 = vld [vmem:[%s2166_s1 + $0x50] sm:$0xff]  }
   0x2   :  { %v1646_v1 = vld [vmem:[%s2166_s1] sm:$0xff]   ;;  %1459 = vmatprep.subr.bf16.mxu0 %v1645_v0  ;;  %v1650_v5 = vld [vmem:[%s2166_s1 + $0x8] sm:$0xff]   ;;  %v1654_v9 = vld [vmem:[%s2166_s1 + $0x10] sm:$0xff]  }
   0x3   :  { %v1647_v2 = vld [vmem:[%s2166_s1 + $0xc0] sm:$0xff]   ;;  %1460 = vmatpush3.bf16.msra.mxu0 %v1646_v1  ;;  %v1651_v6 = vld [vmem:[%s2166_s1 + $0xc8] sm:$0xff]   ;;  %v1655_v10 = vld [vmem:[%s2166_s1 + $0xd0] sm:$0xff]  }
   0x4   :  { %v1648_v3 = vld [vmem:[%s2166_s1 + $0x80] sm:$0xff]   ;;  %1487 = vmatprep.subr.bf16.mxu1 %v1647_v2  ;;  %1461 = vmatprep.subr.bf16.mxu0 %v1649_v4  ;;  %v1652_v7 = vld [vmem:[%s2166_s1 + $0x88] sm:$0xff]   ;;  %v1656_v11 = vld [vmem:[%s2166_s1 + $0x90] sm:$0xff]  }
   0x5   :  { %1488 = vmatpush3.bf16.msra.mxu1 %v1648_v3  ;;  %v1657_v12 = vld [vmem:[%s2166_s1 + $0x58] sm:$0xff]   ;;  %v1661_v16 = vld [vmem:[%s2166_s1 + $0x60] sm:$0xff]   ;;  %v1665_v20 = vld [vmem:[%s2166_s1 + $0x68] sm:$0xff]  }
   0x6   :  { %1489 = vmatprep.subr.bf16.mxu1 %v1651_v6  ;;  %v1658_v13 = vld [vmem:[%s2166_s1 + $0x18] sm:$0xff]   ;;  %v1662_v17 = vld [vmem:[%s2166_s1 + $0x20] sm:$0xff]   ;;  %v1666_v21 = vld [vmem:[%s2166_s1 + $0x28] sm:$0xff]  }
   0x7   :  { %1462 = vmatpush3.bf16.msra.mxu0 %v1650_v5  ;;  %v1659_v14 = vld [vmem:[%s2166_s1 + $0xd8] sm:$0xff]   ;;  %v1663_v18 = vld [vmem:[%s2166_s1 + $0xe0] sm:$0xff]   ;;  %v1667_v22 = vld [vmem:[%s2166_s1 + $0xe8] sm:$0xff]  }
   0x8   :  { %1463 = vmatprep.subr.bf16.mxu0 %v1653_v8  ;;  %v1660_v15 = vld [vmem:[%s2166_s1 + $0x98] sm:$0xff]   ;;  %v1664_v19 = vld [vmem:[%s2166_s1 + $0xa0] sm:$0xff]   ;;  %v1668_v23 = vld [vmem:[%s2166_s1 + $0xa8] sm:$0xff]  }
   0x9   :  { %1490 = vmatpush3.bf16.msra.mxu1 %v1652_v7  ;;  %v1669_v24 = vld [vmem:[%s2166_s1 + $0x70] sm:$0xff]   ;;  %v1673_v28 = vld [vmem:[%s2166_s1 + $0x78] sm:$0xff]   ;;  %v1680_v34 = vld [vmem:[%s2166_s1 + $0x140] sm:$0xff]  }
   0xa   :  { %1491 = vmatprep.subr.bf16.mxu1 %v1655_v10  ;;  %v1670_v25 = vld [vmem:[%s2166_s1 + $0x30] sm:$0xff]   ;;  %v1674_v29 = vld [vmem:[%s2166_s1 + $0x38] sm:$0xff]   ;;  %v1683_v36 = vld [vmem:[%s2167_s0 + $0xc] ss:$52 sps:$4 sm:$0xff]  }
   0xb   :  { %1464 = vmatpush3.bf16.msra.mxu0 %v1654_v9  ;;  %v1671_v26 = vld [vmem:[%s2166_s1 + $0xf0] sm:$0xff]   ;;  %v1675_v30 = vld [vmem:[%s2166_s1 + $0xf8] sm:$0xff]   ;;  %v1684_v37 = vld [vmem:[%s2166_s1 + $0x100] sm:$0xff]   ;;  %1040 = vmatprep.mubr.bf16.mxu1 %v1683_v36 }
   0xc   :  { %1465 = vmatprep.subr.bf16.mxu0 %v1657_v12  ;;  %v1672_v27 = vld [vmem:[%s2166_s1 + $0xb0] sm:$0xff]   ;;  %v1678_v32 = vld [vmem:[%s2167_s0 + $0x4] ss:$52 sps:$4 sm:$0xff]   ;;  %v1681_v35 = vld [vmem:[%s2167_s0 + $0x8] ss:$52 sps:$4 sm:$0xff]  }
   0xd   :  { %1492 = vmatpush3.bf16.msra.mxu1 %v1656_v11  ;;  %v1676_v31 = vld [vmem:[%s2167_s0] ss:$52 sps:$4 sm:$0xff]   ;;  %v1679_v33 = vld [vmem:[%s2166_s1 + $0xb8] sm:$0xff]   ;;  %992 = vmatprep.mubr.bf16.mxu0 %v1678_v32  ;;  %v1687_v40 = vld [vmem:[%s2166_s1 + $0x148] sm:$0xff]  }
   0xe   :  { %1493 = vmatprep.subr.bf16.mxu1 %v1659_v14  ;;  %v1685_v38 = vld [vmem:[%s2166_s1 + $0x1c0] sm:$0xff]   ;;  %v1688_v41 = vld [vmem:[%s2166_s1 + $0x108] sm:$0xff]   ;;  %v1691_v44 = vld [vmem:[%s2166_s1 + $0x150] sm:$0xff]  }
   0xf   :  { %1466 = vmatpush3.bf16.msra.mxu0 %v1658_v13  ;;  %v1686_v39 = vld [vmem:[%s2166_s1 + $0x180] sm:$0xff]   ;;  %v1689_v42 = vld [vmem:[%s2166_s1 + $0x1c8] sm:$0xff]   ;;  %v1692_v45 = vld [vmem:[%s2166_s1 + $0x110] sm:$0xff]  }
  0x10   :  { %1467 = vmatprep.subr.bf16.mxu0 %v1661_v16  ;;  %v1690_v43 = vld [vmem:[%s2166_s1 + $0x188] sm:$0xff]   ;;  %v1693_v46 = vld [vmem:[%s2166_s1 + $0x1d0] sm:$0xff]   ;;  %v1695_v48 = vld [vmem:[%s2166_s1 + $0x158] sm:$0xff]  }
  0x11   :  { %1494 = vmatpush3.bf16.msra.mxu1 %v1660_v15  ;;  %v1694_v47 = vld [vmem:[%s2166_s1 + $0x190] sm:$0xff]   ;;  %v1696_v49 = vld [vmem:[%s2166_s1 + $0x118] sm:$0xff]   ;;  %v1699_v52 = vld [vmem:[%s2166_s1 + $0x160] sm:$0xff]  }
  0x12   :  { %1495 = vmatprep.subr.bf16.mxu1 %v1663_v18  ;;  %v1697_v50 = vld [vmem:[%s2166_s1 + $0x1d8] sm:$0xff]   ;;  %v1700_v53 = vld [vmem:[%s2166_s1 + $0x120] sm:$0xff]   ;;  %v1703_v56 = vld [vmem:[%s2166_s1 + $0x168] sm:$0xff]  }
  0x13   :  { %1468 = vmatpush3.bf16.msra.mxu0 %v1662_v17  ;;  %v1698_v51 = vld [vmem:[%s2166_s1 + $0x198] sm:$0xff]   ;;  %v1701_v54 = vld [vmem:[%s2166_s1 + $0x1e0] sm:$0xff]   ;;  %v29_v57 = vld [vmem:[%s2167_s0 + $0x68] sm:$0x11] }
  0x14   :  { %1469 = vmatprep.subr.bf16.mxu0 %v1665_v20  ;;  %v1702_v55 = vld [vmem:[%s2166_s1 + $0x1a0] sm:$0xff]   ;;  %v1334_v58 = vcombine.high %v29_v57, %v29_v57  ;;  %v1705_v59 = vld [vmem:[%s2166_s1 + $0x128] sm:$0xff]   ;;  %v1333_v60 = vcombine.low %v29_v57, %v29_v57  ;;  %v1709_v63 = vld [vmem:[%s2166_s1 + $0x170] sm:$0xff]  }
  0x15   :  { %1496 = vmatpush3.bf16.msra.mxu1 %v1664_v19  ;;  %v1707_v61 = vld [vmem:[%s2166_s1 + $0x1e8] sm:$0xff]   ;;  %v30_v0 = vld [vmem:[%s2167_s0 + $0x70] sm:$0x11]  ;;  %v1715_v6 = vld [vmem:[%s2166_s1 + $0x178] sm:$0xff]  }
  0x16   :  { %1497 = vmatprep.subr.bf16.mxu1 %v1667_v22  ;;  %v1708_v62 = vld [vmem:[%s2166_s1 + $0x1a8] sm:$0xff]   ;;  %v1336_v1 = vcombine.high %v30_v0, %v30_v0  ;;  %v1711_v2 = vld [vmem:[%s2166_s1 + $0x130] sm:$0xff]   ;;  %v1335_v3 = vcombine.low %v30_v0, %v30_v0  ;;  %v1716_v7 = vld [vmem:[%s2166_s1 + $0x138] sm:$0xff]  }
  0x17   :  { %1470 = vmatpush3.bf16.msra.mxu0 %v1666_v21  ;;  %v1713_v4 = vld [vmem:[%s2166_s1 + $0x1f0] sm:$0xff]   ;;  %v1717_v8 = vld [vmem:[%s2166_s1 + $0x1f8] sm:$0xff]   ;;  %v1722_v12 = vld [vmem:[%s2166_s1 + $0x240] sm:$0xff]  }
  0x18   :  { %1471 = vmatprep.subr.bf16.mxu0 %v1669_v24  ;;  %v1714_v5 = vld [vmem:[%s2166_s1 + $0x1b0] sm:$0xff]   ;;  %v1721_v11 = vld [vmem:[%s2166_s1 + $0x1b8] sm:$0xff]   ;;  %v1726_v15 = vld [vmem:[%s2166_s1 + $0x200] sm:$0xff]  }
  0x19   :  { %1498 = vmatpush3.bf16.msra.mxu1 %v1668_v23  ;;  %v1718_v9 = vld [vmem:[%s2167_s0 + $0x10] ss:$52 sps:$4 sm:$0xff]   ;;  %v1720_v10 = vld [vmem:[%s2167_s0 + $0x14] ss:$52 sps:$4 sm:$0xff]   ;;  %v1723_v13 = vld [vmem:[%s2167_s0 + $0x18] ss:$52 sps:$4 sm:$0xff]  }
  0x1a   :  { %1499 = vmatprep.subr.bf16.mxu1 %v1671_v26  ;;  %v1725_v14 = vld [vmem:[%s2167_s0 + $0x1c] ss:$52 sps:$4 sm:$0xff]   ;;  %v1727_v16 = vld [vmem:[%s2166_s1 + $0x2c0] sm:$0xff]   ;;  %v1729_v18 = vld [vmem:[%s2166_s1 + $0x248] sm:$0xff]  }
  0x1b   :  { %1472 = vmatpush3.bf16.msra.mxu0 %v1670_v25  ;;  %v1728_v17 = vld [vmem:[%s2166_s1 + $0x280] sm:$0xff]   ;;  %v1730_v19 = vld [vmem:[%s2166_s1 + $0x208] sm:$0xff]   ;;  %v31_v21 = vld [vmem:[%s2167_s0 + $0x78] sm:$0x11] }
  0x1c   :  { %1473 = vmatprep.subr.bf16.mxu0 %v1673_v28  ;;  %v1731_v20 = vld [vmem:[%s2166_s1 + $0x2c8] sm:$0xff]   ;;  %v1338_v22 = vcombine.high %v31_v21, %v31_v21  ;;  %v1337_v24 = vcombine.low %v31_v21, %v31_v21  ;;  %v1735_v25 = vld [vmem:[%s2166_s1 + $0x250] sm:$0xff]   ;;  %v32_v26 = vld [vmem:[%s2167_s0 + $0x80] sm:$0x11] }
  0x1d   :  { %1500 = vmatpush3.bf16.msra.mxu1 %v1672_v27  ;;  %v1733_v23 = vld [vmem:[%s2166_s1 + $0x288] sm:$0xff]   ;;  %v1340_v27 = vcombine.high %v32_v26, %v32_v26  ;;  %v1737_v28 = vld [vmem:[%s2166_s1 + $0x210] sm:$0xff]   ;;  %v1741_v32 = vld [vmem:[%s2166_s1 + $0x258] sm:$0xff]  }
  0x1e   :  { %1501 = vmatprep.subr.bf16.mxu1 %v1675_v30  ;;  %v1739_v30 = vld [vmem:[%s2166_s1 + $0x2d0] sm:$0xff]   ;;  %v1745_v36 = vld [vmem:[%s2166_s1 + $0x260] sm:$0xff]   ;;  %v1768_v57 = vld [vmem:[%s2166_s1 + $0x308] sm:$0xff]  }
  0x1f   :  { %1474 = vmatpush3.bf16.msra.mxu0 %v1674_v29  ;;  %v1339_v29 = vcombine.low %v32_v26, %v32_v26  ;;  %v1775_v0 = vld [vmem:[%s2167_s0 + $0x30] ss:$52 sps:$4 sm:$0xff]  }
  0x20   :  { %1515 = vmatprep.subr.bf16.mxu0 %v1680_v34  ;;  %v1743_v34 = vld [vmem:[%s2166_s1 + $0x2d8] sm:$0xff]  }
  0x21   :  { %1502 = vmatpush3.bf16.msra.mxu1 %v1679_v33  ;;  %v1742_v33 = vld [vmem:[%s2166_s1 + $0x218] sm:$0xff]  }
  0x22   :  { %993 = vmatmul.mubr.bf16.vlgmr.msra.gmra.mrb[0].mxu0 %v1676_v31  ;;  %1543 = vmatprep.subr.bf16.mxu1 %v1685_v38  ;;  %v1740_v31 = vld [vmem:[%s2166_s1 + $0x290] sm:$0xff]   ;;  %v1747_v38 = vld [vmem:[%s2166_s1 + $0x2e0] sm:$0xff]  }
  0x23   :  { %1516 = vmatpush3.bf16.msra.mxu0 %v1684_v37  ;;  %1000 = vmatprep.mubr.bf16.mxu0 %v1334_v58  ;;  %v1746_v37 = vld [vmem:[%s2166_s1 + $0x220] sm:$0xff]   ;;  %v33_v58 = vld [vmem:[%s2167_s0 + $0x88] sm:$0x11] }
  0x24   :  { %1041 = vmatmul.mubr.bf16.vlgmr.msra.gmra.mrb[0].mxu1 %v1681_v35  ;;  %1517 = vmatprep.subr.bf16.mxu0 %v1687_v40  ;;  %v1744_v35 = vld [vmem:[%s2166_s1 + $0x298] sm:$0xff]   ;;  %v1749_v40 = vld [vmem:[%s2166_s1 + $0x268] sm:$0xff]  }
  0x25   :  { %1544 = vmatpush3.bf16.msra.mxu1 %v1686_v39  ;;  %1048 = vmatprep.mubr.bf16.mxu1 %v1336_v1  ;;  %v1748_v39 = vld [vmem:[%s2166_s1 + $0x2a0] sm:$0xff]   ;;  %v1774_v1 = vld [vmem:[%s2166_s1 + $0x318] sm:$0xff]  }
  0x26   :  { %1545 = vmatprep.subr.bf16.mxu1 %v1689_v42  ;;  %v1751_v42 = vld [vmem:[%s2166_s1 + $0x2e8] sm:$0xff]  }
  0x27   :  { %1518 = vmatpush3.bf16.msra.mxu0 %v1688_v41  ;;  %v1750_v41 = vld [vmem:[%s2166_s1 + $0x228] sm:$0xff]  }
  0x28   :  { %1519 = vmatprep.subr.bf16.mxu0 %v1691_v44  ;;  %v1753_v44 = vld [vmem:[%s2166_s1 + $0x270] sm:$0xff]  }
  0x29   :  { %1546 = vmatpush3.bf16.msra.mxu1 %v1690_v43  ;;  %v1752_v43 = vld [vmem:[%s2166_s1 + $0x2a8] sm:$0xff]  }
  0x2a   :  { %1547 = vmatprep.subr.bf16.mxu1 %v1693_v46  ;;  %1001 = vmatmul.mubr.bf16.gmra.mrb[4].mxu0 %v1333_v60  ;;  %v1755_v46 = vld [vmem:[%s2166_s1 + $0x2f0] sm:$0xff]  }
  0x2b   :  { %1520 = vmatpush3.bf16.msra.mxu0 %v1692_v45  ;;  %1088 = vmatprep.mubr.bf16.mxu0 %v1720_v10  ;;  %v1754_v45 = vld [vmem:[%s2166_s1 + $0x230] sm:$0xff]  }
  0x2c   :  { %1521 = vmatprep.subr.bf16.mxu0 %v1695_v48  ;;  %1049 = vmatmul.mubr.bf16.gmra.mrb[4].mxu1 %v1335_v3  ;;  %v1757_v48 = vld [vmem:[%s2166_s1 + $0x278] sm:$0xff]   ;;  %v1771_v60 = vld [vmem:[%s2166_s1 + $0x310] sm:$0xff]  }
  0x2d   :  { %1548 = vmatpush3.bf16.msra.mxu1 %v1694_v47  ;;  %1136 = vmatprep.mubr.bf16.mxu1 %v1725_v14  ;;  %v1756_v47 = vld [vmem:[%s2166_s1 + $0x2b0] sm:$0xff]   ;;  %v1776_v3 = vld [vmem:[%s2167_s0 + $0x98] ss:$0 sps:$4 sm:$0x11]  }
  0x2e   :  { %1549 = vmatprep.subr.bf16.mxu1 %v1697_v50  ;;  %v1759_v50 = vld [vmem:[%s2166_s1 + $0x2f8] sm:$0xff]  }
  0x2f   :  { %1522 = vmatpush3.bf16.msra.mxu0 %v1696_v49  ;;  %v1758_v49 = vld [vmem:[%s2166_s1 + $0x238] sm:$0xff]  }
  0x30   :  { %1523 = vmatprep.subr.bf16.mxu0 %v1699_v52  ;;  %v1762_v52 = vld [vmem:[%s2167_s0 + $0x24] ss:$52 sps:$4 sm:$0xff]  }
  0x31   :  { %1550 = vmatpush3.bf16.msra.mxu1 %v1698_v51  ;;  %v1760_v51 = vld [vmem:[%s2167_s0 + $0x20] ss:$52 sps:$4 sm:$0xff]  }
  0x32   :  { %1551 = vmatprep.subr.bf16.mxu1 %v1701_v54  ;;  %v1764_v54 = vld [vmem:[%s2166_s1 + $0x300] sm:$0xff]  }
  0x33   :  { %1524 = vmatpush3.bf16.msra.mxu0 %v1700_v53  ;;  %v1763_v53 = vld [vmem:[%s2166_s1 + $0x2b8] sm:$0xff]  }
  0x34   :  { %1525 = vmatprep.subr.bf16.mxu0 %v1703_v56  ;;  %v1767_v56 = vld [vmem:[%s2167_s0 + $0x2c] ss:$52 sps:$4 sm:$0xff]  }
  0x35   :  { %1552 = vmatpush3.bf16.msra.mxu1 %v1702_v55  ;;  %v1765_v55 = vld [vmem:[%s2167_s0 + $0x28] ss:$52 sps:$4 sm:$0xff]  }
  0x36   :  { %1553 = vmatprep.subr.bf16.mxu1 %v1707_v61  ;;  %v34_v61 = vld [vmem:[%s2167_s0 + $0x90] sm:$0x11] }
  0x37   :  { %1526 = vmatpush3.bf16.msra.mxu0 %v1705_v59  ;;  %v1342_v59 = vcombine.high %v33_v58, %v33_v58 }
  0x38   :  { %1527 = vmatprep.subr.bf16.mxu0 %v1709_v63  ;;  %v1344_v63 = vcombine.high %v34_v61, %v34_v61 }
  0x39   :  { %1554 = vmatpush3.bf16.msra.mxu1 %v1708_v62  ;;  %v1341_v62 = vcombine.low %v33_v58, %v33_v58 }
  0x3a   :  { %1555 = vmatprep.subr.bf16.mxu1 %v1713_v4 }
  0x3b   :  { %1528 = vmatpush3.bf16.msra.mxu0 %v1711_v2  ;;  %v1343_v2 = vcombine.low %v34_v61, %v34_v61 }
  0x3c   :  { %1529 = vmatprep.subr.bf16.mxu0 %v1715_v6 }
  0x3d   :  { %1556 = vmatpush3.bf16.msra.mxu1 %v1714_v5  ;;  %v1319_v5 = vld [vmem:[%s2168_s2] ss:$0 sm:$0xff] }
  0x3e   :  { %1557 = vmatprep.subr.bf16.mxu1 %v1717_v8 }
  0x3f   :  { %1530 = vmatpush3.bf16.msra.mxu0 %v1716_v7 }
  0x40   :  { %1571 = vmatprep.subr.bf16.mxu0 %v1722_v12 }
  0x41   :  { %1558 = vmatpush3.bf16.msra.mxu1 %v1721_v11 }
  0x42   :  { %1089 = vmatmul.mubr.bf16.vlgmr.msra.gmra.mrb[8].mxu0 %v1718_v9  ;;  %1599 = vmatprep.subr.bf16.mxu1 %v1727_v16 }
  0x43   :  { %1572 = vmatpush3.bf16.msra.mxu0 %v1726_v15  ;;  %1096 = vmatprep.mubr.bf16.mxu0 %v1338_v22 }
  0x44   :  { %1137 = vmatmul.mubr.bf16.vlgmr.msra.gmra.mrb[8].mxu1 %v1723_v13  ;;  %1573 = vmatprep.subr.bf16.mxu0 %v1729_v18 }
  0x45   :  { %1600 = vmatpush3.bf16.msra.mxu1 %v1728_v17  ;;  %1144 = vmatprep.mubr.bf16.mxu1 %v1340_v27 }
  0x46   :  { %1601 = vmatprep.subr.bf16.mxu1 %v1731_v20 }
  0x47   :  { %1574 = vmatpush3.bf16.msra.mxu0 %v1730_v19 }
  0x48   :  { %1575 = vmatprep.subr.bf16.mxu0 %v1735_v25 }
  0x49   :  { %1602 = vmatpush3.bf16.msra.mxu1 %v1733_v23 }
  0x4a   :  { %1097 = vmatmul.mubr.bf16.gmra.mrb[12].mxu0 %v1337_v24  ;;  %1603 = vmatprep.subr.bf16.mxu1 %v1739_v30 }
  0x4b   :  { %1576 = vmatpush3.bf16.msra.mxu0 %v1737_v28  ;;  %1184 = vmatprep.mubr.bf16.mxu0 %v1762_v52 }
  0x4c   :  { %1145 = vmatmul.mubr.bf16.gmra.mrb[12].mxu1 %v1339_v29  ;;  %1577 = vmatprep.subr.bf16.mxu0 %v1741_v32 }
  0x4d   :  { %1604 = vmatpush3.bf16.msra.mxu1 %v1740_v31  ;;  %1232 = vmatprep.mubr.bf16.mxu1 %v1767_v56 }
  0x4e   :  { %1605 = vmatprep.subr.bf16.mxu1 %v1743_v34 }
  0x4f   :  { %1578 = vmatpush3.bf16.msra.mxu0 %v1742_v33 }
  0x50   :  { %1579 = vmatprep.subr.bf16.mxu0 %v1745_v36 }
  0x51   :  { %1606 = vmatpush3.bf16.msra.mxu1 %v1744_v35 }
  0x52   :  { %1607 = vmatprep.subr.bf16.mxu1 %v1747_v38 }
  0x53   :  { %1580 = vmatpush3.bf16.msra.mxu0 %v1746_v37 }
  0x54   :  { %1581 = vmatprep.subr.bf16.mxu0 %v1749_v40 }
  0x55   :  { %1608 = vmatpush3.bf16.msra.mxu1 %v1748_v39 }
  0x56   :  { %1609 = vmatprep.subr.bf16.mxu1 %v1751_v42 }
  0x57   :  { %1582 = vmatpush3.bf16.msra.mxu0 %v1750_v41 }
  0x58   :  { %1583 = vmatprep.subr.bf16.mxu0 %v1753_v44 }
  0x59   :  { %1610 = vmatpush3.bf16.msra.mxu1 %v1752_v43 }
  0x5a   :  { %1611 = vmatprep.subr.bf16.mxu1 %v1755_v46 }
  0x5b   :  { %1584 = vmatpush3.bf16.msra.mxu0 %v1754_v45 }
  0x5c   :  { %1585 = vmatprep.subr.bf16.mxu0 %v1757_v48 }
  0x5d   :  { %1612 = vmatpush3.bf16.msra.mxu1 %v1756_v47 }
  0x5e   :  { %1613 = vmatprep.subr.bf16.mxu1 %v1759_v50 }
  0x5f   :  { %1586 = vmatpush3.bf16.msra.mxu0 %v1758_v49 }
  0x60   :  { %1633 = vmatprep.subr.bf16.mxu0 %v1764_v54 }
  0x61   :  { %1614 = vmatpush3.bf16.msra.mxu1 %v1763_v53 }
  0x62   :  { %1185 = vmatmul.mubr.bf16.vlgmr.msra.gmra.mrb[16].mxu0 %v1760_v51 }
  0x63   :  { %1634 = vmatpush3.bf16.msra.mxu0 %v1764_v54  ;;  %1192 = vmatprep.mubr.bf16.mxu0 %v1342_v59 }
  0x64   :  { %1233 = vmatmul.mubr.bf16.vlgmr.msra.gmra.mrb[16].mxu1 %v1765_v55  ;;  %1635 = vmatprep.subr.bf16.mxu0 %v1768_v57 }
  0x65   :  { %1240 = vmatprep.mubr.bf16.mxu1 %v1344_v63 }
  0x67   :  { %1636 = vmatpush3.bf16.msra.mxu0 %v1768_v57 }
  0x68   :  { %1637 = vmatprep.subr.bf16.mxu0 %v1771_v60 }
  0x6a   :  { %1193 = vmatmul.mubr.bf16.gmra.mrb[20].mxu0 %v1341_v62 }
  0x6b   :  { %1641 = vmatprep.mubr.msk.bf16.mxu0 %vm953_vm0, %v1775_v0  ;;  %1638 = vmatpush3.bf16.msra.mxu0 %v1771_v60 }
  0x6c   :  { %1639 = vmatprep.subr.bf16.mxu0 %v1774_v1  ;;  %1241 = vmatmul.mubr.bf16.gmra.mrb[20].mxu1 %v1343_v2 }
  0x6f   :  { %1640 = vmatpush3.bf16.msra.mxu0 %v1774_v1 }
  0x72   :  { %1642 = vmatmul.mubr.msk.bf16.vlgmr.msra.gmra.mrb[24].mxu0 %vm953_vm0, %v1776_v3 }
  0xf5   :  { %v1475_v4 = vpop.f32.mrb[0].mxu0 }
  0xf6   :  { %v1476_v6 = vpop.f32.mrb[1].mxu0 }
  0xf7   :  { %v1477_v7 = vadd.f32 %v1476_v6, %v1475_v4  ;;  %v1478_v8 = vpop.f32.mrb[2].mxu0  ;;  %v1503_v9 = vpop.f32.mrb[0].mxu1 }
  0xf8   :  { %v1479_v10 = vpop.f32.mrb[3].mxu0  ;;  %v1504_v13 = vpop.f32.mrb[1].mxu1 }
  0xf9   :  { %v995_v11 = vadd.f32 %v1477_v7, %v1319_v5  ;;  %v1480_v12 = vadd.f32 %v1479_v10, %v1478_v8  ;;  %v1505_v14 = vadd.f32 %v1504_v13, %v1503_v9  ;;  %v1506_v15 = vpop.f32.mrb[2].mxu1 }
  0xfa   :  { %v1507_v17 = vpop.f32.mrb[3].mxu1 }
  0xfb   :  { %v998_v16 = vadd.f32 %v1480_v12, %v1319_v5  ;;  %v1043_v18 = vadd.f32 %v1505_v14, %v995_v11  ;;  %v1508_v19 = vadd.f32 %v1507_v17, %v1506_v15 }
  0xfd   :  { %v1046_v20 = vadd.f32 %v1508_v19, %v998_v16  ;;  %v1481_v21 = vpop.f32.mrb[4].mxu0 }
  0xfe   :  { %v1482_v22 = vpop.f32.mrb[5].mxu0 }
  0xff   :  { %v1483_v23 = vadd.f32 %v1482_v22, %v1481_v21  ;;  %v1484_v24 = vpop.f32.mrb[6].mxu0  ;;  %v1509_v27 = vpop.f32.mrb[4].mxu1 }
 0x100   :  { %v1485_v25 = vpop.f32.mrb[7].mxu0  ;;  %v1510_v28 = vpop.f32.mrb[5].mxu1 }
 0x101   :  { %v1003_v26 = vadd.f32 %v1483_v23, %v1319_v5  ;;  %v1511_v29 = vadd.f32 %v1510_v28, %v1509_v27  ;;  %v1512_v30 = vpop.f32.mrb[6].mxu1 }
 0x102   :  { %v1513_v31 = vpop.f32.mrb[7].mxu1 }
 0x103   :  { %v1051_v32 = vadd.f32 %v1511_v29, %v1003_v26 }
 0x115   :  { %v1531_v33 = vpop.f32.mrb[8].mxu0 }
 0x116   :  { %v1532_v34 = vpop.f32.mrb[9].mxu0 }
 0x117   :  { %v1533_v35 = vadd.f32 %v1532_v34, %v1531_v33  ;;  %v1534_v36 = vpop.f32.mrb[10].mxu0  ;;  %v1559_v37 = vpop.f32.mrb[8].mxu1 }
 0x118   :  { %v1535_v38 = vpop.f32.mrb[11].mxu0  ;;  %v1560_v41 = vpop.f32.mrb[9].mxu1 }
 0x119   :  { %v1091_v39 = vadd.f32 %v1533_v35, %v1043_v18  ;;  %v1536_v40 = vadd.f32 %v1535_v38, %v1534_v36  ;;  %v1561_v42 = vadd.f32 %v1560_v41, %v1559_v37  ;;  %v1562_v43 = vpop.f32.mrb[10].mxu1 }
 0x11a   :  { %v1563_v45 = vpop.f32.mrb[11].mxu1 }
 0x11b   :  { %v1094_v44 = vadd.f32 %v1536_v40, %v1046_v20  ;;  %v1139_v46 = vadd.f32 %v1561_v42, %v1091_v39  ;;  %v1564_v47 = vadd.f32 %v1563_v45, %v1562_v43 }
 0x11d   :  { %v1142_v48 = vadd.f32 %v1564_v47, %v1094_v44  ;;  %v1537_v49 = vpop.f32.mrb[12].mxu0 }
 0x11e   :  { %v1538_v50 = vpop.f32.mrb[13].mxu0 }
 0x11f   :  { %v1539_v51 = vadd.f32 %v1538_v50, %v1537_v49  ;;  %v1565_v52 = vpop.f32.mrb[12].mxu1  ;;  %v1540_v53 = vpop.f32.mrb[14].mxu0 }
 0x120   :  { %v1566_v54 = vpop.f32.mrb[13].mxu1  ;;  %v1541_v55 = vpop.f32.mrb[15].mxu0 }
 0x121   :  { %v1099_v56 = vadd.f32 %v1539_v51, %v1051_v32  ;;  %v1567_v57 = vadd.f32 %v1566_v54, %v1565_v52  ;;  %v1568_v58 = vpop.f32.mrb[14].mxu1 }
 0x122   :  { %v1569_v59 = vpop.f32.mrb[15].mxu1 }
 0x123   :  { %v1147_v60 = vadd.f32 %v1567_v57, %v1099_v56 }
 0x135   :  { %v1587_v61 = vpop.f32.mrb[16].mxu0 }
 0x136   :  { %v1588_v62 = vpop.f32.mrb[17].mxu0 }
 0x137   :  { %v1589_v63 = vadd.f32 %v1588_v62, %v1587_v61  ;;  %v1590_v0 = vpop.f32.mrb[18].mxu0  ;;  %v1615_v3 = vpop.f32.mrb[16].mxu1 }
 0x138   :  { %v1591_v1 = vpop.f32.mrb[19].mxu0  ;;  %v1616_v5 = vpop.f32.mrb[17].mxu1 }
 0x139   :  { %v1187_v2 = vadd.f32 %v1589_v63, %v1139_v46  ;;  %v1592_v4 = vadd.f32 %v1591_v1, %v1590_v0  ;;  %v1617_v7 = vadd.f32 %v1616_v5, %v1615_v3  ;;  %v1618_v8 = vpop.f32.mrb[18].mxu1 }
 0x13a   :  { %v1619_v9 = vpop.f32.mrb[19].mxu1 }
 0x13b   :  { %v1190_v6 = vadd.f32 %v1592_v4, %v1142_v48  ;;  %v1620_v10 = vadd.f32 %v1619_v9, %v1618_v8  ;;  %v1235_v12 = vadd.f32 %v1617_v7, %v1187_v2 }
 0x13d   :  { %v1593_v11 = vpop.f32.mrb[20].mxu0  ;;  %v1238_v16 = vadd.f32 %v1620_v10, %v1190_v6 }
 0x13e   :  { %v1594_v13 = vpop.f32.mrb[21].mxu0 }
 0x13f   :  { %v1595_v14 = vadd.f32 %v1594_v13, %v1593_v11  ;;  %v1596_v15 = vpop.f32.mrb[22].mxu0  ;;  %v1621_v19 = vpop.f32.mrb[20].mxu1 }
 0x140   :  { %v1597_v17 = vpop.f32.mrb[23].mxu0  ;;  %v1622_v20 = vpop.f32.mrb[21].mxu1 }
 0x141   :  { %v1195_v18 = vadd.f32 %v1595_v14, %v1147_v60  ;;  %v1623_v21 = vadd.f32 %v1622_v20, %v1621_v19  ;;  %v1624_v22 = vpop.f32.mrb[22].mxu1 }
 0x142   :  { %v1625_v23 = vpop.f32.mrb[23].mxu1 }
 0x143   :  { %v1243_v24 = vadd.f32 %v1623_v21, %v1195_v18 }
 0x145   :  { %v1643_v25 = vpop.f32.mrb[24].mxu0 }
 0x146   :  { %v1291_v26 = vadd.f32 %v1643_v25, %v1243_v24  ;;  %v1282_v27 = vpop.f32.mrb[25].mxu0 }
 0x147   :  { %v1283_v28 = vadd.f32 %v1282_v27, %v1235_v12  ;;  %v1644_v29 = vpop.f32.mrb[26].mxu0 }
 0x148   :  { %v1298_v30 = vmax.f32 %v1291_v26, 0.0  ;;  %v1285_v31 = vpop.f32.mrb[27].mxu0 }
 0x149   :  { %v1286_v32 = vadd.f32 %v1285_v31, %v1238_v16  ;;  %v1296_v34 = vmax.f32 %v1283_v28, 0.0 }
 0x14a   :  { %v1453_v33 = vpack.c.bf16 %v1298_v30, %v1298_v30 }
 0x14b   :  { %v1297_v35 = vmax.f32 %v1286_v32, 0.0 }
 0x14c   :  { %1314 = vst [vmem:[%s2169_s3 + $0x8] sm:$0x1] %v1453_v33 }
 0x14d   :  { %v1457_v36 = vpack.c.bf16 %v1297_v35, %v1296_v34 }
 0x14f   :  { %1458 = vst [vmem:[%s2169_s3] sm:$0xff] %v1457_v36  }

// kernel: _lambda_.9
= control target key start
LH: loop header
LB: loop body
LE: loop exit
PB: predicated region body
PF: predicated region fallthrough
CT: control target
= control target key end

     0   :  { %v175_v27 = vlaneseq  ;;  %v1183_v35 = vmov 1966171168   ;;  %s1458_s0 = inlined_call_operand.vmem [shape: bf16[2,1152], index: 0, kind: input, shape index: {}]   ;;  %s1459_s1 = inlined_call_operand.vmem [shape: bf16[1152,9], index: 1, kind: input, shape index: {}]   ;;  %s1460_s2 = inlined_call_operand.vmem [shape: f32[1,9], index: 2, kind: input, shape index: {}]   ;;  %s1461_s3 = inlined_call_operand.hbm [shape: f32[2,9], index: 3, kind: output, shape index: {}]  }
   0x1   :  { %v1086_v0 = vld [vmem:[%s1459_s1 + $0x40] sm:$0xff]   ;;  %v1090_v4 = vld [vmem:[%s1459_s1 + $0x48] sm:$0xff]   ;;  %v1094_v8 = vld [vmem:[%s1459_s1 + $0x50] sm:$0xff]   ;;  %v173_v36 = vunpack.c.l.s4 %v1183_v35 }
   0x2   :  { %v1087_v1 = vld [vmem:[%s1459_s1] sm:$0xff]   ;;  %965 = vmatprep.subr.bf16.mxu0 %v1086_v0  ;;  %v1091_v5 = vld [vmem:[%s1459_s1 + $0x8] sm:$0xff]   ;;  %v1095_v9 = vld [vmem:[%s1459_s1 + $0x10] sm:$0xff]   ;;  %v176_v32 = vshrl.u32 %v175_v27, 7 }
   0x3   :  { %v1088_v2 = vld [vmem:[%s1459_s1 + $0xc0] sm:$0xff]   ;;  %966 = vmatpush3.bf16.msra.mxu0 %v1087_v1  ;;  %v1092_v6 = vld [vmem:[%s1459_s1 + $0xc8] sm:$0xff]   ;;  %v1096_v10 = vld [vmem:[%s1459_s1 + $0xd0] sm:$0xff]   ;;  %v174_v39 = vunpack.c.0.s8 %v173_v36 }
   0x4   :  { %v1089_v3 = vld [vmem:[%s1459_s1 + $0x80] sm:$0xff]   ;;  %987 = vmatprep.subr.bf16.mxu1 %v1088_v2  ;;  %967 = vmatprep.subr.bf16.mxu0 %v1090_v4  ;;  %v1093_v7 = vld [vmem:[%s1459_s1 + $0x88] sm:$0xff]   ;;  %v1097_v11 = vld [vmem:[%s1459_s1 + $0x90] sm:$0xff]  }
   0x5   :  { %988 = vmatpush3.bf16.msra.mxu1 %v1089_v3  ;;  %v1098_v12 = vld [vmem:[%s1459_s1 + $0x58] sm:$0xff]   ;;  %v1102_v16 = vld [vmem:[%s1459_s1 + $0x60] sm:$0xff]   ;;  %v1106_v20 = vld [vmem:[%s1459_s1 + $0x68] sm:$0xff]   ;;  %v1312_v41 = vsub.s32 %v174_v39, %v176_v32 }
   0x6   :  { %989 = vmatprep.subr.bf16.mxu1 %v1092_v6  ;;  %v1099_v13 = vld [vmem:[%s1459_s1 + $0x18] sm:$0xff]   ;;  %v1103_v17 = vld [vmem:[%s1459_s1 + $0x20] sm:$0xff]   ;;  %v1107_v21 = vld [vmem:[%s1459_s1 + $0x28] sm:$0xff]  }
   0x7   :  { %968 = vmatpush3.bf16.msra.mxu0 %v1091_v5  ;;  %v1100_v14 = vld [vmem:[%s1459_s1 + $0xd8] sm:$0xff]   ;;  %v1104_v18 = vld [vmem:[%s1459_s1 + $0xe0] sm:$0xff]   ;;  %v1108_v22 = vld [vmem:[%s1459_s1 + $0xe8] sm:$0xff]  }
   0x8   :  { %969 = vmatprep.subr.bf16.mxu0 %v1094_v8  ;;  %v1101_v15 = vld [vmem:[%s1459_s1 + $0x98] sm:$0xff]   ;;  %v1105_v19 = vld [vmem:[%s1459_s1 + $0xa0] sm:$0xff]   ;;  %v1109_v23 = vld [vmem:[%s1459_s1 + $0xa8] sm:$0xff]  }
   0x9   :  { %990 = vmatpush3.bf16.msra.mxu1 %v1093_v7  ;;  %v1110_v24 = vld [vmem:[%s1459_s1 + $0x70] sm:$0xff]   ;;  %v1114_v29 = vld [vmem:[%s1459_s1 + $0x78] sm:$0xff]   ;;  %v16_v33 = vld [vmem:[%s1458_s0] sm:$0xff] }
   0xa   :  { %991 = vmatprep.subr.bf16.mxu1 %v1096_v10  ;;  %v1111_v25 = vld [vmem:[%s1459_s1 + $0x30] sm:$0xff]   ;;  %v1115_v30 = vld [vmem:[%s1459_s1 + $0x38] sm:$0xff]   ;;  %v1119_v37 = vld [vmem:[%s1459_s1 + $0x140] sm:$0xff]   ;;  %v171_v38 = vcombine.high %v16_v33, %v16_v33  ;;  %v178_v42 = vrot.slane %v16_v33, %v1312_v41 }
   0xb   :  { %970 = vmatpush3.bf16.msra.mxu0 %v1095_v9  ;;  %v1112_v26 = vld [vmem:[%s1459_s1 + $0xf0] sm:$0xff]   ;;  %v1116_v31 = vld [vmem:[%s1459_s1 + $0xf8] sm:$0xff]   ;;  %v1121_v40 = vld [vmem:[%s1459_s1 + $0x1c0] sm:$0xff]  }
   0xc   :  { %971 = vmatprep.subr.bf16.mxu0 %v1098_v12  ;;  %v1113_v28 = vld [vmem:[%s1459_s1 + $0xb0] sm:$0xff]   ;;  %v1118_v34 = vld [vmem:[%s1459_s1 + $0xb8] sm:$0xff]   ;;  %v1316_v43 = vrot.slane %v171_v38, %v1312_v41  ;;  %v186_v44 = vcombine.high %v178_v42, %v178_v42  ;;  %v194_v45 = vrot.slane %v178_v42, %v1312_v41  ;;  %v1120_v48 = vld [vmem:[%s1459_s1 + $0x100] sm:$0xff]  }
   0xd   :  { %992 = vmatpush3.bf16.msra.mxu1 %v1097_v11  ;;  %v1123_v51 = vld [vmem:[%s1459_s1 + $0x148] sm:$0xff]   ;;  %v1122_v53 = vld [vmem:[%s1459_s1 + $0x180] sm:$0xff]   ;;  %v1127_v57 = vld [vmem:[%s1459_s1 + $0x150] sm:$0xff]  }
   0xe   :  { %993 = vmatprep.subr.bf16.mxu1 %v1100_v14  ;;  %v187_v46 = vcombine.high %v1316_v43, %v1316_v43  ;;  %v208_v47 = vrot.slane %v186_v44, %v1312_v41  ;;  %v216_v50 = vcombine.high %v194_v45, %v194_v45  ;;  %v1125_v54 = vld [vmem:[%s1459_s1 + $0x1c8] sm:$0xff]   ;;  %v1129_v59 = vld [vmem:[%s1459_s1 + $0x1d0] sm:$0xff]   ;;  %v1131_v61 = vld [vmem:[%s1459_s1 + $0x158] sm:$0xff]  }
   0xf   :  { %972 = vmatpush3.bf16.msra.mxu0 %v1099_v13  ;;  %v1124_v56 = vld [vmem:[%s1459_s1 + $0x108] sm:$0xff]   ;;  %v1128_v60 = vld [vmem:[%s1459_s1 + $0x110] sm:$0xff]   ;;  %v1133_v63 = vld [vmem:[%s1459_s1 + $0x1d8] sm:$0xff]  }
  0x10   :  { %973 = vmatprep.subr.bf16.mxu0 %v1102_v16  ;;  %v215_v49 = vrot.slane %v187_v46, %v1312_v41  ;;  %707 = vmatprep.mubr.bf16.mxu0 %v208_v47  ;;  %v218_v52 = vcombine.high %v208_v47, %v208_v47  ;;  %v1126_v58 = vld [vmem:[%s1459_s1 + $0x188] sm:$0xff]   ;;  %v1130_v62 = vld [vmem:[%s1459_s1 + $0x190] sm:$0xff]   ;;  %v1132_v0 = vld [vmem:[%s1459_s1 + $0x118] sm:$0xff]  }
  0x11   :  { %994 = vmatpush3.bf16.msra.mxu1 %v1101_v15  ;;  %v1135_v1 = vld [vmem:[%s1459_s1 + $0x160] sm:$0xff]   ;;  %v1134_v2 = vld [vmem:[%s1459_s1 + $0x198] sm:$0xff]   ;;  %v1139_v5 = vld [vmem:[%s1459_s1 + $0x168] sm:$0xff]  }
  0x12   :  { %995 = vmatprep.subr.bf16.mxu1 %v1104_v18  ;;  %v219_v55 = vcombine.high %v215_v49, %v215_v49  ;;  %747 = vmatprep.mubr.bf16.mxu1 %v218_v52  ;;  %v1137_v3 = vld [vmem:[%s1459_s1 + $0x1e0] sm:$0xff]   ;;  %v1141_v7 = vld [vmem:[%s1459_s1 + $0x1e8] sm:$0xff]   ;;  %v1143_v9 = vld [vmem:[%s1459_s1 + $0x170] sm:$0xff]  }
  0x13   :  { %974 = vmatpush3.bf16.msra.mxu0 %v1103_v17  ;;  %v1136_v4 = vld [vmem:[%s1459_s1 + $0x120] sm:$0xff]   ;;  %v1140_v8 = vld [vmem:[%s1459_s1 + $0x128] sm:$0xff]   ;;  %v1145_v11 = vld [vmem:[%s1459_s1 + $0x1f0] sm:$0xff]   ;;  %v201_v17 = vrot.slane %v1316_v43, %v1312_v41 }
  0x14   :  { %975 = vmatprep.subr.bf16.mxu0 %v1106_v20  ;;  %v1138_v6 = vld [vmem:[%s1459_s1 + $0x1a0] sm:$0xff]   ;;  %v1142_v10 = vld [vmem:[%s1459_s1 + $0x1a8] sm:$0xff]   ;;  %v1144_v12 = vld [vmem:[%s1459_s1 + $0x130] sm:$0xff]  }
  0x15   :  { %996 = vmatpush3.bf16.msra.mxu1 %v1105_v19  ;;  %v1147_v13 = vld [vmem:[%s1459_s1 + $0x178] sm:$0xff]   ;;  %v1146_v14 = vld [vmem:[%s1459_s1 + $0x1b0] sm:$0xff]  }
  0x16   :  { %997 = vmatprep.subr.bf16.mxu1 %v1108_v22  ;;  %v1149_v15 = vld [vmem:[%s1459_s1 + $0x1f8] sm:$0xff]  }
  0x17   :  { %976 = vmatpush3.bf16.msra.mxu0 %v1107_v21  ;;  %v1148_v16 = vld [vmem:[%s1459_s1 + $0x138] sm:$0xff]  }
  0x18   :  { %977 = vmatprep.subr.bf16.mxu0 %v1110_v24  ;;  %v1150_v18 = vld [vmem:[%s1459_s1 + $0x1b8] sm:$0xff]  }
  0x19   :  { %998 = vmatpush3.bf16.msra.mxu1 %v1109_v23 }
  0x1a   :  { %999 = vmatprep.subr.bf16.mxu1 %v1112_v26 }
  0x1b   :  { %978 = vmatpush3.bf16.msra.mxu0 %v1111_v25 }
  0x1c   :  { %979 = vmatprep.subr.bf16.mxu0 %v1114_v29 }
  0x1d   :  { %1000 = vmatpush3.bf16.msra.mxu1 %v1113_v28 }
  0x1e   :  { %1001 = vmatprep.subr.bf16.mxu1 %v1116_v31 }
  0x1f   :  { %980 = vmatpush3.bf16.msra.mxu0 %v1115_v30 }
  0x20   :  { %1009 = vmatprep.subr.bf16.mxu0 %v1119_v37 }
  0x21   :  { %1002 = vmatpush3.bf16.msra.mxu1 %v1118_v34 }
  0x22   :  { %1031 = vmatprep.subr.bf16.mxu1 %v1121_v40  ;;  %708 = vmatmul.mubr.bf16.vlgmr.msra.gmra.mrb[0].mxu0 %v194_v45 }
  0x23   :  { %1010 = vmatpush3.bf16.msra.mxu0 %v1120_v48  ;;  %787 = vmatprep.mubr.bf16.mxu0 %v215_v49 }
  0x24   :  { %748 = vmatmul.mubr.bf16.vlgmr.msra.gmra.mrb[0].mxu1 %v216_v50  ;;  %1011 = vmatprep.subr.bf16.mxu0 %v1123_v51 }
  0x25   :  { %1032 = vmatpush3.bf16.msra.mxu1 %v1122_v53  ;;  %827 = vmatprep.mubr.bf16.mxu1 %v219_v55 }
  0x26   :  { %1033 = vmatprep.subr.bf16.mxu1 %v1125_v54 }
  0x27   :  { %1012 = vmatpush3.bf16.msra.mxu0 %v1124_v56 }
  0x28   :  { %1013 = vmatprep.subr.bf16.mxu0 %v1127_v57 }
  0x29   :  { %1034 = vmatpush3.bf16.msra.mxu1 %v1126_v58 }
  0x2a   :  { %1035 = vmatprep.subr.bf16.mxu1 %v1129_v59 }
  0x2b   :  { %1014 = vmatpush3.bf16.msra.mxu0 %v1128_v60 }
  0x2c   :  { %1015 = vmatprep.subr.bf16.mxu0 %v1131_v61 }
  0x2d   :  { %1036 = vmatpush3.bf16.msra.mxu1 %v1130_v62 }
  0x2e   :  { %1037 = vmatprep.subr.bf16.mxu1 %v1133_v63 }
  0x2f   :  { %1016 = vmatpush3.bf16.msra.mxu0 %v1132_v0 }
  0x30   :  { %1017 = vmatprep.subr.bf16.mxu0 %v1135_v1 }
  0x31   :  { %1038 = vmatpush3.bf16.msra.mxu1 %v1134_v2 }
  0x32   :  { %1039 = vmatprep.subr.bf16.mxu1 %v1137_v3 }
  0x33   :  { %1018 = vmatpush3.bf16.msra.mxu0 %v1136_v4 }
  0x34   :  { %1019 = vmatprep.subr.bf16.mxu0 %v1139_v5 }
  0x35   :  { %1040 = vmatpush3.bf16.msra.mxu1 %v1138_v6 }
  0x36   :  { %1041 = vmatprep.subr.bf16.mxu1 %v1141_v7 }
  0x37   :  { %1020 = vmatpush3.bf16.msra.mxu0 %v1140_v8 }
  0x38   :  { %1021 = vmatprep.subr.bf16.mxu0 %v1143_v9 }
  0x39   :  { %1042 = vmatpush3.bf16.msra.mxu1 %v1142_v10 }
  0x3a   :  { %1043 = vmatprep.subr.bf16.mxu1 %v1145_v11 }
  0x3b   :  { %1022 = vmatpush3.bf16.msra.mxu0 %v1144_v12 }
  0x3c   :  { %1023 = vmatprep.subr.bf16.mxu0 %v1147_v13 }
  0x3d   :  { %1044 = vmatpush3.bf16.msra.mxu1 %v1146_v14 }
  0x3e   :  { %1045 = vmatprep.subr.bf16.mxu1 %v1149_v15 }
  0x3f   :  { %8 = vsyncpa [#allocation3], 0  ;;  %1024 = vmatpush3.bf16.msra.mxu0 %v1148_v16  ;;  %v1151_v19 = vld [vmem:[%s1459_s1 + $0x200] sm:$0xff]   ;;  %v1184_v20 = vmov 0.0   ;;  %v217_v21 = vcombine.high %v201_v17, %v201_v17  ;;  %v1152_v22 = vld [vmem:[%s1459_s1 + $0x208] sm:$0xff]   ;;  %vm1185_vm0 = vmmov 0  }
  0x40   :  { %1062 = vmatprep.subr.bf16.mxu0 %v1184_v20  ;;  %v1153_v23 = vld [vmem:[%s1459_s1 + $0x210] sm:$0xff]   ;;  %v1154_v24 = vld [vmem:[%s1459_s1 + $0x218] sm:$0xff]   ;;  %v1155_v25 = vld [vmem:[%s1459_s1 + $0x220] sm:$0xff]   ;;  %vm875_vm1 = vcmask 66560  }
  0x41   :  { %1046 = vmatpush3.bf16.msra.mxu1 %v1150_v18  ;;  %v1156_v26 = vld [vmem:[%s1459_s1 + $0x228] sm:$0xff]   ;;  %v1157_v27 = vld [vmem:[%s1459_s1 + $0x230] sm:$0xff]   ;;  %v1158_v28 = vld [vmem:[%s1459_s1 + $0x238] sm:$0xff]  }
  0x42   :  { %788 = vmatmul.mubr.bf16.vlgmr.msra.gmra.mrb[4].mxu0 %v201_v17  ;;  %v892_v29 = vld.sshfl [vmem:[%s1458_s0 + $0x8] sm:$0x1 pattern:$0x75316420]  ;;  %v891_v32 = vld [vmem:[%s1460_s2] ss:$0 sm:$0xff] }
  0x43   :  { %1063 = vmatpush3.bf16.msra.mxu0 %v1151_v19  ;;  %1078 = vmatprep.mubr.msk.bf16.mxu0 %vm1185_vm0, %v1184_v20  ;;  %v233_v30 = vrot.slane %v892_v29, %v1312_v41  ;;  %s1186_s0 = smov [#allocation2]  }
  0x44   :  { %828 = vmatmul.mubr.bf16.vlgmr.msra.gmra.mrb[4].mxu1 %v217_v21  ;;  %1064 = vmatprep.subr.bf16.mxu0 %v1184_v20  ;;  %s883_s1 = sshll.u32 %s1186_s0, 4  ;;  %s884_s1 = int_to_ptr.vmem [resolvable:$true] %s883_s1 }
  0x45   :  { %s1159_s2 = scalar_lea.vmem %s884_s1, 32  ;;  %p1164_p1 = scmp.lt.s32.totalorder %s884_s1, %s884_s1 }
  0x46   :  { %p1160_p0 = scmp.ne.s32.totalorder %s884_s1, %s1159_s2  ;;  %p1165_p2 = scmp.lt.s32.totalorder %s1159_s2, %s1159_s2 }
  0x47   :  { %1065 = vmatpush3.bf16.msra.mxu0 %v1152_v22 }
  0x48   :  { %1066 = vmatprep.subr.bf16.mxu0 %v1184_v20  ;;  %p1166_p3 = por %p1165_p2, %p1164_p1 }
  0x4a   :  { %p1167_p4 = pnand %p1166_p3, %p1160_p0 }
  0x4b   :  { %1067 = vmatpush3.bf16.msra.mxu0 %v1153_v23 }
  0x4c   :  { %1068 = vmatprep.subr.bf16.mxu0 %v1184_v20 }
  0x4f   :  { %1069 = vmatpush3.bf16.msra.mxu0 %v1154_v24 }
  0x50   :  { %1070 = vmatprep.subr.bf16.mxu0 %v1184_v20 }
  0x53   :  { %1071 = vmatpush3.bf16.msra.mxu0 %v1155_v25 }
  0x54   :  { %1072 = vmatprep.subr.bf16.mxu0 %v1184_v20 }
  0x57   :  { %1073 = vmatpush3.bf16.msra.mxu0 %v1156_v26 }
  0x58   :  { %1074 = vmatprep.subr.bf16.mxu0 %v1184_v20 }
  0x5b   :  { %1075 = vmatpush3.bf16.msra.mxu0 %v1157_v27 }
  0x5c   :  { %1076 = vmatprep.subr.bf16.mxu0 %v1184_v20 }
  0x5f   :  { %1077 = vmatpush3.bf16.msra.mxu0 %v1158_v28 }
  0x62   :  { %1079 = vmatmul.mubr.bf16.vlgmr.msra.gmra.mrb[8].mxu0 %v233_v30 }
  0xf5   :  { %v981_v31 = vpop.f32.mrb[0].mxu0 }
  0xf6   :  { %v982_v33 = vpop.f32.mrb[1].mxu0 }
  0xf7   :  { %v983_v34 = vadd.f32 %v982_v33, %v981_v31  ;;  %v984_v35 = vpop.f32.mrb[2].mxu0  ;;  %v1003_v36 = vpop.f32.mrb[0].mxu1 }
  0xf8   :  { %v985_v37 = vpop.f32.mrb[3].mxu0  ;;  %v1004_v38 = vpop.f32.mrb[1].mxu1 }
  0xf9   :  { %v710_v39 = vadd.f32 %v983_v34, %v891_v32  ;;  %v1005_v40 = vadd.f32 %v1004_v38, %v1003_v36  ;;  %v1006_v42 = vpop.f32.mrb[2].mxu1 }
  0xfa   :  { %v1007_v43 = vpop.f32.mrb[3].mxu1 }
  0xfb   :  { %v750_v44 = vadd.f32 %v1005_v40, %v710_v39 }
 0x115   :  { %v1025_v45 = vpop.f32.mrb[4].mxu0 }
 0x116   :  { %v1026_v41 = vpop.f32.mrb[5].mxu0 }
 0x117   :  { %v1027_v46 = vadd.f32 %v1026_v41, %v1025_v45  ;;  %v1028_v47 = vpop.f32.mrb[6].mxu0  ;;  %v1047_v48 = vpop.f32.mrb[4].mxu1 }
 0x118   :  { %v1029_v49 = vpop.f32.mrb[7].mxu0  ;;  %v1048_v50 = vpop.f32.mrb[5].mxu1 }
 0x119   :  { %v790_v51 = vadd.f32 %v1027_v46, %v750_v44  ;;  %v1049_v52 = vadd.f32 %v1048_v50, %v1047_v48  ;;  %v1050_v53 = vpop.f32.mrb[6].mxu1 }
 0x11a   :  { %v1051_v54 = vpop.f32.mrb[7].mxu1 }
 0x11b   :  { %v830_v55 = vadd.f32 %v1049_v52, %v790_v51 }
 0x135   :  { %v869_v56 = vpop.f32.mrb[8].mxu0 }
 0x136   :  { %v870_v57 = vadd.f32 %v869_v56, %v830_v55  ;;  %v1080_v58 = vpop.f32.mrb[9].mxu0 }
 0x137   :  { %v872_v59 = vpop.f32.mrb[10].mxu0 }
 0x138   :  { %v1081_v60 = vpop.f32.mrb[11].mxu0  ;;  %876 = vst.msk [vmem:[#allocation2] sm:$0x3] %vm875_vm1, %v870_v57 }
 0x139   :  { %1170 = shalt.err (!%p1167_p4)
}
 0x13a   :  { %s1171_s29 = scalar_lea.hbm %s1461_s3, 32 }
 0x13b   :  { %p1172_p5 = scmp.ne.s32.totalorder %s1461_s3, %s1171_s29  ;;  %p1175_p6 = scmp.lt.u32.totalorder %s1171_s29, %s1461_s3 }
 0x13d   :  { %p1177_p7 = pnand %p1175_p6, %p1172_p5 }
 0x13f   :  { %1180 = shalt.err (!%p1177_p7)
}
 0x140   :  { %886 = dma.vmem_to_hbm [thread:$0]  %s884_s1, 32, %s1461_s3, [#allocation3]  }
 0x141   :  { %1181 = dma.done.wait [#allocation3], 32  }
 0x142   :  { %1182 = vsyncadd [#allocation3], 4294967264 }
 0x143   :  { %890 = vsyncpa [#allocation3], 1 }

</bundles_post_ra>
